<compile_context>
chip_gen: v7x
topology: tpu7x:2x2x1
jax: 0.10.0
libtpu: 0.0.40
codegen_flags: <defaults>
</compile_context>

<pallas_src>
import jax
import jax.numpy as jnp
from jax.experimental import pallas as pl
from jax.experimental.pallas import tpu as pltpu

NUM_NEURON = 128
NUM_HIDDEN_LAYERS = 15  # fc2..fc16 (128->128); fc1 is 2->128; fc17 is 128->1


def _elastnet_kernel(x_ref, w1_ref, b1_ref, wh_ref, bh_ref, w17_ref, b17_ref, o_ref):
    # x_ref:  (TM, 2)  f32          w1_ref:  (2, 128)  f32      b1_ref: (1, 128) f32
    # wh_ref: (15, 128, 128) bf16   bh_ref:  (15, 1, 128) f32
    # w17_ref:(1, 128) f32          b17_ref: (1, 1) f32         o_ref:  (TM, 1)  f32
    x = x_ref[...]
    w1 = w1_ref[...]
    b1 = b1_ref[...]
    w17 = w17_ref[...]
    b17 = b17_ref[...]

    # fc1 (in_features=2): two broadcast FMAs on the VPU; K=2 would underfill the MXU.
    h32 = x[:, 0:1] * w1[0:1, :] + x[:, 1:2] * w1[1:2, :] + b1
    h32 = jnp.maximum(h32, 0.0)
    h = h32.astype(jnp.bfloat16)

    # fc2..fc16: one full-tile bf16 MXU matmul per layer with f32 accumulation,
    # bias + ReLU on the VPU. Unrolled so the LLO scheduler sees the whole chain.
    for i in range(NUM_HIDDEN_LAYERS):
        a = jnp.dot(h, wh_ref[i], preferred_element_type=jnp.float32) + bh_ref[i]
        h32 = jnp.maximum(a, 0.0)
        h = h32.astype(jnp.bfloat16)

    # fc17 (out_features=1): VPU multiply + XLU lane reduction instead of an N=1 MXU pass.
    out = jnp.sum(h32 * w17, axis=-1, keepdims=True) + b17
    o_ref[...] = out.astype(o_ref.dtype)


def elastnet_forward(x, params, *, tile_m=512):
    """x: (N, 2). Returns (N, 1) float32. Any N is supported (padded internally)."""
    w1 = params["w1"].astype(jnp.float32)
    b1 = params["b1"].astype(jnp.float32)
    wh = params["wh"].astype(jnp.bfloat16)          # bf16 weights feed the MXU directly
    bh = params["bh"].astype(jnp.float32)
    w17 = params["w17"].astype(jnp.float32)         # stored as (1, 128) row vector
    b17 = params["b17"].astype(jnp.float32)

    x = x.astype(jnp.float32)
    N = x.shape[0]
    assert tile_m % 8 == 0

    n_tiles = pl.cdiv(N, tile_m)
    n_pad = n_tiles * tile_m
    if n_pad != N:
        x = jnp.pad(x, ((0, n_pad - N), (0, 0)))

    full = lambda a: pl.BlockSpec(a.shape, lambda i: (0,) * a.ndim)

    flops = 2 * n_pad * (2 * NUM_NEURON
                         + NUM_HIDDEN_LAYERS * NUM_NEURON * NUM_NEURON
                         + NUM_NEURON)
    bytes_accessed = (x.size * 4 + n_pad * 4 + wh.size * 2
                      + (w1.size + b1.size + bh.size + w17.size + b17.size) * 4)

    out = pl.pallas_call(
        _elastnet_kernel,
        out_shape=jax.ShapeDtypeStruct((n_pad, 1), jnp.float32),
        grid_spec=pltpu.PrefetchScalarGridSpec(
            num_scalar_prefetch=0,
            grid=(n_tiles,),
            in_specs=[
                pl.BlockSpec((tile_m, 2), lambda i: (i, 0)),   # x tile
                full(w1),                                      # (2, 128)
                full(b1),                                      # (1, 128)
                full(wh),                                      # (15, 128, 128) bf16, VMEM-resident
                full(bh),                                      # (15, 1, 128)
                full(w17),                                     # (1, 128)
                full(b17),                                     # (1, 1)
            ],
            out_specs=pl.BlockSpec((tile_m, 1), lambda i: (i, 0)),
        ),
        compiler_params=pltpu.CompilerParams(
            dimension_semantics=("parallel",),                 # batch axis shards across TCs on v7x
        ),
        cost_estimate=pl.CostEstimate(
            flops=flops, transcendentals=0, bytes_accessed=bytes_accessed),
    )(x, w1, b1, wh, bh, w17, b17)
    return out[:N]


def init_params(key):
    """Deterministic init matching nn.Linear default bounds U(-1/sqrt(fan_in), 1/sqrt(fan_in))."""
    keys = jax.random.split(key, 6)

    def unif(k, shape, fan_in):
        bound = 1.0 / jnp.sqrt(jnp.float32(fan_in))
        return jax.random.uniform(k, shape, jnp.float32, -bound, bound)

    return {
        "w1": unif(keys[0], (2, NUM_NEURON), 2),
        "b1": unif(keys[1], (1, NUM_NEURON), 2),
        "wh": unif(keys[2], (NUM_HIDDEN_LAYERS, NUM_NEURON, NUM_NEURON), NUM_NEURON),
        "bh": unif(keys[3], (NUM_HIDDEN_LAYERS, 1, NUM_NEURON), NUM_NEURON),
        "w17": unif(keys[4], (1, NUM_NEURON), NUM_NEURON),
        "b17": unif(keys[5], (1, 1), NUM_NEURON),
    }


def reference_forward_f32(x, params):
    """Full-precision reference (original module semantics)."""
    h = jnp.maximum(x @ params["w1"] + params["b1"], 0.0)
    for i in range(NUM_HIDDEN_LAYERS):
        h = jnp.maximum(h @ params["wh"][i] + params["bh"][i], 0.0)
    return jnp.sum(h * params["w17"], axis=-1, keepdims=True) + params["b17"]


def reference_forward_mixed(x, params):
    """Same precision recipe as the kernel: bf16 weights/activations, f32 accumulation."""
    w1, b1 = params["w1"], params["b1"]
    wh = params["wh"].astype(jnp.bfloat16)
    bh = params["bh"]
    h = jnp.maximum(x[:, 0:1] * w1[0:1, :] + x[:, 1:2] * w1[1:2, :] + b1, 0.0)
    for i in range(NUM_HIDDEN_LAYERS):
        a = jnp.dot(h.astype(jnp.bfloat16), wh[i], preferred_element_type=jnp.float32) + bh[i]
        h = jnp.maximum(a, 0.0)
    return jnp.sum(h * params["w17"], axis=-1, keepdims=True) + params["b17"]


if __name__ == "__main__":
    key = jax.random.PRNGKey(0)
    pkey, xkey = jax.random.split(key)
    params = init_params(pkey)

    # 2-D coordinate inputs, (N, 2). N = 1024 -> 2 grid steps at tile_m=512 (keeps both
    # v7x TensorCores busy) while staying small.
    N = 1024
    x = jax.random.uniform(xkey, (N, 2), jnp.float32)

    out = jax.block_until_ready(elastnet_forward(x, params, tile_m=512))
    assert out.shape == (N, 1)

    ref_mixed = reference_forward_mixed(x, params)   # matched-precision reference
    ref_f32 = reference_forward_f32(x, params)       # original f32 semantics
    assert jnp.allclose(out, ref_mixed, atol=1e-2, rtol=1e-2), "mismatch vs matched-precision reference"
    assert jnp.allclose(out, ref_f32, atol=6e-2, rtol=6e-2), "mismatch vs f32 reference"

    # Ragged batch (not a multiple of tile_m) works via wrapper padding.
    out_ragged = jax.block_until_ready(elastnet_forward(x[:777], params))
    assert out_ragged.shape == (777, 1)
    assert jnp.allclose(out_ragged, ref_mixed[:777], atol=1e-2, rtol=1e-2)

    print("KERNEL_OK")
</pallas_src>

<mosaic_0001>
module attributes {stable_mosaic.version = 11 : i64} {
  func.func @_elastnet_kernel(%arg0: i32, %arg1: memref<512x2xf32, #tpu.memory_space<vmem>>, %arg2: memref<2x128xf32, #tpu.memory_space<vmem>>, %arg3: memref<1x128xf32, #tpu.memory_space<vmem>>, %arg4: memref<15x128x128xbf16, #tpu.memory_space<vmem>>, %arg5: memref<15x1x128xf32, #tpu.memory_space<vmem>>, %arg6: memref<1x128xf32, #tpu.memory_space<vmem>>, %arg7: memref<1x1xf32, #tpu.memory_space<vmem>>, %arg8: memref<512x1xf32, #tpu.memory_space<vmem>>) attributes {dimension_semantics = [#tpu.dimension_semantics<parallel>], iteration_bounds = array<i64: 2>, scalar_prefetch = 0 : i64, scratch_operands = 0 : i64, tpu.core_type = #tpu.core_type<tc>, window_params = [{transform_indices = @transform_0, window_bounds = array<i64: 512, 2>}, {pipeline_mode = #tpu.pipeline_mode<synchronous>, transform_indices = @transform_1, window_bounds = array<i64: 2, 128>}, {pipeline_mode = #tpu.pipeline_mode<synchronous>, transform_indices = @transform_2, window_bounds = array<i64: 1, 128>}, {pipeline_mode = #tpu.pipeline_mode<synchronous>, transform_indices = @transform_3, window_bounds = array<i64: 15, 128, 128>}, {pipeline_mode = #tpu.pipeline_mode<synchronous>, transform_indices = @transform_4, window_bounds = array<i64: 15, 1, 128>}, {pipeline_mode = #tpu.pipeline_mode<synchronous>, transform_indices = @transform_5, window_bounds = array<i64: 1, 128>}, {pipeline_mode = #tpu.pipeline_mode<synchronous>, transform_indices = @transform_6, window_bounds = array<i64: 1, 1>}, {transform_indices = @transform_7, window_bounds = array<i64: 512, 1>}]} {
    %c0 = arith.constant 0 : index
    %c0_0 = arith.constant 0 : index
    %0 = vector.load %arg1[%c0, %c0_0] : memref<512x2xf32, #tpu.memory_space<vmem>>, vector<512x2xf32>
    %c0_1 = arith.constant 0 : index
    %c0_2 = arith.constant 0 : index
    %1 = vector.load %arg2[%c0_1, %c0_2] : memref<2x128xf32, #tpu.memory_space<vmem>>, vector<2x128xf32>
    %c0_3 = arith.constant 0 : index
    %c0_4 = arith.constant 0 : index
    %2 = vector.load %arg3[%c0_3, %c0_4] : memref<1x128xf32, #tpu.memory_space<vmem>>, vector<1x128xf32>
    %c0_5 = arith.constant 0 : index
    %c0_6 = arith.constant 0 : index
    %3 = vector.load %arg6[%c0_5, %c0_6] : memref<1x128xf32, #tpu.memory_space<vmem>>, vector<1x128xf32>
    %c0_7 = arith.constant 0 : index
    %c0_8 = arith.constant 0 : index
    %4 = vector.load %arg7[%c0_7, %c0_8] : memref<1x1xf32, #tpu.memory_space<vmem>>, vector<1x1xf32>
    %5 = vector.extract_strided_slice %0 {offsets = [0, 0], sizes = [512, 1], strides = [1, 1]} : vector<512x2xf32> to vector<512x1xf32>
    %6 = vector.extract_strided_slice %1 {offsets = [0, 0], sizes = [1, 128], strides = [1, 1]} : vector<2x128xf32> to vector<1x128xf32>
    %7 = vector.broadcast %5 : vector<512x1xf32> to vector<512x128xf32>
    %8 = vector.broadcast %6 : vector<1x128xf32> to vector<512x128xf32>
    %9 = arith.mulf %7, %8 : vector<512x128xf32>
    %10 = vector.extract_strided_slice %0 {offsets = [0, 1], sizes = [512, 1], strides = [1, 1]} : vector<512x2xf32> to vector<512x1xf32>
    %11 = vector.extract_strided_slice %1 {offsets = [1, 0], sizes = [1, 128], strides = [1, 1]} : vector<2x128xf32> to vector<1x128xf32>
    %12 = vector.broadcast %10 : vector<512x1xf32> to vector<512x128xf32>
    %13 = vector.broadcast %11 : vector<1x128xf32> to vector<512x128xf32>
    %14 = arith.mulf %12, %13 : vector<512x128xf32>
    %15 = arith.addf %9, %14 : vector<512x128xf32>
    %16 = vector.broadcast %2 : vector<1x128xf32> to vector<512x128xf32>
    %17 = arith.addf %15, %16 : vector<512x128xf32>
    %cst = arith.constant 0.000000e+00 : f32
    %18 = vector.broadcast %cst : f32 to vector<512x128xf32>
    %19 = arith.maximumf %17, %18 : vector<512x128xf32>
    %20 = arith.truncf %19 : vector<512x128xf32> to vector<512x128xbf16>
    %c0_9 = arith.constant 0 : index
    %c0_10 = arith.constant 0 : index
    %c0_11 = arith.constant 0 : index
    %21 = vector.load %arg4[%c0_9, %c0_10, %c0_11] : memref<15x128x128xbf16, #tpu.memory_space<vmem>>, vector<1x128x128xbf16>
    %22 = vector.shape_cast %21 : vector<1x128x128xbf16> to vector<128x128xbf16>
    %cst_12 = arith.constant dense<0.000000e+00> : vector<512x128xf32>
    %23 = tpu.matmul %20, %22, %cst_12 {dimension_numbers = #tpu.dot_dimension_numbers<[1], [0], [0], [1], [0, 0, 1, 1], [], []>} : vector<512x128xbf16>, vector<128x128xbf16>, vector<512x128xf32> -> vector<512x128xf32>
    %c0_13 = arith.constant 0 : index
    %c0_14 = arith.constant 0 : index
    %c0_15 = arith.constant 0 : index
    %24 = vector.load %arg5[%c0_13, %c0_14, %c0_15] : memref<15x1x128xf32, #tpu.memory_space<vmem>>, vector<1x1x128xf32>
    %25 = vector.shape_cast %24 : vector<1x1x128xf32> to vector<1x128xf32>
    %26 = vector.broadcast %25 : vector<1x128xf32> to vector<512x128xf32>
    %27 = arith.addf %23, %26 : vector<512x128xf32>
    %cst_16 = arith.constant 0.000000e+00 : f32
    %28 = vector.broadcast %cst_16 : f32 to vector<512x128xf32>
    %29 = arith.maximumf %27, %28 : vector<512x128xf32>
    %30 = arith.truncf %29 : vector<512x128xf32> to vector<512x128xbf16>
    %c1 = arith.constant 1 : index
    %c0_17 = arith.constant 0 : index
    %c0_18 = arith.constant 0 : index
    %31 = vector.load %arg4[%c1, %c0_17, %c0_18] : memref<15x128x128xbf16, #tpu.memory_space<vmem>>, vector<1x128x128xbf16>
    %32 = vector.shape_cast %31 : vector<1x128x128xbf16> to vector<128x128xbf16>
    %cst_19 = arith.constant dense<0.000000e+00> : vector<512x128xf32>
    %33 = tpu.matmul %30, %32, %cst_19 {dimension_numbers = #tpu.dot_dimension_numbers<[1], [0], [0], [1], [0, 0, 1, 1], [], []>} : vector<512x128xbf16>, vector<128x128xbf16>, vector<512x128xf32> -> vector<512x128xf32>
    %c1_20 = arith.constant 1 : index
    %c0_21 = arith.constant 0 : index
    %c0_22 = arith.constant 0 : index
    %34 = vector.load %arg5[%c1_20, %c0_21, %c0_22] : memref<15x1x128xf32, #tpu.memory_space<vmem>>, vector<1x1x128xf32>
    %35 = vector.shape_cast %34 : vector<1x1x128xf32> to vector<1x128xf32>
    %36 = vector.broadcast %35 : vector<1x128xf32> to vector<512x128xf32>
    %37 = arith.addf %33, %36 : vector<512x128xf32>
    %cst_23 = arith.constant 0.000000e+00 : f32
    %38 = vector.broadcast %cst_23 : f32 to vector<512x128xf32>
    %39 = arith.maximumf %37, %38 : vector<512x128xf32>
    %40 = arith.truncf %39 : vector<512x128xf32> to vector<512x128xbf16>
    %c2 = arith.constant 2 : index
    %c0_24 = arith.constant 0 : index
    %c0_25 = arith.constant 0 : index
    %41 = vector.load %arg4[%c2, %c0_24, %c0_25] : memref<15x128x128xbf16, #tpu.memory_space<vmem>>, vector<1x128x128xbf16>
    %42 = vector.shape_cast %41 : vector<1x128x128xbf16> to vector<128x128xbf16>
    %cst_26 = arith.constant dense<0.000000e+00> : vector<512x128xf32>
    %43 = tpu.matmul %40, %42, %cst_26 {dimension_numbers = #tpu.dot_dimension_numbers<[1], [0], [0], [1], [0, 0, 1, 1], [], []>} : vector<512x128xbf16>, vector<128x128xbf16>, vector<512x128xf32> -> vector<512x128xf32>
    %c2_27 = arith.constant 2 : index
    %c0_28 = arith.constant 0 : index
    %c0_29 = arith.constant 0 : index
    %44 = vector.load %arg5[%c2_27, %c0_28, %c0_29] : memref<15x1x128xf32, #tpu.memory_space<vmem>>, vector<1x1x128xf32>
    %45 = vector.shape_cast %44 : vector<1x1x128xf32> to vector<1x128xf32>
    %46 = vector.broadcast %45 : vector<1x128xf32> to vector<512x128xf32>
    %47 = arith.addf %43, %46 : vector<512x128xf32>
    %cst_30 = arith.constant 0.000000e+00 : f32
    %48 = vector.broadcast %cst_30 : f32 to vector<512x128xf32>
    %49 = arith.maximumf %47, %48 : vector<512x128xf32>
    %50 = arith.truncf %49 : vector<512x128xf32> to vector<512x128xbf16>
    %c3 = arith.constant 3 : index
    %c0_31 = arith.constant 0 : index
    %c0_32 = arith.constant 0 : index
    %51 = vector.load %arg4[%c3, %c0_31, %c0_32] : memref<15x128x128xbf16, #tpu.memory_space<vmem>>, vector<1x128x128xbf16>
    %52 = vector.shape_cast %51 : vector<1x128x128xbf16> to vector<128x128xbf16>
    %cst_33 = arith.constant dense<0.000000e+00> : vector<512x128xf32>
    %53 = tpu.matmul %50, %52, %cst_33 {dimension_numbers = #tpu.dot_dimension_numbers<[1], [0], [0], [1], [0, 0, 1, 1], [], []>} : vector<512x128xbf16>, vector<128x128xbf16>, vector<512x128xf32> -> vector<512x128xf32>
    %c3_34 = arith.constant 3 : index
    %c0_35 = arith.constant 0 : index
    %c0_36 = arith.constant 0 : index
    %54 = vector.load %arg5[%c3_34, %c0_35, %c0_36] : memref<15x1x128xf32, #tpu.memory_space<vmem>>, vector<1x1x128xf32>
    %55 = vector.shape_cast %54 : vector<1x1x128xf32> to vector<1x128xf32>
    %56 = vector.broadcast %55 : vector<1x128xf32> to vector<512x128xf32>
    %57 = arith.addf %53, %56 : vector<512x128xf32>
    %cst_37 = arith.constant 0.000000e+00 : f32
    %58 = vector.broadcast %cst_37 : f32 to vector<512x128xf32>
    %59 = arith.maximumf %57, %58 : vector<512x128xf32>
    %60 = arith.truncf %59 : vector<512x128xf32> to vector<512x128xbf16>
    %c4 = arith.constant 4 : index
    %c0_38 = arith.constant 0 : index
    %c0_39 = arith.constant 0 : index
    %61 = vector.load %arg4[%c4, %c0_38, %c0_39] : memref<15x128x128xbf16, #tpu.memory_space<vmem>>, vector<1x128x128xbf16>
    %62 = vector.shape_cast %61 : vector<1x128x128xbf16> to vector<128x128xbf16>
    %cst_40 = arith.constant dense<0.000000e+00> : vector<512x128xf32>
    %63 = tpu.matmul %60, %62, %cst_40 {dimension_numbers = #tpu.dot_dimension_numbers<[1], [0], [0], [1], [0, 0, 1, 1], [], []>} : vector<512x128xbf16>, vector<128x128xbf16>, vector<512x128xf32> -> vector<512x128xf32>
    %c4_41 = arith.constant 4 : index
    %c0_42 = arith.constant 0 : index
    %c0_43 = arith.constant 0 : index
    %64 = vector.load %arg5[%c4_41, %c0_42, %c0_43] : memref<15x1x128xf32, #tpu.memory_space<vmem>>, vector<1x1x128xf32>
    %65 = vector.shape_cast %64 : vector<1x1x128xf32> to vector<1x128xf32>
    %66 = vector.broadcast %65 : vector<1x128xf32> to vector<512x128xf32>
    %67 = arith.addf %63, %66 : vector<512x128xf32>
    %cst_44 = arith.constant 0.000000e+00 : f32
    %68 = vector.broadcast %cst_44 : f32 to vector<512x128xf32>
    %69 = arith.maximumf %67, %68 : vector<512x128xf32>
    %70 = arith.truncf %69 : vector<512x128xf32> to vector<512x128xbf16>
    %c5 = arith.constant 5 : index
    %c0_45 = arith.constant 0 : index
    %c0_46 = arith.constant 0 : index
    %71 = vector.load %arg4[%c5, %c0_45, %c0_46] : memref<15x128x128xbf16, #tpu.memory_space<vmem>>, vector<1x128x128xbf16>
    %72 = vector.shape_cast %71 : vector<1x128x128xbf16> to vector<128x128xbf16>
    %cst_47 = arith.constant dense<0.000000e+00> : vector<512x128xf32>
    %73 = tpu.matmul %70, %72, %cst_47 {dimension_numbers = #tpu.dot_dimension_numbers<[1], [0], [0], [1], [0, 0, 1, 1], [], []>} : vector<512x128xbf16>, vector<128x128xbf16>, vector<512x128xf32> -> vector<512x128xf32>
    %c5_48 = arith.constant 5 : index
    %c0_49 = arith.constant 0 : index
    %c0_50 = arith.constant 0 : index
    %74 = vector.load %arg5[%c5_48, %c0_49, %c0_50] : memref<15x1x128xf32, #tpu.memory_space<vmem>>, vector<1x1x128xf32>
    %75 = vector.shape_cast %74 : vector<1x1x128xf32> to vector<1x128xf32>
    %76 = vector.broadcast %75 : vector<1x128xf32> to vector<512x128xf32>
    %77 = arith.addf %73, %76 : vector<512x128xf32>
    %cst_51 = arith.constant 0.000000e+00 : f32
    %78 = vector.broadcast %cst_51 : f32 to vector<512x128xf32>
    %79 = arith.maximumf %77, %78 : vector<512x128xf32>
    %80 = arith.truncf %79 : vector<512x128xf32> to vector<512x128xbf16>
    %c6 = arith.constant 6 : index
    %c0_52 = arith.constant 0 : index
    %c0_53 = arith.constant 0 : index
    %81 = vector.load %arg4[%c6, %c0_52, %c0_53] : memref<15x128x128xbf16, #tpu.memory_space<vmem>>, vector<1x128x128xbf16>
    %82 = vector.shape_cast %81 : vector<1x128x128xbf16> to vector<128x128xbf16>
    %cst_54 = arith.constant dense<0.000000e+00> : vector<512x128xf32>
    %83 = tpu.matmul %80, %82, %cst_54 {dimension_numbers = #tpu.dot_dimension_numbers<[1], [0], [0], [1], [0, 0, 1, 1], [], []>} : vector<512x128xbf16>, vector<128x128xbf16>, vector<512x128xf32> -> vector<512x128xf32>
    %c6_55 = arith.constant 6 : index
    %c0_56 = arith.constant 0 : index
    %c0_57 = arith.constant 0 : index
    %84 = vector.load %arg5[%c6_55, %c0_56, %c0_57] : memref<15x1x128xf32, #tpu.memory_space<vmem>>, vector<1x1x128xf32>
    %85 = vector.shape_cast %84 : vector<1x1x128xf32> to vector<1x128xf32>
    %86 = vector.broadcast %85 : vector<1x128xf32> to vector<512x128xf32>
    %87 = arith.addf %83, %86 : vector<512x128xf32>
    %cst_58 = arith.constant 0.000000e+00 : f32
    %88 = vector.broadcast %cst_58 : f32 to vector<512x128xf32>
    %89 = arith.maximumf %87, %88 : vector<512x128xf32>
    %90 = arith.truncf %89 : vector<512x128xf32> to vector<512x128xbf16>
    %c7 = arith.constant 7 : index
    %c0_59 = arith.constant 0 : index
    %c0_60 = arith.constant 0 : index
    %91 = vector.load %arg4[%c7, %c0_59, %c0_60] : memref<15x128x128xbf16, #tpu.memory_space<vmem>>, vector<1x128x128xbf16>
    %92 = vector.shape_cast %91 : vector<1x128x128xbf16> to vector<128x128xbf16>
    %cst_61 = arith.constant dense<0.000000e+00> : vector<512x128xf32>
    %93 = tpu.matmul %90, %92, %cst_61 {dimension_numbers = #tpu.dot_dimension_numbers<[1], [0], [0], [1], [0, 0, 1, 1], [], []>} : vector<512x128xbf16>, vector<128x128xbf16>, vector<512x128xf32> -> vector<512x128xf32>
    %c7_62 = arith.constant 7 : index
    %c0_63 = arith.constant 0 : index
    %c0_64 = arith.constant 0 : index
    %94 = vector.load %arg5[%c7_62, %c0_63, %c0_64] : memref<15x1x128xf32, #tpu.memory_space<vmem>>, vector<1x1x128xf32>
    %95 = vector.shape_cast %94 : vector<1x1x128xf32> to vector<1x128xf32>
    %96 = vector.broadcast %95 : vector<1x128xf32> to vector<512x128xf32>
    %97 = arith.addf %93, %96 : vector<512x128xf32>
    %cst_65 = arith.constant 0.000000e+00 : f32
    %98 = vector.broadcast %cst_65 : f32 to vector<512x128xf32>
    %99 = arith.maximumf %97, %98 : vector<512x128xf32>
    %100 = arith.truncf %99 : vector<512x128xf32> to vector<512x128xbf16>
    %c8 = arith.constant 8 : index
    %c0_66 = arith.constant 0 : index
    %c0_67 = arith.constant 0 : index
    %101 = vector.load %arg4[%c8, %c0_66, %c0_67] : memref<15x128x128xbf16, #tpu.memory_space<vmem>>, vector<1x128x128xbf16>
    %102 = vector.shape_cast %101 : vector<1x128x128xbf16> to vector<128x128xbf16>
    %cst_68 = arith.constant dense<0.000000e+00> : vector<512x128xf32>
    %103 = tpu.matmul %100, %102, %cst_68 {dimension_numbers = #tpu.dot_dimension_numbers<[1], [0], [0], [1], [0, 0, 1, 1], [], []>} : vector<512x128xbf16>, vector<128x128xbf16>, vector<512x128xf32> -> vector<512x128xf32>
    %c8_69 = arith.constant 8 : index
    %c0_70 = arith.constant 0 : index
    %c0_71 = arith.constant 0 : index
    %104 = vector.load %arg5[%c8_69, %c0_70, %c0_71] : memref<15x1x128xf32, #tpu.memory_space<vmem>>, vector<1x1x128xf32>
    %105 = vector.shape_cast %104 : vector<1x1x128xf32> to vector<1x128xf32>
    %106 = vector.broadcast %105 : vector<1x128xf32> to vector<512x128xf32>
    %107 = arith.addf %103, %106 : vector<512x128xf32>
    %cst_72 = arith.constant 0.000000e+00 : f32
    %108 = vector.broadcast %cst_72 : f32 to vector<512x128xf32>
    %109 = arith.maximumf %107, %108 : vector<512x128xf32>
    %110 = arith.truncf %109 : vector<512x128xf32> to vector<512x128xbf16>
    %c9 = arith.constant 9 : index
    %c0_73 = arith.constant 0 : index
    %c0_74 = arith.constant 0 : index
    %111 = vector.load %arg4[%c9, %c0_73, %c0_74] : memref<15x128x128xbf16, #tpu.memory_space<vmem>>, vector<1x128x128xbf16>
    %112 = vector.shape_cast %111 : vector<1x128x128xbf16> to vector<128x128xbf16>
    %cst_75 = arith.constant dense<0.000000e+00> : vector<512x128xf32>
    %113 = tpu.matmul %110, %112, %cst_75 {dimension_numbers = #tpu.dot_dimension_numbers<[1], [0], [0], [1], [0, 0, 1, 1], [], []>} : vector<512x128xbf16>, vector<128x128xbf16>, vector<512x128xf32> -> vector<512x128xf32>
    %c9_76 = arith.constant 9 : index
    %c0_77 = arith.constant 0 : index
    %c0_78 = arith.constant 0 : index
    %114 = vector.load %arg5[%c9_76, %c0_77, %c0_78] : memref<15x1x128xf32, #tpu.memory_space<vmem>>, vector<1x1x128xf32>
    %115 = vector.shape_cast %114 : vector<1x1x128xf32> to vector<1x128xf32>
    %116 = vector.broadcast %115 : vector<1x128xf32> to vector<512x128xf32>
    %117 = arith.addf %113, %116 : vector<512x128xf32>
    %cst_79 = arith.constant 0.000000e+00 : f32
    %118 = vector.broadcast %cst_79 : f32 to vector<512x128xf32>
    %119 = arith.maximumf %117, %118 : vector<512x128xf32>
    %120 = arith.truncf %119 : vector<512x128xf32> to vector<512x128xbf16>
    %c10 = arith.constant 10 : index
    %c0_80 = arith.constant 0 : index
    %c0_81 = arith.constant 0 : index
    %121 = vector.load %arg4[%c10, %c0_80, %c0_81] : memref<15x128x128xbf16, #tpu.memory_space<vmem>>, vector<1x128x128xbf16>
    %122 = vector.shape_cast %121 : vector<1x128x128xbf16> to vector<128x128xbf16>
    %cst_82 = arith.constant dense<0.000000e+00> : vector<512x128xf32>
    %123 = tpu.matmul %120, %122, %cst_82 {dimension_numbers = #tpu.dot_dimension_numbers<[1], [0], [0], [1], [0, 0, 1, 1], [], []>} : vector<512x128xbf16>, vector<128x128xbf16>, vector<512x128xf32> -> vector<512x128xf32>
    %c10_83 = arith.constant 10 : index
    %c0_84 = arith.constant 0 : index
    %c0_85 = arith.constant 0 : index
    %124 = vector.load %arg5[%c10_83, %c0_84, %c0_85] : memref<15x1x128xf32, #tpu.memory_space<vmem>>, vector<1x1x128xf32>
    %125 = vector.shape_cast %124 : vector<1x1x128xf32> to vector<1x128xf32>
    %126 = vector.broadcast %125 : vector<1x128xf32> to vector<512x128xf32>
    %127 = arith.addf %123, %126 : vector<512x128xf32>
    %cst_86 = arith.constant 0.000000e+00 : f32
    %128 = vector.broadcast %cst_86 : f32 to vector<512x128xf32>
    %129 = arith.maximumf %127, %128 : vector<512x128xf32>
    %130 = arith.truncf %129 : vector<512x128xf32> to vector<512x128xbf16>
    %c11 = arith.constant 11 : index
    %c0_87 = arith.constant 0 : index
    %c0_88 = arith.constant 0 : index
    %131 = vector.load %arg4[%c11, %c0_87, %c0_88] : memref<15x128x128xbf16, #tpu.memory_space<vmem>>, vector<1x128x128xbf16>
    %132 = vector.shape_cast %131 : vector<1x128x128xbf16> to vector<128x128xbf16>
    %cst_89 = arith.constant dense<0.000000e+00> : vector<512x128xf32>
    %133 = tpu.matmul %130, %132, %cst_89 {dimension_numbers = #tpu.dot_dimension_numbers<[1], [0], [0], [1], [0, 0, 1, 1], [], []>} : vector<512x128xbf16>, vector<128x128xbf16>, vector<512x128xf32> -> vector<512x128xf32>
    %c11_90 = arith.constant 11 : index
    %c0_91 = arith.constant 0 : index
    %c0_92 = arith.constant 0 : index
    %134 = vector.load %arg5[%c11_90, %c0_91, %c0_92] : memref<15x1x128xf32, #tpu.memory_space<vmem>>, vector<1x1x128xf32>
    %135 = vector.shape_cast %134 : vector<1x1x128xf32> to vector<1x128xf32>
    %136 = vector.broadcast %135 : vector<1x128xf32> to vector<512x128xf32>
    %137 = arith.addf %133, %136 : vector<512x128xf32>
    %cst_93 = arith.constant 0.000000e+00 : f32
    %138 = vector.broadcast %cst_93 : f32 to vector<512x128xf32>
    %139 = arith.maximumf %137, %138 : vector<512x128xf32>
    %140 = arith.truncf %139 : vector<512x128xf32> to vector<512x128xbf16>
    %c12 = arith.constant 12 : index
    %c0_94 = arith.constant 0 : index
    %c0_95 = arith.constant 0 : index
    %141 = vector.load %arg4[%c12, %c0_94, %c0_95] : memref<15x128x128xbf16, #tpu.memory_space<vmem>>, vector<1x128x128xbf16>
    %142 = vector.shape_cast %141 : vector<1x128x128xbf16> to vector<128x128xbf16>
    %cst_96 = arith.constant dense<0.000000e+00> : vector<512x128xf32>
    %143 = tpu.matmul %140, %142, %cst_96 {dimension_numbers = #tpu.dot_dimension_numbers<[1], [0], [0], [1], [0, 0, 1, 1], [], []>} : vector<512x128xbf16>, vector<128x128xbf16>, vector<512x128xf32> -> vector<512x128xf32>
    %c12_97 = arith.constant 12 : index
    %c0_98 = arith.constant 0 : index
    %c0_99 = arith.constant 0 : index
    %144 = vector.load %arg5[%c12_97, %c0_98, %c0_99] : memref<15x1x128xf32, #tpu.memory_space<vmem>>, vector<1x1x128xf32>
    %145 = vector.shape_cast %144 : vector<1x1x128xf32> to vector<1x128xf32>
    %146 = vector.broadcast %145 : vector<1x128xf32> to vector<512x128xf32>
    %147 = arith.addf %143, %146 : vector<512x128xf32>
    %cst_100 = arith.constant 0.000000e+00 : f32
    %148 = vector.broadcast %cst_100 : f32 to vector<512x128xf32>
    %149 = arith.maximumf %147, %148 : vector<512x128xf32>
    %150 = arith.truncf %149 : vector<512x128xf32> to vector<512x128xbf16>
    %c13 = arith.constant 13 : index
    %c0_101 = arith.constant 0 : index
    %c0_102 = arith.constant 0 : index
    %151 = vector.load %arg4[%c13, %c0_101, %c0_102] : memref<15x128x128xbf16, #tpu.memory_space<vmem>>, vector<1x128x128xbf16>
    %152 = vector.shape_cast %151 : vector<1x128x128xbf16> to vector<128x128xbf16>
    %cst_103 = arith.constant dense<0.000000e+00> : vector<512x128xf32>
    %153 = tpu.matmul %150, %152, %cst_103 {dimension_numbers = #tpu.dot_dimension_numbers<[1], [0], [0], [1], [0, 0, 1, 1], [], []>} : vector<512x128xbf16>, vector<128x128xbf16>, vector<512x128xf32> -> vector<512x128xf32>
    %c13_104 = arith.constant 13 : index
    %c0_105 = arith.constant 0 : index
    %c0_106 = arith.constant 0 : index
    %154 = vector.load %arg5[%c13_104, %c0_105, %c0_106] : memref<15x1x128xf32, #tpu.memory_space<vmem>>, vector<1x1x128xf32>
    %155 = vector.shape_cast %154 : vector<1x1x128xf32> to vector<1x128xf32>
    %156 = vector.broadcast %155 : vector<1x128xf32> to vector<512x128xf32>
    %157 = arith.addf %153, %156 : vector<512x128xf32>
    %cst_107 = arith.constant 0.000000e+00 : f32
    %158 = vector.broadcast %cst_107 : f32 to vector<512x128xf32>
    %159 = arith.maximumf %157, %158 : vector<512x128xf32>
    %160 = arith.truncf %159 : vector<512x128xf32> to vector<512x128xbf16>
    %c14 = arith.constant 14 : index
    %c0_108 = arith.constant 0 : index
    %c0_109 = arith.constant 0 : index
    %161 = vector.load %arg4[%c14, %c0_108, %c0_109] : memref<15x128x128xbf16, #tpu.memory_space<vmem>>, vector<1x128x128xbf16>
    %162 = vector.shape_cast %161 : vector<1x128x128xbf16> to vector<128x128xbf16>
    %cst_110 = arith.constant dense<0.000000e+00> : vector<512x128xf32>
    %163 = tpu.matmul %160, %162, %cst_110 {dimension_numbers = #tpu.dot_dimension_numbers<[1], [0], [0], [1], [0, 0, 1, 1], [], []>} : vector<512x128xbf16>, vector<128x128xbf16>, vector<512x128xf32> -> vector<512x128xf32>
    %c14_111 = arith.constant 14 : index
    %c0_112 = arith.constant 0 : index
    %c0_113 = arith.constant 0 : index
    %164 = vector.load %arg5[%c14_111, %c0_112, %c0_113] : memref<15x1x128xf32, #tpu.memory_space<vmem>>, vector<1x1x128xf32>
    %165 = vector.shape_cast %164 : vector<1x1x128xf32> to vector<1x128xf32>
    %166 = vector.broadcast %165 : vector<1x128xf32> to vector<512x128xf32>
    %167 = arith.addf %163, %166 : vector<512x128xf32>
    %cst_114 = arith.constant 0.000000e+00 : f32
    %168 = vector.broadcast %cst_114 : f32 to vector<512x128xf32>
    %169 = arith.maximumf %167, %168 : vector<512x128xf32>
    %170 = vector.broadcast %3 : vector<1x128xf32> to vector<512x128xf32>
    %171 = arith.mulf %169, %170 : vector<512x128xf32>
    %cst_115 = arith.constant dense<0.000000e+00> : vector<512xf32>
    %172 = vector.multi_reduction <add>, %171, %cst_115 [1] : vector<512x128xf32> to vector<512xf32>
    %173 = vector.shape_cast %172 : vector<512xf32> to vector<512x1xf32>
    %174 = vector.broadcast %4 : vector<1x1xf32> to vector<512x1xf32>
    %175 = arith.addf %173, %174 : vector<512x1xf32>
    %c0_116 = arith.constant 0 : index
    %c0_117 = arith.constant 0 : index
    %176 = vector.load %arg8[%c0_116, %c0_117] : memref<512x1xf32, #tpu.memory_space<vmem>>, vector<512x1xf32>
    tpu.vector_store %arg8[%c0_116, %c0_117], %175 {strides = array<i32>} : memref<512x1xf32, #tpu.memory_space<vmem>>, vector<512x1xf32>,
    return
  }
  func.func @transform_0(%arg0: i32) -> (i32, i32) {
    %c0_i32 = arith.constant 0 : i32
    %c0_i32_0 = arith.constant 0 : i32
    return %arg0, %c0_i32 : i32, i32
  }
  func.func @transform_1(%arg0: i32) -> (i32, i32) {
    %c0_i32 = arith.constant 0 : i32
    %c0_i32_0 = arith.constant 0 : i32
    %c0_i32_1 = arith.constant 0 : i32
    return %c0_i32, %c0_i32_0 : i32, i32
  }
  func.func @transform_2(%arg0: i32) -> (i32, i32) {
    %c0_i32 = arith.constant 0 : i32
    %c0_i32_0 = arith.constant 0 : i32
    %c0_i32_1 = arith.constant 0 : i32
    return %c0_i32, %c0_i32_0 : i32, i32
  }
  func.func @transform_3(%arg0: i32) -> (i32, i32, i32) {
    %c0_i32 = arith.constant 0 : i32
    %c0_i32_0 = arith.constant 0 : i32
    %c0_i32_1 = arith.constant 0 : i32
    %c0_i32_2 = arith.constant 0 : i32
    return %c0_i32, %c0_i32_0, %c0_i32_1 : i32, i32, i32
  }
  func.func @transform_4(%arg0: i32) -> (i32, i32, i32) {
    %c0_i32 = arith.constant 0 : i32
    %c0_i32_0 = arith.constant 0 : i32
    %c0_i32_1 = arith.constant 0 : i32
    %c0_i32_2 = arith.constant 0 : i32
    return %c0_i32, %c0_i32_0, %c0_i32_1 : i32, i32, i32
  }
  func.func @transform_5(%arg0: i32) -> (i32, i32) {
    %c0_i32 = arith.constant 0 : i32
    %c0_i32_0 = arith.constant 0 : i32
    %c0_i32_1 = arith.constant 0 : i32
    return %c0_i32, %c0_i32_0 : i32, i32
  }
  func.func @transform_6(%arg0: i32) -> (i32, i32) {
    %c0_i32 = arith.constant 0 : i32
    %c0_i32_0 = arith.constant 0 : i32
    %c0_i32_1 = arith.constant 0 : i32
    return %c0_i32, %c0_i32_0 : i32, i32
  }
  func.func @transform_7(%arg0: i32) -> (i32, i32) {
    %c0_i32 = arith.constant 0 : i32
    %c0_i32_0 = arith.constant 0 : i32
    return %arg0, %c0_i32 : i32, i32
  }
}

</mosaic_0001>

<bundles_post_ra>
// kernel: tpu_custom_call.1
= control target key start
LH: loop header
LB: loop body
LE: loop exit
PB: predicated region body
PF: predicated region fallthrough
CT: control target
= control target key end

     0   :  { %s10973_s26 = smov 0   ;;  %s13226_s0 = inlined_call_operand.vmem [shape: f32[1024,2], index: 0, kind: input, shape index: {}]   ;;  %s13227_s1 = inlined_call_operand.vmem [shape: f32[2,128], index: 1, kind: input, shape index: {}]   ;;  %s13228_s2 = inlined_call_operand.vmem [shape: f32[1,128], index: 2, kind: input, shape index: {}]   ;;  %s13229_s3 = inlined_call_operand.vmem [shape: bf16[15,128,128], index: 3, kind: input, shape index: {}]   ;;  %s13230_s4 = inlined_call_operand.vmem [shape: f32[15,1,128], index: 4, kind: input, shape index: {}]   ;;  %s13231_s5 = inlined_call_operand.vmem [shape: f32[1,128], index: 5, kind: input, shape index: {}]   ;;  %s13232_s6 = inlined_call_operand.<no memory space> [shape: f32[1,1], index: 6, kind: input, shape index: {}]   ;;  %s13233_s7 = inlined_call_operand.vmem [shape: f32[1024,1], index: 7, kind: output, shape index: {}]  }
   0x1   :  { %v12_v0 = vstv %s13232_s6 }
   0x2   :  { %13 = vst [vmem:[#allocation2] sm:$0x1] %v12_v0 }
   0x3 LB: > { %s8520_s27 = sadd.s32 4294967295, %s10926_s26   ;;  %p8524_p0 = scmp.ge.s32.totalorder %s10926_s26, 1  ;;  %s10926_s26 = sphi %s10973_s26, %s19_s26  }
   0x4   : > { %p240_p1 = scmp.lt.s32.totalorder %s10926_s26, 3 }
   0x6   : > { %p241_p2 = pnand %p8524_p0, %p240_p1 }
   0x7   : > { %s8525_s28 = sshll.u32 (!%p241_p2), %s8520_s27, 6  ;;  %v10928_v1 = vmov (!%p241_p2), 1   ;;  %v10929_v8 = vmov (!%p241_p2), 0   ;;  %v10799_v23 = vld [vmem:[%s13229_s3] sm:$0xff] (!%p241_p2)   ;;  %v10800_v26 = vld [vmem:[%s13229_s3 + $0x8] sm:$0xff] (!%p241_p2)   ;;  %v10801_v29 = vld [vmem:[%s13229_s3 + $0x10] sm:$0xff] (!%p241_p2)  }
   0x8   : > { %244 = sbr.rel (%p241_p2) target bundleno = 4009 (0xfa9), region = 48  ;;  %10735 = vset.pattern.permute.xlu0 (!%p241_p2), %v10928_v1  ;;  %10733 = vset.pattern.permute.xlu1 (!%p241_p2), %v10928_v1  ;;  %p273_p3 = scmp.lt.s32.totalorder (!%p241_p2), %s8525_s28, 127  ;;  %v10802_v30 = vld [vmem:[%s13229_s3 + $0x18] sm:$0xff] (!%p241_p2)   ;;  %v10803_v31 = vld [vmem:[%s13229_s3 + $0x20] sm:$0xff] (!%p241_p2)   ;;  %v10804_v33 = vld [vmem:[%s13229_s3 + $0x28] sm:$0xff] (!%p241_p2)   ;;  %vm8399_vm0 = vcmask (!%p241_p2), 7168  }
   0x9   : > { %9507 = vmatprep.subr.bf16.mxu0 (!%p241_p2), %v10799_v23  ;;  %10707 = vmatprep.subr.bf16.mxu1 (!%p241_p2), %v10799_v23  ;;  %v10805_v34 = vld [vmem:[%s13229_s3 + $0x30] sm:$0xff] (!%p241_p2)   ;;  %v10806_v36 = vld [vmem:[%s13229_s3 + $0x38] sm:$0xff] (!%p241_p2)  }
   0xa   : > { %9508 = vmatpush3.bf16.msra.mxu0 (!%p241_p2), %v10799_v23  ;;  %10715 = vmatpush3.bf16.msra.mxu1 (!%p241_p2), %v10799_v23 }
   0xb   : > { %9509 = vmatprep.subr.bf16.mxu0 (!%p241_p2), %v10800_v26  ;;  %10708 = vmatprep.subr.bf16.mxu1 (!%p241_p2), %v10800_v26 }
   0xe   : > { %9510 = vmatpush3.bf16.msra.mxu0 (!%p241_p2), %v10800_v26  ;;  %10716 = vmatpush3.bf16.msra.mxu1 (!%p241_p2), %v10800_v26 }
   0xf   : > { %s13235_s28 = smov (!%p273_p3, %s8525_s28), 127  ;;  %9511 = vmatprep.subr.bf16.mxu0 %v10801_v29  ;;  %10709 = vmatprep.subr.bf16.mxu1 %v10801_v29 }
  0x10   : > { %s8526_s6 = sshll.u32 %s13235_s28, 3 }
  0x11   : > { %s10991_s8 = scalar_lea.vmem %s13226_s0, %s8526_s6 }
  0x12   : > { %v10994_v2 = vld [vmem:[%s10991_s8 + $0x10] sm:$0xff]  ;;  %v10997_v3 = vld [vmem:[%s10991_s8] sm:$0xff]  ;;  %v11005_v5 = vld [vmem:[%s10991_s8 + $0x8] sm:$0xff]  ;;  %9512 = vmatpush3.bf16.msra.mxu0 %v10801_v29  ;;  %10717 = vmatpush3.bf16.msra.mxu1 %v10801_v29 }
  0x13   : > { %750 = vperm.xlu0 %10735, %v10994_v2   ;;  %742 = vperm.xlu1 %10733, %v10997_v3   ;;  %v11002_v4 = vld [vmem:[%s10991_s8 + $0x30] sm:$0xff]  ;;  %v288_v7 = vld [vmem:[%s10991_s8 + $0x18] sm:$0xff]  ;;  %v289_v11 = vld [vmem:[%s10991_s8 + $0x20] sm:$0xff] }
  0x14   : > { %v11010_v6 = vld [vmem:[%s10991_s8 + $0x50] sm:$0xff]  ;;  %v11039_v15 = vld [vmem:[%s10991_s8 + $0x28] sm:$0xff]  ;;  %v292_v17 = vld [vmem:[%s10991_s8 + $0x38] sm:$0xff]  ;;  %9513 = vmatprep.subr.bf16.mxu0 %v10802_v30  ;;  %10710 = vmatprep.subr.bf16.mxu1 %v10802_v30 }
  0x15   : > { %v11016_v9 = vld [vmem:[%s10991_s8 + $0x70] sm:$0xff]  ;;  %v293_v20 = vld [vmem:[%s10991_s8 + $0x40] sm:$0xff]  ;;  %v294_v25 = vld [vmem:[%s10991_s8 + $0x48] sm:$0xff] }
  0x16   : > { %v11021_v10 = vld [vmem:[%s10991_s8 + $0x90] sm:$0xff]  ;;  %v296_v28 = vld [vmem:[%s10991_s8 + $0x58] sm:$0xff]  ;;  %v297_v32 = vld [vmem:[%s10991_s8 + $0x60] sm:$0xff]  ;;  %9514 = vmatpush3.bf16.msra.mxu0 %v10802_v30  ;;  %10718 = vmatpush3.bf16.msra.mxu1 %v10802_v30 }
  0x17   : > { %766 = vperm.xlu0 %10735, %v11002_v4   ;;  %746 = vperm.xlu1 %10733, %v11005_v5   ;;  %v11026_v12 = vld [vmem:[%s10991_s8 + $0xb0] sm:$0xff]  ;;  %v298_v35 = vld [vmem:[%s10991_s8 + $0x68] sm:$0xff]  ;;  %v300_v37 = vld [vmem:[%s10991_s8 + $0x78] sm:$0xff] }
  0x18   : > { %v11030_v13 = vld [vmem:[%s10991_s8 + $0xd0] sm:$0xff]  ;;  %9515 = vmatprep.subr.bf16.mxu0 %v10803_v31  ;;  %10711 = vmatprep.subr.bf16.mxu1 %v10803_v31  ;;  %v301_v38 = vld [vmem:[%s10991_s8 + $0x80] sm:$0xff]  ;;  %v302_v39 = vld [vmem:[%s10991_s8 + $0x88] sm:$0xff] }
  0x19   : > { %v11036_v14 = vld [vmem:[%s10991_s8 + $0xf0] sm:$0xff]  ;;  %v306_v40 = vld [vmem:[%s10991_s8 + $0xa8] sm:$0xff]  ;;  %v304_v41 = vld [vmem:[%s10991_s8 + $0x98] sm:$0xff] }
  0x1a   : > { %v11042_v16 = vld [vmem:[%s10991_s8 + $0x110] sm:$0xff]  ;;  %9516 = vmatpush3.bf16.msra.mxu0 %v10803_v31  ;;  %10719 = vmatpush3.bf16.msra.mxu1 %v10803_v31  ;;  %v310_v42 = vld [vmem:[%s10991_s8 + $0xc8] sm:$0xff]  ;;  %v305_v43 = vld [vmem:[%s10991_s8 + $0xa0] sm:$0xff] }
  0x1b   : > { %782 = vperm.xlu0 %10735, %v11010_v6   ;;  %10734 = vset.pattern.permute.xlu1 %v10929_v8  ;;  %v11050_v18 = vld [vmem:[%s10991_s8 + $0x130] sm:$0xff]  ;;  %v11135_v44 = vld [vmem:[%s10991_s8 + $0xe8] sm:$0xff]  ;;  %v308_v46 = vld [vmem:[%s10991_s8 + $0xb8] sm:$0xff] }
  0x1c   : > { %370 = vperm.xlu1 %10734, %v288_v7   ;;  %v11053_v19 = vld [vmem:[%s10991_s8 + $0x150] sm:$0xff]  ;;  %9517 = vmatprep.subr.bf16.mxu0 %v10804_v33  ;;  %v11141_v45 = vld [vmem:[%s10991_s8 + $0x108] sm:$0xff]  ;;  %v309_v54 = vld [vmem:[%s10991_s8 + $0xc0] sm:$0xff] }
  0x1d   : > { %v11060_v21 = vld [vmem:[%s10991_s8 + $0x170] sm:$0xff]  ;;  %10712 = vmatprep.subr.bf16.mxu1 %v10804_v33  ;;  %v11157_v51 = vld [vmem:[%s10991_s8 + $0x128] sm:$0xff]  ;;  %v312_v62 = vld [vmem:[%s10991_s8 + $0xd8] sm:$0xff] }
  0x1e   : > { %v11064_v22 = vld [vmem:[%s10991_s8 + $0x190] sm:$0xff]  ;;  %9518 = vmatpush3.bf16.msra.mxu0 %v10804_v33  ;;  %10720 = vmatpush3.bf16.msra.mxu1 %v10804_v33  ;;  %v11172_v57 = vld [vmem:[%s10991_s8 + $0x148] sm:$0xff]  ;;  %v317_v30 = vld [vmem:[%s10991_s8 + $0x100] sm:$0xff] }
  0x1f   : > { %798 = vperm.xlu0 %10735, %v11016_v9   ;;  %v11073_v24 = vld [vmem:[%s10991_s8 + $0x1b0] sm:$0xff]  ;;  %9519 = vmatprep.subr.bf16.mxu0 %v10805_v34  ;;  %v11184_v61 = vld [vmem:[%s10991_s8 + $0x168] sm:$0xff] }
  0x20   : > { %10736 = vset.pattern.permute.xlu1 %v10928_v1  ;;  %v11080_v27 = vld [vmem:[%s10991_s8 + $0x1d0] sm:$0xff]  ;;  %10713 = vmatprep.subr.bf16.mxu1 %v10805_v34 }
  0x21   : > { %754 = vperm.xlu1 %10736, %v288_v7   ;;  %v313_v7 = vld [vmem:[%s10991_s8 + $0xe0] sm:$0xff] }
  0x22   : > { %9520 = vmatpush3.bf16.msra.mxu0 %v10805_v34  ;;  %10721 = vmatpush3.bf16.msra.mxu1 %v10805_v34 }
  0x23   : > { %814 = vperm.xlu0 %10735, %v11021_v10   ;;  %9521 = vmatprep.subr.bf16.mxu0 %v10806_v36 }
  0x24   : > { %10714 = vmatprep.subr.bf16.mxu1 %v10806_v36 }
  0x25   : > { %10737 = vset.pattern.permute.xlu1 %v10929_v8 }
  0x26   : > { %375 = vperm.xlu1 %10737, %v289_v11   ;;  %9522 = vmatpush3.bf16.msra.mxu0 %v10806_v36 }
  0x27   : > { %830 = vperm.xlu0 %10735, %v11026_v12   ;;  %10722 = vmatpush3.bf16.msra.mxu1 %v10806_v36 }
  0x2a   : > { %10738 = vset.pattern.permute.xlu1 %v10928_v1 }
  0x2b   : > { %846 = vperm.xlu0 %10735, %v11030_v13   ;;  %758 = vperm.xlu1 %10738, %v289_v11   ;;  %v11215_v11 = vld [vmem:[%s10991_s8 + $0x1a8] sm:$0xff] }
  0x2f   : > { %862 = vperm.xlu0 %10735, %v11036_v14   ;;  %762 = vperm.xlu1 %10738, %v11039_v15  }
  0x33   : > { %878 = vperm.xlu0 %10735, %v11042_v16   ;;  %10739 = vset.pattern.permute.xlu1 %v10929_v8 }
  0x34   : > { %390 = vperm.xlu1 %10739, %v292_v17  }
  0x37   : > { %894 = vperm.xlu0 %10735, %v11050_v18  }
  0x38   : > { %10740 = vset.pattern.permute.xlu1 %v10928_v1 }
  0x39   : > { %770 = vperm.xlu1 %10740, %v292_v17   ;;  %v316_v17 = vld [vmem:[%s10991_s8 + $0xf8] sm:$0xff] }
  0x3b   : > { %910 = vperm.xlu0 %10735, %v11053_v19  }
  0x3d   : > { %10741 = vset.pattern.permute.xlu1 %v10929_v8 }
  0x3e   : > { %395 = vperm.xlu1 %10741, %v293_v20  }
  0x3f   : > { %926 = vperm.xlu0 %10735, %v11060_v21  }
  0x42   : > { %10742 = vset.pattern.permute.xlu1 %v10928_v1 }
  0x43   : > { %942 = vperm.xlu0 %10735, %v11064_v22   ;;  %774 = vperm.xlu1 %10742, %v293_v20  }
  0x47   : > { %958 = vperm.xlu0 %10735, %v11073_v24   ;;  %778 = vperm.xlu1 %10742, %v294_v25  }
  0x4b   : > { %974 = vperm.xlu0 %10735, %v11080_v27   ;;  %10743 = vset.pattern.permute.xlu1 %v10929_v8 }
  0x4c   : > { %410 = vperm.xlu1 %10743, %v296_v28  }
  0x4f   : > { %10792 = vset.pattern.permute.xlu0 %v10929_v8 }
  0x50   : > { %355 = vperm.xlu0 %10792, %v10997_v3   ;;  %10744 = vset.pattern.permute.xlu1 %v10928_v1 }
  0x51   : > { %786 = vperm.xlu1 %10744, %v296_v28  }
  0x54   : > { %360 = vperm.xlu0 %10792, %v11005_v5  }
  0x55   : > { %10745 = vset.pattern.permute.xlu1 %v10929_v8 }
  0x56   : > { %415 = vperm.xlu1 %10745, %v297_v32  }
  0x58   : > { %365 = vperm.xlu0 %10792, %v10994_v2  }
  0x5a   : > { %10746 = vset.pattern.permute.xlu1 %v10928_v1 }
  0x5b   : > { %790 = vperm.xlu1 %10746, %v297_v32  }
  0x5c   : > { %380 = vperm.xlu0 %10792, %v11039_v15   ;;  %v673_v15 = vlaneseq }
  0x5e   : > { %v674_v20 = vshrl.u32 %v673_v15, 7 }
  0x5f   : > { %794 = vperm.xlu1 %10746, %v298_v35  }
  0x60   : > { %385 = vperm.xlu0 %10792, %v11002_v4   ;;  %v11200_v4 = vld [vmem:[%s10991_s8 + $0x188] sm:$0xff]  ;;  %v999_v23 = vsub.s32 1, %v674_v20  ;;  %v675_v26 = vsub.s32 0, %v674_v20  ;;  %v320_v20 = vld [vmem:[%s10991_s8 + $0x118] sm:$0xff] }
  0x63   : > { %10747 = vset.pattern.permute.xlu1 %v10929_v8 }
  0x64   : > { %400 = vperm.xlu0 %10792, %v294_v25   ;;  %430 = vperm.xlu1 %10747, %v300_v37   ;;  %v11247_v25 = vld [vmem:[%s10991_s8 + $0x1e8] sm:$0xff] }
  0x68   : > { %405 = vperm.xlu0 %10792, %v11010_v6   ;;  %10748 = vset.pattern.permute.xlu1 %v10928_v1 }
  0x69   : > { %802 = vperm.xlu1 %10748, %v300_v37  }
  0x6c   : > { %420 = vperm.xlu0 %10792, %v298_v35  }
  0x6d   : > { %10749 = vset.pattern.permute.xlu1 %v10929_v8 }
  0x6e   : > { %435 = vperm.xlu1 %10749, %v301_v38  }
  0x70   : > { %425 = vperm.xlu0 %10792, %v11016_v9  }
  0x72   : > { %10750 = vset.pattern.permute.xlu1 %v10928_v1 }
  0x73   : > { %806 = vperm.xlu1 %10750, %v301_v38  }
  0x74   : > { %440 = vperm.xlu0 %10792, %v302_v39  }
  0x77   : > { %810 = vperm.xlu1 %10750, %v302_v39  }
  0x78   : > { %445 = vperm.xlu0 %10792, %v11021_v10  }
  0x7b   : > { %10751 = vset.pattern.permute.xlu1 %v10929_v8 }
  0x7c   : > { %460 = vperm.xlu0 %10792, %v306_v40   ;;  %450 = vperm.xlu1 %10751, %v304_v41  }
  0x80   : > { %465 = vperm.xlu0 %10792, %v11026_v12   ;;  %10752 = vset.pattern.permute.xlu1 %v10928_v1 }
  0x81   : > { %818 = vperm.xlu1 %10752, %v304_v41  }
  0x84   : > { %480 = vperm.xlu0 %10792, %v310_v42  }
  0x85   : > { %10753 = vset.pattern.permute.xlu1 %v10929_v8 }
  0x86   : > { %455 = vperm.xlu1 %10753, %v305_v43  }
  0x88   : > { %485 = vperm.xlu0 %10792, %v11030_v13  }
  0x8a   : > { %10754 = vset.pattern.permute.xlu1 %v10928_v1 }
  0x8b   : > { %822 = vperm.xlu1 %10754, %v305_v43   ;;  %v11276_v43 = vld [vmem:[%s13228_s2] ss:$0 sm:$0xff] }
  0x8c   : > { %500 = vperm.xlu0 %10792, %v11135_v44  }
  0x8f   : > { %826 = vperm.xlu1 %10754, %v306_v40  }
  0x90   : > { %505 = vperm.xlu0 %10792, %v11036_v14  }
  0x92   : > { %v11144_v47 = vpop.permute.xlu1 %742  ;;  %v11146_v48 = vpop.permute.xlu0 %750 }
  0x93   : > { %10755 = vset.pattern.permute.xlu1 %v10929_v8 }
  0x94   : > { %520 = vperm.xlu0 %10792, %v11141_v45   ;;  %470 = vperm.xlu1 %10755, %v308_v46  }
  0x96   : > { %v11150_v49 = vpop.permute.xlu1 %746  ;;  %v11152_v50 = vpop.permute.xlu0 %766 }
  0x98   : > { %525 = vperm.xlu0 %10792, %v11042_v16   ;;  %10756 = vset.pattern.permute.xlu1 %v10928_v1  ;;  %v11228_v16 = vld [vmem:[%s10991_s8 + $0x1c8] sm:$0xff] }
  0x99   : > { %834 = vperm.xlu1 %10756, %v308_v46  }
  0x9a   : > { %v11159_v52 = vpop.permute.xlu0 %782 }
  0x9b   : > { %v11161_v53 = vpop.permute.xlu1 %370 }
  0x9c   : > { %540 = vperm.xlu0 %10792, %v11157_v51  }
  0x9d   : > { %10757 = vset.pattern.permute.xlu1 %v10929_v8 }
  0x9e   : > { %475 = vperm.xlu1 %10757, %v309_v54   ;;  %v11166_v55 = vpop.permute.xlu0 %798 }
  0xa0   : > { %545 = vperm.xlu0 %10792, %v11050_v18   ;;  %v11169_v56 = vpop.permute.xlu1 %754 }
  0xa2   : > { %10758 = vset.pattern.permute.xlu1 %v10928_v1  ;;  %v11175_v58 = vpop.permute.xlu0 %814 }
  0xa3   : > { %838 = vperm.xlu1 %10758, %v309_v54  }
  0xa4   : > { %560 = vperm.xlu0 %10792, %v11172_v57  }
  0xa5   : > { %v11178_v59 = vpop.permute.xlu1 %375 }
  0xa6   : > { %v11180_v60 = vpop.permute.xlu0 %830 }
  0xa7   : > { %842 = vperm.xlu1 %10758, %v310_v42  }
  0xa8   : > { %565 = vperm.xlu0 %10792, %v11053_v19  }
  0xaa   : > { %v11187_v63 = vpop.permute.xlu1 %758  ;;  %v11189_v0 = vpop.permute.xlu0 %846 }
  0xab   : > { %10759 = vset.pattern.permute.xlu1 %v10929_v8 }
  0xac   : > { %580 = vperm.xlu0 %10792, %v11184_v61   ;;  %490 = vperm.xlu1 %10759, %v312_v62  }
  0xae   : > { %v11193_v2 = vpop.permute.xlu1 %762  ;;  %v11195_v3 = vpop.permute.xlu0 %862 }
  0xb0   : > { %585 = vperm.xlu0 %10792, %v11060_v21   ;;  %10760 = vset.pattern.permute.xlu1 %v10928_v1 }
  0xb1   : > { %850 = vperm.xlu1 %10760, %v312_v62  }
  0xb2   : > { %v11202_v5 = vpop.permute.xlu0 %878 }
  0xb3   : > { %v11204_v6 = vpop.permute.xlu1 %390 }
  0xb4   : > { %600 = vperm.xlu0 %10792, %v11200_v4  }
  0xb5   : > { %10761 = vset.pattern.permute.xlu1 %v10929_v8 }
  0xb6   : > { %495 = vperm.xlu1 %10761, %v313_v7   ;;  %v11209_v9 = vpop.permute.xlu0 %894 }
  0xb8   : > { %605 = vperm.xlu0 %10792, %v11064_v22   ;;  %v11212_v10 = vpop.permute.xlu1 %770 }
  0xba   : > { %10762 = vset.pattern.permute.xlu1 %v10928_v1  ;;  %v11218_v12 = vpop.permute.xlu0 %910 }
  0xbb   : > { %854 = vperm.xlu1 %10762, %v313_v7  }
  0xbc   : > { %620 = vperm.xlu0 %10792, %v11215_v11  }
  0xbd   : > { %v11221_v13 = vpop.permute.xlu1 %395 }
  0xbe   : > { %v11223_v14 = vpop.permute.xlu0 %926 }
  0xbf   : > { %858 = vperm.xlu1 %10762, %v11135_v44  }
  0xc0   : > { %625 = vperm.xlu0 %10792, %v11073_v24   ;;  %v349_v24 = vld [vmem:[%s13227_s1] sm:$0x3] }
  0xc1   : > { %v11254_v31 = vrot.slane %v349_v24, %v999_v23  ;;  %v11259_v32 = vrot.slane %v349_v24, %v675_v26 }
  0xc2   : > { %v11231_v18 = vpop.permute.xlu1 %774  ;;  %v11233_v19 = vpop.permute.xlu0 %942 }
  0xc3   : > { %10763 = vset.pattern.permute.xlu1 %v10929_v8  ;;  %v1001_v34 = vmul.f32 %v11254_v31, %v11144_v47  ;;  %v1004_v37 = vmul.f32 %v11254_v31, %v11169_v56  ;;  %v680_v39 = vmul.f32 %v11259_v32, %v11161_v53  ;;  %v1002_v41 = vmul.f32 %v11254_v31, %v11150_v49 }
  0xc4   : > { %640 = vperm.xlu0 %10792, %v11228_v16   ;;  %510 = vperm.xlu1 %10763, %v316_v17   ;;  %v1005_v46 = vmul.f32 %v11254_v31, %v11187_v63  ;;  %v1003_v49 = vmul.f32 %v11254_v31, %v11146_v48  ;;  %v681_v56 = vmul.f32 %v11259_v32, %v11178_v59 }
  0xc5   : > { %v1068_v44 = vadd.f32 %v1004_v37, %v680_v39  ;;  %v1008_v48 = vmul.f32 %v11254_v31, %v11212_v10  ;;  %v1006_v59 = vmul.f32 %v11254_v31, %v11193_v2  ;;  %v1007_v10 = vmul.f32 %v11254_v31, %v11152_v50 }
  0xc6   : > { %v11237_v21 = vpop.permute.xlu1 %778  ;;  %v11239_v22 = vpop.permute.xlu0 %958  ;;  %v1009_v37 = vmul.f32 %v11254_v31, %v11231_v18 }
  0xc7   : > { %v1138_v63 = vadd.f32 %v11276_v43, %v1068_v44 }
  0xc8   : > { %645 = vperm.xlu0 %10792, %v11080_v27   ;;  %10764 = vset.pattern.permute.xlu1 %v10928_v1  ;;  %v347_v27 = vld [vmem:[%s10991_s8 + $0x1f0] sm:$0xff] }
  0xc9   : > { %866 = vperm.xlu1 %10764, %v316_v17   ;;  %v1069_v17 = vadd.f32 %v1005_v46, %v681_v56 }
  0xca   : > { %v11249_v28 = vpop.permute.xlu0 %974 }
  0xcb   : > { %v11251_v29 = vpop.permute.xlu1 %410  ;;  %v1139_v2 = vadd.f32 %v11276_v43, %v1069_v17  ;;  %v321_v17 = vld [vmem:[%s10991_s8 + $0x120] sm:$0xff] }
  0xcc   : > { %660 = vperm.xlu0 %10792, %v11247_v25  }
  0xcd   : > { %10765 = vset.pattern.permute.xlu1 %v10929_v8 }
  0xce   : > { %515 = vperm.xlu1 %10765, %v317_v30  }
  0xcf   : > { %v356_v33 = vpop.permute.xlu0 %355 }
  0xd0   : > { %v677_v35 = vmul.f32 %v11259_v32, %v356_v33  ;;  %v787_v36 = vpop.permute.xlu1 %786  ;;  %665 = vperm.xlu0 %10792, %v347_v27  }
  0xd2   : > { %v1065_v38 = vadd.f32 %v1001_v34, %v677_v35  ;;  %10766 = vset.pattern.permute.xlu1 %v10928_v1 }
  0xd3   : > { %v361_v40 = vpop.permute.xlu0 %360  ;;  %870 = vperm.xlu1 %10766, %v317_v30  }
  0xd4   : > { %v678_v42 = vmul.f32 %v11259_v32, %v361_v40  ;;  %10797 = vset.pattern.permute.xlu0 %v10928_v1  ;;  %v1135_v54 = vadd.f32 %v11276_v43, %v1065_v38  ;;  %v1202_v38 = vmax.f32 %v1138_v63, 0.0 }
  0xd5   : > { %v11280_v47 = vpop.permute.xlu1 %415  ;;  %990 = vperm.xlu0 %10797, %v347_v27  }
  0xd6   : > { %v1066_v53 = vadd.f32 %v1002_v41, %v678_v42  ;;  %v1199_v26 = vmax.f32 %v1135_v54, 0.0  ;;  %v685_v42 = vmul.f32 %v11259_v32, %v11221_v13  ;;  %v688_v13 = vmul.f32 %v11259_v32, %v11251_v29 }
  0xd7   : > { %v366_v62 = vpop.permute.xlu0 %365  ;;  %874 = vperm.xlu1 %10766, %v11141_v45   ;;  %v684_v45 = vmul.f32 %v11259_v32, %v11204_v6 }
  0xd8   : > { %v679_v7 = vmul.f32 %v11259_v32, %v366_v62  ;;  %v1136_v15 = vadd.f32 %v11276_v43, %v1066_v53  ;;  %v1012_v53 = vmul.f32 %v11254_v31, %v787_v36  ;;  %v1203_v62 = vmax.f32 %v1139_v2, 0.0 }
  0xd9   : > { %v1072_v39 = vadd.f32 %v1008_v48, %v684_v45  ;;  %v1010_v48 = vmul.f32 %v11254_v31, %v11237_v21 }
  0xda   : > { %v1067_v23 = vadd.f32 %v1003_v49, %v679_v7  ;;  %v791_v24 = vpop.permute.xlu1 %790  ;;  %v1200_v30 = vmax.f32 %v1136_v15, 0.0  ;;  %v1073_v49 = vadd.f32 %v1009_v37, %v685_v42 }
  0xdb   : > { %v381_v27 = vpop.permute.xlu0 %380  ;;  %10767 = vset.pattern.permute.xlu1 %v10929_v8  ;;  %v1142_v54 = vadd.f32 %v11276_v43, %v1072_v39  ;;  %v1013_v29 = vmul.f32 %v11254_v31, %v791_v24 }
  0xdc   : > { %v1137_v33 = vadd.f32 %v11276_v43, %v1067_v23  ;;  %v682_v34 = vmul.f32 %v11259_v32, %v381_v27  ;;  %530 = vperm.xlu1 %10767, %v320_v20   ;;  %v1263_v35 = vpack.c.bf16 %v1200_v30, %v1199_v26  ;;  %v1011_v26 = vmul.f32 %v11254_v31, %v11159_v52 }
  0xdd   : > { %v1143_v30 = vadd.f32 %v11276_v43, %v1073_v49  ;;  %v1206_v21 = vmax.f32 %v1142_v54, 0.0  ;;  %v1015_v49 = vmul.f32 %v11254_v31, %v11166_v55 }
  0xde   : > { %v1070_v40 = vadd.f32 %v1006_v59, %v682_v34  ;;  %9523 = vmatprep.mubr.bf16.mxu0 %v1263_v35  ;;  %v795_v41 = vpop.permute.xlu1 %794  ;;  %v1201_v6 = vmax.f32 %v1137_v33, 0.0  ;;  %v1076_v59 = vadd.f32 %v1012_v53, %v688_v13  ;;  %v689_v34 = vmul.f32 %v11259_v32, %v11280_v47 }
  0xdf   : > { %v386_v44 = vpop.permute.xlu0 %385  ;;  %v1207_v2 = vmax.f32 %v1143_v30, 0.0  ;;  %v1014_v42 = vmul.f32 %v11254_v31, %v795_v41 }
  0xe0   : > { %v1140_v46 = vadd.f32 %v11276_v43, %v1070_v40  ;;  %v683_v50 = vmul.f32 %v11259_v32, %v386_v44  ;;  %10768 = vset.pattern.permute.xlu1 %v10928_v1  ;;  %v1264_v18 = vpack.c.bf16 %v1202_v38, %v1201_v6  ;;  %v1146_v38 = vadd.f32 %v11276_v43, %v1076_v59 }
  0xe1   : > { %882 = vperm.xlu1 %10768, %v320_v20   ;;  %v1077_v39 = vadd.f32 %v1013_v29, %v689_v34 }
  0xe2   : > { %v1071_v56 = vadd.f32 %v1007_v10, %v683_v50  ;;  %9524 = vmatmul.mubr.bf16.vlgmr.msra.gmra.mrb[0].mxu0 %v1264_v18  ;;  %v1204_v7 = vmax.f32 %v1140_v46, 0.0  ;;  %v1210_v54 = vmax.f32 %v1146_v38, 0.0  ;;  %v1019_v38 = vmul.f32 %v11254_v31, %v11175_v58 }
  0xe3   : > { %v401_v15 = vpop.permute.xlu0 %400  ;;  %v431_v63 = vpop.permute.xlu1 %430 }
  0xe4   : > { %v1141_v23 = vadd.f32 %v11276_v43, %v1071_v56  ;;  %v686_v36 = vmul.f32 %v11259_v32, %v401_v15  ;;  %v1265_v20 = vpack.c.bf16 %v1204_v7, %v1203_v62  ;;  %v692_v44 = vmul.f32 %v11259_v32, %v431_v63 }
  0xe5   : > { %10769 = vset.pattern.permute.xlu1 %v10929_v8  ;;  %v1147_v56 = vadd.f32 %v11276_v43, %v1077_v39 }
  0xe6   : > { %v1074_v27 = vadd.f32 %v1010_v48, %v686_v36  ;;  %535 = vperm.xlu1 %10769, %v321_v17   ;;  %9527 = vmatprep.mubr.bf16.mxu0 %v1265_v20  ;;  %v1205_v45 = vmax.f32 %v1141_v23, 0.0  ;;  %v324_v48 = vld [vmem:[%s10991_s8 + $0x138] sm:$0xff] }
  0xe7   : > { %v406_v33 = vpop.permute.xlu0 %405  ;;  %v1211_v20 = vmax.f32 %v1147_v56, 0.0 }
  0xe8   : > { %v1144_v35 = vadd.f32 %v11276_v43, %v1074_v27  ;;  %v687_v52 = vmul.f32 %v11259_v32, %v406_v33  ;;  %v803_v10 = vpop.permute.xlu1 %802  ;;  %v1266_v37 = vpack.c.bf16 %v1206_v21, %v1205_v45 }
  0xe9   : > { %v1016_v40 = vmul.f32 %v11254_v31, %v803_v10 }
  0xea   : > { %v1075_v24 = vadd.f32 %v1011_v26, %v687_v52  ;;  %10770 = vset.pattern.permute.xlu1 %v10928_v1  ;;  %9528 = vmatmul.mubr.bf16.gmra.mrb[4].mxu0 %v1266_v37  ;;  %v1208_v6 = vmax.f32 %v1144_v35, 0.0 }
  0xeb   : > { %v421_v47 = vpop.permute.xlu0 %420  ;;  %886 = vperm.xlu1 %10770, %v321_v17   ;;  %v1080_v62 = vadd.f32 %v1016_v40, %v692_v44 }
  0xec   : > { %v1145_v46 = vadd.f32 %v11276_v43, %v1075_v24  ;;  %v690_v50 = vmul.f32 %v11259_v32, %v421_v47  ;;  %v1267_v18 = vpack.c.bf16 %v1208_v6, %v1207_v2 }
  0xed   : > { %v436_v53 = vpop.permute.xlu1 %435  ;;  %v1150_v23 = vadd.f32 %v11276_v43, %v1080_v62 }
  0xee   : > { %v1078_v7 = vadd.f32 %v1014_v42, %v690_v50  ;;  %9531 = vmatprep.mubr.bf16.mxu0 %v1267_v18  ;;  %v1209_v41 = vmax.f32 %v1145_v46, 0.0  ;;  %v693_v30 = vmul.f32 %v11259_v32, %v436_v53  ;;  %v325_v42 = vld [vmem:[%s10991_s8 + $0x140] sm:$0xff] }
  0xef   : > { %v426_v13 = vpop.permute.xlu0 %425  ;;  %890 = vperm.xlu1 %10770, %v11157_v51   ;;  %v1214_v35 = vmax.f32 %v1150_v23, 0.0 }
  0xf0   : > { %v1148_v15 = vadd.f32 %v11276_v43, %v1078_v7  ;;  %v691_v63 = vmul.f32 %v11259_v32, %v426_v13  ;;  %v1268_v17 = vpack.c.bf16 %v1210_v54, %v1209_v41 }
  0xf2   : > { %v1079_v55 = vadd.f32 %v1015_v49, %v691_v63  ;;  %9532 = vmatmul.mubr.bf16.gmra.mrb[8].mxu0 %v1268_v17  ;;  %v807_v36 = vpop.permute.xlu1 %806  ;;  %v1212_v26 = vmax.f32 %v1148_v15, 0.0  ;;  %v328_v15 = vld [vmem:[%s10991_s8 + $0x158] sm:$0xff] }
  0xf3   : > { %v1017_v59 = vmul.f32 %v11254_v31, %v807_v36  ;;  %v441_v29 = vpop.permute.xlu0 %440  ;;  %10771 = vset.pattern.permute.xlu1 %v10929_v8 }
  0xf4   : > { %v1149_v51 = vadd.f32 %v11276_v43, %v1079_v55  ;;  %550 = vperm.xlu1 %10771, %v324_v48   ;;  %v1269_v27 = vpack.c.bf16 %v1212_v26, %v1211_v20  ;;  %v694_v21 = vmul.f32 %v11259_v32, %v441_v29 }
  0xf5   : > { %v1081_v45 = vadd.f32 %v1017_v59, %v693_v30  ;;  %v1023_v30 = vmul.f32 %v11254_v31, %v11180_v60 }
  0xf6   : > { %9535 = vmatprep.mubr.bf16.mxu0 %v1269_v27  ;;  %v811_v33 = vpop.permute.xlu1 %810  ;;  %v1213_v34 = vmax.f32 %v1149_v51, 0.0 }
  0xf7   : > { %v1018_v52 = vmul.f32 %v11254_v31, %v811_v33  ;;  %v446_v10 = vpop.permute.xlu0 %445  ;;  %v1151_v2 = vadd.f32 %v11276_v43, %v1081_v45 }
  0xf8   : > { %10772 = vset.pattern.permute.xlu1 %v10928_v1  ;;  %v1270_v37 = vpack.c.bf16 %v1214_v35, %v1213_v34  ;;  %v695_v24 = vmul.f32 %v11259_v32, %v446_v10 }
  0xf9   : > { %v1082_v39 = vadd.f32 %v1018_v52, %v694_v21  ;;  %898 = vperm.xlu1 %10772, %v324_v48   ;;  %v1215_v44 = vmax.f32 %v1151_v2, 0.0  ;;  %v329_v21 = vld [vmem:[%s10991_s8 + $0x160] sm:$0xff] }
  0xfa   : > { %9536 = vmatmul.mubr.bf16.gmra.mrb[12].mxu0 %v1270_v37  ;;  %v1083_v47 = vadd.f32 %v1019_v38, %v695_v24 }
  0xfb   : > { %v1152_v40 = vadd.f32 %v11276_v43, %v1082_v39  ;;  %v451_v6 = vpop.permute.xlu1 %450  ;;  %v461_v63 = vpop.permute.xlu0 %460 }
  0xfc   : > { %v1153_v18 = vadd.f32 %v11276_v43, %v1083_v47  ;;  %v696_v49 = vmul.f32 %v11259_v32, %v451_v6  ;;  %v698_v55 = vmul.f32 %v11259_v32, %v461_v63  ;;  %v332_v47 = vld [vmem:[%s10991_s8 + $0x178] sm:$0xff]  ;;  %v333_v63 = vld [vmem:[%s10991_s8 + $0x180] sm:$0xff] }
  0xfd   : > { %10773 = vset.pattern.permute.xlu1 %v10929_v8  ;;  %v1216_v46 = vmax.f32 %v1152_v40, 0.0 }
  0xfe   : > { %555 = vperm.xlu1 %10773, %v325_v42   ;;  %v1217_v7 = vmax.f32 %v1153_v18, 0.0 }
  0xff   : > { %v1271_v50 = vpack.c.bf16 %v1216_v46, %v1215_v44  ;;  %v466_v26 = vpop.permute.xlu0 %465 }
 0x100   : > { %v819_v58 = vpop.permute.xlu1 %818  ;;  %v699_v59 = vmul.f32 %v11259_v32, %v466_v26 }
 0x101   : > { %v1020_v53 = vmul.f32 %v11254_v31, %v819_v58  ;;  %9539 = vmatprep.mubr.bf16.mxu0 %v1271_v50 }
 0x102   : > { %10774 = vset.pattern.permute.xlu1 %v10928_v1  ;;  %v1087_v33 = vadd.f32 %v1023_v30, %v699_v59 }
 0x103   : > { %v1084_v54 = vadd.f32 %v1020_v53, %v696_v49  ;;  %902 = vperm.xlu1 %10774, %v325_v42   ;;  %v481_v44 = vpop.permute.xlu0 %480 }
 0x104   : > { %v1157_v60 = vadd.f32 %v11276_v43, %v1087_v33  ;;  %v702_v18 = vmul.f32 %v11259_v32, %v481_v44 }
 0x105   : > { %v1154_v56 = vadd.f32 %v11276_v43, %v1084_v54  ;;  %v456_v62 = vpop.permute.xlu1 %455 }
 0x106   : > { %v697_v48 = vmul.f32 %v11259_v32, %v456_v62  ;;  %v1221_v40 = vmax.f32 %v1157_v60, 0.0 }
 0x107   : > { %906 = vperm.xlu1 %10774, %v11172_v57   ;;  %v1218_v41 = vmax.f32 %v1154_v56, 0.0  ;;  %v486_v54 = vpop.permute.xlu0 %485  ;;  %v1027_v56 = vmul.f32 %v11254_v31, %v11189_v0 }
 0x108   : > { %v703_v62 = vmul.f32 %v11259_v32, %v486_v54 }
 0x109   : > { %v1272_v13 = vpack.c.bf16 %v1218_v41, %v1217_v7 }
 0x10a   : > { %v823_v17 = vpop.permute.xlu1 %822 }
 0x10b   : > { %v1021_v23 = vmul.f32 %v11254_v31, %v823_v17  ;;  %10775 = vset.pattern.permute.xlu1 %v10929_v8  ;;  %9540 = vmatmul.mubr.bf16.gmra.mrb[16].mxu0 %v1272_v13  ;;  %v1091_v17 = vadd.f32 %v1027_v56, %v703_v62 }
 0x10c   : > { %570 = vperm.xlu1 %10775, %v328_v15  }
 0x10d   : > { %v1085_v36 = vadd.f32 %v1021_v23, %v697_v48  ;;  %v1161_v0 = vadd.f32 %v11276_v43, %v1091_v17 }
 0x10e   : > { %v827_v20 = vpop.permute.xlu1 %826 }
 0x10f   : > { %v1022_v57 = vmul.f32 %v11254_v31, %v827_v20  ;;  %v1155_v29 = vadd.f32 %v11276_v43, %v1085_v36 }
 0x110   : > { %10776 = vset.pattern.permute.xlu1 %v10928_v1 }
 0x111   : > { %v1086_v51 = vadd.f32 %v1022_v57, %v698_v55  ;;  %914 = vperm.xlu1 %10776, %v328_v15   ;;  %v1219_v34 = vmax.f32 %v1155_v29, 0.0  ;;  %v1225_v29 = vmax.f32 %v1161_v0, 0.0 }
 0x113   : > { %v1156_v27 = vadd.f32 %v11276_v43, %v1086_v51  ;;  %v471_v45 = vpop.permute.xlu1 %470 }
 0x114   : > { %v700_v37 = vmul.f32 %v11259_v32, %v471_v45  ;;  %v336_v45 = vld [vmem:[%s10991_s8 + $0x198] sm:$0xff] }
 0x115   : > { %10777 = vset.pattern.permute.xlu1 %v10929_v8  ;;  %v1220_v35 = vmax.f32 %v1156_v27, 0.0 }
 0x116   : > { %575 = vperm.xlu1 %10777, %v329_v21  }
 0x117   : > { %v1273_v52 = vpack.c.bf16 %v1220_v35, %v1219_v34  ;;  %v501_v35 = vpop.permute.xlu0 %500 }
 0x118   : > { %v835_v10 = vpop.permute.xlu1 %834 }
 0x119   : > { %v1024_v38 = vmul.f32 %v11254_v31, %v835_v10  ;;  %9543 = vmatprep.mubr.bf16.mxu0 %v1273_v52  ;;  %v706_v52 = vmul.f32 %v11259_v32, %v501_v35 }
 0x11a   : > { %10778 = vset.pattern.permute.xlu1 %v10928_v1 }
 0x11b   : > { %v1088_v2 = vadd.f32 %v1024_v38, %v700_v37  ;;  %918 = vperm.xlu1 %10778, %v329_v21  }
 0x11d   : > { %v1158_v39 = vadd.f32 %v11276_v43, %v1088_v2  ;;  %v476_v24 = vpop.permute.xlu1 %475  ;;  %v506_v2 = vpop.permute.xlu0 %505 }
 0x11e   : > { %v701_v50 = vmul.f32 %v11259_v32, %v476_v24  ;;  %v707_v24 = vmul.f32 %v11259_v32, %v506_v2  ;;  %v344_v2 = vld [vmem:[%s10991_s8 + $0x1d8] sm:$0xff] }
 0x11f   : > { %922 = vperm.xlu1 %10778, %v11184_v61   ;;  %v1222_v6 = vmax.f32 %v1158_v39, 0.0  ;;  %v1031_v39 = vmul.f32 %v11254_v31, %v11195_v3 }
 0x121   : > { %v1274_v42 = vpack.c.bf16 %v1222_v6, %v1221_v40  ;;  %v521_v17 = vpop.permute.xlu0 %520 }
 0x122   : > { %v839_v46 = vpop.permute.xlu1 %838 }
 0x123   : > { %v1025_v58 = vmul.f32 %v11254_v31, %v839_v46  ;;  %10779 = vset.pattern.permute.xlu1 %v10929_v8  ;;  %9544 = vmatmul.mubr.bf16.gmra.mrb[20].mxu0 %v1274_v42  ;;  %v337_v42 = vld [vmem:[%s10991_s8 + $0x1a0] sm:$0xff]  ;;  %v1095_v46 = vadd.f32 %v1031_v39, %v707_v24 }
 0x124   : > { %590 = vperm.xlu1 %10779, %v332_v47  }
 0x125   : > { %v1089_v49 = vadd.f32 %v1025_v58, %v701_v50  ;;  %v1165_v3 = vadd.f32 %v11276_v43, %v1095_v46 }
 0x126   : > { %v843_v53 = vpop.permute.xlu1 %842 }
 0x127   : > { %v1026_v61 = vmul.f32 %v11254_v31, %v843_v53  ;;  %v1159_v7 = vadd.f32 %v11276_v43, %v1089_v49  ;;  %v1229_v56 = vmax.f32 %v1165_v3, 0.0 }
 0x128   : > { %10780 = vset.pattern.permute.xlu1 %v10928_v1 }
 0x129   : > { %v1090_v41 = vadd.f32 %v1026_v61, %v702_v18  ;;  %930 = vperm.xlu1 %10780, %v332_v47   ;;  %v1223_v48 = vmax.f32 %v1159_v7, 0.0 }
 0x12b   : > { %v1160_v13 = vadd.f32 %v11276_v43, %v1090_v41  ;;  %v491_v15 = vpop.permute.xlu1 %490  ;;  %v340_v41 = vld [vmem:[%s10991_s8 + $0x1b8] sm:$0xff] }
 0x12c   : > { %v704_v20 = vmul.f32 %v11259_v32, %v491_v15 }
 0x12d   : > { %10781 = vset.pattern.permute.xlu1 %v10929_v8  ;;  %v1224_v23 = vmax.f32 %v1160_v13, 0.0 }
 0x12e   : > { %595 = vperm.xlu1 %10781, %v333_v63  }
 0x12f   : > { %v1275_v55 = vpack.c.bf16 %v1224_v23, %v1223_v48  ;;  %v710_v48 = vmul.f32 %v11259_v32, %v521_v17 }
 0x130   : > { %v851_v36 = vpop.permute.xlu1 %850 }
 0x131   : > { %v1028_v57 = vmul.f32 %v11254_v31, %v851_v36  ;;  %9547 = vmatprep.mubr.bf16.mxu0 %v1275_v55 }
 0x132   : > { %10782 = vset.pattern.permute.xlu1 %v10928_v1 }
 0x133   : > { %v1092_v26 = vadd.f32 %v1028_v57, %v704_v20  ;;  %934 = vperm.xlu1 %10782, %v333_v63   ;;  %v526_v20 = vpop.permute.xlu0 %525  ;;  %v1035_v57 = vmul.f32 %v11254_v31, %v11202_v5 }
 0x135   : > { %v1162_v30 = vadd.f32 %v11276_v43, %v1092_v26  ;;  %v496_v59 = vpop.permute.xlu1 %495  ;;  %v711_v26 = vmul.f32 %v11259_v32, %v526_v20  ;;  %v348_v20 = vld [vmem:[%s10991_s8 + $0x1f8] sm:$0xff] }
 0x136   : > { %v705_v33 = vmul.f32 %v11259_v32, %v496_v59  ;;  %v341_v59 = vld [vmem:[%s10991_s8 + $0x1c0] sm:$0xff] }
 0x137   : > { %938 = vperm.xlu1 %10782, %v11200_v4   ;;  %v1226_v51 = vmax.f32 %v1162_v30, 0.0 }
 0x139   : > { %v1276_v27 = vpack.c.bf16 %v1226_v51, %v1225_v29 }
 0x13a   : > { %v855_v21 = vpop.permute.xlu1 %854 }
 0x13b   : > { %v1029_v34 = vmul.f32 %v11254_v31, %v855_v21  ;;  %10783 = vset.pattern.permute.xlu1 %v10929_v8  ;;  %9548 = vmatmul.mubr.bf16.gmra.mrb[24].mxu0 %v1276_v27 }
 0x13c   : > { %610 = vperm.xlu1 %10783, %v336_v45  }
 0x13d   : > { %v1093_v10 = vadd.f32 %v1029_v34, %v705_v33 }
 0x13e   : > { %v859_v60 = vpop.permute.xlu1 %858 }
 0x13f   : > { %v1030_v4 = vmul.f32 %v11254_v31, %v859_v60  ;;  %v1163_v37 = vadd.f32 %v11276_v43, %v1093_v10 }
 0x140   : > { %10784 = vset.pattern.permute.xlu1 %v10928_v1 }
 0x141   : > { %v1094_v38 = vadd.f32 %v1030_v4, %v706_v52  ;;  %946 = vperm.xlu1 %10784, %v336_v45   ;;  %v1227_v47 = vmax.f32 %v1163_v37, 0.0  ;;  %v1099_v45 = vadd.f32 %v1035_v57, %v711_v26  ;;  %v10809_v57 = vld [vmem:[%s13229_s3 + $0x50] sm:$0xff]  }
 0x143   : > { %v1164_v40 = vadd.f32 %v11276_v43, %v1094_v38  ;;  %v511_v6 = vpop.permute.xlu1 %510  ;;  %v1169_v5 = vadd.f32 %v11276_v43, %v1099_v45 }
 0x144   : > { %v708_v18 = vmul.f32 %v11259_v32, %v511_v6  ;;  %v541_v6 = vpop.permute.xlu0 %540 }
 0x145   : > { %10785 = vset.pattern.permute.xlu1 %v10929_v8  ;;  %v1228_v44 = vmax.f32 %v1164_v40, 0.0  ;;  %v1233_v4 = vmax.f32 %v1169_v5, 0.0  ;;  %v1043_v5 = vmul.f32 %v11254_v31, %v11218_v12 }
 0x146   : > { %615 = vperm.xlu1 %10785, %v337_v42  }
 0x147   : > { %v1277_v50 = vpack.c.bf16 %v1228_v44, %v1227_v47 }
 0x148   : > { %v867_v58 = vpop.permute.xlu1 %866 }
 0x149   : > { %v1032_v49 = vmul.f32 %v11254_v31, %v867_v58  ;;  %9551 = vmatprep.mubr.bf16.mxu0 %v1277_v50  ;;  %v546_v58 = vpop.permute.xlu0 %545 }
 0x14a   : > { %10786 = vset.pattern.permute.xlu1 %v10928_v1 }
 0x14b   : > { %v1096_v53 = vadd.f32 %v1032_v49, %v708_v18  ;;  %950 = vperm.xlu1 %10786, %v337_v42   ;;  %v714_v42 = vmul.f32 %v11259_v32, %v541_v6  ;;  %v1039_v18 = vmul.f32 %v11254_v31, %v11209_v9  ;;  %v715_v49 = vmul.f32 %v11259_v32, %v546_v58  ;;  %v10807_v9 = vld [vmem:[%s13229_s3 + $0x40] sm:$0xff]  }
 0x14c   : > { %9587 = vmatprep.subr.bf16.mxu1 %v10807_v9 }
 0x14d   : > { %v1166_v61 = vadd.f32 %v11276_v43, %v1096_v53  ;;  %v516_v54 = vpop.permute.xlu1 %515 }
 0x14e   : > { %v709_v15 = vmul.f32 %v11259_v32, %v516_v54 }
 0x14f   : > { %954 = vperm.xlu1 %10786, %v11215_v11   ;;  %v1230_v62 = vmax.f32 %v1166_v61, 0.0  ;;  %v345_v61 = vld [vmem:[%s10991_s8 + $0x1e0] sm:$0xff]  ;;  %s13002_s8 = scalar_lea.vmem %s13233_s7, %s8526_s6 }
 0x151   : > { %v1278_v7 = vpack.c.bf16 %v1230_v62, %v1229_v56  ;;  %v1103_v62 = vadd.f32 %v1039_v18, %v715_v49 }
 0x152   : > { %v871_v13 = vpop.permute.xlu1 %870 }
 0x153   : > { %v1033_v63 = vmul.f32 %v11254_v31, %v871_v13  ;;  %10787 = vset.pattern.permute.xlu1 %v10929_v8  ;;  %9552 = vmatmul.mubr.bf16.gmra.mrb[28].mxu0 %v1278_v7 }
 0x154   : > { %630 = vperm.xlu1 %10787, %v340_v41  }
 0x155   : > { %v1097_v23 = vadd.f32 %v1033_v63, %v709_v15  ;;  %v1173_v63 = vadd.f32 %v11276_v43, %v1103_v62 }
 0x156   : > { %v875_v55 = vpop.permute.xlu1 %874 }
 0x157   : > { %v1034_v11 = vmul.f32 %v11254_v31, %v875_v55  ;;  %v1167_v0 = vadd.f32 %v11276_v43, %v1097_v23  ;;  %v10808_v55 = vld [vmem:[%s13229_s3 + $0x48] sm:$0xff]  }
 0x158   : > { %10788 = vset.pattern.permute.xlu1 %v10928_v1 }
 0x159   : > { %v1098_v36 = vadd.f32 %v1034_v11, %v710_v48  ;;  %962 = vperm.xlu1 %10788, %v340_v41   ;;  %v1231_v51 = vmax.f32 %v1167_v0, 0.0  ;;  %v1237_v11 = vmax.f32 %v1173_v63, 0.0 }
 0x15b   : > { %v531_v30 = vpop.permute.xlu1 %530  ;;  %v1168_v29 = vadd.f32 %v11276_v43, %v1098_v36 }
 0x15c   : > { %v712_v34 = vmul.f32 %v11259_v32, %v531_v30 }
 0x15d   : > { %10789 = vset.pattern.permute.xlu1 %v10929_v8  ;;  %v1232_v27 = vmax.f32 %v1168_v29, 0.0  ;;  %v561_v29 = vpop.permute.xlu0 %560 }
 0x15e   : > { %635 = vperm.xlu1 %10789, %v341_v59   ;;  %v718_v45 = vmul.f32 %v11259_v32, %v561_v29 }
 0x15f   : > { %v1279_v21 = vpack.c.bf16 %v1232_v27, %v1231_v51  ;;  %v10810_v51 = vld [vmem:[%s13229_s3 + $0x58] sm:$0xff]  }
 0x160   : > { %v883_v33 = vpop.permute.xlu1 %882 }
 0x161   : > { %v1036_v35 = vmul.f32 %v11254_v31, %v883_v33  ;;  %9555 = vmatprep.mubr.bf16.mxu1 %v1279_v21 }
 0x162   : > { %10790 = vset.pattern.permute.xlu1 %v10928_v1 }
 0x163   : > { %v1100_v52 = vadd.f32 %v1036_v35, %v712_v34  ;;  %966 = vperm.xlu1 %10790, %v341_v59   ;;  %v10811_v34 = vld [vmem:[%s13229_s3 + $0x60] sm:$0xff]   ;;  %v566_v35 = vpop.permute.xlu0 %565 }
 0x165   : > { %v1170_v10 = vadd.f32 %v11276_v43, %v1100_v52  ;;  %v536_v60 = vpop.permute.xlu1 %535  ;;  %v719_v52 = vmul.f32 %v11259_v32, %v566_v35 }
 0x166   : > { %v713_v24 = vmul.f32 %v11259_v32, %v536_v60 }
 0x167   : > { %970 = vperm.xlu1 %10790, %v11228_v16   ;;  %v1234_v37 = vmax.f32 %v1170_v10, 0.0 }
 0x169   : > { %v1280_v38 = vpack.c.bf16 %v1234_v37, %v1233_v4  ;;  %v10812_v37 = vld [vmem:[%s13229_s3 + $0x68] sm:$0xff]  }
 0x16a   : > { %v887_v39 = vpop.permute.xlu1 %886 }
 0x16b   : > { %v1037_v40 = vmul.f32 %v11254_v31, %v887_v39  ;;  %10791 = vset.pattern.permute.xlu1 %v10929_v8  ;;  %9556 = vmatmul.mubr.bf16.vlgmr.msra.gmra.mrb[0].mxu1 %v1280_v38  ;;  %v1107_v38 = vadd.f32 %v1043_v5, %v719_v52 }
 0x16c   : > { %650 = vperm.xlu1 %10791, %v344_v2   ;;  %9588 = vmatpush3.bf16.msra.mxu1 %v10807_v9 }
 0x16d   : > { %v1101_v47 = vadd.f32 %v1037_v40, %v713_v24  ;;  %9589 = vmatprep.subr.bf16.mxu1 %v10808_v55  ;;  %v10813_v40 = vld [vmem:[%s13229_s3 + $0x70] sm:$0xff]   ;;  %v1177_v6 = vadd.f32 %v11276_v43, %v1107_v38 }
 0x16e   : > { %v891_v44 = vpop.permute.xlu1 %890 }
 0x16f   : > { %v1038_v16 = vmul.f32 %v11254_v31, %v891_v44  ;;  %v1171_v46 = vadd.f32 %v11276_v43, %v1101_v47  ;;  %v10814_v47 = vld [vmem:[%s13229_s3 + $0x78] sm:$0xff]  }
 0x170   : > { %10793 = vset.pattern.permute.xlu1 %v10928_v1  ;;  %9590 = vmatpush3.bf16.msra.mxu1 %v10808_v55 }
 0x171   : > { %v1102_v50 = vadd.f32 %v1038_v16, %v714_v42  ;;  %978 = vperm.xlu1 %10793, %v344_v2   ;;  %v1235_v54 = vmax.f32 %v1171_v46, 0.0  ;;  %9591 = vmatprep.subr.bf16.mxu1 %v10809_v57  ;;  %v1241_v46 = vmax.f32 %v1177_v6, 0.0 }
 0x173   : > { %v1172_v3 = vadd.f32 %v11276_v43, %v1102_v50  ;;  %v551_v53 = vpop.permute.xlu1 %550 }
 0x174   : > { %v716_v13 = vmul.f32 %v11259_v32, %v551_v53  ;;  %9592 = vmatpush3.bf16.msra.mxu1 %v10809_v57  ;;  %v581_v53 = vpop.permute.xlu0 %580 }
 0x175   : > { %10794 = vset.pattern.permute.xlu1 %v10929_v8  ;;  %v1236_v56 = vmax.f32 %v1172_v3, 0.0  ;;  %9593 = vmatprep.subr.bf16.mxu1 %v10810_v51 }
 0x176   : > { %655 = vperm.xlu1 %10794, %v345_v61  }
 0x177   : > { %v1281_v7 = vpack.c.bf16 %v1236_v56, %v1235_v54  ;;  %v722_v56 = vmul.f32 %v11259_v32, %v581_v53 }
 0x178   : > { %v899_v41 = vpop.permute.xlu1 %898  ;;  %9594 = vmatpush3.bf16.msra.mxu1 %v10810_v51 }
 0x179   : > { %v1040_v15 = vmul.f32 %v11254_v31, %v899_v41  ;;  %9559 = vmatprep.mubr.bf16.mxu1 %v1281_v7  ;;  %9595 = vmatprep.subr.bf16.mxu1 %v10811_v34 }
 0x17a   : > { %10795 = vset.pattern.permute.xlu1 %v10928_v1 }
 0x17b   : > { %v1104_v17 = vadd.f32 %v1040_v15, %v716_v13  ;;  %982 = vperm.xlu1 %10795, %v345_v61   ;;  %v586_v13 = vpop.permute.xlu0 %585  ;;  %v1047_v15 = vmul.f32 %v11254_v31, %v11223_v14 }
 0x17c   : > { %9596 = vmatpush3.bf16.msra.mxu1 %v10811_v34  ;;  %v723_v9 = vmul.f32 %v11259_v32, %v586_v13 }
 0x17d   : > { %v1174_v48 = vadd.f32 %v11276_v43, %v1104_v17  ;;  %v556_v23 = vpop.permute.xlu1 %555  ;;  %9597 = vmatprep.subr.bf16.mxu1 %v10812_v37 }
 0x17e   : > { %v717_v30 = vmul.f32 %v11259_v32, %v556_v23  ;;  %v1111_v55 = vadd.f32 %v1047_v15, %v723_v9 }
 0x17f   : > { %986 = vperm.xlu1 %10795, %v11247_v25   ;;  %v1238_v36 = vmax.f32 %v1174_v48, 0.0 }
 0x180   : > { %9598 = vmatpush3.bf16.msra.mxu1 %v10812_v37  ;;  %v1181_v57 = vadd.f32 %v11276_v43, %v1111_v55 }
 0x181   : > { %v1282_v0 = vpack.c.bf16 %v1238_v36, %v1237_v11  ;;  %9599 = vmatprep.subr.bf16.mxu1 %v10813_v40 }
 0x182   : > { %v903_v26 = vpop.permute.xlu1 %902 }
 0x183   : > { %v1041_v59 = vmul.f32 %v11254_v31, %v903_v26  ;;  %10796 = vset.pattern.permute.xlu1 %v10929_v8  ;;  %9560 = vmatmul.mubr.bf16.gmra.mrb[4].mxu1 %v1282_v0 }
 0x184   : > { %670 = vperm.xlu1 %10796, %v348_v20   ;;  %9600 = vmatpush3.bf16.msra.mxu1 %v10813_v40 }
 0x185   : > { %v1105_v25 = vadd.f32 %v1041_v59, %v717_v30  ;;  %9601 = vmatprep.subr.bf16.mxu1 %v10814_v47  ;;  %v1245_v59 = vmax.f32 %v1181_v57, 0.0  ;;  %v11551_v57 = vld [vmem:[%s13228_s2] ss:$0 sm:$0xff] }
 0x186   : > { %v907_v27 = vpop.permute.xlu1 %906 }
 0x187   : > { %v1042_v21 = vmul.f32 %v11254_v31, %v907_v27  ;;  %v1175_v8 = vadd.f32 %v11276_v43, %v1105_v25 }
 0x188   : > { %10798 = vset.pattern.permute.xlu1 %v10928_v1  ;;  %9602 = vmatpush3.bf16.msra.mxu1 %v10814_v47 }
 0x189   : > { %v1106_v33 = vadd.f32 %v1042_v21, %v718_v45  ;;  %994 = vperm.xlu1 %10798, %v348_v20   ;;  %v1239_v1 = vmax.f32 %v1175_v8, 0.0  ;;  %v11522_v21 = vld [vmem:[%s13230_s4] ss:$0 sm:$0xff]  ;;  %v601_v8 = vpop.permute.xlu0 %600 }
 0x18b   : > { %v1176_v10 = vadd.f32 %v11276_v43, %v1106_v33  ;;  %v571_v60 = vpop.permute.xlu1 %570 }
 0x18c   : > { %v720_v24 = vmul.f32 %v11259_v32, %v571_v60 }
 0x18d   : > { %v1240_v4 = vmax.f32 %v1176_v10, 0.0  ;;  %v726_v10 = vmul.f32 %v11259_v32, %v601_v8  ;;  %v606_v40 = vpop.permute.xlu0 %605 }
 0x18e   : > { %v727_v47 = vmul.f32 %v11259_v32, %v606_v40 }
 0x18f   : > { %v1283_v2 = vpack.c.bf16 %v1240_v4, %v1239_v1 }
 0x190   : > { %v915_v39 = vpop.permute.xlu1 %914 }
 0x191   : > { %v1044_v12 = vmul.f32 %v11254_v31, %v915_v39  ;;  %9563 = vmatprep.mubr.bf16.mxu1 %v1283_v2 }
 0x193   : > { %v1108_v42 = vadd.f32 %v1044_v12, %v720_v24  ;;  %v1051_v12 = vmul.f32 %v11254_v31, %v11233_v19 }
 0x195   : > { %v1178_v44 = vadd.f32 %v11276_v43, %v1108_v42  ;;  %v576_v16 = vpop.permute.xlu1 %575 }
 0x196   : > { %v721_v49 = vmul.f32 %v11259_v32, %v576_v16 }
 0x197   : > { %v1242_v50 = vmax.f32 %v1178_v44, 0.0 }
 0x199   : > { %v1284_v58 = vpack.c.bf16 %v1242_v50, %v1241_v46 }
 0x19a   : > { %v919_v18 = vpop.permute.xlu1 %918 }
 0x19b   : > { %v1045_v3 = vmul.f32 %v11254_v31, %v919_v18  ;;  %9564 = vmatmul.mubr.bf16.gmra.mrb[8].mxu1 %v1284_v58 }
 0x19d   : > { %v1109_v61 = vadd.f32 %v1045_v3, %v721_v49 }
 0x19e   : > { %v923_v54 = vpop.permute.xlu1 %922 }
 0x19f   : > { %v1046_v62 = vmul.f32 %v11254_v31, %v923_v54  ;;  %v1179_v7 = vadd.f32 %v11276_v43, %v1109_v61  ;;  %v1115_v54 = vadd.f32 %v1051_v12, %v727_v47 }
 0x1a1   : > { %v1110_v41 = vadd.f32 %v1046_v62, %v722_v56  ;;  %v1243_v48 = vmax.f32 %v1179_v7, 0.0  ;;  %v1185_v55 = vadd.f32 %v11276_v43, %v1115_v54 }
 0x1a3   : > { %v1180_v63 = vadd.f32 %v11276_v43, %v1110_v41  ;;  %v591_v17 = vpop.permute.xlu1 %590 }
 0x1a4   : > { %v724_v0 = vmul.f32 %v11259_v32, %v591_v17 }
 0x1a5   : > { %v1244_v23 = vmax.f32 %v1180_v63, 0.0 }
 0x1a7   : > { %v1285_v11 = vpack.c.bf16 %v1244_v23, %v1243_v48 }
 0x1a8   : > { %v931_v36 = vpop.permute.xlu1 %930 }
 0x1a9   : > { %v1048_v20 = vmul.f32 %v11254_v31, %v931_v36  ;;  %9567 = vmatprep.mubr.bf16.mxu1 %v1285_v11 }
 0x1ab   : > { %v1112_v26 = vadd.f32 %v1048_v20, %v724_v0 }
 0x1ad   : > { %v1182_v14 = vadd.f32 %v11276_v43, %v1112_v26  ;;  %v596_v30 = vpop.permute.xlu1 %595 }
 0x1ae   : > { %v725_v27 = vmul.f32 %v11259_v32, %v596_v30 }
 0x1af   : > { %v1246_v29 = vmax.f32 %v1182_v14, 0.0 }
 0x1b1   : > { %v1286_v25 = vpack.c.bf16 %v1246_v29, %v1245_v59 }
 0x1b2   : > { %v935_v51 = vpop.permute.xlu1 %934 }
 0x1b3   : > { %v1049_v45 = vmul.f32 %v11254_v31, %v935_v51  ;;  %9568 = vmatmul.mubr.bf16.gmra.mrb[12].mxu1 %v1286_v25 }
 0x1b5   : > { %v1113_v33 = vadd.f32 %v1049_v45, %v725_v27  ;;  %v9525_v34 = vpop.f32.mrb[0].mxu0 }
 0x1b6   : > { %v1409_v35 = vadd.f32 %v9525_v34, %v11522_v21  ;;  %v1400_v5 = vpop.f32.mrb[1].mxu0  ;;  %v939_v52 = vpop.permute.xlu1 %938 }
 0x1b7   : > { %v1401_v60 = vadd.f32 %v11522_v21, %v1400_v5  ;;  %v1050_v1 = vmul.f32 %v11254_v31, %v939_v52  ;;  %v9526_v4 = vpop.f32.mrb[2].mxu0  ;;  %v1183_v2 = vadd.f32 %v11276_v43, %v1113_v33 }
 0x1b8   : > { %v1412_v37 = vadd.f32 %v9526_v4, %v11522_v21  ;;  %v1403_v38 = vpop.f32.mrb[3].mxu0  ;;  %v1657_v6 = vmax.f32 %v1409_v35, 0.0 }
 0x1b9   : > { %v1114_v39 = vadd.f32 %v1050_v1, %v726_v10  ;;  %v1404_v24 = vadd.f32 %v11522_v21, %v1403_v38  ;;  %v1655_v44 = vmax.f32 %v1401_v60, 0.0  ;;  %v1247_v49 = vmax.f32 %v1183_v2, 0.0  ;;  %v621_v38 = vpop.permute.xlu0 %620 }
 0x1ba   : > { %v1658_v42 = vmax.f32 %v1412_v37, 0.0  ;;  %v730_v47 = vmul.f32 %v11259_v32, %v621_v38 }
 0x1bb   : > { %v1184_v16 = vadd.f32 %v11276_v43, %v1114_v39  ;;  %v1656_v46 = vmax.f32 %v1404_v24, 0.0  ;;  %v611_v50 = vpop.permute.xlu1 %610  ;;  %v1249_v43 = vmax.f32 %v1185_v55, 0.0 }
 0x1bc   : > { %v11535_v58 = vpack.c.bf16 %v1658_v42, %v1657_v6  ;;  %v728_v9 = vmul.f32 %v11259_v32, %v611_v50 }
 0x1bd   : > { %v9529_v18 = vpop.f32.mrb[4].mxu0  ;;  %v1248_v3 = vmax.f32 %v1184_v16, 0.0  ;;  %v11537_v53 = vpack.c.bf16 %v1656_v46, %v1655_v44  ;;  %v626_v54 = vpop.permute.xlu0 %625 }
 0x1be   : > { %v1425_v61 = vadd.f32 %v9529_v18, %v11522_v21  ;;  %v1416_v19 = vpop.f32.mrb[5].mxu0 }
 0x1bf   : > { %v1417_v56 = vadd.f32 %v11522_v21, %v1416_v19  ;;  %v9530_v62 = vpop.f32.mrb[6].mxu0  ;;  %v1287_v7 = vpack.c.bf16 %v1248_v3, %v1247_v49  ;;  %v1055_v19 = vmul.f32 %v11254_v31, %v11239_v22 }
 0x1c0   : > { %v1428_v41 = vadd.f32 %v9530_v62, %v11522_v21  ;;  %v1419_v13 = vpop.f32.mrb[7].mxu0  ;;  %v947_v15 = vpop.permute.xlu1 %946  ;;  %v1661_v48 = vmax.f32 %v1425_v61, 0.0 }
 0x1c1   : > { %v1420_v63 = vadd.f32 %v11522_v21, %v1419_v13  ;;  %v1052_v17 = vmul.f32 %v11254_v31, %v947_v15  ;;  %9571 = vmatprep.mubr.bf16.mxu1 %v1287_v7  ;;  %v1659_v11 = vmax.f32 %v1417_v56, 0.0  ;;  %v731_v7 = vmul.f32 %v11259_v32, %v626_v54 }
 0x1c2   : > { %v1662_v23 = vmax.f32 %v1428_v41, 0.0 }
 0x1c3   : > { %v1660_v36 = vmax.f32 %v1420_v63, 0.0  ;;  %v1116_v0 = vadd.f32 %v1052_v17, %v728_v9  ;;  %v1119_v55 = vadd.f32 %v1055_v19, %v731_v7 }
 0x1c4   : > { %v11546_v20 = vpack.c.bf16 %v1662_v23, %v1661_v48 }
 0x1c5   : > { %v1186_v26 = vadd.f32 %v11551_v57, %v1116_v0  ;;  %v9533_v14 = vpop.f32.mrb[8].mxu0  ;;  %v616_v30 = vpop.permute.xlu1 %615  ;;  %v11554_v59 = vpack.c.bf16 %v1660_v36, %v1659_v11 }
 0x1c6   : > { %v1441_v29 = vadd.f32 %v9533_v14, %v11522_v21  ;;  %v1432_v25 = vpop.f32.mrb[9].mxu0  ;;  %v729_v60 = vmul.f32 %v11259_v32, %v616_v30 }
 0x1c7   : > { %v1250_v51 = vmax.f32 %v1186_v26, 0.0  ;;  %v1433_v27 = vadd.f32 %v11522_v21, %v1432_v25  ;;  %v9534_v45 = vpop.f32.mrb[10].mxu0  ;;  %v1189_v26 = vadd.f32 %v11551_v57, %v1119_v55 }
 0x1c8   : > { %v1444_v8 = vadd.f32 %v9534_v45, %v11522_v21  ;;  %v1435_v33 = vpop.f32.mrb[11].mxu0  ;;  %v1665_v5 = vmax.f32 %v1441_v29, 0.0 }
 0x1c9   : > { %v1436_v34 = vadd.f32 %v11522_v21, %v1435_v33  ;;  %v1288_v35 = vpack.c.bf16 %v1250_v51, %v1249_v43  ;;  %v1663_v1 = vmax.f32 %v1433_v27, 0.0  ;;  %v1253_v43 = vmax.f32 %v1189_v26, 0.0 }
 0x1ca   : > { %v1666_v52 = vmax.f32 %v1444_v8, 0.0  ;;  %v951_v10 = vpop.permute.xlu1 %950 }
 0x1cb   : > { %v1664_v4 = vmax.f32 %v1436_v34, 0.0  ;;  %v1053_v37 = vmul.f32 %v11254_v31, %v951_v10  ;;  %9572 = vmatmul.mubr.bf16.gmra.mrb[16].mxu1 %v1288_v35 }
 0x1cc   : > { %v11562_v2 = vpack.c.bf16 %v1666_v52, %v1665_v5  ;;  %v641_v52 = vpop.permute.xlu0 %640 }
 0x1cd   : > { %v1117_v39 = vadd.f32 %v1053_v37, %v729_v60  ;;  %v9537_v24 = vpop.f32.mrb[12].mxu0  ;;  %v11564_v12 = vpack.c.bf16 %v1664_v4, %v1663_v1 }
 0x1ce   : > { %v1457_v40 = vadd.f32 %v9537_v24, %v11522_v21  ;;  %v1448_v6 = vpop.f32.mrb[13].mxu0  ;;  %v955_v42 = vpop.permute.xlu1 %954 }
 0x1cf   : > { %v1449_v44 = vadd.f32 %v11522_v21, %v1448_v6  ;;  %v1054_v16 = vmul.f32 %v11254_v31, %v955_v42  ;;  %v9538_v46 = vpop.f32.mrb[14].mxu0  ;;  %v1187_v49 = vadd.f32 %v11551_v57, %v1117_v39 }
 0x1d0   : > { %v1460_v50 = vadd.f32 %v9538_v46, %v11522_v21  ;;  %v1451_v18 = vpop.f32.mrb[15].mxu0  ;;  %v1669_v56 = vmax.f32 %v1457_v40, 0.0  ;;  %v646_v46 = vpop.permute.xlu0 %645 }
 0x1d1   : > { %v1118_v3 = vadd.f32 %v1054_v16, %v730_v47  ;;  %v1452_v61 = vadd.f32 %v11522_v21, %v1451_v18  ;;  %v1667_v41 = vmax.f32 %v1449_v44, 0.0  ;;  %v1251_v17 = vmax.f32 %v1187_v49, 0.0 }
 0x1d2   : > { %v1670_v62 = vmax.f32 %v1460_v50, 0.0  ;;  %v734_v44 = vmul.f32 %v11259_v32, %v641_v52  ;;  %v1059_v49 = vmul.f32 %v11254_v31, %v11249_v28 }
 0x1d3   : > { %v1188_v13 = vadd.f32 %v11551_v57, %v1118_v3  ;;  %v1668_v15 = vmax.f32 %v1452_v61, 0.0  ;;  %v631_v9 = vpop.permute.xlu1 %630  ;;  %v735_v3 = vmul.f32 %v11259_v32, %v646_v46 }
 0x1d4   : > { %v11577_v63 = vpack.c.bf16 %v1670_v62, %v1669_v56  ;;  %v732_v22 = vmul.f32 %v11259_v32, %v631_v9 }
 0x1d5   : > { %v1252_v48 = vmax.f32 %v1188_v13, 0.0  ;;  %v11579_v23 = vpack.c.bf16 %v1668_v15, %v1667_v41  ;;  %v1123_v62 = vadd.f32 %v1059_v49, %v735_v3 }
 0x1d7   : > { %v1289_v11 = vpack.c.bf16 %v1252_v48, %v1251_v17  ;;  %v1193_v9 = vadd.f32 %v11551_v57, %v1123_v62  ;;  %v661_v48 = vpop.permute.xlu0 %660 }
 0x1d8   : > { %v963_v36 = vpop.permute.xlu1 %962 }
 0x1d9   : > { %v1056_v0 = vmul.f32 %v11254_v31, %v963_v36  ;;  %9575 = vmatprep.mubr.bf16.mxu1 %v1289_v11  ;;  %v1257_v36 = vmax.f32 %v1193_v9, 0.0 }
 0x1db   : > { %v1120_v14 = vadd.f32 %v1056_v0, %v732_v22 }
 0x1dd   : > { %v1190_v30 = vadd.f32 %v11551_v57, %v1120_v14  ;;  %v636_v29 = vpop.permute.xlu1 %635 }
 0x1de   : > { %v9541_v25 = vpop.f32.mrb[16].mxu0  ;;  %v733_v1 = vmul.f32 %v11259_v32, %v636_v29 }
 0x1df   : > { %v1254_v51 = vmax.f32 %v1190_v30, 0.0  ;;  %v1473_v27 = vadd.f32 %v9541_v25, %v11522_v21  ;;  %v1464_v45 = vpop.f32.mrb[17].mxu0 }
 0x1e0   : > { %v1465_v8 = vadd.f32 %v11522_v21, %v1464_v45  ;;  %v9542_v33 = vpop.f32.mrb[18].mxu0 }
 0x1e1   : > { %v1476_v34 = vadd.f32 %v9542_v33, %v11522_v21  ;;  %v1467_v35 = vpop.f32.mrb[19].mxu0  ;;  %v1290_v5 = vpack.c.bf16 %v1254_v51, %v1253_v43  ;;  %v1673_v4 = vmax.f32 %v1473_v27, 0.0  ;;  %v666_v51 = vpop.permute.xlu0 %665 }
 0x1e2   : > { %v1468_v10 = vadd.f32 %v11522_v21, %v1467_v35  ;;  %v967_v60 = vpop.permute.xlu1 %966  ;;  %v1671_v39 = vmax.f32 %v1465_v8, 0.0 }
 0x1e3   : > { %v1674_v37 = vmax.f32 %v1476_v34, 0.0  ;;  %v1057_v38 = vmul.f32 %v11254_v31, %v967_v60  ;;  %9576 = vmatmul.mubr.bf16.gmra.mrb[20].mxu1 %v1290_v5 }
 0x1e4   : > { %v1672_v24 = vmax.f32 %v1468_v10, 0.0 }
 0x1e5   : > { %v1121_v40 = vadd.f32 %v1057_v38, %v733_v1  ;;  %v11591_v6 = vpack.c.bf16 %v1674_v37, %v1673_v4  ;;  %v738_v37 = vmul.f32 %v11259_v32, %v661_v48 }
 0x1e6   : > { %v971_v42 = vpop.permute.xlu1 %970  ;;  %v11593_v47 = vpack.c.bf16 %v1672_v24, %v1671_v39  ;;  %v991_v39 = vpop.permute.xlu0 %990 }
 0x1e7   : > { %v1058_v16 = vmul.f32 %v11254_v31, %v971_v42  ;;  %v1191_v50 = vadd.f32 %v11551_v57, %v1121_v40  ;;  %v739_v42 = vmul.f32 %v11259_v32, %v666_v51 }
 0x1e9   : > { %v1122_v18 = vadd.f32 %v1058_v16, %v734_v44  ;;  %v1255_v54 = vmax.f32 %v1191_v50, 0.0  ;;  %v1063_v44 = vmul.f32 %v11254_v31, %v991_v39 }
 0x1eb   : > { %v1192_v61 = vadd.f32 %v11551_v57, %v1122_v18  ;;  %v651_v19 = vpop.permute.xlu1 %650  ;;  %v1127_v49 = vadd.f32 %v1063_v44, %v739_v42  ;;  %v10815_v42 = vld [vmem:[%s13229_s3 + $0x80] sm:$0xff]  }
 0x1ec   : > { %v736_v13 = vmul.f32 %v11259_v32, %v651_v19  ;;  %9667 = vmatprep.subr.bf16.mxu0 %v10815_v42 }
 0x1ed   : > { %v1256_v56 = vmax.f32 %v1192_v61, 0.0  ;;  %9668 = vmatpush3.bf16.msra.mxu0 %v10815_v42 }
 0x1ef   : > { %v1291_v7 = vpack.c.bf16 %v1256_v56, %v1255_v54  ;;  %v1197_v56 = vadd.f32 %v11551_v57, %v1127_v49 }
 0x1f0   : > { %v979_v41 = vpop.permute.xlu1 %978 }
 0x1f1   : > { %v1060_v15 = vmul.f32 %v11254_v31, %v979_v41  ;;  %9579 = vmatprep.mubr.bf16.mxu1 %v1291_v7 }
 0x1f3   : > { %v1124_v17 = vadd.f32 %v1060_v15, %v736_v13  ;;  %v1261_v13 = vmax.f32 %v1197_v56, 0.0 }
 0x1f5   : > { %v1194_v28 = vadd.f32 %v11551_v57, %v1124_v17  ;;  %v656_v55 = vpop.permute.xlu1 %655 }
 0x1f6   : > { %v9545_v11 = vpop.f32.mrb[20].mxu0  ;;  %v737_v8 = vmul.f32 %v11259_v32, %v656_v55 }
 0x1f7   : > { %v1258_v22 = vmax.f32 %v1194_v28, 0.0  ;;  %v1489_v0 = vadd.f32 %v9545_v11, %v11522_v21  ;;  %v1480_v26 = vpop.f32.mrb[21].mxu0 }
 0x1f8   : > { %v1481_v14 = vadd.f32 %v11522_v21, %v1480_v26  ;;  %v9546_v30 = vpop.f32.mrb[22].mxu0 }
 0x1f9   : > { %v1492_v29 = vadd.f32 %v9546_v30, %v11522_v21  ;;  %v1483_v25 = vpop.f32.mrb[23].mxu0  ;;  %v1292_v43 = vpack.c.bf16 %v1258_v22, %v1257_v36  ;;  %v1677_v33 = vmax.f32 %v1489_v0, 0.0 }
 0x1fa   : > { %v1484_v27 = vadd.f32 %v11522_v21, %v1483_v25  ;;  %v983_v45 = vpop.permute.xlu1 %982  ;;  %v1675_v5 = vmax.f32 %v1481_v14, 0.0 }
 0x1fb   : > { %v1678_v34 = vmax.f32 %v1492_v29, 0.0  ;;  %v1061_v35 = vmul.f32 %v11254_v31, %v983_v45  ;;  %9580 = vmatmul.mubr.bf16.gmra.mrb[24].mxu1 %v1292_v43 }
 0x1fc   : > { %v1676_v52 = vmax.f32 %v1484_v27, 0.0 }
 0x1fd   : > { %v1125_v10 = vadd.f32 %v1061_v35, %v737_v8  ;;  %v11612_v60 = vpack.c.bf16 %v1678_v34, %v1677_v33 }
 0x1fe   : > { %v987_v1 = vpop.permute.xlu1 %986  ;;  %v1729_v4 = vpack.c.bf16 %v1676_v52, %v1675_v5 }
 0x1ff   : > { %v1062_v38 = vmul.f32 %v11254_v31, %v987_v1  ;;  %v1195_v24 = vadd.f32 %v11551_v57, %v1125_v10 }
 0x201   : > { %v1126_v40 = vadd.f32 %v1062_v38, %v738_v37  ;;  %v1259_v50 = vmax.f32 %v1195_v24, 0.0 }
 0x203   : > { %v1196_v16 = vadd.f32 %v11551_v57, %v1126_v40  ;;  %v671_v46 = vpop.permute.xlu1 %670 }
 0x204   : > { %v740_v19 = vmul.f32 %v11259_v32, %v671_v46 }
 0x205   : > { %v1260_v18 = vmax.f32 %v1196_v16, 0.0 }
 0x207   : > { %v1293_v3 = vpack.c.bf16 %v1260_v18, %v1259_v50  ;;  %v10816_v50 = vld [vmem:[%s13229_s3 + $0x88] sm:$0xff]  }
 0x208   : > { %v995_v61 = vpop.permute.xlu1 %994  ;;  %9669 = vmatprep.subr.bf16.mxu0 %v10816_v50 }
 0x209   : > { %v1064_v54 = vmul.f32 %v11254_v31, %v995_v61  ;;  %9583 = vmatprep.mubr.bf16.mxu1 %v1293_v3  ;;  %v10817_v61 = vld [vmem:[%s13229_s3 + $0x90] sm:$0xff]   ;;  %9670 = vmatpush3.bf16.msra.mxu0 %v10816_v50 }
 0x20a   : > { %9671 = vmatprep.subr.bf16.mxu0 %v10817_v61 }
 0x20b   : > { %v1128_v62 = vadd.f32 %v1064_v54, %v740_v19 }
 0x20d   : > { %v1198_v7 = vadd.f32 %v11551_v57, %v1128_v62  ;;  %9672 = vmatpush3.bf16.msra.mxu0 %v10817_v61 }
 0x20e   : > { %v9549_v41 = vpop.f32.mrb[24].mxu0 }
 0x20f   : > { %v1262_v15 = vmax.f32 %v1198_v7, 0.0  ;;  %v1505_v9 = vadd.f32 %v9549_v41, %v11522_v21  ;;  %v1496_v17 = vpop.f32.mrb[25].mxu0  ;;  %v10818_v7 = vld [vmem:[%s13229_s3 + $0x98] sm:$0xff]   ;;  %v10819_v41 = vld [vmem:[%s13229_s3 + $0xa0] sm:$0xff]  }
 0x210   : > { %v1497_v48 = vadd.f32 %v11522_v21, %v1496_v17  ;;  %v9550_v28 = vpop.f32.mrb[26].mxu0  ;;  %9673 = vmatprep.subr.bf16.mxu0 %v10818_v7 }
 0x211   : > { %v1508_v55 = vadd.f32 %v9550_v28, %v11522_v21  ;;  %v1499_v32 = vpop.f32.mrb[27].mxu0  ;;  %v1294_v11 = vpack.c.bf16 %v1262_v15, %v1261_v13  ;;  %v1681_v36 = vmax.f32 %v1505_v9, 0.0  ;;  %9674 = vmatpush3.bf16.msra.mxu0 %v10818_v7  ;;  %v10820_v13 = vld [vmem:[%s13229_s3 + $0xa8] sm:$0xff]  }
 0x212   : > { %v1500_v31 = vadd.f32 %v11522_v21, %v1499_v32  ;;  %v1679_v0 = vmax.f32 %v1497_v48, 0.0  ;;  %9675 = vmatprep.subr.bf16.mxu0 %v10819_v41  ;;  %v10821_v48 = vld [vmem:[%s13229_s3 + $0xb0] sm:$0xff]  }
 0x213   : > { %v1682_v22 = vmax.f32 %v1508_v55, 0.0  ;;  %9584 = vmatmul.mubr.bf16.gmra.mrb[28].mxu1 %v1294_v11 }
 0x214   : > { %v1680_v57 = vmax.f32 %v1500_v31, 0.0  ;;  %9603 = vmatprep.mubr.bf16.mxu1 %v11537_v53 }
 0x215   : > { %v1732_v26 = vpack.c.bf16 %v1682_v22, %v1681_v36  ;;  %9676 = vmatpush3.bf16.msra.mxu0 %v10819_v41 }
 0x216   : > { %v1731_v14 = vpack.c.bf16 %v1680_v57, %v1679_v0  ;;  %9677 = vmatprep.subr.bf16.mxu0 %v10820_v13  ;;  %v10822_v0 = vld [vmem:[%s13229_s3 + $0xb8] sm:$0xff]  }
 0x219   : > { %9678 = vmatpush3.bf16.msra.mxu0 %v10820_v13 }
 0x21a   : > { %9679 = vmatprep.subr.bf16.mxu0 %v10821_v48 }
 0x21b   : > { %9604 = vmatmul.mubr.bf16.vlgmr.msra.gmra.mrb[32].mxu1 %v11535_v58 }
 0x21c   : > { %9607 = vmatprep.mubr.bf16.mxu1 %v11554_v59 }
 0x21d   : > { %9680 = vmatpush3.bf16.msra.mxu0 %v10821_v48 }
 0x21e   : > { %9681 = vmatprep.subr.bf16.mxu0 %v10822_v0 }
 0x221   : > { %9682 = vmatpush3.bf16.msra.mxu0 %v10822_v0 }
 0x223   : > { %9608 = vmatmul.mubr.bf16.gmra.mrb[36].mxu1 %v11546_v20 }
 0x224   : > { %9611 = vmatprep.mubr.bf16.mxu1 %v11564_v12 }
 0x226   : > { %v9553_v30 = vpop.f32.mrb[28].mxu0 }
 0x227   : > { %v1521_v29 = vadd.f32 %v9553_v30, %v11522_v21  ;;  %v1512_v25 = vpop.f32.mrb[29].mxu0 }
 0x228   : > { %v1513_v43 = vadd.f32 %v11522_v21, %v1512_v25  ;;  %v9554_v51 = vpop.f32.mrb[30].mxu0 }
 0x229   : > { %v1524_v27 = vadd.f32 %v9554_v51, %v11522_v21  ;;  %v1515_v53 = vpop.f32.mrb[31].mxu0  ;;  %v1685_v8 = vmax.f32 %v1521_v29, 0.0 }
 0x22a   : > { %v1516_v45 = vadd.f32 %v11522_v21, %v1515_v53  ;;  %v1683_v59 = vmax.f32 %v1513_v43, 0.0 }
 0x22b   : > { %v1686_v58 = vmax.f32 %v1524_v27, 0.0  ;;  %9612 = vmatmul.mubr.bf16.gmra.mrb[40].mxu1 %v11562_v2 }
 0x22c   : > { %v1684_v20 = vmax.f32 %v1516_v45, 0.0  ;;  %9615 = vmatprep.mubr.bf16.mxu1 %v11579_v23 }
 0x22d   : > { %v1734_v12 = vpack.c.bf16 %v1686_v58, %v1685_v8 }
 0x22e   : > { %v1733_v33 = vpack.c.bf16 %v1684_v20, %v1683_v59 }
 0x233   : > { %9616 = vmatmul.mubr.bf16.gmra.mrb[44].mxu1 %v11577_v63 }
 0x234   : > { %9619 = vmatprep.mubr.bf16.mxu1 %v11593_v47 }
 0x23b   : > { %9620 = vmatmul.mubr.bf16.gmra.mrb[48].mxu1 %v11591_v6 }
 0x23c   : > { %9623 = vmatprep.mubr.bf16.mxu1 %v1729_v4 }
 0x23e   : > { %v9557_v34 = vpop.f32.mrb[0].mxu1 }
 0x23f   : > { %v1537_v35 = vadd.f32 %v9557_v34, %v11522_v21  ;;  %v1528_v5 = vpop.f32.mrb[1].mxu1 }
 0x240   : > { %v1529_v52 = vadd.f32 %v11522_v21, %v1528_v5  ;;  %v9558_v2 = vpop.f32.mrb[2].mxu1 }
 0x241   : > { %v1540_v10 = vadd.f32 %v9558_v2, %v11522_v21  ;;  %v1531_v1 = vpop.f32.mrb[3].mxu1  ;;  %v1689_v37 = vmax.f32 %v1537_v35, 0.0 }
 0x242   : > { %v1532_v23 = vadd.f32 %v11522_v21, %v1531_v1  ;;  %v1687_v63 = vmax.f32 %v1529_v52, 0.0 }
 0x243   : > { %v1690_v38 = vmax.f32 %v1540_v10, 0.0  ;;  %9624 = vmatmul.mubr.bf16.gmra.mrb[52].mxu1 %v11612_v60 }
 0x244   : > { %v1688_v47 = vmax.f32 %v1532_v23, 0.0  ;;  %9627 = vmatprep.mubr.bf16.mxu1 %v1731_v14 }
 0x245   : > { %v1736_v6 = vpack.c.bf16 %v1690_v38, %v1689_v37 }
 0x246   : > { %v1735_v4 = vpack.c.bf16 %v1688_v47, %v1687_v63 }
 0x24b   : > { %9628 = vmatmul.mubr.bf16.gmra.mrb[56].mxu1 %v1732_v26 }
 0x24c   : > { %9631 = vmatprep.mubr.bf16.mxu1 %v1733_v33 }
 0x253   : > { %9632 = vmatmul.mubr.bf16.gmra.mrb[60].mxu1 %v1734_v12 }
 0x254   : > { %9635 = vmatprep.mubr.bf16.mxu1 %v1735_v4 }
 0x256   : > { %v9561_v39 = vpop.f32.mrb[4].mxu1 }
 0x257   : > { %v1553_v24 = vadd.f32 %v9561_v39, %v11522_v21  ;;  %v1544_v40 = vpop.f32.mrb[5].mxu1 }
 0x258   : > { %v1545_v44 = vadd.f32 %v11522_v21, %v1544_v40  ;;  %v9562_v60 = vpop.f32.mrb[6].mxu1 }
 0x259   : > { %v1556_v16 = vadd.f32 %v9562_v60, %v11522_v21  ;;  %v1547_v46 = vpop.f32.mrb[7].mxu1  ;;  %v1693_v49 = vmax.f32 %v1553_v24, 0.0 }
 0x25a   : > { %v1548_v18 = vadd.f32 %v11522_v21, %v1547_v46  ;;  %v1691_v19 = vmax.f32 %v1545_v44, 0.0 }
 0x25b   : > { %v1694_v3 = vmax.f32 %v1556_v16, 0.0  ;;  %9636 = vmatmul.mubr.bf16.gmra.mrb[64].mxu1 %v1736_v6 }
 0x25c   : > { %v1692_v54 = vmax.f32 %v1548_v18, 0.0 }
 0x25d   : > { %v1738_v56 = vpack.c.bf16 %v1694_v3, %v1693_v49 }
 0x25e   : > { %v1737_v62 = vpack.c.bf16 %v1692_v54, %v1691_v19 }
 0x260   : > { %9639 = vmatprep.mubr.bf16.mxu1 %v1737_v62 }
 0x263   : > { %9640 = vmatmul.mubr.bf16.gmra.mrb[68].mxu1 %v1738_v56 }
 0x26e   : > { %v9565_v15 = vpop.f32.mrb[8].mxu1 }
 0x26f   : > { %v1569_v9 = vadd.f32 %v9565_v15, %v11522_v21  ;;  %v1560_v17 = vpop.f32.mrb[9].mxu1 }
 0x270   : > { %v1561_v28 = vadd.f32 %v11522_v21, %v1560_v17  ;;  %v9566_v55 = vpop.f32.mrb[10].mxu1 }
 0x271   : > { %v1572_v32 = vadd.f32 %v9566_v55, %v11522_v21  ;;  %v1563_v11 = vpop.f32.mrb[11].mxu1  ;;  %v1697_v36 = vmax.f32 %v1569_v9, 0.0 }
 0x272   : > { %v1564_v31 = vadd.f32 %v11522_v21, %v1563_v11  ;;  %v1695_v57 = vmax.f32 %v1561_v28, 0.0 }
 0x273   : > { %v1698_v22 = vmax.f32 %v1572_v32, 0.0 }
 0x274   : > { %v1696_v26 = vmax.f32 %v1564_v31, 0.0 }
 0x275   : > { %v1740_v14 = vpack.c.bf16 %v1698_v22, %v1697_v36 }
 0x276   : > { %v1739_v30 = vpack.c.bf16 %v1696_v26, %v1695_v57 }
 0x278   : > { %9643 = vmatprep.mubr.bf16.mxu1 %v1739_v30 }
 0x279   : > { %9644 = vmatmul.mubr.bf16.gmra.mrb[72].mxu1 %v1740_v14 }
 0x286   : > { %v9569_v29 = vpop.f32.mrb[12].mxu1 }
 0x287   : > { %v1585_v25 = vadd.f32 %v9569_v29, %v11522_v21  ;;  %v1576_v43 = vpop.f32.mrb[13].mxu1 }
 0x288   : > { %v1577_v51 = vadd.f32 %v11522_v21, %v1576_v43  ;;  %v9570_v27 = vpop.f32.mrb[14].mxu1 }
 0x289   : > { %v1588_v53 = vadd.f32 %v9570_v27, %v11522_v21  ;;  %v1579_v45 = vpop.f32.mrb[15].mxu1  ;;  %v1701_v58 = vmax.f32 %v1585_v25, 0.0 }
 0x28a   : > { %v1580_v8 = vadd.f32 %v11522_v21, %v1579_v45  ;;  %v1699_v20 = vmax.f32 %v1577_v51, 0.0 }
 0x28b   : > { %v1702_v59 = vmax.f32 %v1588_v53, 0.0  ;;  %v11702_v53 = vld [vmem:[%s13230_s4 + $0x1] ss:$0 sm:$0xff] }
 0x28c   : > { %v1700_v12 = vmax.f32 %v1580_v8, 0.0 }
 0x28d   : > { %v1742_v33 = vpack.c.bf16 %v1702_v59, %v1701_v58 }
 0x28e   : > { %v1741_v34 = vpack.c.bf16 %v1700_v12, %v1699_v20 }
 0x290   : > { %9647 = vmatprep.mubr.bf16.mxu1 %v1741_v34 }
 0x291   : > { %9648 = vmatmul.mubr.bf16.gmra.mrb[76].mxu1 %v1742_v33 }
 0x29e   : > { %v9573_v35 = vpop.f32.mrb[16].mxu1 }
 0x29f   : > { %v1601_v5 = vadd.f32 %v9573_v35, %v11522_v21  ;;  %v1592_v52 = vpop.f32.mrb[17].mxu1 }
 0x2a0   : > { %v1593_v2 = vadd.f32 %v11522_v21, %v1592_v52  ;;  %v9574_v10 = vpop.f32.mrb[18].mxu1 }
 0x2a1   : > { %v1604_v1 = vadd.f32 %v9574_v10, %v11522_v21  ;;  %v1595_v23 = vpop.f32.mrb[19].mxu1  ;;  %v1705_v38 = vmax.f32 %v1601_v5, 0.0 }
 0x2a2   : > { %v1596_v37 = vadd.f32 %v11522_v21, %v1595_v23  ;;  %v1703_v47 = vmax.f32 %v1593_v2, 0.0 }
 0x2a3   : > { %v1706_v63 = vmax.f32 %v1604_v1, 0.0 }
 0x2a4   : > { %v1704_v6 = vmax.f32 %v1596_v37, 0.0 }
 0x2a5   : > { %v1744_v4 = vpack.c.bf16 %v1706_v63, %v1705_v38 }
 0x2a6   : > { %v1743_v39 = vpack.c.bf16 %v1704_v6, %v1703_v47 }
 0x2a8   : > { %9651 = vmatprep.mubr.bf16.mxu1 %v1743_v39 }
 0x2a9   : > { %9652 = vmatmul.mubr.bf16.gmra.mrb[80].mxu1 %v1744_v4 }
 0x2b6   : > { %v9577_v24 = vpop.f32.mrb[20].mxu1 }
 0x2b7   : > { %v1617_v40 = vadd.f32 %v9577_v24, %v11522_v21  ;;  %v1608_v42 = vpop.f32.mrb[21].mxu1 }
 0x2b8   : > { %v1609_v44 = vadd.f32 %v11522_v21, %v1608_v42  ;;  %v9578_v60 = vpop.f32.mrb[22].mxu1 }
 0x2b9   : > { %v1620_v16 = vadd.f32 %v9578_v60, %v11522_v21  ;;  %v1611_v46 = vpop.f32.mrb[23].mxu1  ;;  %v1709_v18 = vmax.f32 %v1617_v40, 0.0 }
 0x2ba   : > { %v1612_v50 = vadd.f32 %v11522_v21, %v1611_v46  ;;  %v1707_v3 = vmax.f32 %v1609_v44, 0.0 }
 0x2bb   : > { %v1710_v49 = vmax.f32 %v1620_v16, 0.0 }
 0x2bc   : > { %v1708_v61 = vmax.f32 %v1612_v50, 0.0 }
 0x2bd   : > { %v1746_v19 = vpack.c.bf16 %v1710_v49, %v1709_v18 }
 0x2be   : > { %v1745_v54 = vpack.c.bf16 %v1708_v61, %v1707_v3 }
 0x2c0   : > { %9655 = vmatprep.mubr.bf16.mxu1 %v1745_v54 }
 0x2c1   : > { %9656 = vmatmul.mubr.bf16.gmra.mrb[84].mxu1 %v1746_v19 }
 0x2ce   : > { %v9581_v56 = vpop.f32.mrb[24].mxu1 }
 0x2cf   : > { %v1633_v62 = vadd.f32 %v9581_v56, %v11522_v21  ;;  %v1624_v7 = vpop.f32.mrb[25].mxu1 }
 0x2d0   : > { %v1625_v41 = vadd.f32 %v11522_v21, %v1624_v7  ;;  %v9582_v13 = vpop.f32.mrb[26].mxu1 }
 0x2d1   : > { %v1636_v15 = vadd.f32 %v9582_v13, %v11522_v21  ;;  %v1627_v9 = vpop.f32.mrb[27].mxu1  ;;  %v1713_v48 = vmax.f32 %v1633_v62, 0.0 }
 0x2d2   : > { %v1628_v17 = vadd.f32 %v11522_v21, %v1627_v9  ;;  %v1711_v55 = vmax.f32 %v1625_v41, 0.0 }
 0x2d3   : > { %v1714_v28 = vmax.f32 %v1636_v15, 0.0 }
 0x2d4   : > { %v1712_v32 = vmax.f32 %v1628_v17, 0.0 }
 0x2d5   : > { %v1748_v11 = vpack.c.bf16 %v1714_v28, %v1713_v48 }
 0x2d6   : > { %v1747_v31 = vpack.c.bf16 %v1712_v32, %v1711_v55 }
 0x2d8   : > { %9659 = vmatprep.mubr.bf16.mxu1 %v1747_v31 }
 0x2d9   : > { %9660 = vmatmul.mubr.bf16.gmra.mrb[88].mxu1 %v1748_v11 }
 0x2e6   : > { %v9585_v36 = vpop.f32.mrb[28].mxu1 }
 0x2e7   : > { %v1649_v22 = vadd.f32 %v9585_v36, %v11522_v21  ;;  %v1640_v0 = vpop.f32.mrb[29].mxu1 }
 0x2e8   : > { %v1641_v57 = vadd.f32 %v11522_v21, %v1640_v0  ;;  %v9586_v26 = vpop.f32.mrb[30].mxu1 }
 0x2e9   : > { %v1652_v14 = vadd.f32 %v9586_v26, %v11522_v21  ;;  %v1643_v30 = vpop.f32.mrb[31].mxu1  ;;  %v1717_v25 = vmax.f32 %v1649_v22, 0.0 }
 0x2ea   : > { %v1644_v29 = vadd.f32 %v11522_v21, %v1643_v30  ;;  %v1715_v51 = vmax.f32 %v1641_v57, 0.0 }
 0x2eb   : > { %v1718_v43 = vmax.f32 %v1652_v14, 0.0 }
 0x2ec   : > { %v1716_v27 = vmax.f32 %v1644_v29, 0.0 }
 0x2ed   : > { %v1750_v45 = vpack.c.bf16 %v1718_v43, %v1717_v25 }
 0x2ee   : > { %v9605_v8 = vpop.f32.mrb[32].mxu1  ;;  %v1749_v58 = vpack.c.bf16 %v1716_v27, %v1715_v51 }
 0x2ef   : > { %v1867_v59 = vadd.f32 %v9605_v8, %v11702_v53  ;;  %v1858_v20 = vpop.f32.mrb[33].mxu1 }
 0x2f0   : > { %v1859_v12 = vadd.f32 %v11702_v53, %v1858_v20  ;;  %v9606_v33 = vpop.f32.mrb[34].mxu1  ;;  %9663 = vmatprep.mubr.bf16.mxu1 %v1749_v58 }
 0x2f1   : > { %v1870_v21 = vadd.f32 %v9606_v33, %v11702_v53  ;;  %v1861_v34 = vpop.f32.mrb[35].mxu1  ;;  %9664 = vmatmul.mubr.bf16.gmra.mrb[92].mxu1 %v1750_v45  ;;  %v2115_v5 = vmax.f32 %v1867_v59, 0.0 }
 0x2f2   : > { %v1862_v35 = vadd.f32 %v11702_v53, %v1861_v34  ;;  %v2113_v2 = vmax.f32 %v1859_v12, 0.0 }
 0x2f3   : > { %v2116_v52 = vmax.f32 %v1870_v21, 0.0 }
 0x2f4   : > { %v2114_v10 = vmax.f32 %v1862_v35, 0.0 }
 0x2f5   : > { %v2178_v1 = vpack.c.bf16 %v2116_v52, %v2115_v5 }
 0x2f6   : > { %v9609_v23 = vpop.f32.mrb[36].mxu1  ;;  %v2177_v37 = vpack.c.bf16 %v2114_v10, %v2113_v2 }
 0x2f7   : > { %v1883_v38 = vadd.f32 %v9609_v23, %v11702_v53  ;;  %v1874_v63 = vpop.f32.mrb[37].mxu1 }
 0x2f8   : > { %v1875_v47 = vadd.f32 %v11702_v53, %v1874_v63  ;;  %v9610_v6 = vpop.f32.mrb[38].mxu1  ;;  %9683 = vmatprep.mubr.bf16.mxu0 %v2177_v37 }
 0x2f9   : > { %v1886_v4 = vadd.f32 %v9610_v6, %v11702_v53  ;;  %v1877_v39 = vpop.f32.mrb[39].mxu1  ;;  %9684 = vmatmul.mubr.bf16.vlgmr.msra.gmra.mrb[32].mxu0 %v2178_v1  ;;  %v2119_v40 = vmax.f32 %v1883_v38, 0.0 }
 0x2fa   : > { %v1878_v24 = vadd.f32 %v11702_v53, %v1877_v39  ;;  %v2117_v44 = vmax.f32 %v1875_v47, 0.0 }
 0x2fb   : > { %v2120_v42 = vmax.f32 %v1886_v4, 0.0 }
 0x2fc   : > { %v2118_v60 = vmax.f32 %v1878_v24, 0.0 }
 0x2fd   : > { %v2180_v16 = vpack.c.bf16 %v2120_v42, %v2119_v40 }
 0x2fe   : > { %v9613_v46 = vpop.f32.mrb[40].mxu1  ;;  %v2179_v50 = vpack.c.bf16 %v2118_v60, %v2117_v44 }
 0x2ff   : > { %v1899_v18 = vadd.f32 %v9613_v46, %v11702_v53  ;;  %v1890_v49 = vpop.f32.mrb[41].mxu1 }
 0x300   : > { %v1891_v3 = vadd.f32 %v11702_v53, %v1890_v49  ;;  %v9614_v61 = vpop.f32.mrb[42].mxu1  ;;  %9687 = vmatprep.mubr.bf16.mxu0 %v2179_v50 }
 0x301   : > { %v1902_v19 = vadd.f32 %v9614_v61, %v11702_v53  ;;  %v1893_v54 = vpop.f32.mrb[43].mxu1  ;;  %9688 = vmatmul.mubr.bf16.gmra.mrb[36].mxu0 %v2180_v16  ;;  %v2123_v62 = vmax.f32 %v1899_v18, 0.0 }
 0x302   : > { %v1894_v56 = vadd.f32 %v11702_v53, %v1893_v54  ;;  %v2121_v41 = vmax.f32 %v1891_v3, 0.0 }
 0x303   : > { %v2124_v7 = vmax.f32 %v1902_v19, 0.0 }
 0x304   : > { %v2122_v13 = vmax.f32 %v1894_v56, 0.0 }
 0x305   : > { %v2182_v15 = vpack.c.bf16 %v2124_v7, %v2123_v62 }
 0x306   : > { %v9617_v9 = vpop.f32.mrb[44].mxu1  ;;  %v2181_v17 = vpack.c.bf16 %v2122_v13, %v2121_v41 }
 0x307   : > { %v1915_v48 = vadd.f32 %v9617_v9, %v11702_v53  ;;  %v1906_v28 = vpop.f32.mrb[45].mxu1 }
 0x308   : > { %v1907_v55 = vadd.f32 %v11702_v53, %v1906_v28  ;;  %v9618_v32 = vpop.f32.mrb[46].mxu1  ;;  %9691 = vmatprep.mubr.bf16.mxu0 %v2181_v17 }
 0x309   : > { %v1918_v11 = vadd.f32 %v9618_v32, %v11702_v53  ;;  %v1909_v31 = vpop.f32.mrb[47].mxu1  ;;  %9692 = vmatmul.mubr.bf16.gmra.mrb[40].mxu0 %v2182_v15  ;;  %v2127_v22 = vmax.f32 %v1915_v48, 0.0 }
 0x30a   : > { %v1910_v36 = vadd.f32 %v11702_v53, %v1909_v31  ;;  %v2125_v57 = vmax.f32 %v1907_v55, 0.0 }
 0x30b   : > { %v2128_v0 = vmax.f32 %v1918_v11, 0.0 }
 0x30c   : > { %v2126_v26 = vmax.f32 %v1910_v36, 0.0 }
 0x30d   : > { %v2184_v14 = vpack.c.bf16 %v2128_v0, %v2127_v22 }
 0x30e   : > { %v9621_v30 = vpop.f32.mrb[48].mxu1  ;;  %v2183_v29 = vpack.c.bf16 %v2126_v26, %v2125_v57 }
 0x30f   : > { %v1931_v25 = vadd.f32 %v9621_v30, %v11702_v53  ;;  %v1922_v43 = vpop.f32.mrb[49].mxu1 }
 0x310   : > { %v1923_v51 = vadd.f32 %v11702_v53, %v1922_v43  ;;  %v9622_v27 = vpop.f32.mrb[50].mxu1  ;;  %9695 = vmatprep.mubr.bf16.mxu0 %v2183_v29 }
 0x311   : > { %v1934_v45 = vadd.f32 %v9622_v27, %v11702_v53  ;;  %v1925_v8 = vpop.f32.mrb[51].mxu1  ;;  %9696 = vmatmul.mubr.bf16.gmra.mrb[44].mxu0 %v2184_v14  ;;  %v2131_v59 = vmax.f32 %v1931_v25, 0.0  ;;  %v10823_v25 = vld [vmem:[%s13229_s3 + $0xc0] sm:$0xff]  }
 0x312   : > { %v1926_v58 = vadd.f32 %v11702_v53, %v1925_v8  ;;  %v2129_v12 = vmax.f32 %v1923_v51, 0.0  ;;  %9747 = vmatprep.subr.bf16.mxu1 %v10823_v25 }
 0x313   : > { %v2132_v20 = vmax.f32 %v1934_v45, 0.0  ;;  %9748 = vmatpush3.bf16.msra.mxu1 %v10823_v25 }
 0x314   : > { %v2130_v33 = vmax.f32 %v1926_v58, 0.0 }
 0x315   : > { %v2186_v21 = vpack.c.bf16 %v2132_v20, %v2131_v59 }
 0x316   : > { %v9625_v34 = vpop.f32.mrb[52].mxu1  ;;  %v2185_v35 = vpack.c.bf16 %v2130_v33, %v2129_v12  ;;  %v10824_v33 = vld [vmem:[%s13229_s3 + $0xc8] sm:$0xff]  }
 0x317   : > { %v1947_v5 = vadd.f32 %v9625_v34, %v11702_v53  ;;  %v1938_v52 = vpop.f32.mrb[53].mxu1  ;;  %9749 = vmatprep.subr.bf16.mxu1 %v10824_v33 }
 0x318   : > { %v1939_v2 = vadd.f32 %v11702_v53, %v1938_v52  ;;  %v9626_v10 = vpop.f32.mrb[54].mxu1  ;;  %9699 = vmatprep.mubr.bf16.mxu0 %v2185_v35  ;;  %9750 = vmatpush3.bf16.msra.mxu1 %v10824_v33 }
 0x319   : > { %v1950_v1 = vadd.f32 %v9626_v10, %v11702_v53  ;;  %v1941_v23 = vpop.f32.mrb[55].mxu1  ;;  %9700 = vmatmul.mubr.bf16.gmra.mrb[48].mxu0 %v2186_v21  ;;  %v2135_v38 = vmax.f32 %v1947_v5, 0.0  ;;  %v10825_v21 = vld [vmem:[%s13229_s3 + $0xd0] sm:$0xff]  }
 0x31a   : > { %v1942_v37 = vadd.f32 %v11702_v53, %v1941_v23  ;;  %v2133_v47 = vmax.f32 %v1939_v2, 0.0  ;;  %9751 = vmatprep.subr.bf16.mxu1 %v10825_v21  ;;  %v10826_v23 = vld [vmem:[%s13229_s3 + $0xd8] sm:$0xff]  }
 0x31b   : > { %v2136_v63 = vmax.f32 %v1950_v1, 0.0 }
 0x31c   : > { %v2134_v6 = vmax.f32 %v1942_v37, 0.0  ;;  %9752 = vmatpush3.bf16.msra.mxu1 %v10825_v21 }
 0x31d   : > { %v2188_v4 = vpack.c.bf16 %v2136_v63, %v2135_v38  ;;  %9753 = vmatprep.subr.bf16.mxu1 %v10826_v23 }
 0x31e   : > { %v9629_v39 = vpop.f32.mrb[56].mxu1  ;;  %v2187_v24 = vpack.c.bf16 %v2134_v6, %v2133_v47  ;;  %v10827_v6 = vld [vmem:[%s13229_s3 + $0xe0] sm:$0xff]  }
 0x31f   : > { %v1963_v40 = vadd.f32 %v9629_v39, %v11702_v53  ;;  %v1954_v42 = vpop.f32.mrb[57].mxu1 }
 0x320   : > { %v1955_v44 = vadd.f32 %v11702_v53, %v1954_v42  ;;  %v9630_v60 = vpop.f32.mrb[58].mxu1  ;;  %9703 = vmatprep.mubr.bf16.mxu0 %v2187_v24  ;;  %9754 = vmatpush3.bf16.msra.mxu1 %v10826_v23  ;;  %v10829_v42 = vld [vmem:[%s13229_s3 + $0xf0] sm:$0xff]  }
 0x321   : > { %v1966_v16 = vadd.f32 %v9630_v60, %v11702_v53  ;;  %v1957_v46 = vpop.f32.mrb[59].mxu1  ;;  %9704 = vmatmul.mubr.bf16.gmra.mrb[52].mxu0 %v2188_v4  ;;  %v2139_v18 = vmax.f32 %v1963_v40, 0.0  ;;  %9755 = vmatprep.subr.bf16.mxu1 %v10827_v6  ;;  %v10828_v4 = vld [vmem:[%s13229_s3 + $0xe8] sm:$0xff]  }
 0x322   : > { %v1958_v50 = vadd.f32 %v11702_v53, %v1957_v46  ;;  %v2137_v3 = vmax.f32 %v1955_v44, 0.0 }
 0x323   : > { %v2140_v49 = vmax.f32 %v1966_v16, 0.0 }
 0x324   : > { %v2138_v61 = vmax.f32 %v1958_v50, 0.0  ;;  %9756 = vmatpush3.bf16.msra.mxu1 %v10827_v6 }
 0x325   : > { %v2190_v19 = vpack.c.bf16 %v2140_v49, %v2139_v18  ;;  %9757 = vmatprep.subr.bf16.mxu1 %v10828_v4 }
 0x326   : > { %v9633_v54 = vpop.f32.mrb[60].mxu1  ;;  %v2189_v56 = vpack.c.bf16 %v2138_v61, %v2137_v3  ;;  %v10830_v3 = vld [vmem:[%s13229_s3 + $0xf8] sm:$0xff]  }
 0x327   : > { %v1979_v62 = vadd.f32 %v9633_v54, %v11702_v53  ;;  %v1970_v7 = vpop.f32.mrb[61].mxu1 }
 0x328   : > { %v1971_v41 = vadd.f32 %v11702_v53, %v1970_v7  ;;  %v9634_v13 = vpop.f32.mrb[62].mxu1  ;;  %9707 = vmatprep.mubr.bf16.mxu0 %v2189_v56  ;;  %9758 = vmatpush3.bf16.msra.mxu1 %v10828_v4 }
 0x329   : > { %v1982_v15 = vadd.f32 %v9634_v13, %v11702_v53  ;;  %v1973_v9 = vpop.f32.mrb[63].mxu1  ;;  %9708 = vmatmul.mubr.bf16.gmra.mrb[56].mxu0 %v2190_v19  ;;  %v2143_v48 = vmax.f32 %v1979_v62, 0.0  ;;  %9759 = vmatprep.subr.bf16.mxu1 %v10829_v42 }
 0x32a   : > { %v1974_v17 = vadd.f32 %v11702_v53, %v1973_v9  ;;  %v2141_v55 = vmax.f32 %v1971_v41, 0.0 }
 0x32b   : > { %v2144_v28 = vmax.f32 %v1982_v15, 0.0 }
 0x32c   : > { %v2142_v32 = vmax.f32 %v1974_v17, 0.0  ;;  %9760 = vmatpush3.bf16.msra.mxu1 %v10829_v42 }
 0x32d   : > { %v2192_v11 = vpack.c.bf16 %v2144_v28, %v2143_v48  ;;  %9761 = vmatprep.subr.bf16.mxu1 %v10830_v3 }
 0x32e   : > { %v9637_v31 = vpop.f32.mrb[64].mxu1  ;;  %v2191_v36 = vpack.c.bf16 %v2142_v32, %v2141_v55 }
 0x32f   : > { %v1995_v22 = vadd.f32 %v9637_v31, %v11702_v53  ;;  %v1986_v0 = vpop.f32.mrb[65].mxu1 }
 0x330   : > { %v1987_v57 = vadd.f32 %v11702_v53, %v1986_v0  ;;  %v9638_v26 = vpop.f32.mrb[66].mxu1  ;;  %9711 = vmatprep.mubr.bf16.mxu0 %v2191_v36  ;;  %9762 = vmatpush3.bf16.msra.mxu1 %v10830_v3 }
 0x331   : > { %v1998_v14 = vadd.f32 %v9638_v26, %v11702_v53  ;;  %v1989_v30 = vpop.f32.mrb[67].mxu1  ;;  %9712 = vmatmul.mubr.bf16.gmra.mrb[60].mxu0 %v2192_v11  ;;  %v2147_v43 = vmax.f32 %v1995_v22, 0.0 }
 0x332   : > { %v1990_v29 = vadd.f32 %v11702_v53, %v1989_v30  ;;  %v2145_v27 = vmax.f32 %v1987_v57, 0.0 }
 0x333   : > { %v2148_v51 = vmax.f32 %v1998_v14, 0.0 }
 0x334   : > { %v2146_v45 = vmax.f32 %v1990_v29, 0.0 }
 0x335   : > { %v2194_v8 = vpack.c.bf16 %v2148_v51, %v2147_v43 }
 0x336   : > { %v9641_v58 = vpop.f32.mrb[68].mxu1  ;;  %v2193_v59 = vpack.c.bf16 %v2146_v45, %v2145_v27 }
 0x337   : > { %v2011_v20 = vadd.f32 %v9641_v58, %v11702_v53  ;;  %v2002_v12 = vpop.f32.mrb[69].mxu1 }
 0x338   : > { %v2003_v34 = vadd.f32 %v11702_v53, %v2002_v12  ;;  %v9642_v35 = vpop.f32.mrb[70].mxu1  ;;  %9715 = vmatprep.mubr.bf16.mxu0 %v2193_v59 }
 0x339   : > { %v2014_v5 = vadd.f32 %v9642_v35, %v11702_v53  ;;  %v2005_v52 = vpop.f32.mrb[71].mxu1  ;;  %9716 = vmatmul.mubr.bf16.gmra.mrb[64].mxu0 %v2194_v8  ;;  %v2151_v10 = vmax.f32 %v2011_v20, 0.0 }
 0x33a   : > { %v2006_v2 = vadd.f32 %v11702_v53, %v2005_v52  ;;  %v2149_v37 = vmax.f32 %v2003_v34, 0.0 }
 0x33b   : > { %v2152_v1 = vmax.f32 %v2014_v5, 0.0 }
 0x33c   : > { %v2150_v38 = vmax.f32 %v2006_v2, 0.0 }
 0x33d   : > { %v2196_v63 = vpack.c.bf16 %v2152_v1, %v2151_v10 }
 0x33e   : > { %v2195_v47 = vpack.c.bf16 %v2150_v38, %v2149_v37 }
 0x340   : > { %9719 = vmatprep.mubr.bf16.mxu0 %v2195_v47 }
 0x341   : > { %9720 = vmatmul.mubr.bf16.gmra.mrb[68].mxu0 %v2196_v63 }
 0x34c   : > { %v9645_v39 = vpop.f32.mrb[72].mxu1 }
 0x34d   : > { %v2027_v24 = vadd.f32 %v9645_v39, %v11702_v53  ;;  %v2018_v40 = vpop.f32.mrb[73].mxu1 }
 0x34e   : > { %v2019_v44 = vadd.f32 %v11702_v53, %v2018_v40  ;;  %v9646_v60 = vpop.f32.mrb[74].mxu1 }
 0x34f   : > { %v2030_v16 = vadd.f32 %v9646_v60, %v11702_v53  ;;  %v2021_v46 = vpop.f32.mrb[75].mxu1  ;;  %v2155_v18 = vmax.f32 %v2027_v24, 0.0 }
 0x350   : > { %v2022_v50 = vadd.f32 %v11702_v53, %v2021_v46  ;;  %v2153_v61 = vmax.f32 %v2019_v44, 0.0 }
 0x351   : > { %v2156_v49 = vmax.f32 %v2030_v16, 0.0 }
 0x352   : > { %v2154_v19 = vmax.f32 %v2022_v50, 0.0 }
 0x353   : > { %v2198_v54 = vpack.c.bf16 %v2156_v49, %v2155_v18 }
 0x354   : > { %v2197_v56 = vpack.c.bf16 %v2154_v19, %v2153_v61 }
 0x356   : > { %9723 = vmatprep.mubr.bf16.mxu0 %v2197_v56 }
 0x357   : > { %9724 = vmatmul.mubr.bf16.gmra.mrb[72].mxu0 %v2198_v54 }
 0x364   : > { %v9649_v62 = vpop.f32.mrb[76].mxu1 }
 0x365   : > { %v2043_v7 = vadd.f32 %v9649_v62, %v11702_v53  ;;  %v2034_v41 = vpop.f32.mrb[77].mxu1 }
 0x366   : > { %v2035_v13 = vadd.f32 %v11702_v53, %v2034_v41  ;;  %v9650_v15 = vpop.f32.mrb[78].mxu1 }
 0x367   : > { %v2046_v9 = vadd.f32 %v9650_v15, %v11702_v53  ;;  %v2037_v17 = vpop.f32.mrb[79].mxu1  ;;  %v2159_v28 = vmax.f32 %v2043_v7, 0.0 }
 0x368   : > { %v2038_v48 = vadd.f32 %v11702_v53, %v2037_v17  ;;  %v2157_v32 = vmax.f32 %v2035_v13, 0.0 }
 0x369   : > { %v2160_v55 = vmax.f32 %v2046_v9, 0.0  ;;  %v11795_v9 = vld [vmem:[%s13230_s4 + $0x2] ss:$0 sm:$0xff] }
 0x36a   : > { %v2158_v11 = vmax.f32 %v2038_v48, 0.0 }
 0x36b   : > { %v2200_v31 = vpack.c.bf16 %v2160_v55, %v2159_v28 }
 0x36c   : > { %v2199_v36 = vpack.c.bf16 %v2158_v11, %v2157_v32 }
 0x36e   : > { %9727 = vmatprep.mubr.bf16.mxu0 %v2199_v36 }
 0x36f   : > { %9728 = vmatmul.mubr.bf16.gmra.mrb[76].mxu0 %v2200_v31 }
 0x37c   : > { %v9653_v22 = vpop.f32.mrb[80].mxu1 }
 0x37d   : > { %v2059_v0 = vadd.f32 %v9653_v22, %v11702_v53  ;;  %v2050_v57 = vpop.f32.mrb[81].mxu1 }
 0x37e   : > { %v2051_v26 = vadd.f32 %v11702_v53, %v2050_v57  ;;  %v9654_v14 = vpop.f32.mrb[82].mxu1 }
 0x37f   : > { %v2062_v30 = vadd.f32 %v9654_v14, %v11702_v53  ;;  %v2053_v29 = vpop.f32.mrb[83].mxu1  ;;  %v2163_v43 = vmax.f32 %v2059_v0, 0.0 }
 0x380   : > { %v2054_v25 = vadd.f32 %v11702_v53, %v2053_v29  ;;  %v2161_v27 = vmax.f32 %v2051_v26, 0.0 }
 0x381   : > { %v2164_v51 = vmax.f32 %v2062_v30, 0.0 }
 0x382   : > { %v2162_v45 = vmax.f32 %v2054_v25, 0.0 }
 0x383   : > { %v2202_v8 = vpack.c.bf16 %v2164_v51, %v2163_v43 }
 0x384   : > { %v2201_v58 = vpack.c.bf16 %v2162_v45, %v2161_v27 }
 0x386   : > { %9731 = vmatprep.mubr.bf16.mxu0 %v2201_v58 }
 0x387   : > { %9732 = vmatmul.mubr.bf16.gmra.mrb[80].mxu0 %v2202_v8 }
 0x394   : > { %v9657_v59 = vpop.f32.mrb[84].mxu1 }
 0x395   : > { %v2075_v20 = vadd.f32 %v9657_v59, %v11702_v53  ;;  %v2066_v12 = vpop.f32.mrb[85].mxu1 }
 0x396   : > { %v2067_v33 = vadd.f32 %v11702_v53, %v2066_v12  ;;  %v9658_v21 = vpop.f32.mrb[86].mxu1 }
 0x397   : > { %v2078_v34 = vadd.f32 %v9658_v21, %v11702_v53  ;;  %v2069_v35 = vpop.f32.mrb[87].mxu1  ;;  %v2167_v52 = vmax.f32 %v2075_v20, 0.0 }
 0x398   : > { %v2070_v5 = vadd.f32 %v11702_v53, %v2069_v35  ;;  %v2165_v10 = vmax.f32 %v2067_v33, 0.0 }
 0x399   : > { %v2168_v2 = vmax.f32 %v2078_v34, 0.0 }
 0x39a   : > { %v2166_v1 = vmax.f32 %v2070_v5, 0.0 }
 0x39b   : > { %v2204_v23 = vpack.c.bf16 %v2168_v2, %v2167_v52 }
 0x39c   : > { %v2203_v37 = vpack.c.bf16 %v2166_v1, %v2165_v10 }
 0x39e   : > { %9735 = vmatprep.mubr.bf16.mxu0 %v2203_v37 }
 0x39f   : > { %9736 = vmatmul.mubr.bf16.gmra.mrb[84].mxu0 %v2204_v23 }
 0x3ac   : > { %v9661_v38 = vpop.f32.mrb[88].mxu1 }
 0x3ad   : > { %v2091_v63 = vadd.f32 %v9661_v38, %v11702_v53  ;;  %v2082_v47 = vpop.f32.mrb[89].mxu1 }
 0x3ae   : > { %v2083_v6 = vadd.f32 %v11702_v53, %v2082_v47  ;;  %v9662_v4 = vpop.f32.mrb[90].mxu1 }
 0x3af   : > { %v2094_v39 = vadd.f32 %v9662_v4, %v11702_v53  ;;  %v2085_v24 = vpop.f32.mrb[91].mxu1  ;;  %v2171_v42 = vmax.f32 %v2091_v63, 0.0 }
 0x3b0   : > { %v2086_v40 = vadd.f32 %v11702_v53, %v2085_v24  ;;  %v2169_v60 = vmax.f32 %v2083_v6, 0.0 }
 0x3b1   : > { %v2172_v44 = vmax.f32 %v2094_v39, 0.0 }
 0x3b2   : > { %v2170_v16 = vmax.f32 %v2086_v40, 0.0 }
 0x3b3   : > { %v2206_v46 = vpack.c.bf16 %v2172_v44, %v2171_v42 }
 0x3b4   : > { %v2205_v50 = vpack.c.bf16 %v2170_v16, %v2169_v60 }
 0x3b6   : > { %9739 = vmatprep.mubr.bf16.mxu0 %v2205_v50 }
 0x3b7   : > { %9740 = vmatmul.mubr.bf16.gmra.mrb[88].mxu0 %v2206_v46 }
 0x3c4   : > { %v9665_v18 = vpop.f32.mrb[92].mxu1 }
 0x3c5   : > { %v2107_v49 = vadd.f32 %v9665_v18, %v11702_v53  ;;  %v2098_v3 = vpop.f32.mrb[93].mxu1 }
 0x3c6   : > { %v2099_v61 = vadd.f32 %v11702_v53, %v2098_v3  ;;  %v9666_v19 = vpop.f32.mrb[94].mxu1 }
 0x3c7   : > { %v2110_v54 = vadd.f32 %v9666_v19, %v11702_v53  ;;  %v2101_v56 = vpop.f32.mrb[95].mxu1  ;;  %v2175_v7 = vmax.f32 %v2107_v49, 0.0 }
 0x3c8   : > { %v2102_v62 = vadd.f32 %v11702_v53, %v2101_v56  ;;  %v2173_v13 = vmax.f32 %v2099_v61, 0.0 }
 0x3c9   : > { %v2176_v41 = vmax.f32 %v2110_v54, 0.0 }
 0x3ca   : > { %v2174_v15 = vmax.f32 %v2102_v62, 0.0 }
 0x3cb   : > { %v2208_v17 = vpack.c.bf16 %v2176_v41, %v2175_v7 }
 0x3cc   : > { %v9685_v48 = vpop.f32.mrb[32].mxu0  ;;  %v2207_v28 = vpack.c.bf16 %v2174_v15, %v2173_v13 }
 0x3cd   : > { %v2325_v55 = vadd.f32 %v9685_v48, %v11795_v9  ;;  %v2316_v32 = vpop.f32.mrb[33].mxu0 }
 0x3ce   : > { %v2317_v11 = vadd.f32 %v11795_v9, %v2316_v32  ;;  %v9686_v31 = vpop.f32.mrb[34].mxu0  ;;  %9743 = vmatprep.mubr.bf16.mxu0 %v2207_v28 }
 0x3cf   : > { %v2328_v53 = vadd.f32 %v9686_v31, %v11795_v9  ;;  %v2319_v36 = vpop.f32.mrb[35].mxu0  ;;  %9744 = vmatmul.mubr.bf16.gmra.mrb[92].mxu0 %v2208_v17  ;;  %v2573_v0 = vmax.f32 %v2325_v55, 0.0 }
 0x3d0   : > { %v2320_v22 = vadd.f32 %v11795_v9, %v2319_v36  ;;  %v2571_v26 = vmax.f32 %v2317_v11, 0.0 }
 0x3d1   : > { %v2574_v57 = vmax.f32 %v2328_v53, 0.0 }
 0x3d2   : > { %v2572_v14 = vmax.f32 %v2320_v22, 0.0 }
 0x3d3   : > { %v2636_v30 = vpack.c.bf16 %v2574_v57, %v2573_v0 }
 0x3d4   : > { %v9689_v29 = vpop.f32.mrb[36].mxu0  ;;  %v2635_v25 = vpack.c.bf16 %v2572_v14, %v2571_v26 }
 0x3d5   : > { %v2341_v43 = vadd.f32 %v9689_v29, %v11795_v9  ;;  %v2332_v51 = vpop.f32.mrb[37].mxu0 }
 0x3d6   : > { %v2333_v27 = vadd.f32 %v11795_v9, %v2332_v51  ;;  %v9690_v45 = vpop.f32.mrb[38].mxu0  ;;  %9763 = vmatprep.mubr.bf16.mxu1 %v2635_v25 }
 0x3d7   : > { %v2344_v8 = vadd.f32 %v9690_v45, %v11795_v9  ;;  %v2335_v58 = vpop.f32.mrb[39].mxu0  ;;  %9764 = vmatmul.mubr.bf16.vlgmr.msra.gmra.mrb[96].mxu1 %v2636_v30  ;;  %v2577_v20 = vmax.f32 %v2341_v43, 0.0 }
 0x3d8   : > { %v2336_v59 = vadd.f32 %v11795_v9, %v2335_v58  ;;  %v2575_v33 = vmax.f32 %v2333_v27, 0.0 }
 0x3d9   : > { %v2578_v12 = vmax.f32 %v2344_v8, 0.0 }
 0x3da   : > { %v2576_v21 = vmax.f32 %v2336_v59, 0.0 }
 0x3db   : > { %v2638_v34 = vpack.c.bf16 %v2578_v12, %v2577_v20 }
 0x3dc   : > { %v9693_v35 = vpop.f32.mrb[40].mxu0  ;;  %v2637_v5 = vpack.c.bf16 %v2576_v21, %v2575_v33 }
 0x3dd   : > { %v2357_v52 = vadd.f32 %v9693_v35, %v11795_v9  ;;  %v2348_v2 = vpop.f32.mrb[41].mxu0 }
 0x3de   : > { %v2349_v10 = vadd.f32 %v11795_v9, %v2348_v2  ;;  %v9694_v1 = vpop.f32.mrb[42].mxu0  ;;  %9767 = vmatprep.mubr.bf16.mxu1 %v2637_v5 }
 0x3df   : > { %v2360_v23 = vadd.f32 %v9694_v1, %v11795_v9  ;;  %v2351_v37 = vpop.f32.mrb[43].mxu0  ;;  %9768 = vmatmul.mubr.bf16.gmra.mrb[100].mxu1 %v2638_v34  ;;  %v2581_v63 = vmax.f32 %v2357_v52, 0.0 }
 0x3e0   : > { %v2352_v38 = vadd.f32 %v11795_v9, %v2351_v37  ;;  %v2579_v6 = vmax.f32 %v2349_v10, 0.0 }
 0x3e1   : > { %v2582_v47 = vmax.f32 %v2360_v23, 0.0 }
 0x3e2   : > { %v2580_v4 = vmax.f32 %v2352_v38, 0.0 }
 0x3e3   : > { %v2640_v39 = vpack.c.bf16 %v2582_v47, %v2581_v63 }
 0x3e4   : > { %v9697_v24 = vpop.f32.mrb[44].mxu0  ;;  %v2639_v40 = vpack.c.bf16 %v2580_v4, %v2579_v6 }
 0x3e5   : > { %v2373_v42 = vadd.f32 %v9697_v24, %v11795_v9  ;;  %v2364_v44 = vpop.f32.mrb[45].mxu0 }
 0x3e6   : > { %v2365_v60 = vadd.f32 %v11795_v9, %v2364_v44  ;;  %v9698_v16 = vpop.f32.mrb[46].mxu0  ;;  %9771 = vmatprep.mubr.bf16.mxu1 %v2639_v40 }
 0x3e7   : > { %v2376_v46 = vadd.f32 %v9698_v16, %v11795_v9  ;;  %v2367_v50 = vpop.f32.mrb[47].mxu0  ;;  %9772 = vmatmul.mubr.bf16.gmra.mrb[104].mxu1 %v2640_v39  ;;  %v2585_v49 = vmax.f32 %v2373_v42, 0.0 }
 0x3e8   : > { %v2368_v18 = vadd.f32 %v11795_v9, %v2367_v50  ;;  %v2583_v61 = vmax.f32 %v2365_v60, 0.0 }
 0x3e9   : > { %v2586_v3 = vmax.f32 %v2376_v46, 0.0 }
 0x3ea   : > { %v2584_v19 = vmax.f32 %v2368_v18, 0.0 }
 0x3eb   : > { %v2642_v54 = vpack.c.bf16 %v2586_v3, %v2585_v49 }
 0x3ec   : > { %v9701_v56 = vpop.f32.mrb[48].mxu0  ;;  %v2641_v62 = vpack.c.bf16 %v2584_v19, %v2583_v61 }
 0x3ed   : > { %v2389_v7 = vadd.f32 %v9701_v56, %v11795_v9  ;;  %v2380_v41 = vpop.f32.mrb[49].mxu0 }
 0x3ee   : > { %v2381_v13 = vadd.f32 %v11795_v9, %v2380_v41  ;;  %v9702_v15 = vpop.f32.mrb[50].mxu0  ;;  %9775 = vmatprep.mubr.bf16.mxu1 %v2641_v62 }
 0x3ef   : > { %v2392_v17 = vadd.f32 %v9702_v15, %v11795_v9  ;;  %v2383_v48 = vpop.f32.mrb[51].mxu0  ;;  %9776 = vmatmul.mubr.bf16.gmra.mrb[108].mxu1 %v2642_v54  ;;  %v2589_v55 = vmax.f32 %v2389_v7, 0.0  ;;  %v10831_v7 = vld [vmem:[%s13229_s3 + $0x100] sm:$0xff]  }
 0x3f0   : > { %v2384_v28 = vadd.f32 %v11795_v9, %v2383_v48  ;;  %v2587_v11 = vmax.f32 %v2381_v13, 0.0  ;;  %9827 = vmatprep.subr.bf16.mxu0 %v10831_v7 }
 0x3f1   : > { %v2590_v32 = vmax.f32 %v2392_v17, 0.0  ;;  %9828 = vmatpush3.bf16.msra.mxu0 %v10831_v7 }
 0x3f2   : > { %v2588_v31 = vmax.f32 %v2384_v28, 0.0 }
 0x3f3   : > { %v2644_v53 = vpack.c.bf16 %v2590_v32, %v2589_v55 }
 0x3f4   : > { %v9705_v36 = vpop.f32.mrb[52].mxu0  ;;  %v2643_v22 = vpack.c.bf16 %v2588_v31, %v2587_v11  ;;  %v10832_v31 = vld [vmem:[%s13229_s3 + $0x108] sm:$0xff]  }
 0x3f5   : > { %v2405_v0 = vadd.f32 %v9705_v36, %v11795_v9  ;;  %v2396_v57 = vpop.f32.mrb[53].mxu0  ;;  %9829 = vmatprep.subr.bf16.mxu0 %v10832_v31 }
 0x3f6   : > { %v2397_v26 = vadd.f32 %v11795_v9, %v2396_v57  ;;  %v9706_v14 = vpop.f32.mrb[54].mxu0  ;;  %9779 = vmatprep.mubr.bf16.mxu1 %v2643_v22  ;;  %9830 = vmatpush3.bf16.msra.mxu0 %v10832_v31 }
 0x3f7   : > { %v2408_v30 = vadd.f32 %v9706_v14, %v11795_v9  ;;  %v2399_v29 = vpop.f32.mrb[55].mxu0  ;;  %9780 = vmatmul.mubr.bf16.gmra.mrb[112].mxu1 %v2644_v53  ;;  %v2593_v43 = vmax.f32 %v2405_v0, 0.0  ;;  %v10833_v53 = vld [vmem:[%s13229_s3 + $0x110] sm:$0xff]  }
 0x3f8   : > { %v2400_v25 = vadd.f32 %v11795_v9, %v2399_v29  ;;  %v2591_v27 = vmax.f32 %v2397_v26, 0.0  ;;  %9831 = vmatprep.subr.bf16.mxu0 %v10833_v53  ;;  %v10834_v29 = vld [vmem:[%s13229_s3 + $0x118] sm:$0xff]  }
 0x3f9   : > { %v2594_v51 = vmax.f32 %v2408_v30, 0.0 }
 0x3fa   : > { %v2592_v45 = vmax.f32 %v2400_v25, 0.0  ;;  %9832 = vmatpush3.bf16.msra.mxu0 %v10833_v53 }
 0x3fb   : > { %v2646_v8 = vpack.c.bf16 %v2594_v51, %v2593_v43  ;;  %9833 = vmatprep.subr.bf16.mxu0 %v10834_v29 }
 0x3fc   : > { %v9709_v58 = vpop.f32.mrb[56].mxu0  ;;  %v2645_v59 = vpack.c.bf16 %v2592_v45, %v2591_v27  ;;  %v10835_v45 = vld [vmem:[%s13229_s3 + $0x120] sm:$0xff]  }
 0x3fd   : > { %v2421_v20 = vadd.f32 %v9709_v58, %v11795_v9  ;;  %v2412_v12 = vpop.f32.mrb[57].mxu0 }
 0x3fe   : > { %v2413_v33 = vadd.f32 %v11795_v9, %v2412_v12  ;;  %v9710_v21 = vpop.f32.mrb[58].mxu0  ;;  %9783 = vmatprep.mubr.bf16.mxu1 %v2645_v59  ;;  %9834 = vmatpush3.bf16.msra.mxu0 %v10834_v29  ;;  %v10837_v12 = vld [vmem:[%s13229_s3 + $0x130] sm:$0xff]  }
 0x3ff   : > { %v2424_v34 = vadd.f32 %v9710_v21, %v11795_v9  ;;  %v2415_v35 = vpop.f32.mrb[59].mxu0  ;;  %9784 = vmatmul.mubr.bf16.gmra.mrb[116].mxu1 %v2646_v8  ;;  %v2597_v52 = vmax.f32 %v2421_v20, 0.0  ;;  %9835 = vmatprep.subr.bf16.mxu0 %v10835_v45  ;;  %v10836_v8 = vld [vmem:[%s13229_s3 + $0x128] sm:$0xff]  }
 0x400   : > { %v2416_v5 = vadd.f32 %v11795_v9, %v2415_v35  ;;  %v2595_v10 = vmax.f32 %v2413_v33, 0.0 }
 0x401   : > { %v2598_v2 = vmax.f32 %v2424_v34, 0.0 }
 0x402   : > { %v2596_v1 = vmax.f32 %v2416_v5, 0.0  ;;  %9836 = vmatpush3.bf16.msra.mxu0 %v10835_v45 }
 0x403   : > { %v2648_v23 = vpack.c.bf16 %v2598_v2, %v2597_v52  ;;  %9837 = vmatprep.subr.bf16.mxu0 %v10836_v8 }
 0x404   : > { %v9713_v37 = vpop.f32.mrb[60].mxu0  ;;  %v2647_v38 = vpack.c.bf16 %v2596_v1, %v2595_v10  ;;  %v10838_v10 = vld [vmem:[%s13229_s3 + $0x138] sm:$0xff]  }
 0x405   : > { %v2437_v63 = vadd.f32 %v9713_v37, %v11795_v9  ;;  %v2428_v47 = vpop.f32.mrb[61].mxu0 }
 0x406   : > { %v2429_v6 = vadd.f32 %v11795_v9, %v2428_v47  ;;  %v9714_v4 = vpop.f32.mrb[62].mxu0  ;;  %9787 = vmatprep.mubr.bf16.mxu1 %v2647_v38  ;;  %9838 = vmatpush3.bf16.msra.mxu0 %v10836_v8 }
 0x407   : > { %v2440_v39 = vadd.f32 %v9714_v4, %v11795_v9  ;;  %v2431_v24 = vpop.f32.mrb[63].mxu0  ;;  %9788 = vmatmul.mubr.bf16.gmra.mrb[120].mxu1 %v2648_v23  ;;  %v2601_v42 = vmax.f32 %v2437_v63, 0.0  ;;  %9839 = vmatprep.subr.bf16.mxu0 %v10837_v12 }
 0x408   : > { %v2432_v40 = vadd.f32 %v11795_v9, %v2431_v24  ;;  %v2599_v60 = vmax.f32 %v2429_v6, 0.0 }
 0x409   : > { %v2602_v44 = vmax.f32 %v2440_v39, 0.0 }
 0x40a   : > { %v2600_v16 = vmax.f32 %v2432_v40, 0.0  ;;  %9840 = vmatpush3.bf16.msra.mxu0 %v10837_v12 }
 0x40b   : > { %v2650_v46 = vpack.c.bf16 %v2602_v44, %v2601_v42  ;;  %9841 = vmatprep.subr.bf16.mxu0 %v10838_v10 }
 0x40c   : > { %v9717_v50 = vpop.f32.mrb[64].mxu0  ;;  %v2649_v18 = vpack.c.bf16 %v2600_v16, %v2599_v60 }
 0x40d   : > { %v2453_v49 = vadd.f32 %v9717_v50, %v11795_v9  ;;  %v2444_v3 = vpop.f32.mrb[65].mxu0 }
 0x40e   : > { %v2445_v61 = vadd.f32 %v11795_v9, %v2444_v3  ;;  %v9718_v19 = vpop.f32.mrb[66].mxu0  ;;  %9791 = vmatprep.mubr.bf16.mxu1 %v2649_v18  ;;  %9842 = vmatpush3.bf16.msra.mxu0 %v10838_v10 }
 0x40f   : > { %v2456_v54 = vadd.f32 %v9718_v19, %v11795_v9  ;;  %v2447_v56 = vpop.f32.mrb[67].mxu0  ;;  %9792 = vmatmul.mubr.bf16.gmra.mrb[124].mxu1 %v2650_v46  ;;  %v2605_v41 = vmax.f32 %v2453_v49, 0.0 }
 0x410   : > { %v2448_v62 = vadd.f32 %v11795_v9, %v2447_v56  ;;  %v2603_v15 = vmax.f32 %v2445_v61, 0.0 }
 0x411   : > { %v2606_v13 = vmax.f32 %v2456_v54, 0.0 }
 0x412   : > { %v2604_v17 = vmax.f32 %v2448_v62, 0.0 }
 0x413   : > { %v2652_v48 = vpack.c.bf16 %v2606_v13, %v2605_v41 }
 0x414   : > { %v9721_v28 = vpop.f32.mrb[68].mxu0  ;;  %v2651_v55 = vpack.c.bf16 %v2604_v17, %v2603_v15 }
 0x415   : > { %v2469_v32 = vadd.f32 %v9721_v28, %v11795_v9  ;;  %v2460_v11 = vpop.f32.mrb[69].mxu0 }
 0x416   : > { %v2461_v36 = vadd.f32 %v11795_v9, %v2460_v11  ;;  %v9722_v22 = vpop.f32.mrb[70].mxu0  ;;  %9795 = vmatprep.mubr.bf16.mxu1 %v2651_v55 }
 0x417   : > { %v2472_v0 = vadd.f32 %v9722_v22, %v11795_v9  ;;  %v2463_v57 = vpop.f32.mrb[71].mxu0  ;;  %9796 = vmatmul.mubr.bf16.gmra.mrb[128].mxu1 %v2652_v48  ;;  %v2609_v14 = vmax.f32 %v2469_v32, 0.0 }
 0x418   : > { %v2464_v26 = vadd.f32 %v11795_v9, %v2463_v57  ;;  %v2607_v25 = vmax.f32 %v2461_v36, 0.0 }
 0x419   : > { %v2610_v30 = vmax.f32 %v2472_v0, 0.0 }
 0x41a   : > { %v2608_v43 = vmax.f32 %v2464_v26, 0.0 }
 0x41b   : > { %v2654_v51 = vpack.c.bf16 %v2610_v30, %v2609_v14 }
 0x41c   : > { %v2653_v27 = vpack.c.bf16 %v2608_v43, %v2607_v25 }
 0x41e   : > { %9799 = vmatprep.mubr.bf16.mxu1 %v2653_v27 }
 0x41f   : > { %9800 = vmatmul.mubr.bf16.gmra.mrb[132].mxu1 %v2654_v51 }
 0x42a   : > { %v9725_v58 = vpop.f32.mrb[72].mxu0 }
 0x42b   : > { %v2485_v59 = vadd.f32 %v9725_v58, %v11795_v9  ;;  %v2476_v20 = vpop.f32.mrb[73].mxu0 }
 0x42c   : > { %v2477_v33 = vadd.f32 %v11795_v9, %v2476_v20  ;;  %v9726_v21 = vpop.f32.mrb[74].mxu0 }
 0x42d   : > { %v2488_v34 = vadd.f32 %v9726_v21, %v11795_v9  ;;  %v2479_v35 = vpop.f32.mrb[75].mxu0  ;;  %v2613_v52 = vmax.f32 %v2485_v59, 0.0 }
 0x42e   : > { %v2480_v5 = vadd.f32 %v11795_v9, %v2479_v35  ;;  %v2611_v1 = vmax.f32 %v2477_v33, 0.0 }
 0x42f   : > { %v2614_v2 = vmax.f32 %v2488_v34, 0.0 }
 0x430   : > { %v2612_v23 = vmax.f32 %v2480_v5, 0.0 }
 0x431   : > { %v2656_v37 = vpack.c.bf16 %v2614_v2, %v2613_v52 }
 0x432   : > { %v2655_v38 = vpack.c.bf16 %v2612_v23, %v2611_v1 }
 0x434   : > { %9803 = vmatprep.mubr.bf16.mxu1 %v2655_v38 }
 0x435   : > { %9804 = vmatmul.mubr.bf16.gmra.mrb[136].mxu1 %v2656_v37 }
 0x442   : > { %v9729_v63 = vpop.f32.mrb[76].mxu0 }
 0x443   : > { %v2501_v47 = vadd.f32 %v9729_v63, %v11795_v9  ;;  %v2492_v6 = vpop.f32.mrb[77].mxu0 }
 0x444   : > { %v2493_v4 = vadd.f32 %v11795_v9, %v2492_v6  ;;  %v9730_v39 = vpop.f32.mrb[78].mxu0 }
 0x445   : > { %v2504_v24 = vadd.f32 %v9730_v39, %v11795_v9  ;;  %v2495_v40 = vpop.f32.mrb[79].mxu0  ;;  %v2617_v44 = vmax.f32 %v2501_v47, 0.0 }
 0x446   : > { %v2496_v42 = vadd.f32 %v11795_v9, %v2495_v40  ;;  %v2615_v16 = vmax.f32 %v2493_v4, 0.0 }
 0x447   : > { %v2618_v60 = vmax.f32 %v2504_v24, 0.0  ;;  %v11888_v24 = vld [vmem:[%s13230_s4 + $0x3] ss:$0 sm:$0xff] }
 0x448   : > { %v2616_v46 = vmax.f32 %v2496_v42, 0.0 }
 0x449   : > { %v2658_v50 = vpack.c.bf16 %v2618_v60, %v2617_v44 }
 0x44a   : > { %v2657_v18 = vpack.c.bf16 %v2616_v46, %v2615_v16 }
 0x44c   : > { %9807 = vmatprep.mubr.bf16.mxu1 %v2657_v18 }
 0x44d   : > { %9808 = vmatmul.mubr.bf16.gmra.mrb[140].mxu1 %v2658_v50 }
 0x45a   : > { %v9733_v49 = vpop.f32.mrb[80].mxu0 }
 0x45b   : > { %v2517_v3 = vadd.f32 %v9733_v49, %v11795_v9  ;;  %v2508_v61 = vpop.f32.mrb[81].mxu0 }
 0x45c   : > { %v2509_v19 = vadd.f32 %v11795_v9, %v2508_v61  ;;  %v9734_v54 = vpop.f32.mrb[82].mxu0 }
 0x45d   : > { %v2520_v56 = vadd.f32 %v9734_v54, %v11795_v9  ;;  %v2511_v62 = vpop.f32.mrb[83].mxu0  ;;  %v2621_v41 = vmax.f32 %v2517_v3, 0.0 }
 0x45e   : > { %v2512_v7 = vadd.f32 %v11795_v9, %v2511_v62  ;;  %v2619_v15 = vmax.f32 %v2509_v19, 0.0 }
 0x45f   : > { %v2622_v13 = vmax.f32 %v2520_v56, 0.0 }
 0x460   : > { %v2620_v17 = vmax.f32 %v2512_v7, 0.0 }
 0x461   : > { %v2660_v48 = vpack.c.bf16 %v2622_v13, %v2621_v41 }
 0x462   : > { %v2659_v28 = vpack.c.bf16 %v2620_v17, %v2619_v15 }
 0x464   : > { %9811 = vmatprep.mubr.bf16.mxu1 %v2659_v28 }
 0x465   : > { %9812 = vmatmul.mubr.bf16.gmra.mrb[144].mxu1 %v2660_v48 }
 0x472   : > { %v9737_v55 = vpop.f32.mrb[84].mxu0 }
 0x473   : > { %v2533_v32 = vadd.f32 %v9737_v55, %v11795_v9  ;;  %v2524_v11 = vpop.f32.mrb[85].mxu0 }
 0x474   : > { %v2525_v31 = vadd.f32 %v11795_v9, %v2524_v11  ;;  %v9738_v53 = vpop.f32.mrb[86].mxu0 }
 0x475   : > { %v2536_v36 = vadd.f32 %v9738_v53, %v11795_v9  ;;  %v2527_v22 = vpop.f32.mrb[87].mxu0  ;;  %v2625_v57 = vmax.f32 %v2533_v32, 0.0 }
 0x476   : > { %v2528_v0 = vadd.f32 %v11795_v9, %v2527_v22  ;;  %v2623_v14 = vmax.f32 %v2525_v31, 0.0 }
 0x477   : > { %v2626_v26 = vmax.f32 %v2536_v36, 0.0 }
 0x478   : > { %v2624_v30 = vmax.f32 %v2528_v0, 0.0 }
 0x479   : > { %v2662_v29 = vpack.c.bf16 %v2626_v26, %v2625_v57 }
 0x47a   : > { %v2661_v25 = vpack.c.bf16 %v2624_v30, %v2623_v14 }
 0x47c   : > { %9815 = vmatprep.mubr.bf16.mxu1 %v2661_v25 }
 0x47d   : > { %9816 = vmatmul.mubr.bf16.gmra.mrb[148].mxu1 %v2662_v29 }
 0x48a   : > { %v9741_v43 = vpop.f32.mrb[88].mxu0 }
 0x48b   : > { %v2549_v51 = vadd.f32 %v9741_v43, %v11795_v9  ;;  %v2540_v27 = vpop.f32.mrb[89].mxu0 }
 0x48c   : > { %v2541_v45 = vadd.f32 %v11795_v9, %v2540_v27  ;;  %v9742_v8 = vpop.f32.mrb[90].mxu0 }
 0x48d   : > { %v2552_v58 = vadd.f32 %v9742_v8, %v11795_v9  ;;  %v2543_v59 = vpop.f32.mrb[91].mxu0  ;;  %v2629_v12 = vmax.f32 %v2549_v51, 0.0 }
 0x48e   : > { %v2544_v20 = vadd.f32 %v11795_v9, %v2543_v59  ;;  %v2627_v21 = vmax.f32 %v2541_v45, 0.0 }
 0x48f   : > { %v2630_v33 = vmax.f32 %v2552_v58, 0.0 }
 0x490   : > { %v2628_v34 = vmax.f32 %v2544_v20, 0.0 }
 0x491   : > { %v2664_v35 = vpack.c.bf16 %v2630_v33, %v2629_v12 }
 0x492   : > { %v2663_v5 = vpack.c.bf16 %v2628_v34, %v2627_v21 }
 0x494   : > { %9819 = vmatprep.mubr.bf16.mxu1 %v2663_v5 }
 0x495   : > { %9820 = vmatmul.mubr.bf16.gmra.mrb[152].mxu1 %v2664_v35 }
 0x4a2   : > { %v9745_v52 = vpop.f32.mrb[92].mxu0 }
 0x4a3   : > { %v2565_v2 = vadd.f32 %v9745_v52, %v11795_v9  ;;  %v2556_v10 = vpop.f32.mrb[93].mxu0 }
 0x4a4   : > { %v2557_v1 = vadd.f32 %v11795_v9, %v2556_v10  ;;  %v9746_v23 = vpop.f32.mrb[94].mxu0 }
 0x4a5   : > { %v2568_v37 = vadd.f32 %v9746_v23, %v11795_v9  ;;  %v2559_v38 = vpop.f32.mrb[95].mxu0  ;;  %v2633_v47 = vmax.f32 %v2565_v2, 0.0 }
 0x4a6   : > { %v2560_v63 = vadd.f32 %v11795_v9, %v2559_v38  ;;  %v2631_v4 = vmax.f32 %v2557_v1, 0.0 }
 0x4a7   : > { %v2634_v6 = vmax.f32 %v2568_v37, 0.0 }
 0x4a8   : > { %v2632_v39 = vmax.f32 %v2560_v63, 0.0 }
 0x4a9   : > { %v2666_v40 = vpack.c.bf16 %v2634_v6, %v2633_v47 }
 0x4aa   : > { %v9765_v42 = vpop.f32.mrb[96].mxu1  ;;  %v2665_v44 = vpack.c.bf16 %v2632_v39, %v2631_v4 }
 0x4ab   : > { %v2783_v60 = vadd.f32 %v9765_v42, %v11888_v24  ;;  %v2774_v16 = vpop.f32.mrb[97].mxu1 }
 0x4ac   : > { %v2775_v46 = vadd.f32 %v11888_v24, %v2774_v16  ;;  %v9766_v50 = vpop.f32.mrb[98].mxu1  ;;  %9823 = vmatprep.mubr.bf16.mxu1 %v2665_v44 }
 0x4ad   : > { %v2786_v9 = vadd.f32 %v9766_v50, %v11888_v24  ;;  %v2777_v18 = vpop.f32.mrb[99].mxu1  ;;  %9824 = vmatmul.mubr.bf16.gmra.mrb[156].mxu1 %v2666_v40  ;;  %v3031_v3 = vmax.f32 %v2783_v60, 0.0 }
 0x4ae   : > { %v2778_v49 = vadd.f32 %v11888_v24, %v2777_v18  ;;  %v3029_v19 = vmax.f32 %v2775_v46, 0.0 }
 0x4af   : > { %v3032_v61 = vmax.f32 %v2786_v9, 0.0 }
 0x4b0   : > { %v3030_v54 = vmax.f32 %v2778_v49, 0.0 }
 0x4b1   : > { %v3094_v56 = vpack.c.bf16 %v3032_v61, %v3031_v3 }
 0x4b2   : > { %v9769_v62 = vpop.f32.mrb[100].mxu1  ;;  %v3093_v7 = vpack.c.bf16 %v3030_v54, %v3029_v19 }
 0x4b3   : > { %v2799_v41 = vadd.f32 %v9769_v62, %v11888_v24  ;;  %v2790_v13 = vpop.f32.mrb[101].mxu1 }
 0x4b4   : > { %v2791_v15 = vadd.f32 %v11888_v24, %v2790_v13  ;;  %v9770_v17 = vpop.f32.mrb[102].mxu1  ;;  %9843 = vmatprep.mubr.bf16.mxu0 %v3093_v7 }
 0x4b5   : > { %v2802_v48 = vadd.f32 %v9770_v17, %v11888_v24  ;;  %v2793_v28 = vpop.f32.mrb[103].mxu1  ;;  %9844 = vmatmul.mubr.bf16.vlgmr.msra.gmra.mrb[96].mxu0 %v3094_v56  ;;  %v3035_v32 = vmax.f32 %v2799_v41, 0.0 }
 0x4b6   : > { %v2794_v55 = vadd.f32 %v11888_v24, %v2793_v28  ;;  %v3033_v31 = vmax.f32 %v2791_v15, 0.0 }
 0x4b7   : > { %v3036_v11 = vmax.f32 %v2802_v48, 0.0 }
 0x4b8   : > { %v3034_v53 = vmax.f32 %v2794_v55, 0.0 }
 0x4b9   : > { %v3096_v36 = vpack.c.bf16 %v3036_v11, %v3035_v32 }
 0x4ba   : > { %v9773_v22 = vpop.f32.mrb[104].mxu1  ;;  %v3095_v0 = vpack.c.bf16 %v3034_v53, %v3033_v31 }
 0x4bb   : > { %v2815_v57 = vadd.f32 %v9773_v22, %v11888_v24  ;;  %v2806_v26 = vpop.f32.mrb[105].mxu1 }
 0x4bc   : > { %v2807_v14 = vadd.f32 %v11888_v24, %v2806_v26  ;;  %v9774_v30 = vpop.f32.mrb[106].mxu1  ;;  %9847 = vmatprep.mubr.bf16.mxu0 %v3095_v0 }
 0x4bd   : > { %v2818_v29 = vadd.f32 %v9774_v30, %v11888_v24  ;;  %v2809_v25 = vpop.f32.mrb[107].mxu1  ;;  %9848 = vmatmul.mubr.bf16.gmra.mrb[100].mxu0 %v3096_v36  ;;  %v3039_v51 = vmax.f32 %v2815_v57, 0.0 }
 0x4be   : > { %v2810_v43 = vadd.f32 %v11888_v24, %v2809_v25  ;;  %v3037_v45 = vmax.f32 %v2807_v14, 0.0 }
 0x4bf   : > { %v3040_v27 = vmax.f32 %v2818_v29, 0.0 }
 0x4c0   : > { %v3038_v8 = vmax.f32 %v2810_v43, 0.0 }
 0x4c1   : > { %v3098_v58 = vpack.c.bf16 %v3040_v27, %v3039_v51 }
 0x4c2   : > { %v9777_v59 = vpop.f32.mrb[108].mxu1  ;;  %v3097_v20 = vpack.c.bf16 %v3038_v8, %v3037_v45 }
 0x4c3   : > { %v2831_v12 = vadd.f32 %v9777_v59, %v11888_v24  ;;  %v2822_v33 = vpop.f32.mrb[109].mxu1 }
 0x4c4   : > { %v2823_v21 = vadd.f32 %v11888_v24, %v2822_v33  ;;  %v9778_v34 = vpop.f32.mrb[110].mxu1  ;;  %9851 = vmatprep.mubr.bf16.mxu0 %v3097_v20 }
 0x4c5   : > { %v2834_v35 = vadd.f32 %v9778_v34, %v11888_v24  ;;  %v2825_v5 = vpop.f32.mrb[111].mxu1  ;;  %9852 = vmatmul.mubr.bf16.gmra.mrb[104].mxu0 %v3098_v58  ;;  %v3043_v2 = vmax.f32 %v2831_v12, 0.0 }
 0x4c6   : > { %v2826_v52 = vadd.f32 %v11888_v24, %v2825_v5  ;;  %v3041_v1 = vmax.f32 %v2823_v21, 0.0 }
 0x4c7   : > { %v3044_v10 = vmax.f32 %v2834_v35, 0.0 }
 0x4c8   : > { %v3042_v23 = vmax.f32 %v2826_v52, 0.0 }
 0x4c9   : > { %v3100_v37 = vpack.c.bf16 %v3044_v10, %v3043_v2 }
 0x4ca   : > { %v9781_v38 = vpop.f32.mrb[112].mxu1  ;;  %v3099_v63 = vpack.c.bf16 %v3042_v23, %v3041_v1 }
 0x4cb   : > { %v2847_v47 = vadd.f32 %v9781_v38, %v11888_v24  ;;  %v2838_v6 = vpop.f32.mrb[113].mxu1 }
 0x4cc   : > { %v2839_v4 = vadd.f32 %v11888_v24, %v2838_v6  ;;  %v9782_v39 = vpop.f32.mrb[114].mxu1  ;;  %9855 = vmatprep.mubr.bf16.mxu0 %v3099_v63 }
 0x4cd   : > { %v2850_v40 = vadd.f32 %v9782_v39, %v11888_v24  ;;  %v2841_v42 = vpop.f32.mrb[115].mxu1  ;;  %9856 = vmatmul.mubr.bf16.gmra.mrb[108].mxu0 %v3100_v37  ;;  %v3047_v60 = vmax.f32 %v2847_v47, 0.0  ;;  %v10839_v47 = vld [vmem:[%s13229_s3 + $0x140] sm:$0xff]  }
 0x4ce   : > { %v2842_v44 = vadd.f32 %v11888_v24, %v2841_v42  ;;  %v3045_v46 = vmax.f32 %v2839_v4, 0.0  ;;  %9907 = vmatprep.subr.bf16.mxu1 %v10839_v47 }
 0x4cf   : > { %v3048_v16 = vmax.f32 %v2850_v40, 0.0  ;;  %9908 = vmatpush3.bf16.msra.mxu1 %v10839_v47 }
 0x4d0   : > { %v3046_v50 = vmax.f32 %v2842_v44, 0.0 }
 0x4d1   : > { %v3102_v9 = vpack.c.bf16 %v3048_v16, %v3047_v60 }
 0x4d2   : > { %v9785_v18 = vpop.f32.mrb[116].mxu1  ;;  %v3101_v49 = vpack.c.bf16 %v3046_v50, %v3045_v46  ;;  %v10840_v50 = vld [vmem:[%s13229_s3 + $0x148] sm:$0xff]  }
 0x4d3   : > { %v2863_v3 = vadd.f32 %v9785_v18, %v11888_v24  ;;  %v2854_v61 = vpop.f32.mrb[117].mxu1  ;;  %9909 = vmatprep.subr.bf16.mxu1 %v10840_v50 }
 0x4d4   : > { %v2855_v19 = vadd.f32 %v11888_v24, %v2854_v61  ;;  %v9786_v54 = vpop.f32.mrb[118].mxu1  ;;  %9859 = vmatprep.mubr.bf16.mxu0 %v3101_v49  ;;  %9910 = vmatpush3.bf16.msra.mxu1 %v10840_v50 }
 0x4d5   : > { %v2866_v56 = vadd.f32 %v9786_v54, %v11888_v24  ;;  %v2857_v62 = vpop.f32.mrb[119].mxu1  ;;  %9860 = vmatmul.mubr.bf16.gmra.mrb[112].mxu0 %v3102_v9  ;;  %v3051_v41 = vmax.f32 %v2863_v3, 0.0  ;;  %v10841_v9 = vld [vmem:[%s13229_s3 + $0x150] sm:$0xff]  }
 0x4d6   : > { %v2858_v7 = vadd.f32 %v11888_v24, %v2857_v62  ;;  %v3049_v15 = vmax.f32 %v2855_v19, 0.0  ;;  %9911 = vmatprep.subr.bf16.mxu1 %v10841_v9  ;;  %v10842_v62 = vld [vmem:[%s13229_s3 + $0x158] sm:$0xff]  }
 0x4d7   : > { %v3052_v13 = vmax.f32 %v2866_v56, 0.0 }
 0x4d8   : > { %v3050_v17 = vmax.f32 %v2858_v7, 0.0  ;;  %9912 = vmatpush3.bf16.msra.mxu1 %v10841_v9 }
 0x4d9   : > { %v3104_v48 = vpack.c.bf16 %v3052_v13, %v3051_v41  ;;  %9913 = vmatprep.subr.bf16.mxu1 %v10842_v62 }
 0x4da   : > { %v9789_v28 = vpop.f32.mrb[120].mxu1  ;;  %v3103_v55 = vpack.c.bf16 %v3050_v17, %v3049_v15  ;;  %v10843_v17 = vld [vmem:[%s13229_s3 + $0x160] sm:$0xff]  }
 0x4db   : > { %v2879_v32 = vadd.f32 %v9789_v28, %v11888_v24  ;;  %v2870_v11 = vpop.f32.mrb[121].mxu1 }
 0x4dc   : > { %v2871_v31 = vadd.f32 %v11888_v24, %v2870_v11  ;;  %v9790_v53 = vpop.f32.mrb[122].mxu1  ;;  %9863 = vmatprep.mubr.bf16.mxu0 %v3103_v55  ;;  %9914 = vmatpush3.bf16.msra.mxu1 %v10842_v62  ;;  %v10845_v11 = vld [vmem:[%s13229_s3 + $0x170] sm:$0xff]  }
 0x4dd   : > { %v2882_v36 = vadd.f32 %v9790_v53, %v11888_v24  ;;  %v2873_v22 = vpop.f32.mrb[123].mxu1  ;;  %9864 = vmatmul.mubr.bf16.gmra.mrb[116].mxu0 %v3104_v48  ;;  %v3055_v57 = vmax.f32 %v2879_v32, 0.0  ;;  %9915 = vmatprep.subr.bf16.mxu1 %v10843_v17  ;;  %v10844_v48 = vld [vmem:[%s13229_s3 + $0x168] sm:$0xff]  }
 0x4de   : > { %v2874_v0 = vadd.f32 %v11888_v24, %v2873_v22  ;;  %v3053_v14 = vmax.f32 %v2871_v31, 0.0 }
 0x4df   : > { %v3056_v26 = vmax.f32 %v2882_v36, 0.0 }
 0x4e0   : > { %v3054_v30 = vmax.f32 %v2874_v0, 0.0  ;;  %9916 = vmatpush3.bf16.msra.mxu1 %v10843_v17 }
 0x4e1   : > { %v3106_v29 = vpack.c.bf16 %v3056_v26, %v3055_v57  ;;  %9917 = vmatprep.subr.bf16.mxu1 %v10844_v48 }
 0x4e2   : > { %v9793_v25 = vpop.f32.mrb[124].mxu1  ;;  %v3105_v43 = vpack.c.bf16 %v3054_v30, %v3053_v14  ;;  %v10846_v14 = vld [vmem:[%s13229_s3 + $0x178] sm:$0xff]  }
 0x4e3   : > { %v2895_v51 = vadd.f32 %v9793_v25, %v11888_v24  ;;  %v2886_v27 = vpop.f32.mrb[125].mxu1 }
 0x4e4   : > { %v2887_v45 = vadd.f32 %v11888_v24, %v2886_v27  ;;  %v9794_v8 = vpop.f32.mrb[126].mxu1  ;;  %9867 = vmatprep.mubr.bf16.mxu0 %v3105_v43  ;;  %9918 = vmatpush3.bf16.msra.mxu1 %v10844_v48 }
 0x4e5   : > { %v2898_v58 = vadd.f32 %v9794_v8, %v11888_v24  ;;  %v2889_v59 = vpop.f32.mrb[127].mxu1  ;;  %9868 = vmatmul.mubr.bf16.gmra.mrb[120].mxu0 %v3106_v29  ;;  %v3059_v12 = vmax.f32 %v2895_v51, 0.0  ;;  %9919 = vmatprep.subr.bf16.mxu1 %v10845_v11 }
 0x4e6   : > { %v2890_v20 = vadd.f32 %v11888_v24, %v2889_v59  ;;  %v3057_v21 = vmax.f32 %v2887_v45, 0.0 }
 0x4e7   : > { %v3060_v33 = vmax.f32 %v2898_v58, 0.0 }
 0x4e8   : > { %v3058_v34 = vmax.f32 %v2890_v20, 0.0  ;;  %9920 = vmatpush3.bf16.msra.mxu1 %v10845_v11 }
 0x4e9   : > { %v3108_v35 = vpack.c.bf16 %v3060_v33, %v3059_v12  ;;  %9921 = vmatprep.subr.bf16.mxu1 %v10846_v14 }
 0x4ea   : > { %v9797_v5 = vpop.f32.mrb[128].mxu1  ;;  %v3107_v52 = vpack.c.bf16 %v3058_v34, %v3057_v21 }
 0x4eb   : > { %v2911_v2 = vadd.f32 %v9797_v5, %v11888_v24  ;;  %v2902_v10 = vpop.f32.mrb[129].mxu1 }
 0x4ec   : > { %v2903_v1 = vadd.f32 %v11888_v24, %v2902_v10  ;;  %v9798_v23 = vpop.f32.mrb[130].mxu1  ;;  %9871 = vmatprep.mubr.bf16.mxu0 %v3107_v52  ;;  %9922 = vmatpush3.bf16.msra.mxu1 %v10846_v14 }
 0x4ed   : > { %v2914_v37 = vadd.f32 %v9798_v23, %v11888_v24  ;;  %v2905_v38 = vpop.f32.mrb[131].mxu1  ;;  %9872 = vmatmul.mubr.bf16.gmra.mrb[124].mxu0 %v3108_v35  ;;  %v3063_v6 = vmax.f32 %v2911_v2, 0.0 }
 0x4ee   : > { %v2906_v63 = vadd.f32 %v11888_v24, %v2905_v38  ;;  %v3061_v39 = vmax.f32 %v2903_v1, 0.0 }
 0x4ef   : > { %v3064_v4 = vmax.f32 %v2914_v37, 0.0 }
 0x4f0   : > { %v3062_v40 = vmax.f32 %v2906_v63, 0.0 }
 0x4f1   : > { %v3110_v42 = vpack.c.bf16 %v3064_v4, %v3063_v6 }
 0x4f2   : > { %v9801_v44 = vpop.f32.mrb[132].mxu1  ;;  %v3109_v60 = vpack.c.bf16 %v3062_v40, %v3061_v39 }
 0x4f3   : > { %v2927_v16 = vadd.f32 %v9801_v44, %v11888_v24  ;;  %v2918_v46 = vpop.f32.mrb[133].mxu1 }
 0x4f4   : > { %v2919_v18 = vadd.f32 %v11888_v24, %v2918_v46  ;;  %v9802_v49 = vpop.f32.mrb[134].mxu1  ;;  %9875 = vmatprep.mubr.bf16.mxu0 %v3109_v60 }
 0x4f5   : > { %v2930_v3 = vadd.f32 %v9802_v49, %v11888_v24  ;;  %v2921_v61 = vpop.f32.mrb[135].mxu1  ;;  %9876 = vmatmul.mubr.bf16.gmra.mrb[128].mxu0 %v3110_v42  ;;  %v3067_v54 = vmax.f32 %v2927_v16, 0.0 }
 0x4f6   : > { %v2922_v19 = vadd.f32 %v11888_v24, %v2921_v61  ;;  %v3065_v7 = vmax.f32 %v2919_v18, 0.0 }
 0x4f7   : > { %v3068_v56 = vmax.f32 %v2930_v3, 0.0 }
 0x4f8   : > { %v3066_v41 = vmax.f32 %v2922_v19, 0.0 }
 0x4f9   : > { %v3112_v13 = vpack.c.bf16 %v3068_v56, %v3067_v54 }
 0x4fa   : > { %v3111_v15 = vpack.c.bf16 %v3066_v41, %v3065_v7 }
 0x4fc   : > { %9879 = vmatprep.mubr.bf16.mxu0 %v3111_v15 }
 0x4fd   : > { %9880 = vmatmul.mubr.bf16.gmra.mrb[132].mxu0 %v3112_v13 }
 0x508   : > { %v9805_v28 = vpop.f32.mrb[136].mxu1 }
 0x509   : > { %v2943_v55 = vadd.f32 %v9805_v28, %v11888_v24  ;;  %v2934_v32 = vpop.f32.mrb[137].mxu1 }
 0x50a   : > { %v2935_v31 = vadd.f32 %v11888_v24, %v2934_v32  ;;  %v9806_v53 = vpop.f32.mrb[138].mxu1 }
 0x50b   : > { %v2946_v36 = vadd.f32 %v9806_v53, %v11888_v24  ;;  %v2937_v22 = vpop.f32.mrb[139].mxu1  ;;  %v3071_v57 = vmax.f32 %v2943_v55, 0.0 }
 0x50c   : > { %v2938_v0 = vadd.f32 %v11888_v24, %v2937_v22  ;;  %v3069_v30 = vmax.f32 %v2935_v31, 0.0 }
 0x50d   : > { %v3072_v26 = vmax.f32 %v2946_v36, 0.0 }
 0x50e   : > { %v3070_v29 = vmax.f32 %v2938_v0, 0.0 }
 0x50f   : > { %v3114_v25 = vpack.c.bf16 %v3072_v26, %v3071_v57 }
 0x510   : > { %v3113_v43 = vpack.c.bf16 %v3070_v29, %v3069_v30 }
 0x512   : > { %9883 = vmatprep.mubr.bf16.mxu0 %v3113_v43 }
 0x513   : > { %9884 = vmatmul.mubr.bf16.gmra.mrb[136].mxu0 %v3114_v25 }
 0x520   : > { %v9809_v51 = vpop.f32.mrb[140].mxu1 }
 0x521   : > { %v2959_v27 = vadd.f32 %v9809_v51, %v11888_v24  ;;  %v2950_v45 = vpop.f32.mrb[141].mxu1 }
 0x522   : > { %v2951_v8 = vadd.f32 %v11888_v24, %v2950_v45  ;;  %v9810_v58 = vpop.f32.mrb[142].mxu1 }
 0x523   : > { %v2962_v59 = vadd.f32 %v9810_v58, %v11888_v24  ;;  %v2953_v20 = vpop.f32.mrb[143].mxu1  ;;  %v3075_v33 = vmax.f32 %v2959_v27, 0.0 }
 0x524   : > { %v2954_v12 = vadd.f32 %v11888_v24, %v2953_v20  ;;  %v3073_v34 = vmax.f32 %v2951_v8, 0.0 }
 0x525   : > { %v3076_v21 = vmax.f32 %v2962_v59, 0.0  ;;  %v11981_v59 = vld [vmem:[%s13230_s4 + $0x4] ss:$0 sm:$0xff] }
 0x526   : > { %v3074_v35 = vmax.f32 %v2954_v12, 0.0 }
 0x527   : > { %v3116_v5 = vpack.c.bf16 %v3076_v21, %v3075_v33 }
 0x528   : > { %v3115_v52 = vpack.c.bf16 %v3074_v35, %v3073_v34 }
 0x52a   : > { %9887 = vmatprep.mubr.bf16.mxu0 %v3115_v52 }
 0x52b   : > { %9888 = vmatmul.mubr.bf16.gmra.mrb[140].mxu0 %v3116_v5 }
 0x538   : > { %v9813_v2 = vpop.f32.mrb[144].mxu1 }
 0x539   : > { %v2975_v10 = vadd.f32 %v9813_v2, %v11888_v24  ;;  %v2966_v1 = vpop.f32.mrb[145].mxu1 }
 0x53a   : > { %v2967_v23 = vadd.f32 %v11888_v24, %v2966_v1  ;;  %v9814_v37 = vpop.f32.mrb[146].mxu1 }
 0x53b   : > { %v2978_v38 = vadd.f32 %v9814_v37, %v11888_v24  ;;  %v2969_v63 = vpop.f32.mrb[147].mxu1  ;;  %v3079_v6 = vmax.f32 %v2975_v10, 0.0 }
 0x53c   : > { %v2970_v47 = vadd.f32 %v11888_v24, %v2969_v63  ;;  %v3077_v39 = vmax.f32 %v2967_v23, 0.0 }
 0x53d   : > { %v3080_v4 = vmax.f32 %v2978_v38, 0.0 }
 0x53e   : > { %v3078_v40 = vmax.f32 %v2970_v47, 0.0 }
 0x53f   : > { %v3118_v42 = vpack.c.bf16 %v3080_v4, %v3079_v6 }
 0x540   : > { %v3117_v44 = vpack.c.bf16 %v3078_v40, %v3077_v39 }
 0x542   : > { %9891 = vmatprep.mubr.bf16.mxu0 %v3117_v44 }
 0x543   : > { %9892 = vmatmul.mubr.bf16.gmra.mrb[144].mxu0 %v3118_v42 }
 0x550   : > { %v9817_v60 = vpop.f32.mrb[148].mxu1 }
 0x551   : > { %v2991_v16 = vadd.f32 %v9817_v60, %v11888_v24  ;;  %v2982_v46 = vpop.f32.mrb[149].mxu1 }
 0x552   : > { %v2983_v50 = vadd.f32 %v11888_v24, %v2982_v46  ;;  %v9818_v9 = vpop.f32.mrb[150].mxu1 }
 0x553   : > { %v2994_v18 = vadd.f32 %v9818_v9, %v11888_v24  ;;  %v2985_v49 = vpop.f32.mrb[151].mxu1  ;;  %v3083_v61 = vmax.f32 %v2991_v16, 0.0 }
 0x554   : > { %v2986_v3 = vadd.f32 %v11888_v24, %v2985_v49  ;;  %v3081_v54 = vmax.f32 %v2983_v50, 0.0 }
 0x555   : > { %v3084_v19 = vmax.f32 %v2994_v18, 0.0 }
 0x556   : > { %v3082_v56 = vmax.f32 %v2986_v3, 0.0 }
 0x557   : > { %v3120_v62 = vpack.c.bf16 %v3084_v19, %v3083_v61 }
 0x558   : > { %v3119_v7 = vpack.c.bf16 %v3082_v56, %v3081_v54 }
 0x55a   : > { %9895 = vmatprep.mubr.bf16.mxu0 %v3119_v7 }
 0x55b   : > { %9896 = vmatmul.mubr.bf16.gmra.mrb[148].mxu0 %v3120_v62 }
 0x568   : > { %v9821_v41 = vpop.f32.mrb[152].mxu1 }
 0x569   : > { %v3007_v13 = vadd.f32 %v9821_v41, %v11888_v24  ;;  %v2998_v15 = vpop.f32.mrb[153].mxu1 }
 0x56a   : > { %v2999_v17 = vadd.f32 %v11888_v24, %v2998_v15  ;;  %v9822_v48 = vpop.f32.mrb[154].mxu1 }
 0x56b   : > { %v3010_v28 = vadd.f32 %v9822_v48, %v11888_v24  ;;  %v3001_v55 = vpop.f32.mrb[155].mxu1  ;;  %v3087_v11 = vmax.f32 %v3007_v13, 0.0 }
 0x56c   : > { %v3002_v32 = vadd.f32 %v11888_v24, %v3001_v55  ;;  %v3085_v53 = vmax.f32 %v2999_v17, 0.0 }
 0x56d   : > { %v3088_v31 = vmax.f32 %v3010_v28, 0.0 }
 0x56e   : > { %v3086_v36 = vmax.f32 %v3002_v32, 0.0 }
 0x56f   : > { %v3122_v22 = vpack.c.bf16 %v3088_v31, %v3087_v11 }
 0x570   : > { %v3121_v0 = vpack.c.bf16 %v3086_v36, %v3085_v53 }
 0x572   : > { %9899 = vmatprep.mubr.bf16.mxu0 %v3121_v0 }
 0x573   : > { %9900 = vmatmul.mubr.bf16.gmra.mrb[152].mxu0 %v3122_v22 }
 0x580   : > { %v9825_v57 = vpop.f32.mrb[156].mxu1 }
 0x581   : > { %v3023_v26 = vadd.f32 %v9825_v57, %v11888_v24  ;;  %v3014_v14 = vpop.f32.mrb[157].mxu1 }
 0x582   : > { %v3015_v30 = vadd.f32 %v11888_v24, %v3014_v14  ;;  %v9826_v29 = vpop.f32.mrb[158].mxu1 }
 0x583   : > { %v3026_v25 = vadd.f32 %v9826_v29, %v11888_v24  ;;  %v3017_v43 = vpop.f32.mrb[159].mxu1  ;;  %v3091_v27 = vmax.f32 %v3023_v26, 0.0 }
 0x584   : > { %v3018_v51 = vadd.f32 %v11888_v24, %v3017_v43  ;;  %v3089_v8 = vmax.f32 %v3015_v30, 0.0 }
 0x585   : > { %v3092_v45 = vmax.f32 %v3026_v25, 0.0 }
 0x586   : > { %v3090_v58 = vmax.f32 %v3018_v51, 0.0 }
 0x587   : > { %v3124_v20 = vpack.c.bf16 %v3092_v45, %v3091_v27 }
 0x588   : > { %v9845_v12 = vpop.f32.mrb[96].mxu0  ;;  %v3123_v33 = vpack.c.bf16 %v3090_v58, %v3089_v8 }
 0x589   : > { %v3241_v21 = vadd.f32 %v9845_v12, %v11981_v59  ;;  %v3232_v34 = vpop.f32.mrb[97].mxu0 }
 0x58a   : > { %v3233_v35 = vadd.f32 %v11981_v59, %v3232_v34  ;;  %v9846_v5 = vpop.f32.mrb[98].mxu0  ;;  %9903 = vmatprep.mubr.bf16.mxu0 %v3123_v33 }
 0x58b   : > { %v3244_v24 = vadd.f32 %v9846_v5, %v11981_v59  ;;  %v3235_v52 = vpop.f32.mrb[99].mxu0  ;;  %9904 = vmatmul.mubr.bf16.gmra.mrb[156].mxu0 %v3124_v20  ;;  %v3489_v10 = vmax.f32 %v3241_v21, 0.0 }
 0x58c   : > { %v3236_v2 = vadd.f32 %v11981_v59, %v3235_v52  ;;  %v3487_v23 = vmax.f32 %v3233_v35, 0.0 }
 0x58d   : > { %v3490_v1 = vmax.f32 %v3244_v24, 0.0 }
 0x58e   : > { %v3488_v37 = vmax.f32 %v3236_v2, 0.0 }
 0x58f   : > { %v3552_v38 = vpack.c.bf16 %v3490_v1, %v3489_v10 }
 0x590   : > { %v9849_v63 = vpop.f32.mrb[100].mxu0  ;;  %v3551_v47 = vpack.c.bf16 %v3488_v37, %v3487_v23 }
 0x591   : > { %v3257_v6 = vadd.f32 %v9849_v63, %v11981_v59  ;;  %v3248_v4 = vpop.f32.mrb[101].mxu0 }
 0x592   : > { %v3249_v39 = vadd.f32 %v11981_v59, %v3248_v4  ;;  %v9850_v40 = vpop.f32.mrb[102].mxu0  ;;  %9923 = vmatprep.mubr.bf16.mxu1 %v3551_v47 }
 0x593   : > { %v3260_v42 = vadd.f32 %v9850_v40, %v11981_v59  ;;  %v3251_v44 = vpop.f32.mrb[103].mxu0  ;;  %9924 = vmatmul.mubr.bf16.vlgmr.msra.gmra.mrb[160].mxu1 %v3552_v38  ;;  %v3493_v16 = vmax.f32 %v3257_v6, 0.0 }
 0x594   : > { %v3252_v60 = vadd.f32 %v11981_v59, %v3251_v44  ;;  %v3491_v50 = vmax.f32 %v3249_v39, 0.0 }
 0x595   : > { %v3494_v46 = vmax.f32 %v3260_v42, 0.0 }
 0x596   : > { %v3492_v9 = vmax.f32 %v3252_v60, 0.0 }
 0x597   : > { %v3554_v18 = vpack.c.bf16 %v3494_v46, %v3493_v16 }
 0x598   : > { %v9853_v49 = vpop.f32.mrb[104].mxu0  ;;  %v3553_v3 = vpack.c.bf16 %v3492_v9, %v3491_v50 }
 0x599   : > { %v3273_v61 = vadd.f32 %v9853_v49, %v11981_v59  ;;  %v3264_v19 = vpop.f32.mrb[105].mxu0 }
 0x59a   : > { %v3265_v54 = vadd.f32 %v11981_v59, %v3264_v19  ;;  %v9854_v56 = vpop.f32.mrb[106].mxu0  ;;  %9927 = vmatprep.mubr.bf16.mxu1 %v3553_v3 }
 0x59b   : > { %v3276_v62 = vadd.f32 %v9854_v56, %v11981_v59  ;;  %v3267_v7 = vpop.f32.mrb[107].mxu0  ;;  %9928 = vmatmul.mubr.bf16.gmra.mrb[164].mxu1 %v3554_v18  ;;  %v3497_v13 = vmax.f32 %v3273_v61, 0.0 }
 0x59c   : > { %v3268_v41 = vadd.f32 %v11981_v59, %v3267_v7  ;;  %v3495_v17 = vmax.f32 %v3265_v54, 0.0 }
 0x59d   : > { %v3498_v15 = vmax.f32 %v3276_v62, 0.0 }
 0x59e   : > { %v3496_v48 = vmax.f32 %v3268_v41, 0.0 }
 0x59f   : > { %v3556_v28 = vpack.c.bf16 %v3498_v15, %v3497_v13 }
 0x5a0   : > { %v9857_v55 = vpop.f32.mrb[108].mxu0  ;;  %v3555_v32 = vpack.c.bf16 %v3496_v48, %v3495_v17 }
 0x5a1   : > { %v3289_v11 = vadd.f32 %v9857_v55, %v11981_v59  ;;  %v3280_v31 = vpop.f32.mrb[109].mxu0 }
 0x5a2   : > { %v3281_v53 = vadd.f32 %v11981_v59, %v3280_v31  ;;  %v9858_v36 = vpop.f32.mrb[110].mxu0  ;;  %9931 = vmatprep.mubr.bf16.mxu1 %v3555_v32 }
 0x5a3   : > { %v3292_v22 = vadd.f32 %v9858_v36, %v11981_v59  ;;  %v3283_v0 = vpop.f32.mrb[111].mxu0  ;;  %9932 = vmatmul.mubr.bf16.gmra.mrb[168].mxu1 %v3556_v28  ;;  %v3501_v26 = vmax.f32 %v3289_v11, 0.0 }
 0x5a4   : > { %v3284_v57 = vadd.f32 %v11981_v59, %v3283_v0  ;;  %v3499_v30 = vmax.f32 %v3281_v53, 0.0 }
 0x5a5   : > { %v3502_v14 = vmax.f32 %v3292_v22, 0.0 }
 0x5a6   : > { %v3500_v29 = vmax.f32 %v3284_v57, 0.0 }
 0x5a7   : > { %v3558_v25 = vpack.c.bf16 %v3502_v14, %v3501_v26 }
 0x5a8   : > { %v9861_v43 = vpop.f32.mrb[112].mxu0  ;;  %v3557_v51 = vpack.c.bf16 %v3500_v29, %v3499_v30 }
 0x5a9   : > { %v3305_v27 = vadd.f32 %v9861_v43, %v11981_v59  ;;  %v3296_v45 = vpop.f32.mrb[113].mxu0 }
 0x5aa   : > { %v3297_v8 = vadd.f32 %v11981_v59, %v3296_v45  ;;  %v9862_v58 = vpop.f32.mrb[114].mxu0  ;;  %9935 = vmatprep.mubr.bf16.mxu1 %v3557_v51 }
 0x5ab   : > { %v3308_v20 = vadd.f32 %v9862_v58, %v11981_v59  ;;  %v3299_v12 = vpop.f32.mrb[115].mxu0  ;;  %9936 = vmatmul.mubr.bf16.gmra.mrb[172].mxu1 %v3558_v25  ;;  %v3505_v21 = vmax.f32 %v3305_v27, 0.0  ;;  %v10847_v27 = vld [vmem:[%s13229_s3 + $0x180] sm:$0xff]  }
 0x5ac   : > { %v3300_v33 = vadd.f32 %v11981_v59, %v3299_v12  ;;  %v3503_v35 = vmax.f32 %v3297_v8, 0.0  ;;  %9987 = vmatprep.subr.bf16.mxu0 %v10847_v27 }
 0x5ad   : > { %v3506_v34 = vmax.f32 %v3308_v20, 0.0  ;;  %9988 = vmatpush3.bf16.msra.mxu0 %v10847_v27 }
 0x5ae   : > { %v3504_v5 = vmax.f32 %v3300_v33, 0.0 }
 0x5af   : > { %v3560_v24 = vpack.c.bf16 %v3506_v34, %v3505_v21 }
 0x5b0   : > { %v9865_v52 = vpop.f32.mrb[116].mxu0  ;;  %v3559_v2 = vpack.c.bf16 %v3504_v5, %v3503_v35  ;;  %v10848_v5 = vld [vmem:[%s13229_s3 + $0x188] sm:$0xff]  }
 0x5b1   : > { %v3321_v10 = vadd.f32 %v9865_v52, %v11981_v59  ;;  %v3312_v1 = vpop.f32.mrb[117].mxu0  ;;  %9989 = vmatprep.subr.bf16.mxu0 %v10848_v5 }
 0x5b2   : > { %v3313_v23 = vadd.f32 %v11981_v59, %v3312_v1  ;;  %v9866_v37 = vpop.f32.mrb[118].mxu0  ;;  %9939 = vmatprep.mubr.bf16.mxu1 %v3559_v2  ;;  %9990 = vmatpush3.bf16.msra.mxu0 %v10848_v5 }
 0x5b3   : > { %v3324_v38 = vadd.f32 %v9866_v37, %v11981_v59  ;;  %v3315_v63 = vpop.f32.mrb[119].mxu0  ;;  %9940 = vmatmul.mubr.bf16.gmra.mrb[176].mxu1 %v3560_v24  ;;  %v3509_v6 = vmax.f32 %v3321_v10, 0.0  ;;  %v10849_v24 = vld [vmem:[%s13229_s3 + $0x190] sm:$0xff]  }
 0x5b4   : > { %v3316_v47 = vadd.f32 %v11981_v59, %v3315_v63  ;;  %v3507_v39 = vmax.f32 %v3313_v23, 0.0  ;;  %9991 = vmatprep.subr.bf16.mxu0 %v10849_v24  ;;  %v10850_v63 = vld [vmem:[%s13229_s3 + $0x198] sm:$0xff]  }
 0x5b5   : > { %v3510_v4 = vmax.f32 %v3324_v38, 0.0 }
 0x5b6   : > { %v3508_v40 = vmax.f32 %v3316_v47, 0.0  ;;  %9992 = vmatpush3.bf16.msra.mxu0 %v10849_v24 }
 0x5b7   : > { %v3562_v42 = vpack.c.bf16 %v3510_v4, %v3509_v6  ;;  %9993 = vmatprep.subr.bf16.mxu0 %v10850_v63 }
 0x5b8   : > { %v9869_v44 = vpop.f32.mrb[120].mxu0  ;;  %v3561_v60 = vpack.c.bf16 %v3508_v40, %v3507_v39  ;;  %v10851_v40 = vld [vmem:[%s13229_s3 + $0x1a0] sm:$0xff]  }
 0x5b9   : > { %v3337_v16 = vadd.f32 %v9869_v44, %v11981_v59  ;;  %v3328_v46 = vpop.f32.mrb[121].mxu0 }
 0x5ba   : > { %v3329_v50 = vadd.f32 %v11981_v59, %v3328_v46  ;;  %v9870_v9 = vpop.f32.mrb[122].mxu0  ;;  %9943 = vmatprep.mubr.bf16.mxu1 %v3561_v60  ;;  %9994 = vmatpush3.bf16.msra.mxu0 %v10850_v63  ;;  %v10853_v46 = vld [vmem:[%s13229_s3 + $0x1b0] sm:$0xff]  }
 0x5bb   : > { %v3340_v18 = vadd.f32 %v9870_v9, %v11981_v59  ;;  %v3331_v49 = vpop.f32.mrb[123].mxu0  ;;  %9944 = vmatmul.mubr.bf16.gmra.mrb[180].mxu1 %v3562_v42  ;;  %v3513_v61 = vmax.f32 %v3337_v16, 0.0  ;;  %9995 = vmatprep.subr.bf16.mxu0 %v10851_v40  ;;  %v10852_v42 = vld [vmem:[%s13229_s3 + $0x1a8] sm:$0xff]  }
 0x5bc   : > { %v3332_v3 = vadd.f32 %v11981_v59, %v3331_v49  ;;  %v3511_v54 = vmax.f32 %v3329_v50, 0.0 }
 0x5bd   : > { %v3514_v19 = vmax.f32 %v3340_v18, 0.0 }
 0x5be   : > { %v3512_v56 = vmax.f32 %v3332_v3, 0.0  ;;  %9996 = vmatpush3.bf16.msra.mxu0 %v10851_v40 }
 0x5bf   : > { %v3564_v62 = vpack.c.bf16 %v3514_v19, %v3513_v61  ;;  %9997 = vmatprep.subr.bf16.mxu0 %v10852_v42 }
 0x5c0   : > { %v9873_v7 = vpop.f32.mrb[124].mxu0  ;;  %v3563_v41 = vpack.c.bf16 %v3512_v56, %v3511_v54  ;;  %v10854_v54 = vld [vmem:[%s13229_s3 + $0x1b8] sm:$0xff]  }
 0x5c1   : > { %v3353_v13 = vadd.f32 %v9873_v7, %v11981_v59  ;;  %v3344_v15 = vpop.f32.mrb[125].mxu0 }
 0x5c2   : > { %v3345_v17 = vadd.f32 %v11981_v59, %v3344_v15  ;;  %v9874_v48 = vpop.f32.mrb[126].mxu0  ;;  %9947 = vmatprep.mubr.bf16.mxu1 %v3563_v41  ;;  %9998 = vmatpush3.bf16.msra.mxu0 %v10852_v42 }
 0x5c3   : > { %v3356_v28 = vadd.f32 %v9874_v48, %v11981_v59  ;;  %v3347_v55 = vpop.f32.mrb[127].mxu0  ;;  %9948 = vmatmul.mubr.bf16.gmra.mrb[184].mxu1 %v3564_v62  ;;  %v3517_v11 = vmax.f32 %v3353_v13, 0.0  ;;  %9999 = vmatprep.subr.bf16.mxu0 %v10853_v46 }
 0x5c4   : > { %v3348_v32 = vadd.f32 %v11981_v59, %v3347_v55  ;;  %v3515_v53 = vmax.f32 %v3345_v17, 0.0 }
 0x5c5   : > { %v3518_v31 = vmax.f32 %v3356_v28, 0.0 }
 0x5c6   : > { %v3516_v36 = vmax.f32 %v3348_v32, 0.0  ;;  %10000 = vmatpush3.bf16.msra.mxu0 %v10853_v46 }
 0x5c7   : > { %v3566_v22 = vpack.c.bf16 %v3518_v31, %v3517_v11  ;;  %10001 = vmatprep.subr.bf16.mxu0 %v10854_v54 }
 0x5c8   : > { %v9877_v0 = vpop.f32.mrb[128].mxu0  ;;  %v3565_v57 = vpack.c.bf16 %v3516_v36, %v3515_v53 }
 0x5c9   : > { %v3369_v26 = vadd.f32 %v9877_v0, %v11981_v59  ;;  %v3360_v14 = vpop.f32.mrb[129].mxu0 }
 0x5ca   : > { %v3361_v30 = vadd.f32 %v11981_v59, %v3360_v14  ;;  %v9878_v29 = vpop.f32.mrb[130].mxu0  ;;  %9951 = vmatprep.mubr.bf16.mxu1 %v3565_v57  ;;  %10002 = vmatpush3.bf16.msra.mxu0 %v10854_v54 }
 0x5cb   : > { %v3372_v25 = vadd.f32 %v9878_v29, %v11981_v59  ;;  %v3363_v43 = vpop.f32.mrb[131].mxu0  ;;  %9952 = vmatmul.mubr.bf16.gmra.mrb[188].mxu1 %v3566_v22  ;;  %v3521_v45 = vmax.f32 %v3369_v26, 0.0 }
 0x5cc   : > { %v3364_v51 = vadd.f32 %v11981_v59, %v3363_v43  ;;  %v3519_v58 = vmax.f32 %v3361_v30, 0.0 }
 0x5cd   : > { %v3522_v8 = vmax.f32 %v3372_v25, 0.0 }
 0x5ce   : > { %v3520_v20 = vmax.f32 %v3364_v51, 0.0 }
 0x5cf   : > { %v3568_v12 = vpack.c.bf16 %v3522_v8, %v3521_v45 }
 0x5d0   : > { %v9881_v33 = vpop.f32.mrb[132].mxu0  ;;  %v3567_v21 = vpack.c.bf16 %v3520_v20, %v3519_v58 }
 0x5d1   : > { %v3385_v34 = vadd.f32 %v9881_v33, %v11981_v59  ;;  %v3376_v35 = vpop.f32.mrb[133].mxu0 }
 0x5d2   : > { %v3377_v52 = vadd.f32 %v11981_v59, %v3376_v35  ;;  %v9882_v2 = vpop.f32.mrb[134].mxu0  ;;  %9955 = vmatprep.mubr.bf16.mxu1 %v3567_v21 }
 0x5d3   : > { %v3388_v10 = vadd.f32 %v9882_v2, %v11981_v59  ;;  %v3379_v1 = vpop.f32.mrb[135].mxu0  ;;  %9956 = vmatmul.mubr.bf16.gmra.mrb[192].mxu1 %v3568_v12  ;;  %v3525_v37 = vmax.f32 %v3385_v34, 0.0 }
 0x5d4   : > { %v3380_v23 = vadd.f32 %v11981_v59, %v3379_v1  ;;  %v3523_v47 = vmax.f32 %v3377_v52, 0.0 }
 0x5d5   : > { %v3526_v38 = vmax.f32 %v3388_v10, 0.0 }
 0x5d6   : > { %v3524_v6 = vmax.f32 %v3380_v23, 0.0 }
 0x5d7   : > { %v3570_v4 = vpack.c.bf16 %v3526_v38, %v3525_v37 }
 0x5d8   : > { %v3569_v39 = vpack.c.bf16 %v3524_v6, %v3523_v47 }
 0x5da   : > { %9959 = vmatprep.mubr.bf16.mxu1 %v3569_v39 }
 0x5db   : > { %9960 = vmatmul.mubr.bf16.gmra.mrb[196].mxu1 %v3570_v4 }
 0x5e6   : > { %v9885_v44 = vpop.f32.mrb[136].mxu0 }
 0x5e7   : > { %v3401_v60 = vadd.f32 %v9885_v44, %v11981_v59  ;;  %v3392_v16 = vpop.f32.mrb[137].mxu0 }
 0x5e8   : > { %v3393_v50 = vadd.f32 %v11981_v59, %v3392_v16  ;;  %v9886_v9 = vpop.f32.mrb[138].mxu0 }
 0x5e9   : > { %v3404_v18 = vadd.f32 %v9886_v9, %v11981_v59  ;;  %v3395_v49 = vpop.f32.mrb[139].mxu0  ;;  %v3529_v61 = vmax.f32 %v3401_v60, 0.0 }
 0x5ea   : > { %v3396_v3 = vadd.f32 %v11981_v59, %v3395_v49  ;;  %v3527_v56 = vmax.f32 %v3393_v50, 0.0 }
 0x5eb   : > { %v3530_v19 = vmax.f32 %v3404_v18, 0.0 }
 0x5ec   : > { %v3528_v62 = vmax.f32 %v3396_v3, 0.0 }
 0x5ed   : > { %v3572_v7 = vpack.c.bf16 %v3530_v19, %v3529_v61 }
 0x5ee   : > { %v3571_v41 = vpack.c.bf16 %v3528_v62, %v3527_v56 }
 0x5f0   : > { %9963 = vmatprep.mubr.bf16.mxu1 %v3571_v41 }
 0x5f1   : > { %9964 = vmatmul.mubr.bf16.gmra.mrb[200].mxu1 %v3572_v7 }
 0x5fe   : > { %v9889_v13 = vpop.f32.mrb[140].mxu0 }
 0x5ff   : > { %v3417_v15 = vadd.f32 %v9889_v13, %v11981_v59  ;;  %v3408_v17 = vpop.f32.mrb[141].mxu0 }
 0x600   : > { %v3409_v48 = vadd.f32 %v11981_v59, %v3408_v17  ;;  %v9890_v28 = vpop.f32.mrb[142].mxu0 }
 0x601   : > { %v3420_v55 = vadd.f32 %v9890_v28, %v11981_v59  ;;  %v3411_v32 = vpop.f32.mrb[143].mxu0  ;;  %v3533_v31 = vmax.f32 %v3417_v15, 0.0 }
 0x602   : > { %v3412_v11 = vadd.f32 %v11981_v59, %v3411_v32  ;;  %v3531_v36 = vmax.f32 %v3409_v48, 0.0 }
 0x603   : > { %v3534_v53 = vmax.f32 %v3420_v55, 0.0  ;;  %v12074_v55 = vld [vmem:[%s13230_s4 + $0x5] ss:$0 sm:$0xff] }
 0x604   : > { %v3532_v22 = vmax.f32 %v3412_v11, 0.0 }
 0x605   : > { %v3574_v0 = vpack.c.bf16 %v3534_v53, %v3533_v31 }
 0x606   : > { %v3573_v57 = vpack.c.bf16 %v3532_v22, %v3531_v36 }
 0x608   : > { %9967 = vmatprep.mubr.bf16.mxu1 %v3573_v57 }
 0x609   : > { %9968 = vmatmul.mubr.bf16.gmra.mrb[204].mxu1 %v3574_v0 }
 0x616   : > { %v9893_v26 = vpop.f32.mrb[144].mxu0 }
 0x617   : > { %v3433_v14 = vadd.f32 %v9893_v26, %v11981_v59  ;;  %v3424_v30 = vpop.f32.mrb[145].mxu0 }
 0x618   : > { %v3425_v29 = vadd.f32 %v11981_v59, %v3424_v30  ;;  %v9894_v25 = vpop.f32.mrb[146].mxu0 }
 0x619   : > { %v3436_v43 = vadd.f32 %v9894_v25, %v11981_v59  ;;  %v3427_v51 = vpop.f32.mrb[147].mxu0  ;;  %v3537_v45 = vmax.f32 %v3433_v14, 0.0 }
 0x61a   : > { %v3428_v27 = vadd.f32 %v11981_v59, %v3427_v51  ;;  %v3535_v58 = vmax.f32 %v3425_v29, 0.0 }
 0x61b   : > { %v3538_v8 = vmax.f32 %v3436_v43, 0.0 }
 0x61c   : > { %v3536_v20 = vmax.f32 %v3428_v27, 0.0 }
 0x61d   : > { %v3576_v12 = vpack.c.bf16 %v3538_v8, %v3537_v45 }
 0x61e   : > { %v3575_v33 = vpack.c.bf16 %v3536_v20, %v3535_v58 }
 0x620   : > { %9971 = vmatprep.mubr.bf16.mxu1 %v3575_v33 }
 0x621   : > { %9972 = vmatmul.mubr.bf16.gmra.mrb[208].mxu1 %v3576_v12 }
 0x62e   : > { %v9897_v21 = vpop.f32.mrb[148].mxu0 }
 0x62f   : > { %v3449_v34 = vadd.f32 %v9897_v21, %v11981_v59  ;;  %v3440_v35 = vpop.f32.mrb[149].mxu0 }
 0x630   : > { %v3441_v5 = vadd.f32 %v11981_v59, %v3440_v35  ;;  %v9898_v24 = vpop.f32.mrb[150].mxu0 }
 0x631   : > { %v3452_v52 = vadd.f32 %v9898_v24, %v11981_v59  ;;  %v3443_v2 = vpop.f32.mrb[151].mxu0  ;;  %v3541_v1 = vmax.f32 %v3449_v34, 0.0 }
 0x632   : > { %v3444_v10 = vadd.f32 %v11981_v59, %v3443_v2  ;;  %v3539_v37 = vmax.f32 %v3441_v5, 0.0 }
 0x633   : > { %v3542_v23 = vmax.f32 %v3452_v52, 0.0 }
 0x634   : > { %v3540_v38 = vmax.f32 %v3444_v10, 0.0 }
 0x635   : > { %v3578_v63 = vpack.c.bf16 %v3542_v23, %v3541_v1 }
 0x636   : > { %v3577_v47 = vpack.c.bf16 %v3540_v38, %v3539_v37 }
 0x638   : > { %9975 = vmatprep.mubr.bf16.mxu1 %v3577_v47 }
 0x639   : > { %9976 = vmatmul.mubr.bf16.gmra.mrb[212].mxu1 %v3578_v63 }
 0x646   : > { %v9901_v6 = vpop.f32.mrb[152].mxu0 }
 0x647   : > { %v3465_v4 = vadd.f32 %v9901_v6, %v11981_v59  ;;  %v3456_v39 = vpop.f32.mrb[153].mxu0 }
 0x648   : > { %v3457_v40 = vadd.f32 %v11981_v59, %v3456_v39  ;;  %v9902_v42 = vpop.f32.mrb[154].mxu0 }
 0x649   : > { %v3468_v44 = vadd.f32 %v9902_v42, %v11981_v59  ;;  %v3459_v60 = vpop.f32.mrb[155].mxu0  ;;  %v3545_v46 = vmax.f32 %v3465_v4, 0.0 }
 0x64a   : > { %v3460_v16 = vadd.f32 %v11981_v59, %v3459_v60  ;;  %v3543_v9 = vmax.f32 %v3457_v40, 0.0 }
 0x64b   : > { %v3546_v50 = vmax.f32 %v3468_v44, 0.0 }
 0x64c   : > { %v3544_v18 = vmax.f32 %v3460_v16, 0.0 }
 0x64d   : > { %v3580_v49 = vpack.c.bf16 %v3546_v50, %v3545_v46 }
 0x64e   : > { %v3579_v3 = vpack.c.bf16 %v3544_v18, %v3543_v9 }
 0x650   : > { %9979 = vmatprep.mubr.bf16.mxu1 %v3579_v3 }
 0x651   : > { %9980 = vmatmul.mubr.bf16.gmra.mrb[216].mxu1 %v3580_v49 }
 0x65e   : > { %v9905_v61 = vpop.f32.mrb[156].mxu0 }
 0x65f   : > { %v3481_v19 = vadd.f32 %v9905_v61, %v11981_v59  ;;  %v3472_v54 = vpop.f32.mrb[157].mxu0 }
 0x660   : > { %v3473_v56 = vadd.f32 %v11981_v59, %v3472_v54  ;;  %v9906_v62 = vpop.f32.mrb[158].mxu0 }
 0x661   : > { %v3484_v7 = vadd.f32 %v9906_v62, %v11981_v59  ;;  %v3475_v41 = vpop.f32.mrb[159].mxu0  ;;  %v3549_v15 = vmax.f32 %v3481_v19, 0.0 }
 0x662   : > { %v3476_v13 = vadd.f32 %v11981_v59, %v3475_v41  ;;  %v3547_v48 = vmax.f32 %v3473_v56, 0.0 }
 0x663   : > { %v3550_v17 = vmax.f32 %v3484_v7, 0.0 }
 0x664   : > { %v3548_v28 = vmax.f32 %v3476_v13, 0.0 }
 0x665   : > { %v3582_v32 = vpack.c.bf16 %v3550_v17, %v3549_v15 }
 0x666   : > { %v9925_v11 = vpop.f32.mrb[160].mxu1  ;;  %v3581_v31 = vpack.c.bf16 %v3548_v28, %v3547_v48 }
 0x667   : > { %v3699_v53 = vadd.f32 %v9925_v11, %v12074_v55  ;;  %v3690_v36 = vpop.f32.mrb[161].mxu1 }
 0x668   : > { %v3691_v22 = vadd.f32 %v12074_v55, %v3690_v36  ;;  %v9926_v0 = vpop.f32.mrb[162].mxu1  ;;  %9983 = vmatprep.mubr.bf16.mxu1 %v3581_v31 }
 0x669   : > { %v3702_v59 = vadd.f32 %v9926_v0, %v12074_v55  ;;  %v3693_v57 = vpop.f32.mrb[163].mxu1  ;;  %9984 = vmatmul.mubr.bf16.gmra.mrb[220].mxu1 %v3582_v32  ;;  %v3947_v14 = vmax.f32 %v3699_v53, 0.0 }
 0x66a   : > { %v3694_v26 = vadd.f32 %v12074_v55, %v3693_v57  ;;  %v3945_v29 = vmax.f32 %v3691_v22, 0.0 }
 0x66b   : > { %v3948_v30 = vmax.f32 %v3702_v59, 0.0 }
 0x66c   : > { %v3946_v25 = vmax.f32 %v3694_v26, 0.0 }
 0x66d   : > { %v4010_v43 = vpack.c.bf16 %v3948_v30, %v3947_v14 }
 0x66e   : > { %v9929_v51 = vpop.f32.mrb[164].mxu1  ;;  %v4009_v27 = vpack.c.bf16 %v3946_v25, %v3945_v29 }
 0x66f   : > { %v3715_v45 = vadd.f32 %v9929_v51, %v12074_v55  ;;  %v3706_v8 = vpop.f32.mrb[165].mxu1 }
 0x670   : > { %v3707_v58 = vadd.f32 %v12074_v55, %v3706_v8  ;;  %v9930_v20 = vpop.f32.mrb[166].mxu1  ;;  %10003 = vmatprep.mubr.bf16.mxu0 %v4009_v27 }
 0x671   : > { %v3718_v12 = vadd.f32 %v9930_v20, %v12074_v55  ;;  %v3709_v33 = vpop.f32.mrb[167].mxu1  ;;  %10004 = vmatmul.mubr.bf16.vlgmr.msra.gmra.mrb[160].mxu0 %v4010_v43  ;;  %v3951_v34 = vmax.f32 %v3715_v45, 0.0 }
 0x672   : > { %v3710_v21 = vadd.f32 %v12074_v55, %v3709_v33  ;;  %v3949_v5 = vmax.f32 %v3707_v58, 0.0 }
 0x673   : > { %v3952_v35 = vmax.f32 %v3718_v12, 0.0 }
 0x674   : > { %v3950_v24 = vmax.f32 %v3710_v21, 0.0 }
 0x675   : > { %v4012_v52 = vpack.c.bf16 %v3952_v35, %v3951_v34 }
 0x676   : > { %v9933_v2 = vpop.f32.mrb[168].mxu1  ;;  %v4011_v10 = vpack.c.bf16 %v3950_v24, %v3949_v5 }
 0x677   : > { %v3731_v1 = vadd.f32 %v9933_v2, %v12074_v55  ;;  %v3722_v23 = vpop.f32.mrb[169].mxu1 }
 0x678   : > { %v3723_v37 = vadd.f32 %v12074_v55, %v3722_v23  ;;  %v9934_v38 = vpop.f32.mrb[170].mxu1  ;;  %10007 = vmatprep.mubr.bf16.mxu0 %v4011_v10 }
 0x679   : > { %v3734_v63 = vadd.f32 %v9934_v38, %v12074_v55  ;;  %v3725_v47 = vpop.f32.mrb[171].mxu1  ;;  %10008 = vmatmul.mubr.bf16.gmra.mrb[164].mxu0 %v4012_v52  ;;  %v3955_v4 = vmax.f32 %v3731_v1, 0.0 }
 0x67a   : > { %v3726_v6 = vadd.f32 %v12074_v55, %v3725_v47  ;;  %v3953_v40 = vmax.f32 %v3723_v37, 0.0 }
 0x67b   : > { %v3956_v39 = vmax.f32 %v3734_v63, 0.0 }
 0x67c   : > { %v3954_v42 = vmax.f32 %v3726_v6, 0.0 }
 0x67d   : > { %v4014_v44 = vpack.c.bf16 %v3956_v39, %v3955_v4 }
 0x67e   : > { %v9937_v60 = vpop.f32.mrb[172].mxu1  ;;  %v4013_v16 = vpack.c.bf16 %v3954_v42, %v3953_v40 }
 0x67f   : > { %v3747_v46 = vadd.f32 %v9937_v60, %v12074_v55  ;;  %v3738_v50 = vpop.f32.mrb[173].mxu1 }
 0x680   : > { %v3739_v9 = vadd.f32 %v12074_v55, %v3738_v50  ;;  %v9938_v18 = vpop.f32.mrb[174].mxu1  ;;  %10011 = vmatprep.mubr.bf16.mxu0 %v4013_v16 }
 0x681   : > { %v3750_v49 = vadd.f32 %v9938_v18, %v12074_v55  ;;  %v3741_v3 = vpop.f32.mrb[175].mxu1  ;;  %10012 = vmatmul.mubr.bf16.gmra.mrb[168].mxu0 %v4014_v44  ;;  %v3959_v19 = vmax.f32 %v3747_v46, 0.0 }
 0x682   : > { %v3742_v61 = vadd.f32 %v12074_v55, %v3741_v3  ;;  %v3957_v56 = vmax.f32 %v3739_v9, 0.0 }
 0x683   : > { %v3960_v54 = vmax.f32 %v3750_v49, 0.0 }
 0x684   : > { %v3958_v62 = vmax.f32 %v3742_v61, 0.0 }
 0x685   : > { %v4016_v7 = vpack.c.bf16 %v3960_v54, %v3959_v19 }
 0x686   : > { %v9941_v41 = vpop.f32.mrb[176].mxu1  ;;  %v4015_v13 = vpack.c.bf16 %v3958_v62, %v3957_v56 }
 0x687   : > { %v3763_v15 = vadd.f32 %v9941_v41, %v12074_v55  ;;  %v3754_v17 = vpop.f32.mrb[177].mxu1 }
 0x688   : > { %v3755_v48 = vadd.f32 %v12074_v55, %v3754_v17  ;;  %v9942_v28 = vpop.f32.mrb[178].mxu1  ;;  %10015 = vmatprep.mubr.bf16.mxu0 %v4015_v13 }
 0x689   : > { %v3766_v32 = vadd.f32 %v9942_v28, %v12074_v55  ;;  %v3757_v11 = vpop.f32.mrb[179].mxu1  ;;  %10016 = vmatmul.mubr.bf16.gmra.mrb[172].mxu0 %v4016_v7  ;;  %v3963_v53 = vmax.f32 %v3763_v15, 0.0  ;;  %v10855_v15 = vld [vmem:[%s13229_s3 + $0x1c0] sm:$0xff]  }
 0x68a   : > { %v3758_v31 = vadd.f32 %v12074_v55, %v3757_v11  ;;  %v3961_v22 = vmax.f32 %v3755_v48, 0.0  ;;  %10067 = vmatprep.subr.bf16.mxu1 %v10855_v15 }
 0x68b   : > { %v3964_v36 = vmax.f32 %v3766_v32, 0.0  ;;  %10068 = vmatpush3.bf16.msra.mxu1 %v10855_v15 }
 0x68c   : > { %v3962_v0 = vmax.f32 %v3758_v31, 0.0 }
 0x68d   : > { %v4018_v59 = vpack.c.bf16 %v3964_v36, %v3963_v53 }
 0x68e   : > { %v9945_v57 = vpop.f32.mrb[180].mxu1  ;;  %v4017_v26 = vpack.c.bf16 %v3962_v0, %v3961_v22  ;;  %v10856_v0 = vld [vmem:[%s13229_s3 + $0x1c8] sm:$0xff]  }
 0x68f   : > { %v3779_v14 = vadd.f32 %v9945_v57, %v12074_v55  ;;  %v3770_v30 = vpop.f32.mrb[181].mxu1  ;;  %10069 = vmatprep.subr.bf16.mxu1 %v10856_v0 }
 0x690   : > { %v3771_v29 = vadd.f32 %v12074_v55, %v3770_v30  ;;  %v9946_v25 = vpop.f32.mrb[182].mxu1  ;;  %10019 = vmatprep.mubr.bf16.mxu0 %v4017_v26  ;;  %10070 = vmatpush3.bf16.msra.mxu1 %v10856_v0 }
 0x691   : > { %v3782_v43 = vadd.f32 %v9946_v25, %v12074_v55  ;;  %v3773_v51 = vpop.f32.mrb[183].mxu1  ;;  %10020 = vmatmul.mubr.bf16.gmra.mrb[176].mxu0 %v4018_v59  ;;  %v3967_v45 = vmax.f32 %v3779_v14, 0.0  ;;  %v10857_v59 = vld [vmem:[%s13229_s3 + $0x1d0] sm:$0xff]  }
 0x692   : > { %v3774_v27 = vadd.f32 %v12074_v55, %v3773_v51  ;;  %v3965_v58 = vmax.f32 %v3771_v29, 0.0  ;;  %10071 = vmatprep.subr.bf16.mxu1 %v10857_v59  ;;  %v10858_v51 = vld [vmem:[%s13229_s3 + $0x1d8] sm:$0xff]  }
 0x693   : > { %v3968_v8 = vmax.f32 %v3782_v43, 0.0 }
 0x694   : > { %v3966_v20 = vmax.f32 %v3774_v27, 0.0  ;;  %10072 = vmatpush3.bf16.msra.mxu1 %v10857_v59 }
 0x695   : > { %v4020_v12 = vpack.c.bf16 %v3968_v8, %v3967_v45  ;;  %10073 = vmatprep.subr.bf16.mxu1 %v10858_v51 }
 0x696   : > { %v9949_v33 = vpop.f32.mrb[184].mxu1  ;;  %v4019_v21 = vpack.c.bf16 %v3966_v20, %v3965_v58  ;;  %v10859_v20 = vld [vmem:[%s13229_s3 + $0x1e0] sm:$0xff]  }
 0x697   : > { %v3795_v34 = vadd.f32 %v9949_v33, %v12074_v55  ;;  %v3786_v35 = vpop.f32.mrb[185].mxu1 }
 0x698   : > { %v3787_v5 = vadd.f32 %v12074_v55, %v3786_v35  ;;  %v9950_v24 = vpop.f32.mrb[186].mxu1  ;;  %10023 = vmatprep.mubr.bf16.mxu0 %v4019_v21  ;;  %10074 = vmatpush3.bf16.msra.mxu1 %v10858_v51  ;;  %v10861_v35 = vld [vmem:[%s13229_s3 + $0x1f0] sm:$0xff]  }
 0x699   : > { %v3798_v52 = vadd.f32 %v9950_v24, %v12074_v55  ;;  %v3789_v2 = vpop.f32.mrb[187].mxu1  ;;  %10024 = vmatmul.mubr.bf16.gmra.mrb[180].mxu0 %v4020_v12  ;;  %v3971_v1 = vmax.f32 %v3795_v34, 0.0  ;;  %10075 = vmatprep.subr.bf16.mxu1 %v10859_v20  ;;  %v10860_v12 = vld [vmem:[%s13229_s3 + $0x1e8] sm:$0xff]  }
 0x69a   : > { %v3790_v10 = vadd.f32 %v12074_v55, %v3789_v2  ;;  %v3969_v37 = vmax.f32 %v3787_v5, 0.0 }
 0x69b   : > { %v3972_v23 = vmax.f32 %v3798_v52, 0.0 }
 0x69c   : > { %v3970_v38 = vmax.f32 %v3790_v10, 0.0  ;;  %10076 = vmatpush3.bf16.msra.mxu1 %v10859_v20 }
 0x69d   : > { %v4022_v63 = vpack.c.bf16 %v3972_v23, %v3971_v1  ;;  %10077 = vmatprep.subr.bf16.mxu1 %v10860_v12 }
 0x69e   : > { %v9953_v47 = vpop.f32.mrb[188].mxu1  ;;  %v4021_v6 = vpack.c.bf16 %v3970_v38, %v3969_v37  ;;  %v10862_v37 = vld [vmem:[%s13229_s3 + $0x1f8] sm:$0xff]  }
 0x69f   : > { %v3811_v4 = vadd.f32 %v9953_v47, %v12074_v55  ;;  %v3802_v39 = vpop.f32.mrb[189].mxu1 }
 0x6a0   : > { %v3803_v40 = vadd.f32 %v12074_v55, %v3802_v39  ;;  %v9954_v42 = vpop.f32.mrb[190].mxu1  ;;  %10027 = vmatprep.mubr.bf16.mxu0 %v4021_v6  ;;  %10078 = vmatpush3.bf16.msra.mxu1 %v10860_v12 }
 0x6a1   : > { %v3814_v44 = vadd.f32 %v9954_v42, %v12074_v55  ;;  %v3805_v60 = vpop.f32.mrb[191].mxu1  ;;  %10028 = vmatmul.mubr.bf16.gmra.mrb[184].mxu0 %v4022_v63  ;;  %v3975_v46 = vmax.f32 %v3811_v4, 0.0  ;;  %10079 = vmatprep.subr.bf16.mxu1 %v10861_v35 }
 0x6a2   : > { %v3806_v16 = vadd.f32 %v12074_v55, %v3805_v60  ;;  %v3973_v9 = vmax.f32 %v3803_v40, 0.0 }
 0x6a3   : > { %v3976_v50 = vmax.f32 %v3814_v44, 0.0 }
 0x6a4   : > { %v3974_v18 = vmax.f32 %v3806_v16, 0.0  ;;  %10080 = vmatpush3.bf16.msra.mxu1 %v10861_v35 }
 0x6a5   : > { %v4024_v49 = vpack.c.bf16 %v3976_v50, %v3975_v46  ;;  %10081 = vmatprep.subr.bf16.mxu1 %v10862_v37 }
 0x6a6   : > { %v9957_v3 = vpop.f32.mrb[192].mxu1  ;;  %v4023_v61 = vpack.c.bf16 %v3974_v18, %v3973_v9 }
 0x6a7   : > { %v3827_v19 = vadd.f32 %v9957_v3, %v12074_v55  ;;  %v3818_v54 = vpop.f32.mrb[193].mxu1 }
 0x6a8   : > { %v3819_v56 = vadd.f32 %v12074_v55, %v3818_v54  ;;  %v9958_v62 = vpop.f32.mrb[194].mxu1  ;;  %10031 = vmatprep.mubr.bf16.mxu0 %v4023_v61  ;;  %10082 = vmatpush3.bf16.msra.mxu1 %v10862_v37 }
 0x6a9   : > { %v3830_v7 = vadd.f32 %v9958_v62, %v12074_v55  ;;  %v3821_v41 = vpop.f32.mrb[195].mxu1  ;;  %10032 = vmatmul.mubr.bf16.gmra.mrb[188].mxu0 %v4024_v49  ;;  %v3979_v17 = vmax.f32 %v3827_v19, 0.0 }
 0x6aa   : > { %v3822_v13 = vadd.f32 %v12074_v55, %v3821_v41  ;;  %v3977_v28 = vmax.f32 %v3819_v56, 0.0 }
 0x6ab   : > { %v3980_v48 = vmax.f32 %v3830_v7, 0.0 }
 0x6ac   : > { %v3978_v32 = vmax.f32 %v3822_v13, 0.0 }
 0x6ad   : > { %v4026_v11 = vpack.c.bf16 %v3980_v48, %v3979_v17 }
 0x6ae   : > { %v9961_v31 = vpop.f32.mrb[196].mxu1  ;;  %v4025_v53 = vpack.c.bf16 %v3978_v32, %v3977_v28 }
 0x6af   : > { %v3843_v36 = vadd.f32 %v9961_v31, %v12074_v55  ;;  %v3834_v22 = vpop.f32.mrb[197].mxu1 }
 0x6b0   : > { %v3835_v57 = vadd.f32 %v12074_v55, %v3834_v22  ;;  %v9962_v26 = vpop.f32.mrb[198].mxu1  ;;  %10035 = vmatprep.mubr.bf16.mxu0 %v4025_v53 }
 0x6b1   : > { %v3846_v14 = vadd.f32 %v9962_v26, %v12074_v55  ;;  %v3837_v30 = vpop.f32.mrb[199].mxu1  ;;  %10036 = vmatmul.mubr.bf16.gmra.mrb[192].mxu0 %v4026_v11  ;;  %v3983_v25 = vmax.f32 %v3843_v36, 0.0 }
 0x6b2   : > { %v3838_v29 = vadd.f32 %v12074_v55, %v3837_v30  ;;  %v3981_v27 = vmax.f32 %v3835_v57, 0.0 }
 0x6b3   : > { %v3984_v43 = vmax.f32 %v3846_v14, 0.0 }
 0x6b4   : > { %v3982_v45 = vmax.f32 %v3838_v29, 0.0 }
 0x6b5   : > { %v4028_v8 = vpack.c.bf16 %v3984_v43, %v3983_v25 }
 0x6b6   : > { %v4027_v58 = vpack.c.bf16 %v3982_v45, %v3981_v27 }
 0x6b8   : > { %10039 = vmatprep.mubr.bf16.mxu0 %v4027_v58 }
 0x6b9   : > { %10040 = vmatmul.mubr.bf16.gmra.mrb[196].mxu0 %v4028_v8 }
 0x6c4   : > { %v9965_v33 = vpop.f32.mrb[200].mxu1 }
 0x6c5   : > { %v3859_v21 = vadd.f32 %v9965_v33, %v12074_v55  ;;  %v3850_v34 = vpop.f32.mrb[201].mxu1 }
 0x6c6   : > { %v3851_v5 = vadd.f32 %v12074_v55, %v3850_v34  ;;  %v9966_v24 = vpop.f32.mrb[202].mxu1 }
 0x6c7   : > { %v3862_v52 = vadd.f32 %v9966_v24, %v12074_v55  ;;  %v3853_v2 = vpop.f32.mrb[203].mxu1  ;;  %v3987_v1 = vmax.f32 %v3859_v21, 0.0 }
 0x6c8   : > { %v3854_v10 = vadd.f32 %v12074_v55, %v3853_v2  ;;  %v3985_v38 = vmax.f32 %v3851_v5, 0.0 }
 0x6c9   : > { %v3988_v23 = vmax.f32 %v3862_v52, 0.0 }
 0x6ca   : > { %v3986_v63 = vmax.f32 %v3854_v10, 0.0 }
 0x6cb   : > { %v4030_v47 = vpack.c.bf16 %v3988_v23, %v3987_v1 }
 0x6cc   : > { %v4029_v6 = vpack.c.bf16 %v3986_v63, %v3985_v38 }
 0x6ce   : > { %10043 = vmatprep.mubr.bf16.mxu0 %v4029_v6 }
 0x6cf   : > { %10044 = vmatmul.mubr.bf16.gmra.mrb[200].mxu0 %v4030_v47 }
 0x6dc   : > { %v9969_v4 = vpop.f32.mrb[204].mxu1 }
 0x6dd   : > { %v3875_v39 = vadd.f32 %v9969_v4, %v12074_v55  ;;  %v3866_v40 = vpop.f32.mrb[205].mxu1 }
 0x6de   : > { %v3867_v42 = vadd.f32 %v12074_v55, %v3866_v40  ;;  %v9970_v44 = vpop.f32.mrb[206].mxu1 }
 0x6df   : > { %v3878_v60 = vadd.f32 %v9970_v44, %v12074_v55  ;;  %v3869_v16 = vpop.f32.mrb[207].mxu1  ;;  %v3991_v50 = vmax.f32 %v3875_v39, 0.0 }
 0x6e0   : > { %v3870_v46 = vadd.f32 %v12074_v55, %v3869_v16  ;;  %v3989_v18 = vmax.f32 %v3867_v42, 0.0 }
 0x6e1   : > { %v3992_v9 = vmax.f32 %v3878_v60, 0.0  ;;  %v12167_v60 = vld [vmem:[%s13230_s4 + $0x6] ss:$0 sm:$0xff] }
 0x6e2   : > { %v3990_v49 = vmax.f32 %v3870_v46, 0.0 }
 0x6e3   : > { %v4032_v3 = vpack.c.bf16 %v3992_v9, %v3991_v50 }
 0x6e4   : > { %v4031_v61 = vpack.c.bf16 %v3990_v49, %v3989_v18 }
 0x6e6   : > { %10047 = vmatprep.mubr.bf16.mxu0 %v4031_v61 }
 0x6e7   : > { %10048 = vmatmul.mubr.bf16.gmra.mrb[204].mxu0 %v4032_v3 }
 0x6f4   : > { %v9973_v19 = vpop.f32.mrb[208].mxu1 }
 0x6f5   : > { %v3891_v54 = vadd.f32 %v9973_v19, %v12074_v55  ;;  %v3882_v56 = vpop.f32.mrb[209].mxu1 }
 0x6f6   : > { %v3883_v62 = vadd.f32 %v12074_v55, %v3882_v56  ;;  %v9974_v7 = vpop.f32.mrb[210].mxu1 }
 0x6f7   : > { %v3894_v41 = vadd.f32 %v9974_v7, %v12074_v55  ;;  %v3885_v13 = vpop.f32.mrb[211].mxu1  ;;  %v3995_v17 = vmax.f32 %v3891_v54, 0.0 }
 0x6f8   : > { %v3886_v15 = vadd.f32 %v12074_v55, %v3885_v13  ;;  %v3993_v28 = vmax.f32 %v3883_v62, 0.0 }
 0x6f9   : > { %v3996_v48 = vmax.f32 %v3894_v41, 0.0 }
 0x6fa   : > { %v3994_v32 = vmax.f32 %v3886_v15, 0.0 }
 0x6fb   : > { %v4034_v11 = vpack.c.bf16 %v3996_v48, %v3995_v17 }
 0x6fc   : > { %v4033_v31 = vpack.c.bf16 %v3994_v32, %v3993_v28 }
 0x6fe   : > { %10051 = vmatprep.mubr.bf16.mxu0 %v4033_v31 }
 0x6ff   : > { %10052 = vmatmul.mubr.bf16.gmra.mrb[208].mxu0 %v4034_v11 }
 0x70c   : > { %v9977_v53 = vpop.f32.mrb[212].mxu1 }
 0x70d   : > { %v3907_v36 = vadd.f32 %v9977_v53, %v12074_v55  ;;  %v3898_v22 = vpop.f32.mrb[213].mxu1 }
 0x70e   : > { %v3899_v0 = vadd.f32 %v12074_v55, %v3898_v22  ;;  %v9978_v59 = vpop.f32.mrb[214].mxu1 }
 0x70f   : > { %v3910_v57 = vadd.f32 %v9978_v59, %v12074_v55  ;;  %v3901_v26 = vpop.f32.mrb[215].mxu1  ;;  %v3999_v30 = vmax.f32 %v3907_v36, 0.0 }
 0x710   : > { %v3902_v14 = vadd.f32 %v12074_v55, %v3901_v26  ;;  %v3997_v25 = vmax.f32 %v3899_v0, 0.0 }
 0x711   : > { %v4000_v29 = vmax.f32 %v3910_v57, 0.0 }
 0x712   : > { %v3998_v43 = vmax.f32 %v3902_v14, 0.0 }
 0x713   : > { %v4036_v51 = vpack.c.bf16 %v4000_v29, %v3999_v30 }
 0x714   : > { %v4035_v27 = vpack.c.bf16 %v3998_v43, %v3997_v25 }
 0x716   : > { %10055 = vmatprep.mubr.bf16.mxu0 %v4035_v27 }
 0x717   : > { %10056 = vmatmul.mubr.bf16.gmra.mrb[212].mxu0 %v4036_v51 }
 0x724   : > { %v9981_v45 = vpop.f32.mrb[216].mxu1 }
 0x725   : > { %v3923_v8 = vadd.f32 %v9981_v45, %v12074_v55  ;;  %v3914_v58 = vpop.f32.mrb[217].mxu1 }
 0x726   : > { %v3915_v20 = vadd.f32 %v12074_v55, %v3914_v58  ;;  %v9982_v12 = vpop.f32.mrb[218].mxu1 }
 0x727   : > { %v3926_v33 = vadd.f32 %v9982_v12, %v12074_v55  ;;  %v3917_v21 = vpop.f32.mrb[219].mxu1  ;;  %v4003_v35 = vmax.f32 %v3923_v8, 0.0 }
 0x728   : > { %v3918_v34 = vadd.f32 %v12074_v55, %v3917_v21  ;;  %v4001_v24 = vmax.f32 %v3915_v20, 0.0 }
 0x729   : > { %v4004_v5 = vmax.f32 %v3926_v33, 0.0 }
 0x72a   : > { %v4002_v52 = vmax.f32 %v3918_v34, 0.0 }
 0x72b   : > { %v4038_v2 = vpack.c.bf16 %v4004_v5, %v4003_v35 }
 0x72c   : > { %v4037_v10 = vpack.c.bf16 %v4002_v52, %v4001_v24 }
 0x72e   : > { %10059 = vmatprep.mubr.bf16.mxu0 %v4037_v10 }
 0x72f   : > { %10060 = vmatmul.mubr.bf16.gmra.mrb[216].mxu0 %v4038_v2 }
 0x73c   : > { %v9985_v1 = vpop.f32.mrb[220].mxu1 }
 0x73d   : > { %v3939_v23 = vadd.f32 %v9985_v1, %v12074_v55  ;;  %v3930_v37 = vpop.f32.mrb[221].mxu1 }
 0x73e   : > { %v3931_v38 = vadd.f32 %v12074_v55, %v3930_v37  ;;  %v9986_v63 = vpop.f32.mrb[222].mxu1 }
 0x73f   : > { %v3942_v47 = vadd.f32 %v9986_v63, %v12074_v55  ;;  %v3933_v6 = vpop.f32.mrb[223].mxu1  ;;  %v4007_v39 = vmax.f32 %v3939_v23, 0.0 }
 0x740   : > { %v3934_v4 = vadd.f32 %v12074_v55, %v3933_v6  ;;  %v4005_v42 = vmax.f32 %v3931_v38, 0.0 }
 0x741   : > { %v4008_v40 = vmax.f32 %v3942_v47, 0.0 }
 0x742   : > { %v4006_v44 = vmax.f32 %v3934_v4, 0.0 }
 0x743   : > { %v4040_v16 = vpack.c.bf16 %v4008_v40, %v4007_v39 }
 0x744   : > { %v10005_v46 = vpop.f32.mrb[160].mxu0  ;;  %v4039_v50 = vpack.c.bf16 %v4006_v44, %v4005_v42 }
 0x745   : > { %v4157_v9 = vadd.f32 %v10005_v46, %v12167_v60  ;;  %v4148_v18 = vpop.f32.mrb[161].mxu0 }
 0x746   : > { %v4149_v49 = vadd.f32 %v12167_v60, %v4148_v18  ;;  %v10006_v3 = vpop.f32.mrb[162].mxu0  ;;  %10063 = vmatprep.mubr.bf16.mxu0 %v4039_v50 }
 0x747   : > { %v4160_v55 = vadd.f32 %v10006_v3, %v12167_v60  ;;  %v4151_v61 = vpop.f32.mrb[163].mxu0  ;;  %10064 = vmatmul.mubr.bf16.gmra.mrb[220].mxu0 %v4040_v16  ;;  %v4405_v54 = vmax.f32 %v4157_v9, 0.0 }
 0x748   : > { %v4152_v19 = vadd.f32 %v12167_v60, %v4151_v61  ;;  %v4403_v62 = vmax.f32 %v4149_v49, 0.0 }
 0x749   : > { %v4406_v56 = vmax.f32 %v4160_v55, 0.0 }
 0x74a   : > { %v4404_v7 = vmax.f32 %v4152_v19, 0.0 }
 0x74b   : > { %v4468_v41 = vpack.c.bf16 %v4406_v56, %v4405_v54 }
 0x74c   : > { %v10009_v13 = vpop.f32.mrb[164].mxu0  ;;  %v4467_v15 = vpack.c.bf16 %v4404_v7, %v4403_v62 }
 0x74d   : > { %v4173_v17 = vadd.f32 %v10009_v13, %v12167_v60  ;;  %v4164_v48 = vpop.f32.mrb[165].mxu0 }
 0x74e   : > { %v4165_v28 = vadd.f32 %v12167_v60, %v4164_v48  ;;  %v10010_v32 = vpop.f32.mrb[166].mxu0  ;;  %10083 = vmatprep.mubr.bf16.mxu1 %v4467_v15 }
 0x74f   : > { %v4176_v11 = vadd.f32 %v10010_v32, %v12167_v60  ;;  %v4167_v31 = vpop.f32.mrb[167].mxu0  ;;  %10084 = vmatmul.mubr.bf16.vlgmr.msra.gmra.mrb[224].mxu1 %v4468_v41  ;;  %v4409_v36 = vmax.f32 %v4173_v17, 0.0 }
 0x750   : > { %v4168_v53 = vadd.f32 %v12167_v60, %v4167_v31  ;;  %v4407_v0 = vmax.f32 %v4165_v28, 0.0 }
 0x751   : > { %v4410_v22 = vmax.f32 %v4176_v11, 0.0 }
 0x752   : > { %v4408_v59 = vmax.f32 %v4168_v53, 0.0 }
 0x753   : > { %v4470_v57 = vpack.c.bf16 %v4410_v22, %v4409_v36 }
 0x754   : > { %v10013_v26 = vpop.f32.mrb[168].mxu0  ;;  %v4469_v14 = vpack.c.bf16 %v4408_v59, %v4407_v0 }
 0x755   : > { %v4189_v30 = vadd.f32 %v10013_v26, %v12167_v60  ;;  %v4180_v29 = vpop.f32.mrb[169].mxu0 }
 0x756   : > { %v4181_v25 = vadd.f32 %v12167_v60, %v4180_v29  ;;  %v10014_v43 = vpop.f32.mrb[170].mxu0  ;;  %10087 = vmatprep.mubr.bf16.mxu1 %v4469_v14 }
 0x757   : > { %v4192_v51 = vadd.f32 %v10014_v43, %v12167_v60  ;;  %v4183_v27 = vpop.f32.mrb[171].mxu0  ;;  %10088 = vmatmul.mubr.bf16.gmra.mrb[228].mxu1 %v4470_v57  ;;  %v4413_v8 = vmax.f32 %v4189_v30, 0.0 }
 0x758   : > { %v4184_v45 = vadd.f32 %v12167_v60, %v4183_v27  ;;  %v4411_v20 = vmax.f32 %v4181_v25, 0.0 }
 0x759   : > { %v4414_v58 = vmax.f32 %v4192_v51, 0.0 }
 0x75a   : > { %v4412_v12 = vmax.f32 %v4184_v45, 0.0 }
 0x75b   : > { %v4472_v33 = vpack.c.bf16 %v4414_v58, %v4413_v8 }
 0x75c   : > { %v10017_v21 = vpop.f32.mrb[172].mxu0  ;;  %v4471_v34 = vpack.c.bf16 %v4412_v12, %v4411_v20 }
 0x75d   : > { %v4205_v35 = vadd.f32 %v10017_v21, %v12167_v60  ;;  %v4196_v5 = vpop.f32.mrb[173].mxu0 }
 0x75e   : > { %v4197_v24 = vadd.f32 %v12167_v60, %v4196_v5  ;;  %v10018_v52 = vpop.f32.mrb[174].mxu0  ;;  %10091 = vmatprep.mubr.bf16.mxu1 %v4471_v34 }
 0x75f   : > { %v4208_v2 = vadd.f32 %v10018_v52, %v12167_v60  ;;  %v4199_v10 = vpop.f32.mrb[175].mxu0  ;;  %10092 = vmatmul.mubr.bf16.gmra.mrb[232].mxu1 %v4472_v33  ;;  %v4417_v23 = vmax.f32 %v4205_v35, 0.0 }
 0x760   : > { %v4200_v1 = vadd.f32 %v12167_v60, %v4199_v10  ;;  %v4415_v38 = vmax.f32 %v4197_v24, 0.0 }
 0x761   : > { %v4418_v37 = vmax.f32 %v4208_v2, 0.0 }
 0x762   : > { %v4416_v63 = vmax.f32 %v4200_v1, 0.0 }
 0x763   : > { %v4474_v47 = vpack.c.bf16 %v4418_v37, %v4417_v23 }
 0x764   : > { %v10021_v6 = vpop.f32.mrb[176].mxu0  ;;  %v4473_v4 = vpack.c.bf16 %v4416_v63, %v4415_v38 }
 0x765   : > { %v4221_v39 = vadd.f32 %v10021_v6, %v12167_v60  ;;  %v4212_v40 = vpop.f32.mrb[177].mxu0 }
 0x766   : > { %v4213_v42 = vadd.f32 %v12167_v60, %v4212_v40  ;;  %v10022_v44 = vpop.f32.mrb[178].mxu0  ;;  %10095 = vmatprep.mubr.bf16.mxu1 %v4473_v4 }
 0x767   : > { %v4224_v16 = vadd.f32 %v10022_v44, %v12167_v60  ;;  %v4215_v46 = vpop.f32.mrb[179].mxu0  ;;  %10096 = vmatmul.mubr.bf16.gmra.mrb[236].mxu1 %v4474_v47  ;;  %v4421_v9 = vmax.f32 %v4221_v39, 0.0 }
 0x768   : > { %v4216_v50 = vadd.f32 %v12167_v60, %v4215_v46  ;;  %v4419_v49 = vmax.f32 %v4213_v42, 0.0  ;;  %v10863_v42 = vld [vmem:[%s13229_s3 + $0x200] sm:$0xff]  }
 0x769   : > { %v4422_v18 = vmax.f32 %v4224_v16, 0.0  ;;  %10147 = vmatprep.subr.bf16.mxu0 %v10863_v42 }
 0x76a   : > { %v4420_v3 = vmax.f32 %v4216_v50, 0.0  ;;  %10148 = vmatpush3.bf16.msra.mxu0 %v10863_v42 }
 0x76b   : > { %v4476_v55 = vpack.c.bf16 %v4422_v18, %v4421_v9 }
 0x76c   : > { %v10025_v61 = vpop.f32.mrb[180].mxu0  ;;  %v4475_v19 = vpack.c.bf16 %v4420_v3, %v4419_v49  ;;  %v10864_v3 = vld [vmem:[%s13229_s3 + $0x208] sm:$0xff]  }
 0x76d   : > { %v4237_v54 = vadd.f32 %v10025_v61, %v12167_v60  ;;  %v4228_v56 = vpop.f32.mrb[181].mxu0  ;;  %10149 = vmatprep.subr.bf16.mxu0 %v10864_v3 }
 0x76e   : > { %v4229_v62 = vadd.f32 %v12167_v60, %v4228_v56  ;;  %v10026_v7 = vpop.f32.mrb[182].mxu0  ;;  %10099 = vmatprep.mubr.bf16.mxu1 %v4475_v19  ;;  %10150 = vmatpush3.bf16.msra.mxu0 %v10864_v3 }
 0x76f   : > { %v4240_v41 = vadd.f32 %v10026_v7, %v12167_v60  ;;  %v4231_v13 = vpop.f32.mrb[183].mxu0  ;;  %10100 = vmatmul.mubr.bf16.gmra.mrb[240].mxu1 %v4476_v55  ;;  %v4425_v17 = vmax.f32 %v4237_v54, 0.0  ;;  %v10865_v55 = vld [vmem:[%s13229_s3 + $0x210] sm:$0xff]  }
 0x770   : > { %v4232_v15 = vadd.f32 %v12167_v60, %v4231_v13  ;;  %v4423_v28 = vmax.f32 %v4229_v62, 0.0  ;;  %10151 = vmatprep.subr.bf16.mxu0 %v10865_v55  ;;  %v10866_v13 = vld [vmem:[%s13229_s3 + $0x218] sm:$0xff]  }
 0x771   : > { %v4426_v48 = vmax.f32 %v4240_v41, 0.0 }
 0x772   : > { %v4424_v32 = vmax.f32 %v4232_v15, 0.0  ;;  %10152 = vmatpush3.bf16.msra.mxu0 %v10865_v55 }
 0x773   : > { %v4478_v11 = vpack.c.bf16 %v4426_v48, %v4425_v17  ;;  %10153 = vmatprep.subr.bf16.mxu0 %v10866_v13 }
 0x774   : > { %v10029_v31 = vpop.f32.mrb[184].mxu0  ;;  %v4477_v53 = vpack.c.bf16 %v4424_v32, %v4423_v28  ;;  %v10867_v32 = vld [vmem:[%s13229_s3 + $0x220] sm:$0xff]  }
 0x775   : > { %v4253_v36 = vadd.f32 %v10029_v31, %v12167_v60  ;;  %v4244_v22 = vpop.f32.mrb[185].mxu0 }
 0x776   : > { %v4245_v0 = vadd.f32 %v12167_v60, %v4244_v22  ;;  %v10030_v59 = vpop.f32.mrb[186].mxu0  ;;  %10103 = vmatprep.mubr.bf16.mxu1 %v4477_v53  ;;  %10154 = vmatpush3.bf16.msra.mxu0 %v10866_v13  ;;  %v10869_v22 = vld [vmem:[%s13229_s3 + $0x230] sm:$0xff]  }
 0x777   : > { %v4256_v57 = vadd.f32 %v10030_v59, %v12167_v60  ;;  %v4247_v26 = vpop.f32.mrb[187].mxu0  ;;  %10104 = vmatmul.mubr.bf16.gmra.mrb[244].mxu1 %v4478_v11  ;;  %v4429_v30 = vmax.f32 %v4253_v36, 0.0  ;;  %10155 = vmatprep.subr.bf16.mxu0 %v10867_v32  ;;  %v10868_v11 = vld [vmem:[%s13229_s3 + $0x228] sm:$0xff]  }
 0x778   : > { %v4248_v14 = vadd.f32 %v12167_v60, %v4247_v26  ;;  %v4427_v25 = vmax.f32 %v4245_v0, 0.0 }
 0x779   : > { %v4430_v29 = vmax.f32 %v4256_v57, 0.0 }
 0x77a   : > { %v4428_v43 = vmax.f32 %v4248_v14, 0.0  ;;  %10156 = vmatpush3.bf16.msra.mxu0 %v10867_v32 }
 0x77b   : > { %v4480_v51 = vpack.c.bf16 %v4430_v29, %v4429_v30  ;;  %10157 = vmatprep.subr.bf16.mxu0 %v10868_v11 }
 0x77c   : > { %v10033_v27 = vpop.f32.mrb[188].mxu0  ;;  %v4479_v45 = vpack.c.bf16 %v4428_v43, %v4427_v25  ;;  %v10870_v25 = vld [vmem:[%s13229_s3 + $0x238] sm:$0xff]  }
 0x77d   : > { %v4269_v8 = vadd.f32 %v10033_v27, %v12167_v60  ;;  %v4260_v58 = vpop.f32.mrb[189].mxu0 }
 0x77e   : > { %v4261_v20 = vadd.f32 %v12167_v60, %v4260_v58  ;;  %v10034_v12 = vpop.f32.mrb[190].mxu0  ;;  %10107 = vmatprep.mubr.bf16.mxu1 %v4479_v45  ;;  %10158 = vmatpush3.bf16.msra.mxu0 %v10868_v11 }
 0x77f   : > { %v4272_v33 = vadd.f32 %v10034_v12, %v12167_v60  ;;  %v4263_v21 = vpop.f32.mrb[191].mxu0  ;;  %10108 = vmatmul.mubr.bf16.gmra.mrb[248].mxu1 %v4480_v51  ;;  %v4433_v35 = vmax.f32 %v4269_v8, 0.0  ;;  %10159 = vmatprep.subr.bf16.mxu0 %v10869_v22 }
 0x780   : > { %v4264_v34 = vadd.f32 %v12167_v60, %v4263_v21  ;;  %v4431_v24 = vmax.f32 %v4261_v20, 0.0 }
 0x781   : > { %v4434_v5 = vmax.f32 %v4272_v33, 0.0 }
 0x782   : > { %v4432_v52 = vmax.f32 %v4264_v34, 0.0  ;;  %10160 = vmatpush3.bf16.msra.mxu0 %v10869_v22 }
 0x783   : > { %v4482_v2 = vpack.c.bf16 %v4434_v5, %v4433_v35  ;;  %10161 = vmatprep.subr.bf16.mxu0 %v10870_v25 }
 0x784   : > { %v10037_v10 = vpop.f32.mrb[192].mxu0  ;;  %v4481_v1 = vpack.c.bf16 %v4432_v52, %v4431_v24 }
 0x785   : > { %v4285_v23 = vadd.f32 %v10037_v10, %v12167_v60  ;;  %v4276_v37 = vpop.f32.mrb[193].mxu0 }
 0x786   : > { %v4277_v38 = vadd.f32 %v12167_v60, %v4276_v37  ;;  %v10038_v63 = vpop.f32.mrb[194].mxu0  ;;  %10111 = vmatprep.mubr.bf16.mxu1 %v4481_v1  ;;  %10162 = vmatpush3.bf16.msra.mxu0 %v10870_v25 }
 0x787   : > { %v4288_v47 = vadd.f32 %v10038_v63, %v12167_v60  ;;  %v4279_v6 = vpop.f32.mrb[195].mxu0  ;;  %10112 = vmatmul.mubr.bf16.gmra.mrb[252].mxu1 %v4482_v2  ;;  %v4437_v39 = vmax.f32 %v4285_v23, 0.0 }
 0x788   : > { %v4280_v4 = vadd.f32 %v12167_v60, %v4279_v6  ;;  %v4435_v44 = vmax.f32 %v4277_v38, 0.0 }
 0x789   : > { %v4438_v40 = vmax.f32 %v4288_v47, 0.0 }
 0x78a   : > { %v4436_v16 = vmax.f32 %v4280_v4, 0.0 }
 0x78b   : > { %v4484_v46 = vpack.c.bf16 %v4438_v40, %v4437_v39 }
 0x78c   : > { %v10041_v50 = vpop.f32.mrb[196].mxu0  ;;  %v4483_v9 = vpack.c.bf16 %v4436_v16, %v4435_v44 }
 0x78d   : > { %v4301_v18 = vadd.f32 %v10041_v50, %v12167_v60  ;;  %v4292_v49 = vpop.f32.mrb[197].mxu0 }
 0x78e   : > { %v4293_v61 = vadd.f32 %v12167_v60, %v4292_v49  ;;  %v10042_v19 = vpop.f32.mrb[198].mxu0  ;;  %10115 = vmatprep.mubr.bf16.mxu1 %v4483_v9 }
 0x78f   : > { %v4304_v54 = vadd.f32 %v10042_v19, %v12167_v60  ;;  %v4295_v56 = vpop.f32.mrb[199].mxu0  ;;  %10116 = vmatmul.mubr.bf16.gmra.mrb[0].mxu1 %v4484_v46  ;;  %v4441_v7 = vmax.f32 %v4301_v18, 0.0 }
 0x790   : > { %v4296_v62 = vadd.f32 %v12167_v60, %v4295_v56  ;;  %v4439_v15 = vmax.f32 %v4293_v61, 0.0 }
 0x791   : > { %v4442_v41 = vmax.f32 %v4304_v54, 0.0 }
 0x792   : > { %v4440_v17 = vmax.f32 %v4296_v62, 0.0 }
 0x793   : > { %v4486_v48 = vpack.c.bf16 %v4442_v41, %v4441_v7 }
 0x794   : > { %v4485_v28 = vpack.c.bf16 %v4440_v17, %v4439_v15 }
 0x796   : > { %10119 = vmatprep.mubr.bf16.mxu1 %v4485_v28 }
 0x797   : > { %10120 = vmatmul.mubr.bf16.gmra.mrb[4].mxu1 %v4486_v48 }
 0x7a2   : > { %v10045_v31 = vpop.f32.mrb[200].mxu0 }
 0x7a3   : > { %v4317_v53 = vadd.f32 %v10045_v31, %v12167_v60  ;;  %v4308_v36 = vpop.f32.mrb[201].mxu0 }
 0x7a4   : > { %v4309_v0 = vadd.f32 %v12167_v60, %v4308_v36  ;;  %v10046_v59 = vpop.f32.mrb[202].mxu0 }
 0x7a5   : > { %v4320_v57 = vadd.f32 %v10046_v59, %v12167_v60  ;;  %v4311_v26 = vpop.f32.mrb[203].mxu0  ;;  %v4445_v30 = vmax.f32 %v4317_v53, 0.0 }
 0x7a6   : > { %v4312_v14 = vadd.f32 %v12167_v60, %v4311_v26  ;;  %v4443_v43 = vmax.f32 %v4309_v0, 0.0 }
 0x7a7   : > { %v4446_v29 = vmax.f32 %v4320_v57, 0.0 }
 0x7a8   : > { %v4444_v51 = vmax.f32 %v4312_v14, 0.0 }
 0x7a9   : > { %v4488_v27 = vpack.c.bf16 %v4446_v29, %v4445_v30 }
 0x7aa   : > { %v4487_v45 = vpack.c.bf16 %v4444_v51, %v4443_v43 }
 0x7ac   : > { %10123 = vmatprep.mubr.bf16.mxu1 %v4487_v45 }
 0x7ad   : > { %10124 = vmatmul.mubr.bf16.gmra.mrb[8].mxu1 %v4488_v27 }
 0x7ba   : > { %v10049_v8 = vpop.f32.mrb[204].mxu0 }
 0x7bb   : > { %v4333_v58 = vadd.f32 %v10049_v8, %v12167_v60  ;;  %v4324_v20 = vpop.f32.mrb[205].mxu0 }
 0x7bc   : > { %v4325_v12 = vadd.f32 %v12167_v60, %v4324_v20  ;;  %v10050_v33 = vpop.f32.mrb[206].mxu0 }
 0x7bd   : > { %v4336_v21 = vadd.f32 %v10050_v33, %v12167_v60  ;;  %v4327_v34 = vpop.f32.mrb[207].mxu0  ;;  %v4449_v5 = vmax.f32 %v4333_v58, 0.0 }
 0x7be   : > { %v4328_v35 = vadd.f32 %v12167_v60, %v4327_v34  ;;  %v4447_v52 = vmax.f32 %v4325_v12, 0.0 }
 0x7bf   : > { %v4450_v24 = vmax.f32 %v4336_v21, 0.0  ;;  %v12260_v21 = vld [vmem:[%s13230_s4 + $0x7] ss:$0 sm:$0xff] }
 0x7c0   : > { %v4448_v2 = vmax.f32 %v4328_v35, 0.0 }
 0x7c1   : > { %v4490_v10 = vpack.c.bf16 %v4450_v24, %v4449_v5 }
 0x7c2   : > { %v4489_v1 = vpack.c.bf16 %v4448_v2, %v4447_v52 }
 0x7c4   : > { %10127 = vmatprep.mubr.bf16.mxu1 %v4489_v1 }
 0x7c5   : > { %10128 = vmatmul.mubr.bf16.gmra.mrb[12].mxu1 %v4490_v10 }
 0x7d2   : > { %v10053_v23 = vpop.f32.mrb[208].mxu0 }
 0x7d3   : > { %v4349_v37 = vadd.f32 %v10053_v23, %v12167_v60  ;;  %v4340_v38 = vpop.f32.mrb[209].mxu0 }
 0x7d4   : > { %v4341_v63 = vadd.f32 %v12167_v60, %v4340_v38  ;;  %v10054_v47 = vpop.f32.mrb[210].mxu0 }
 0x7d5   : > { %v4352_v6 = vadd.f32 %v10054_v47, %v12167_v60  ;;  %v4343_v4 = vpop.f32.mrb[211].mxu0  ;;  %v4453_v40 = vmax.f32 %v4349_v37, 0.0 }
 0x7d6   : > { %v4344_v39 = vadd.f32 %v12167_v60, %v4343_v4  ;;  %v4451_v44 = vmax.f32 %v4341_v63, 0.0 }
 0x7d7   : > { %v4454_v42 = vmax.f32 %v4352_v6, 0.0 }
 0x7d8   : > { %v4452_v16 = vmax.f32 %v4344_v39, 0.0 }
 0x7d9   : > { %v4492_v46 = vpack.c.bf16 %v4454_v42, %v4453_v40 }
 0x7da   : > { %v4491_v50 = vpack.c.bf16 %v4452_v16, %v4451_v44 }
 0x7dc   : > { %10131 = vmatprep.mubr.bf16.mxu1 %v4491_v50 }
 0x7dd   : > { %10132 = vmatmul.mubr.bf16.gmra.mrb[16].mxu1 %v4492_v46 }
 0x7ea   : > { %v10057_v9 = vpop.f32.mrb[212].mxu0 }
 0x7eb   : > { %v4365_v18 = vadd.f32 %v10057_v9, %v12167_v60  ;;  %v4356_v49 = vpop.f32.mrb[213].mxu0 }
 0x7ec   : > { %v4357_v3 = vadd.f32 %v12167_v60, %v4356_v49  ;;  %v10058_v55 = vpop.f32.mrb[214].mxu0 }
 0x7ed   : > { %v4368_v61 = vadd.f32 %v10058_v55, %v12167_v60  ;;  %v4359_v19 = vpop.f32.mrb[215].mxu0  ;;  %v4457_v56 = vmax.f32 %v4365_v18, 0.0 }
 0x7ee   : > { %v4360_v54 = vadd.f32 %v12167_v60, %v4359_v19  ;;  %v4455_v7 = vmax.f32 %v4357_v3, 0.0 }
 0x7ef   : > { %v4458_v62 = vmax.f32 %v4368_v61, 0.0 }
 0x7f0   : > { %v4456_v41 = vmax.f32 %v4360_v54, 0.0 }
 0x7f1   : > { %v4494_v13 = vpack.c.bf16 %v4458_v62, %v4457_v56 }
 0x7f2   : > { %v4493_v15 = vpack.c.bf16 %v4456_v41, %v4455_v7 }
 0x7f4   : > { %10135 = vmatprep.mubr.bf16.mxu1 %v4493_v15 }
 0x7f5   : > { %10136 = vmatmul.mubr.bf16.gmra.mrb[20].mxu1 %v4494_v13 }
 0x802   : > { %v10061_v17 = vpop.f32.mrb[216].mxu0 }
 0x803   : > { %v4381_v48 = vadd.f32 %v10061_v17, %v12167_v60  ;;  %v4372_v28 = vpop.f32.mrb[217].mxu0 }
 0x804   : > { %v4373_v32 = vadd.f32 %v12167_v60, %v4372_v28  ;;  %v10062_v11 = vpop.f32.mrb[218].mxu0 }
 0x805   : > { %v4384_v31 = vadd.f32 %v10062_v11, %v12167_v60  ;;  %v4375_v53 = vpop.f32.mrb[219].mxu0  ;;  %v4461_v22 = vmax.f32 %v4381_v48, 0.0 }
 0x806   : > { %v4376_v36 = vadd.f32 %v12167_v60, %v4375_v53  ;;  %v4459_v59 = vmax.f32 %v4373_v32, 0.0 }
 0x807   : > { %v4462_v0 = vmax.f32 %v4384_v31, 0.0 }
 0x808   : > { %v4460_v57 = vmax.f32 %v4376_v36, 0.0 }
 0x809   : > { %v4496_v26 = vpack.c.bf16 %v4462_v0, %v4461_v22 }
 0x80a   : > { %v4495_v14 = vpack.c.bf16 %v4460_v57, %v4459_v59 }
 0x80c   : > { %10139 = vmatprep.mubr.bf16.mxu1 %v4495_v14 }
 0x80d   : > { %10140 = vmatmul.mubr.bf16.gmra.mrb[24].mxu1 %v4496_v26 }
 0x81a   : > { %v10065_v30 = vpop.f32.mrb[220].mxu0 }
 0x81b   : > { %v4397_v29 = vadd.f32 %v10065_v30, %v12167_v60  ;;  %v4388_v25 = vpop.f32.mrb[221].mxu0 }
 0x81c   : > { %v4389_v43 = vadd.f32 %v12167_v60, %v4388_v25  ;;  %v10066_v51 = vpop.f32.mrb[222].mxu0 }
 0x81d   : > { %v4400_v27 = vadd.f32 %v10066_v51, %v12167_v60  ;;  %v4391_v45 = vpop.f32.mrb[223].mxu0  ;;  %v4465_v58 = vmax.f32 %v4397_v29, 0.0 }
 0x81e   : > { %v4392_v8 = vadd.f32 %v12167_v60, %v4391_v45  ;;  %v4463_v12 = vmax.f32 %v4389_v43, 0.0 }
 0x81f   : > { %v4466_v20 = vmax.f32 %v4400_v27, 0.0 }
 0x820   : > { %v4464_v33 = vmax.f32 %v4392_v8, 0.0 }
 0x821   : > { %v4498_v34 = vpack.c.bf16 %v4466_v20, %v4465_v58 }
 0x822   : > { %v10085_v35 = vpop.f32.mrb[224].mxu1  ;;  %v4497_v5 = vpack.c.bf16 %v4464_v33, %v4463_v12 }
 0x823   : > { %v4615_v24 = vadd.f32 %v10085_v35, %v12260_v21  ;;  %v4606_v52 = vpop.f32.mrb[225].mxu1 }
 0x824   : > { %v4607_v2 = vadd.f32 %v12260_v21, %v4606_v52  ;;  %v10086_v10 = vpop.f32.mrb[226].mxu1  ;;  %10143 = vmatprep.mubr.bf16.mxu1 %v4497_v5 }
 0x825   : > { %v4618_v60 = vadd.f32 %v10086_v10, %v12260_v21  ;;  %v4609_v1 = vpop.f32.mrb[227].mxu1  ;;  %10144 = vmatmul.mubr.bf16.gmra.mrb[28].mxu1 %v4498_v34  ;;  %v4863_v37 = vmax.f32 %v4615_v24, 0.0 }
 0x826   : > { %v4610_v23 = vadd.f32 %v12260_v21, %v4609_v1  ;;  %v4861_v63 = vmax.f32 %v4607_v2, 0.0 }
 0x827   : > { %v4864_v38 = vmax.f32 %v4618_v60, 0.0 }
 0x828   : > { %v4862_v47 = vmax.f32 %v4610_v23, 0.0 }
 0x829   : > { %v4926_v6 = vpack.c.bf16 %v4864_v38, %v4863_v37 }
 0x82a   : > { %v4925_v4 = vpack.c.bf16 %v4862_v47, %v4861_v63  ;;  %v10089_v39 = vpop.f32.mrb[228].mxu1 }
 0x82b   : > { %v4631_v40 = vadd.f32 %v10089_v39, %v12260_v21  ;;  %v4622_v42 = vpop.f32.mrb[229].mxu1 }
 0x82c   : > { %v4623_v44 = vadd.f32 %v12260_v21, %v4622_v42  ;;  %v10090_v16 = vpop.f32.mrb[230].mxu1  ;;  %10163 = vmatprep.mubr.bf16.mxu0 %v4925_v4 }
 0x82d   : > { %v4634_v46 = vadd.f32 %v10090_v16, %v12260_v21  ;;  %v4625_v50 = vpop.f32.mrb[231].mxu1  ;;  %10164 = vmatmul.mubr.bf16.vlgmr.msra.gmra.mrb[224].mxu0 %v4926_v6  ;;  %v4867_v18 = vmax.f32 %v4631_v40, 0.0 }
 0x82e   : > { %v4626_v9 = vadd.f32 %v12260_v21, %v4625_v50  ;;  %v4865_v3 = vmax.f32 %v4623_v44, 0.0 }
 0x82f   : > { %v4868_v49 = vmax.f32 %v4634_v46, 0.0 }
 0x830   : > { %v4866_v55 = vmax.f32 %v4626_v9, 0.0 }
 0x831   : > { %v4928_v61 = vpack.c.bf16 %v4868_v49, %v4867_v18 }
 0x832   : > { %v4927_v19 = vpack.c.bf16 %v4866_v55, %v4865_v3  ;;  %v10093_v54 = vpop.f32.mrb[232].mxu1 }
 0x833   : > { %v4647_v56 = vadd.f32 %v10093_v54, %v12260_v21  ;;  %v4638_v62 = vpop.f32.mrb[233].mxu1 }
 0x834   : > { %v4639_v7 = vadd.f32 %v12260_v21, %v4638_v62  ;;  %v10094_v41 = vpop.f32.mrb[234].mxu1  ;;  %10167 = vmatprep.mubr.bf16.mxu0 %v4927_v19 }
 0x835   : > { %v4650_v13 = vadd.f32 %v10094_v41, %v12260_v21  ;;  %v4641_v15 = vpop.f32.mrb[235].mxu1  ;;  %10168 = vmatmul.mubr.bf16.gmra.mrb[228].mxu0 %v4928_v61  ;;  %v4871_v48 = vmax.f32 %v4647_v56, 0.0 }
 0x836   : > { %v4642_v17 = vadd.f32 %v12260_v21, %v4641_v15  ;;  %v4869_v32 = vmax.f32 %v4639_v7, 0.0 }
 0x837   : > { %v4872_v28 = vmax.f32 %v4650_v13, 0.0 }
 0x838   : > { %v4870_v11 = vmax.f32 %v4642_v17, 0.0 }
 0x839   : > { %v4930_v31 = vpack.c.bf16 %v4872_v28, %v4871_v48 }
 0x83a   : > { %v4929_v53 = vpack.c.bf16 %v4870_v11, %v4869_v32  ;;  %v10097_v36 = vpop.f32.mrb[236].mxu1 }
 0x83b   : > { %v4663_v22 = vadd.f32 %v10097_v36, %v12260_v21  ;;  %v4654_v0 = vpop.f32.mrb[237].mxu1 }
 0x83c   : > { %v4655_v59 = vadd.f32 %v12260_v21, %v4654_v0  ;;  %v10098_v57 = vpop.f32.mrb[238].mxu1  ;;  %10171 = vmatprep.mubr.bf16.mxu0 %v4929_v53 }
 0x83d   : > { %v4666_v26 = vadd.f32 %v10098_v57, %v12260_v21  ;;  %v4657_v14 = vpop.f32.mrb[239].mxu1  ;;  %10172 = vmatmul.mubr.bf16.gmra.mrb[232].mxu0 %v4930_v31  ;;  %v4875_v29 = vmax.f32 %v4663_v22, 0.0 }
 0x83e   : > { %v4658_v30 = vadd.f32 %v12260_v21, %v4657_v14  ;;  %v4873_v43 = vmax.f32 %v4655_v59, 0.0 }
 0x83f   : > { %v4876_v25 = vmax.f32 %v4666_v26, 0.0 }
 0x840   : > { %v4874_v51 = vmax.f32 %v4658_v30, 0.0 }
 0x841   : > { %v4932_v27 = vpack.c.bf16 %v4876_v25, %v4875_v29 }
 0x842   : > { %v4931_v45 = vpack.c.bf16 %v4874_v51, %v4873_v43  ;;  %v10101_v8 = vpop.f32.mrb[240].mxu1 }
 0x843   : > { %v4679_v58 = vadd.f32 %v10101_v8, %v12260_v21  ;;  %v4670_v20 = vpop.f32.mrb[241].mxu1 }
 0x844   : > { %v4671_v12 = vadd.f32 %v12260_v21, %v4670_v20  ;;  %v10102_v33 = vpop.f32.mrb[242].mxu1  ;;  %10175 = vmatprep.mubr.bf16.mxu0 %v4931_v45 }
 0x845   : > { %v4682_v34 = vadd.f32 %v10102_v33, %v12260_v21  ;;  %v4673_v35 = vpop.f32.mrb[243].mxu1  ;;  %10176 = vmatmul.mubr.bf16.gmra.mrb[236].mxu0 %v4932_v27  ;;  %v4879_v24 = vmax.f32 %v4679_v58, 0.0 }
 0x846   : > { %v4674_v5 = vadd.f32 %v12260_v21, %v4673_v35  ;;  %v4877_v2 = vmax.f32 %v4671_v12, 0.0 }
 0x847   : > { %v4880_v52 = vmax.f32 %v4682_v34, 0.0  ;;  %v10871_v34 = vld [vmem:[%s13229_s3 + $0x240] sm:$0xff]  }
 0x848   : > { %v4878_v10 = vmax.f32 %v4674_v5, 0.0  ;;  %10227 = vmatprep.subr.bf16.mxu1 %v10871_v34 }
 0x849   : > { %v4934_v60 = vpack.c.bf16 %v4880_v52, %v4879_v24  ;;  %10228 = vmatpush3.bf16.msra.mxu1 %v10871_v34 }
 0x84a   : > { %v4933_v1 = vpack.c.bf16 %v4878_v10, %v4877_v2  ;;  %v10105_v23 = vpop.f32.mrb[244].mxu1  ;;  %v10872_v10 = vld [vmem:[%s13229_s3 + $0x248] sm:$0xff]  }
 0x84b   : > { %v4695_v37 = vadd.f32 %v10105_v23, %v12260_v21  ;;  %v4686_v38 = vpop.f32.mrb[245].mxu1  ;;  %v10873_v23 = vld [vmem:[%s13229_s3 + $0x250] sm:$0xff]   ;;  %10229 = vmatprep.subr.bf16.mxu1 %v10872_v10 }
 0x84c   : > { %v4687_v63 = vadd.f32 %v12260_v21, %v4686_v38  ;;  %v10106_v47 = vpop.f32.mrb[246].mxu1  ;;  %10179 = vmatprep.mubr.bf16.mxu0 %v4933_v1 }
 0x84d   : > { %v4698_v6 = vadd.f32 %v10106_v47, %v12260_v21  ;;  %v4689_v4 = vpop.f32.mrb[247].mxu1  ;;  %10180 = vmatmul.mubr.bf16.gmra.mrb[240].mxu0 %v4934_v60  ;;  %v4883_v40 = vmax.f32 %v4695_v37, 0.0  ;;  %10230 = vmatpush3.bf16.msra.mxu1 %v10872_v10 }
 0x84e   : > { %v4690_v39 = vadd.f32 %v12260_v21, %v4689_v4  ;;  %v4881_v44 = vmax.f32 %v4687_v63, 0.0  ;;  %10231 = vmatprep.subr.bf16.mxu1 %v10873_v23 }
 0x84f   : > { %v4884_v42 = vmax.f32 %v4698_v6, 0.0 }
 0x850   : > { %v4882_v16 = vmax.f32 %v4690_v39, 0.0 }
 0x851   : > { %v4936_v46 = vpack.c.bf16 %v4884_v42, %v4883_v40  ;;  %v10874_v40 = vld [vmem:[%s13229_s3 + $0x258] sm:$0xff]   ;;  %10232 = vmatpush3.bf16.msra.mxu1 %v10873_v23 }
 0x852   : > { %v4935_v50 = vpack.c.bf16 %v4882_v16, %v4881_v44  ;;  %v10109_v9 = vpop.f32.mrb[248].mxu1  ;;  %10233 = vmatprep.subr.bf16.mxu1 %v10874_v40  ;;  %v10875_v16 = vld [vmem:[%s13229_s3 + $0x260] sm:$0xff]  }
 0x853   : > { %v4711_v18 = vadd.f32 %v10109_v9, %v12260_v21  ;;  %v4702_v49 = vpop.f32.mrb[249].mxu1 }
 0x854   : > { %v4703_v3 = vadd.f32 %v12260_v21, %v4702_v49  ;;  %v10110_v55 = vpop.f32.mrb[250].mxu1  ;;  %10183 = vmatprep.mubr.bf16.mxu0 %v4935_v50  ;;  %v10877_v49 = vld [vmem:[%s13229_s3 + $0x270] sm:$0xff]  }
 0x855   : > { %v4714_v61 = vadd.f32 %v10110_v55, %v12260_v21  ;;  %v4705_v19 = vpop.f32.mrb[251].mxu1  ;;  %10184 = vmatmul.mubr.bf16.gmra.mrb[244].mxu0 %v4936_v46  ;;  %v4887_v56 = vmax.f32 %v4711_v18, 0.0  ;;  %10234 = vmatpush3.bf16.msra.mxu1 %v10874_v40  ;;  %v10876_v46 = vld [vmem:[%s13229_s3 + $0x268] sm:$0xff]  }
 0x856   : > { %v4706_v54 = vadd.f32 %v12260_v21, %v4705_v19  ;;  %v4885_v7 = vmax.f32 %v4703_v3, 0.0  ;;  %10235 = vmatprep.subr.bf16.mxu1 %v10875_v16 }
 0x857   : > { %v4888_v62 = vmax.f32 %v4714_v61, 0.0 }
 0x858   : > { %v4886_v41 = vmax.f32 %v4706_v54, 0.0 }
 0x859   : > { %v4938_v13 = vpack.c.bf16 %v4888_v62, %v4887_v56  ;;  %10236 = vmatpush3.bf16.msra.mxu1 %v10875_v16 }
 0x85a   : > { %v4937_v15 = vpack.c.bf16 %v4886_v41, %v4885_v7  ;;  %v10113_v17 = vpop.f32.mrb[252].mxu1  ;;  %10237 = vmatprep.subr.bf16.mxu1 %v10876_v46  ;;  %v10878_v7 = vld [vmem:[%s13229_s3 + $0x278] sm:$0xff]  }
 0x85b   : > { %v4727_v48 = vadd.f32 %v10113_v17, %v12260_v21  ;;  %v4718_v28 = vpop.f32.mrb[253].mxu1 }
 0x85c   : > { %v4719_v32 = vadd.f32 %v12260_v21, %v4718_v28  ;;  %v10114_v11 = vpop.f32.mrb[254].mxu1  ;;  %10187 = vmatprep.mubr.bf16.mxu0 %v4937_v15 }
 0x85d   : > { %v4730_v31 = vadd.f32 %v10114_v11, %v12260_v21  ;;  %v4721_v53 = vpop.f32.mrb[255].mxu1  ;;  %10188 = vmatmul.mubr.bf16.gmra.mrb[248].mxu0 %v4938_v13  ;;  %v4891_v22 = vmax.f32 %v4727_v48, 0.0  ;;  %10238 = vmatpush3.bf16.msra.mxu1 %v10876_v46 }
 0x85e   : > { %v4722_v36 = vadd.f32 %v12260_v21, %v4721_v53  ;;  %v4889_v59 = vmax.f32 %v4719_v32, 0.0  ;;  %10239 = vmatprep.subr.bf16.mxu1 %v10877_v49 }
 0x85f   : > { %v4892_v0 = vmax.f32 %v4730_v31, 0.0 }
 0x860   : > { %v4890_v57 = vmax.f32 %v4722_v36, 0.0 }
 0x861   : > { %v4940_v26 = vpack.c.bf16 %v4892_v0, %v4891_v22  ;;  %10240 = vmatpush3.bf16.msra.mxu1 %v10877_v49 }
 0x862   : > { %v4939_v14 = vpack.c.bf16 %v4890_v57, %v4889_v59  ;;  %v10117_v30 = vpop.f32.mrb[0].mxu1  ;;  %10241 = vmatprep.subr.bf16.mxu1 %v10878_v7 }
 0x863   : > { %v4743_v29 = vadd.f32 %v10117_v30, %v12260_v21  ;;  %v4734_v25 = vpop.f32.mrb[1].mxu1 }
 0x864   : > { %v4735_v43 = vadd.f32 %v12260_v21, %v4734_v25  ;;  %v10118_v51 = vpop.f32.mrb[2].mxu1  ;;  %10191 = vmatprep.mubr.bf16.mxu0 %v4939_v14 }
 0x865   : > { %v4746_v27 = vadd.f32 %v10118_v51, %v12260_v21  ;;  %v4737_v45 = vpop.f32.mrb[3].mxu1  ;;  %10192 = vmatmul.mubr.bf16.gmra.mrb[252].mxu0 %v4940_v26  ;;  %v4895_v58 = vmax.f32 %v4743_v29, 0.0  ;;  %10242 = vmatpush3.bf16.msra.mxu1 %v10878_v7 }
 0x866   : > { %v4738_v8 = vadd.f32 %v12260_v21, %v4737_v45  ;;  %v4893_v12 = vmax.f32 %v4735_v43, 0.0 }
 0x867   : > { %v4896_v20 = vmax.f32 %v4746_v27, 0.0 }
 0x868   : > { %v4894_v33 = vmax.f32 %v4738_v8, 0.0 }
 0x869   : > { %v4942_v35 = vpack.c.bf16 %v4896_v20, %v4895_v58 }
 0x86a   : > { %v4941_v5 = vpack.c.bf16 %v4894_v33, %v4893_v12  ;;  %v10121_v24 = vpop.f32.mrb[4].mxu1 }
 0x86b   : > { %v4759_v52 = vadd.f32 %v10121_v24, %v12260_v21  ;;  %v4750_v2 = vpop.f32.mrb[5].mxu1 }
 0x86c   : > { %v4751_v60 = vadd.f32 %v12260_v21, %v4750_v2  ;;  %v10122_v1 = vpop.f32.mrb[6].mxu1  ;;  %10195 = vmatprep.mubr.bf16.mxu0 %v4941_v5 }
 0x86d   : > { %v4762_v37 = vadd.f32 %v10122_v1, %v12260_v21  ;;  %v4753_v38 = vpop.f32.mrb[7].mxu1  ;;  %10196 = vmatmul.mubr.bf16.gmra.mrb[0].mxu0 %v4942_v35  ;;  %v4899_v47 = vmax.f32 %v4759_v52, 0.0 }
 0x86e   : > { %v4754_v63 = vadd.f32 %v12260_v21, %v4753_v38  ;;  %v4897_v4 = vmax.f32 %v4751_v60, 0.0 }
 0x86f   : > { %v4900_v6 = vmax.f32 %v4762_v37, 0.0 }
 0x870   : > { %v4898_v39 = vmax.f32 %v4754_v63, 0.0 }
 0x871   : > { %v4944_v42 = vpack.c.bf16 %v4900_v6, %v4899_v47 }
 0x872   : > { %v4943_v44 = vpack.c.bf16 %v4898_v39, %v4897_v4 }
 0x874   : > { %10199 = vmatprep.mubr.bf16.mxu0 %v4943_v44 }
 0x875   : > { %10200 = vmatmul.mubr.bf16.gmra.mrb[4].mxu0 %v4944_v42 }
 0x880   : > { %v10125_v50 = vpop.f32.mrb[8].mxu1 }
 0x881   : > { %v4775_v9 = vadd.f32 %v10125_v50, %v12260_v21  ;;  %v4766_v18 = vpop.f32.mrb[9].mxu1 }
 0x882   : > { %v4767_v3 = vadd.f32 %v12260_v21, %v4766_v18  ;;  %v10126_v55 = vpop.f32.mrb[10].mxu1 }
 0x883   : > { %v4778_v61 = vadd.f32 %v10126_v55, %v12260_v21  ;;  %v4769_v19 = vpop.f32.mrb[11].mxu1  ;;  %v4903_v56 = vmax.f32 %v4775_v9, 0.0 }
 0x884   : > { %v4770_v54 = vadd.f32 %v12260_v21, %v4769_v19  ;;  %v4901_v41 = vmax.f32 %v4767_v3, 0.0 }
 0x885   : > { %v4904_v62 = vmax.f32 %v4778_v61, 0.0 }
 0x886   : > { %v4902_v13 = vmax.f32 %v4770_v54, 0.0 }
 0x887   : > { %v4946_v15 = vpack.c.bf16 %v4904_v62, %v4903_v56 }
 0x888   : > { %v4945_v17 = vpack.c.bf16 %v4902_v13, %v4901_v41 }
 0x88a   : > { %10203 = vmatprep.mubr.bf16.mxu0 %v4945_v17 }
 0x88b   : > { %10204 = vmatmul.mubr.bf16.gmra.mrb[8].mxu0 %v4946_v15 }
 0x898   : > { %v10129_v48 = vpop.f32.mrb[12].mxu1 }
 0x899   : > { %v4791_v28 = vadd.f32 %v10129_v48, %v12260_v21  ;;  %v4782_v32 = vpop.f32.mrb[13].mxu1 }
 0x89a   : > { %v4783_v11 = vadd.f32 %v12260_v21, %v4782_v32  ;;  %v10130_v31 = vpop.f32.mrb[14].mxu1 }
 0x89b   : > { %v4794_v53 = vadd.f32 %v10130_v31, %v12260_v21  ;;  %v4785_v36 = vpop.f32.mrb[15].mxu1  ;;  %v4907_v0 = vmax.f32 %v4791_v28, 0.0 }
 0x89c   : > { %v4786_v22 = vadd.f32 %v12260_v21, %v4785_v36  ;;  %v4905_v57 = vmax.f32 %v4783_v11, 0.0 }
 0x89d   : > { %v4908_v59 = vmax.f32 %v4794_v53, 0.0  ;;  %v12353_v53 = vld [vmem:[%s13230_s4 + $0x8] ss:$0 sm:$0xff] }
 0x89e   : > { %v4906_v26 = vmax.f32 %v4786_v22, 0.0 }
 0x89f   : > { %v4948_v14 = vpack.c.bf16 %v4908_v59, %v4907_v0 }
 0x8a0   : > { %v4947_v30 = vpack.c.bf16 %v4906_v26, %v4905_v57 }
 0x8a2   : > { %10207 = vmatprep.mubr.bf16.mxu0 %v4947_v30 }
 0x8a3   : > { %10208 = vmatmul.mubr.bf16.gmra.mrb[12].mxu0 %v4948_v14 }
 0x8b0   : > { %v10133_v29 = vpop.f32.mrb[16].mxu1 }
 0x8b1   : > { %v4807_v25 = vadd.f32 %v10133_v29, %v12260_v21  ;;  %v4798_v43 = vpop.f32.mrb[17].mxu1 }
 0x8b2   : > { %v4799_v51 = vadd.f32 %v12260_v21, %v4798_v43  ;;  %v10134_v27 = vpop.f32.mrb[18].mxu1 }
 0x8b3   : > { %v4810_v45 = vadd.f32 %v10134_v27, %v12260_v21  ;;  %v4801_v8 = vpop.f32.mrb[19].mxu1  ;;  %v4911_v20 = vmax.f32 %v4807_v25, 0.0 }
 0x8b4   : > { %v4802_v58 = vadd.f32 %v12260_v21, %v4801_v8  ;;  %v4909_v33 = vmax.f32 %v4799_v51, 0.0 }
 0x8b5   : > { %v4912_v12 = vmax.f32 %v4810_v45, 0.0 }
 0x8b6   : > { %v4910_v34 = vmax.f32 %v4802_v58, 0.0 }
 0x8b7   : > { %v4950_v35 = vpack.c.bf16 %v4912_v12, %v4911_v20 }
 0x8b8   : > { %v4949_v5 = vpack.c.bf16 %v4910_v34, %v4909_v33 }
 0x8ba   : > { %10211 = vmatprep.mubr.bf16.mxu0 %v4949_v5 }
 0x8bb   : > { %10212 = vmatmul.mubr.bf16.gmra.mrb[16].mxu0 %v4950_v35 }
 0x8c8   : > { %v10137_v24 = vpop.f32.mrb[20].mxu1 }
 0x8c9   : > { %v4823_v52 = vadd.f32 %v10137_v24, %v12260_v21  ;;  %v4814_v2 = vpop.f32.mrb[21].mxu1 }
 0x8ca   : > { %v4815_v10 = vadd.f32 %v12260_v21, %v4814_v2  ;;  %v10138_v60 = vpop.f32.mrb[22].mxu1 }
 0x8cb   : > { %v4826_v1 = vadd.f32 %v10138_v60, %v12260_v21  ;;  %v4817_v23 = vpop.f32.mrb[23].mxu1  ;;  %v4915_v38 = vmax.f32 %v4823_v52, 0.0 }
 0x8cc   : > { %v4818_v37 = vadd.f32 %v12260_v21, %v4817_v23  ;;  %v4913_v47 = vmax.f32 %v4815_v10, 0.0 }
 0x8cd   : > { %v4916_v63 = vmax.f32 %v4826_v1, 0.0 }
 0x8ce   : > { %v4914_v6 = vmax.f32 %v4818_v37, 0.0 }
 0x8cf   : > { %v4952_v4 = vpack.c.bf16 %v4916_v63, %v4915_v38 }
 0x8d0   : > { %v4951_v39 = vpack.c.bf16 %v4914_v6, %v4913_v47 }
 0x8d2   : > { %10215 = vmatprep.mubr.bf16.mxu0 %v4951_v39 }
 0x8d3   : > { %10216 = vmatmul.mubr.bf16.gmra.mrb[20].mxu0 %v4952_v4 }
 0x8e0   : > { %v10141_v40 = vpop.f32.mrb[24].mxu1 }
 0x8e1   : > { %v4839_v42 = vadd.f32 %v10141_v40, %v12260_v21  ;;  %v4830_v44 = vpop.f32.mrb[25].mxu1 }
 0x8e2   : > { %v4831_v16 = vadd.f32 %v12260_v21, %v4830_v44  ;;  %v10142_v46 = vpop.f32.mrb[26].mxu1 }
 0x8e3   : > { %v4842_v50 = vadd.f32 %v10142_v46, %v12260_v21  ;;  %v4833_v9 = vpop.f32.mrb[27].mxu1  ;;  %v4919_v49 = vmax.f32 %v4839_v42, 0.0 }
 0x8e4   : > { %v4834_v18 = vadd.f32 %v12260_v21, %v4833_v9  ;;  %v4917_v55 = vmax.f32 %v4831_v16, 0.0 }
 0x8e5   : > { %v4920_v3 = vmax.f32 %v4842_v50, 0.0 }
 0x8e6   : > { %v4918_v61 = vmax.f32 %v4834_v18, 0.0 }
 0x8e7   : > { %v4954_v19 = vpack.c.bf16 %v4920_v3, %v4919_v49 }
 0x8e8   : > { %v4953_v54 = vpack.c.bf16 %v4918_v61, %v4917_v55 }
 0x8ea   : > { %10219 = vmatprep.mubr.bf16.mxu0 %v4953_v54 }
 0x8eb   : > { %10220 = vmatmul.mubr.bf16.gmra.mrb[24].mxu0 %v4954_v19 }
 0x8f8   : > { %v10145_v56 = vpop.f32.mrb[28].mxu1 }
 0x8f9   : > { %v4855_v62 = vadd.f32 %v10145_v56, %v12260_v21  ;;  %v4846_v7 = vpop.f32.mrb[29].mxu1 }
 0x8fa   : > { %v4847_v41 = vadd.f32 %v12260_v21, %v4846_v7  ;;  %v10146_v13 = vpop.f32.mrb[30].mxu1 }
 0x8fb   : > { %v4858_v15 = vadd.f32 %v10146_v13, %v12260_v21  ;;  %v4849_v17 = vpop.f32.mrb[31].mxu1  ;;  %v4923_v28 = vmax.f32 %v4855_v62, 0.0 }
 0x8fc   : > { %v4850_v48 = vadd.f32 %v12260_v21, %v4849_v17  ;;  %v4921_v11 = vmax.f32 %v4847_v41, 0.0 }
 0x8fd   : > { %v4924_v32 = vmax.f32 %v4858_v15, 0.0 }
 0x8fe   : > { %v4922_v31 = vmax.f32 %v4850_v48, 0.0 }
 0x8ff   : > { %v4956_v36 = vpack.c.bf16 %v4924_v32, %v4923_v28 }
 0x900   : > { %v4955_v22 = vpack.c.bf16 %v4922_v31, %v4921_v11  ;;  %v10165_v0 = vpop.f32.mrb[224].mxu0 }
 0x901   : > { %v5073_v59 = vadd.f32 %v10165_v0, %v12353_v53  ;;  %v5064_v57 = vpop.f32.mrb[225].mxu0 }
 0x902   : > { %v5065_v26 = vadd.f32 %v12353_v53, %v5064_v57  ;;  %v10166_v14 = vpop.f32.mrb[226].mxu0  ;;  %10223 = vmatprep.mubr.bf16.mxu0 %v4955_v22 }
 0x903   : > { %v5076_v21 = vadd.f32 %v10166_v14, %v12353_v53  ;;  %v5067_v30 = vpop.f32.mrb[227].mxu0  ;;  %10224 = vmatmul.mubr.bf16.gmra.mrb[28].mxu0 %v4956_v36  ;;  %v5321_v25 = vmax.f32 %v5073_v59, 0.0 }
 0x904   : > { %v5068_v29 = vadd.f32 %v12353_v53, %v5067_v30  ;;  %v5319_v51 = vmax.f32 %v5065_v26, 0.0 }
 0x905   : > { %v5322_v43 = vmax.f32 %v5076_v21, 0.0 }
 0x906   : > { %v5320_v27 = vmax.f32 %v5068_v29, 0.0 }
 0x907   : > { %v5384_v45 = vpack.c.bf16 %v5322_v43, %v5321_v25 }
 0x908   : > { %v5383_v8 = vpack.c.bf16 %v5320_v27, %v5319_v51  ;;  %v10169_v58 = vpop.f32.mrb[228].mxu0 }
 0x909   : > { %v5089_v20 = vadd.f32 %v10169_v58, %v12353_v53  ;;  %v5080_v12 = vpop.f32.mrb[229].mxu0 }
 0x90a   : > { %v5081_v33 = vadd.f32 %v12353_v53, %v5080_v12  ;;  %v10170_v34 = vpop.f32.mrb[230].mxu0  ;;  %10243 = vmatprep.mubr.bf16.mxu1 %v5383_v8 }
 0x90b   : > { %v5092_v35 = vadd.f32 %v10170_v34, %v12353_v53  ;;  %v5083_v5 = vpop.f32.mrb[231].mxu0  ;;  %10244 = vmatmul.mubr.bf16.vlgmr.msra.gmra.mrb[32].mxu1 %v5384_v45  ;;  %v5325_v52 = vmax.f32 %v5089_v20, 0.0 }
 0x90c   : > { %v5084_v24 = vadd.f32 %v12353_v53, %v5083_v5  ;;  %v5323_v10 = vmax.f32 %v5081_v33, 0.0 }
 0x90d   : > { %v5326_v2 = vmax.f32 %v5092_v35, 0.0 }
 0x90e   : > { %v5324_v60 = vmax.f32 %v5084_v24, 0.0 }
 0x90f   : > { %v5386_v1 = vpack.c.bf16 %v5326_v2, %v5325_v52 }
 0x910   : > { %v5385_v23 = vpack.c.bf16 %v5324_v60, %v5323_v10  ;;  %v10173_v37 = vpop.f32.mrb[232].mxu0 }
 0x911   : > { %v5105_v38 = vadd.f32 %v10173_v37, %v12353_v53  ;;  %v5096_v63 = vpop.f32.mrb[233].mxu0 }
 0x912   : > { %v5097_v47 = vadd.f32 %v12353_v53, %v5096_v63  ;;  %v10174_v6 = vpop.f32.mrb[234].mxu0  ;;  %10247 = vmatprep.mubr.bf16.mxu1 %v5385_v23 }
 0x913   : > { %v5108_v4 = vadd.f32 %v10174_v6, %v12353_v53  ;;  %v5099_v39 = vpop.f32.mrb[235].mxu0  ;;  %10248 = vmatmul.mubr.bf16.gmra.mrb[36].mxu1 %v5386_v1  ;;  %v5329_v42 = vmax.f32 %v5105_v38, 0.0 }
 0x914   : > { %v5100_v40 = vadd.f32 %v12353_v53, %v5099_v39  ;;  %v5327_v16 = vmax.f32 %v5097_v47, 0.0 }
 0x915   : > { %v5330_v44 = vmax.f32 %v5108_v4, 0.0 }
 0x916   : > { %v5328_v46 = vmax.f32 %v5100_v40, 0.0 }
 0x917   : > { %v5388_v50 = vpack.c.bf16 %v5330_v44, %v5329_v42 }
 0x918   : > { %v5387_v9 = vpack.c.bf16 %v5328_v46, %v5327_v16  ;;  %v10177_v18 = vpop.f32.mrb[236].mxu0 }
 0x919   : > { %v5121_v49 = vadd.f32 %v10177_v18, %v12353_v53  ;;  %v5112_v3 = vpop.f32.mrb[237].mxu0 }
 0x91a   : > { %v5113_v55 = vadd.f32 %v12353_v53, %v5112_v3  ;;  %v10178_v61 = vpop.f32.mrb[238].mxu0  ;;  %10251 = vmatprep.mubr.bf16.mxu1 %v5387_v9 }
 0x91b   : > { %v5124_v19 = vadd.f32 %v10178_v61, %v12353_v53  ;;  %v5115_v54 = vpop.f32.mrb[239].mxu0  ;;  %10252 = vmatmul.mubr.bf16.gmra.mrb[40].mxu1 %v5388_v50  ;;  %v5333_v62 = vmax.f32 %v5121_v49, 0.0 }
 0x91c   : > { %v5116_v56 = vadd.f32 %v12353_v53, %v5115_v54  ;;  %v5331_v41 = vmax.f32 %v5113_v55, 0.0 }
 0x91d   : > { %v5334_v7 = vmax.f32 %v5124_v19, 0.0 }
 0x91e   : > { %v5332_v13 = vmax.f32 %v5116_v56, 0.0 }
 0x91f   : > { %v5390_v15 = vpack.c.bf16 %v5334_v7, %v5333_v62 }
 0x920   : > { %v5389_v17 = vpack.c.bf16 %v5332_v13, %v5331_v41  ;;  %v10181_v48 = vpop.f32.mrb[240].mxu0 }
 0x921   : > { %v5137_v28 = vadd.f32 %v10181_v48, %v12353_v53  ;;  %v5128_v32 = vpop.f32.mrb[241].mxu0 }
 0x922   : > { %v5129_v11 = vadd.f32 %v12353_v53, %v5128_v32  ;;  %v10182_v31 = vpop.f32.mrb[242].mxu0  ;;  %10255 = vmatprep.mubr.bf16.mxu1 %v5389_v17 }
 0x923   : > { %v5140_v36 = vadd.f32 %v10182_v31, %v12353_v53  ;;  %v5131_v22 = vpop.f32.mrb[243].mxu0  ;;  %10256 = vmatmul.mubr.bf16.gmra.mrb[44].mxu1 %v5390_v15  ;;  %v5337_v59 = vmax.f32 %v5137_v28, 0.0 }
 0x924   : > { %v5132_v0 = vadd.f32 %v12353_v53, %v5131_v22  ;;  %v5335_v26 = vmax.f32 %v5129_v11, 0.0 }
 0x925   : > { %v5338_v57 = vmax.f32 %v5140_v36, 0.0  ;;  %v10879_v36 = vld [vmem:[%s13229_s3 + $0x280] sm:$0xff]  }
 0x926   : > { %v5336_v14 = vmax.f32 %v5132_v0, 0.0  ;;  %10307 = vmatprep.subr.bf16.mxu0 %v10879_v36 }
 0x927   : > { %v5392_v21 = vpack.c.bf16 %v5338_v57, %v5337_v59  ;;  %10308 = vmatpush3.bf16.msra.mxu0 %v10879_v36 }
 0x928   : > { %v5391_v30 = vpack.c.bf16 %v5336_v14, %v5335_v26  ;;  %v10185_v29 = vpop.f32.mrb[244].mxu0  ;;  %v10880_v14 = vld [vmem:[%s13229_s3 + $0x288] sm:$0xff]  }
 0x929   : > { %v5153_v25 = vadd.f32 %v10185_v29, %v12353_v53  ;;  %v5144_v43 = vpop.f32.mrb[245].mxu0  ;;  %v10881_v29 = vld [vmem:[%s13229_s3 + $0x290] sm:$0xff]   ;;  %10309 = vmatprep.subr.bf16.mxu0 %v10880_v14 }
 0x92a   : > { %v5145_v51 = vadd.f32 %v12353_v53, %v5144_v43  ;;  %v10186_v27 = vpop.f32.mrb[246].mxu0  ;;  %10259 = vmatprep.mubr.bf16.mxu1 %v5391_v30 }
 0x92b   : > { %v5156_v45 = vadd.f32 %v10186_v27, %v12353_v53  ;;  %v5147_v8 = vpop.f32.mrb[247].mxu0  ;;  %10260 = vmatmul.mubr.bf16.gmra.mrb[48].mxu1 %v5392_v21  ;;  %v5341_v20 = vmax.f32 %v5153_v25, 0.0  ;;  %10310 = vmatpush3.bf16.msra.mxu0 %v10880_v14 }
 0x92c   : > { %v5148_v58 = vadd.f32 %v12353_v53, %v5147_v8  ;;  %v5339_v33 = vmax.f32 %v5145_v51, 0.0  ;;  %10311 = vmatprep.subr.bf16.mxu0 %v10881_v29 }
 0x92d   : > { %v5342_v12 = vmax.f32 %v5156_v45, 0.0 }
 0x92e   : > { %v5340_v34 = vmax.f32 %v5148_v58, 0.0 }
 0x92f   : > { %v5394_v35 = vpack.c.bf16 %v5342_v12, %v5341_v20  ;;  %v10882_v20 = vld [vmem:[%s13229_s3 + $0x298] sm:$0xff]   ;;  %10312 = vmatpush3.bf16.msra.mxu0 %v10881_v29 }
 0x930   : > { %v5393_v5 = vpack.c.bf16 %v5340_v34, %v5339_v33  ;;  %v10189_v24 = vpop.f32.mrb[248].mxu0  ;;  %10313 = vmatprep.subr.bf16.mxu0 %v10882_v20  ;;  %v10883_v34 = vld [vmem:[%s13229_s3 + $0x2a0] sm:$0xff]  }
 0x931   : > { %v5169_v52 = vadd.f32 %v10189_v24, %v12353_v53  ;;  %v5160_v2 = vpop.f32.mrb[249].mxu0 }
 0x932   : > { %v5161_v10 = vadd.f32 %v12353_v53, %v5160_v2  ;;  %v10190_v60 = vpop.f32.mrb[250].mxu0  ;;  %10263 = vmatprep.mubr.bf16.mxu1 %v5393_v5  ;;  %v10885_v2 = vld [vmem:[%s13229_s3 + $0x2b0] sm:$0xff]  }
 0x933   : > { %v5172_v1 = vadd.f32 %v10190_v60, %v12353_v53  ;;  %v5163_v23 = vpop.f32.mrb[251].mxu0  ;;  %10264 = vmatmul.mubr.bf16.gmra.mrb[52].mxu1 %v5394_v35  ;;  %v5345_v38 = vmax.f32 %v5169_v52, 0.0  ;;  %10314 = vmatpush3.bf16.msra.mxu0 %v10882_v20  ;;  %v10884_v35 = vld [vmem:[%s13229_s3 + $0x2a8] sm:$0xff]  }
 0x934   : > { %v5164_v37 = vadd.f32 %v12353_v53, %v5163_v23  ;;  %v5343_v47 = vmax.f32 %v5161_v10, 0.0  ;;  %10315 = vmatprep.subr.bf16.mxu0 %v10883_v34 }
 0x935   : > { %v5346_v63 = vmax.f32 %v5172_v1, 0.0 }
 0x936   : > { %v5344_v6 = vmax.f32 %v5164_v37, 0.0 }
 0x937   : > { %v5396_v4 = vpack.c.bf16 %v5346_v63, %v5345_v38  ;;  %10316 = vmatpush3.bf16.msra.mxu0 %v10883_v34 }
 0x938   : > { %v5395_v39 = vpack.c.bf16 %v5344_v6, %v5343_v47  ;;  %v10193_v40 = vpop.f32.mrb[252].mxu0  ;;  %10317 = vmatprep.subr.bf16.mxu0 %v10884_v35  ;;  %v10886_v47 = vld [vmem:[%s13229_s3 + $0x2b8] sm:$0xff]  }
 0x939   : > { %v5185_v42 = vadd.f32 %v10193_v40, %v12353_v53  ;;  %v5176_v44 = vpop.f32.mrb[253].mxu0 }
 0x93a   : > { %v5177_v16 = vadd.f32 %v12353_v53, %v5176_v44  ;;  %v10194_v46 = vpop.f32.mrb[254].mxu0  ;;  %10267 = vmatprep.mubr.bf16.mxu1 %v5395_v39 }
 0x93b   : > { %v5188_v50 = vadd.f32 %v10194_v46, %v12353_v53  ;;  %v5179_v9 = vpop.f32.mrb[255].mxu0  ;;  %10268 = vmatmul.mubr.bf16.gmra.mrb[56].mxu1 %v5396_v4  ;;  %v5349_v49 = vmax.f32 %v5185_v42, 0.0  ;;  %10318 = vmatpush3.bf16.msra.mxu0 %v10884_v35 }
 0x93c   : > { %v5180_v18 = vadd.f32 %v12353_v53, %v5179_v9  ;;  %v5347_v55 = vmax.f32 %v5177_v16, 0.0  ;;  %10319 = vmatprep.subr.bf16.mxu0 %v10885_v2 }
 0x93d   : > { %v5350_v3 = vmax.f32 %v5188_v50, 0.0 }
 0x93e   : > { %v5348_v61 = vmax.f32 %v5180_v18, 0.0 }
 0x93f   : > { %v5398_v19 = vpack.c.bf16 %v5350_v3, %v5349_v49  ;;  %10320 = vmatpush3.bf16.msra.mxu0 %v10885_v2 }
 0x940   : > { %v5397_v54 = vpack.c.bf16 %v5348_v61, %v5347_v55  ;;  %v10197_v56 = vpop.f32.mrb[0].mxu0  ;;  %10321 = vmatprep.subr.bf16.mxu0 %v10886_v47 }
 0x941   : > { %v5201_v62 = vadd.f32 %v10197_v56, %v12353_v53  ;;  %v5192_v7 = vpop.f32.mrb[1].mxu0 }
 0x942   : > { %v5193_v41 = vadd.f32 %v12353_v53, %v5192_v7  ;;  %v10198_v13 = vpop.f32.mrb[2].mxu0  ;;  %10271 = vmatprep.mubr.bf16.mxu1 %v5397_v54 }
 0x943   : > { %v5204_v15 = vadd.f32 %v10198_v13, %v12353_v53  ;;  %v5195_v17 = vpop.f32.mrb[3].mxu0  ;;  %10272 = vmatmul.mubr.bf16.gmra.mrb[60].mxu1 %v5398_v19  ;;  %v5353_v28 = vmax.f32 %v5201_v62, 0.0  ;;  %10322 = vmatpush3.bf16.msra.mxu0 %v10886_v47 }
 0x944   : > { %v5196_v48 = vadd.f32 %v12353_v53, %v5195_v17  ;;  %v5351_v11 = vmax.f32 %v5193_v41, 0.0 }
 0x945   : > { %v5354_v32 = vmax.f32 %v5204_v15, 0.0 }
 0x946   : > { %v5352_v31 = vmax.f32 %v5196_v48, 0.0 }
 0x947   : > { %v5400_v22 = vpack.c.bf16 %v5354_v32, %v5353_v28 }
 0x948   : > { %v5399_v0 = vpack.c.bf16 %v5352_v31, %v5351_v11  ;;  %v10201_v59 = vpop.f32.mrb[4].mxu0 }
 0x949   : > { %v5217_v57 = vadd.f32 %v10201_v59, %v12353_v53  ;;  %v5208_v26 = vpop.f32.mrb[5].mxu0 }
 0x94a   : > { %v5209_v21 = vadd.f32 %v12353_v53, %v5208_v26  ;;  %v10202_v30 = vpop.f32.mrb[6].mxu0  ;;  %10275 = vmatprep.mubr.bf16.mxu1 %v5399_v0 }
 0x94b   : > { %v5220_v25 = vadd.f32 %v10202_v30, %v12353_v53  ;;  %v5211_v43 = vpop.f32.mrb[7].mxu0  ;;  %10276 = vmatmul.mubr.bf16.gmra.mrb[64].mxu1 %v5400_v22  ;;  %v5357_v27 = vmax.f32 %v5217_v57, 0.0 }
 0x94c   : > { %v5212_v51 = vadd.f32 %v12353_v53, %v5211_v43  ;;  %v5355_v8 = vmax.f32 %v5209_v21, 0.0 }
 0x94d   : > { %v5358_v45 = vmax.f32 %v5220_v25, 0.0 }
 0x94e   : > { %v5356_v58 = vmax.f32 %v5212_v51, 0.0 }
 0x94f   : > { %v5402_v12 = vpack.c.bf16 %v5358_v45, %v5357_v27 }
 0x950   : > { %v5401_v33 = vpack.c.bf16 %v5356_v58, %v5355_v8 }
 0x952   : > { %10279 = vmatprep.mubr.bf16.mxu1 %v5401_v33 }
 0x953   : > { %10280 = vmatmul.mubr.bf16.gmra.mrb[68].mxu1 %v5402_v12 }
 0x95e   : > { %v10205_v5 = vpop.f32.mrb[8].mxu0 }
 0x95f   : > { %v5233_v24 = vadd.f32 %v10205_v5, %v12353_v53  ;;  %v5224_v52 = vpop.f32.mrb[9].mxu0 }
 0x960   : > { %v5225_v10 = vadd.f32 %v12353_v53, %v5224_v52  ;;  %v10206_v60 = vpop.f32.mrb[10].mxu0 }
 0x961   : > { %v5236_v1 = vadd.f32 %v10206_v60, %v12353_v53  ;;  %v5227_v23 = vpop.f32.mrb[11].mxu0  ;;  %v5361_v38 = vmax.f32 %v5233_v24, 0.0 }
 0x962   : > { %v5228_v37 = vadd.f32 %v12353_v53, %v5227_v23  ;;  %v5359_v6 = vmax.f32 %v5225_v10, 0.0 }
 0x963   : > { %v5362_v63 = vmax.f32 %v5236_v1, 0.0 }
 0x964   : > { %v5360_v4 = vmax.f32 %v5228_v37, 0.0 }
 0x965   : > { %v5404_v39 = vpack.c.bf16 %v5362_v63, %v5361_v38 }
 0x966   : > { %v5403_v40 = vpack.c.bf16 %v5360_v4, %v5359_v6 }
 0x968   : > { %10283 = vmatprep.mubr.bf16.mxu1 %v5403_v40 }
 0x969   : > { %10284 = vmatmul.mubr.bf16.gmra.mrb[72].mxu1 %v5404_v39 }
 0x976   : > { %v10209_v42 = vpop.f32.mrb[12].mxu0 }
 0x977   : > { %v5249_v44 = vadd.f32 %v10209_v42, %v12353_v53  ;;  %v5240_v16 = vpop.f32.mrb[13].mxu0 }
 0x978   : > { %v5241_v46 = vadd.f32 %v12353_v53, %v5240_v16  ;;  %v10210_v50 = vpop.f32.mrb[14].mxu0 }
 0x979   : > { %v5252_v9 = vadd.f32 %v10210_v50, %v12353_v53  ;;  %v5243_v18 = vpop.f32.mrb[15].mxu0  ;;  %v5365_v3 = vmax.f32 %v5249_v44, 0.0 }
 0x97a   : > { %v5244_v49 = vadd.f32 %v12353_v53, %v5243_v18  ;;  %v5363_v61 = vmax.f32 %v5241_v46, 0.0 }
 0x97b   : > { %v5366_v55 = vmax.f32 %v5252_v9, 0.0  ;;  %v12446_v9 = vld [vmem:[%s13230_s4 + $0x9] ss:$0 sm:$0xff] }
 0x97c   : > { %v5364_v19 = vmax.f32 %v5244_v49, 0.0 }
 0x97d   : > { %v5406_v54 = vpack.c.bf16 %v5366_v55, %v5365_v3 }
 0x97e   : > { %v5405_v56 = vpack.c.bf16 %v5364_v19, %v5363_v61 }
 0x980   : > { %10287 = vmatprep.mubr.bf16.mxu1 %v5405_v56 }
 0x981   : > { %10288 = vmatmul.mubr.bf16.gmra.mrb[76].mxu1 %v5406_v54 }
 0x98e   : > { %v10213_v62 = vpop.f32.mrb[16].mxu0 }
 0x98f   : > { %v5265_v7 = vadd.f32 %v10213_v62, %v12353_v53  ;;  %v5256_v41 = vpop.f32.mrb[17].mxu0 }
 0x990   : > { %v5257_v13 = vadd.f32 %v12353_v53, %v5256_v41  ;;  %v10214_v15 = vpop.f32.mrb[18].mxu0 }
 0x991   : > { %v5268_v17 = vadd.f32 %v10214_v15, %v12353_v53  ;;  %v5259_v48 = vpop.f32.mrb[19].mxu0  ;;  %v5369_v32 = vmax.f32 %v5265_v7, 0.0 }
 0x992   : > { %v5260_v28 = vadd.f32 %v12353_v53, %v5259_v48  ;;  %v5367_v31 = vmax.f32 %v5257_v13, 0.0 }
 0x993   : > { %v5370_v11 = vmax.f32 %v5268_v17, 0.0 }
 0x994   : > { %v5368_v36 = vmax.f32 %v5260_v28, 0.0 }
 0x995   : > { %v5408_v22 = vpack.c.bf16 %v5370_v11, %v5369_v32 }
 0x996   : > { %v5407_v0 = vpack.c.bf16 %v5368_v36, %v5367_v31 }
 0x998   : > { %10291 = vmatprep.mubr.bf16.mxu1 %v5407_v0 }
 0x999   : > { %10292 = vmatmul.mubr.bf16.gmra.mrb[80].mxu1 %v5408_v22 }
 0x9a6   : > { %v10217_v59 = vpop.f32.mrb[20].mxu0 }
 0x9a7   : > { %v5281_v57 = vadd.f32 %v10217_v59, %v12353_v53  ;;  %v5272_v26 = vpop.f32.mrb[21].mxu0 }
 0x9a8   : > { %v5273_v14 = vadd.f32 %v12353_v53, %v5272_v26  ;;  %v10218_v21 = vpop.f32.mrb[22].mxu0 }
 0x9a9   : > { %v5284_v30 = vadd.f32 %v10218_v21, %v12353_v53  ;;  %v5275_v29 = vpop.f32.mrb[23].mxu0  ;;  %v5373_v43 = vmax.f32 %v5281_v57, 0.0 }
 0x9aa   : > { %v5276_v25 = vadd.f32 %v12353_v53, %v5275_v29  ;;  %v5371_v27 = vmax.f32 %v5273_v14, 0.0 }
 0x9ab   : > { %v5374_v51 = vmax.f32 %v5284_v30, 0.0 }
 0x9ac   : > { %v5372_v45 = vmax.f32 %v5276_v25, 0.0 }
 0x9ad   : > { %v5410_v8 = vpack.c.bf16 %v5374_v51, %v5373_v43 }
 0x9ae   : > { %v5409_v58 = vpack.c.bf16 %v5372_v45, %v5371_v27 }
 0x9b0   : > { %10295 = vmatprep.mubr.bf16.mxu1 %v5409_v58 }
 0x9b1   : > { %10296 = vmatmul.mubr.bf16.gmra.mrb[84].mxu1 %v5410_v8 }
 0x9be   : > { %v10221_v20 = vpop.f32.mrb[24].mxu0 }
 0x9bf   : > { %v5297_v12 = vadd.f32 %v10221_v20, %v12353_v53  ;;  %v5288_v33 = vpop.f32.mrb[25].mxu0 }
 0x9c0   : > { %v5289_v34 = vadd.f32 %v12353_v53, %v5288_v33  ;;  %v10222_v35 = vpop.f32.mrb[26].mxu0 }
 0x9c1   : > { %v5300_v5 = vadd.f32 %v10222_v35, %v12353_v53  ;;  %v5291_v24 = vpop.f32.mrb[27].mxu0  ;;  %v5377_v2 = vmax.f32 %v5297_v12, 0.0 }
 0x9c2   : > { %v5292_v52 = vadd.f32 %v12353_v53, %v5291_v24  ;;  %v5375_v60 = vmax.f32 %v5289_v34, 0.0 }
 0x9c3   : > { %v5378_v10 = vmax.f32 %v5300_v5, 0.0 }
 0x9c4   : > { %v5376_v1 = vmax.f32 %v5292_v52, 0.0 }
 0x9c5   : > { %v5412_v23 = vpack.c.bf16 %v5378_v10, %v5377_v2 }
 0x9c6   : > { %v5411_v37 = vpack.c.bf16 %v5376_v1, %v5375_v60 }
 0x9c8   : > { %10299 = vmatprep.mubr.bf16.mxu1 %v5411_v37 }
 0x9c9   : > { %10300 = vmatmul.mubr.bf16.gmra.mrb[88].mxu1 %v5412_v23 }
 0x9d6   : > { %v10225_v38 = vpop.f32.mrb[28].mxu0 }
 0x9d7   : > { %v5313_v63 = vadd.f32 %v10225_v38, %v12353_v53  ;;  %v5304_v47 = vpop.f32.mrb[29].mxu0 }
 0x9d8   : > { %v5305_v6 = vadd.f32 %v12353_v53, %v5304_v47  ;;  %v10226_v4 = vpop.f32.mrb[30].mxu0 }
 0x9d9   : > { %v5316_v39 = vadd.f32 %v10226_v4, %v12353_v53  ;;  %v5307_v40 = vpop.f32.mrb[31].mxu0  ;;  %v5381_v44 = vmax.f32 %v5313_v63, 0.0 }
 0x9da   : > { %v5308_v42 = vadd.f32 %v12353_v53, %v5307_v40  ;;  %v5379_v46 = vmax.f32 %v5305_v6, 0.0 }
 0x9db   : > { %v5382_v16 = vmax.f32 %v5316_v39, 0.0 }
 0x9dc   : > { %v5380_v50 = vmax.f32 %v5308_v42, 0.0 }
 0x9dd   : > { %v5414_v18 = vpack.c.bf16 %v5382_v16, %v5381_v44 }
 0x9de   : > { %v5413_v49 = vpack.c.bf16 %v5380_v50, %v5379_v46  ;;  %v10245_v3 = vpop.f32.mrb[32].mxu1 }
 0x9df   : > { %v5531_v55 = vadd.f32 %v10245_v3, %v12446_v9  ;;  %v5522_v61 = vpop.f32.mrb[33].mxu1 }
 0x9e0   : > { %v5523_v19 = vadd.f32 %v12446_v9, %v5522_v61  ;;  %v10246_v54 = vpop.f32.mrb[34].mxu1  ;;  %10303 = vmatprep.mubr.bf16.mxu1 %v5413_v49 }
 0x9e1   : > { %v5534_v53 = vadd.f32 %v10246_v54, %v12446_v9  ;;  %v5525_v56 = vpop.f32.mrb[35].mxu1  ;;  %10304 = vmatmul.mubr.bf16.gmra.mrb[92].mxu1 %v5414_v18  ;;  %v5779_v7 = vmax.f32 %v5531_v55, 0.0 }
 0x9e2   : > { %v5526_v62 = vadd.f32 %v12446_v9, %v5525_v56  ;;  %v5777_v13 = vmax.f32 %v5523_v19, 0.0 }
 0x9e3   : > { %v5780_v41 = vmax.f32 %v5534_v53, 0.0 }
 0x9e4   : > { %v5778_v15 = vmax.f32 %v5526_v62, 0.0 }
 0x9e5   : > { %v5842_v17 = vpack.c.bf16 %v5780_v41, %v5779_v7 }
 0x9e6   : > { %v5841_v48 = vpack.c.bf16 %v5778_v15, %v5777_v13  ;;  %v10249_v28 = vpop.f32.mrb[36].mxu1 }
 0x9e7   : > { %v5547_v32 = vadd.f32 %v10249_v28, %v12446_v9  ;;  %v5538_v11 = vpop.f32.mrb[37].mxu1 }
 0x9e8   : > { %v5539_v31 = vadd.f32 %v12446_v9, %v5538_v11  ;;  %v10250_v36 = vpop.f32.mrb[38].mxu1  ;;  %10323 = vmatprep.mubr.bf16.mxu0 %v5841_v48 }
 0x9e9   : > { %v5550_v22 = vadd.f32 %v10250_v36, %v12446_v9  ;;  %v5541_v0 = vpop.f32.mrb[39].mxu1  ;;  %10324 = vmatmul.mubr.bf16.vlgmr.msra.gmra.mrb[32].mxu0 %v5842_v17  ;;  %v5783_v57 = vmax.f32 %v5547_v32, 0.0 }
 0x9ea   : > { %v5542_v59 = vadd.f32 %v12446_v9, %v5541_v0  ;;  %v5781_v14 = vmax.f32 %v5539_v31, 0.0 }
 0x9eb   : > { %v5784_v26 = vmax.f32 %v5550_v22, 0.0 }
 0x9ec   : > { %v5782_v21 = vmax.f32 %v5542_v59, 0.0 }
 0x9ed   : > { %v5844_v30 = vpack.c.bf16 %v5784_v26, %v5783_v57 }
 0x9ee   : > { %v5843_v29 = vpack.c.bf16 %v5782_v21, %v5781_v14  ;;  %v10253_v25 = vpop.f32.mrb[40].mxu1 }
 0x9ef   : > { %v5563_v43 = vadd.f32 %v10253_v25, %v12446_v9  ;;  %v5554_v51 = vpop.f32.mrb[41].mxu1 }
 0x9f0   : > { %v5555_v27 = vadd.f32 %v12446_v9, %v5554_v51  ;;  %v10254_v45 = vpop.f32.mrb[42].mxu1  ;;  %10327 = vmatprep.mubr.bf16.mxu0 %v5843_v29 }
 0x9f1   : > { %v5566_v8 = vadd.f32 %v10254_v45, %v12446_v9  ;;  %v5557_v58 = vpop.f32.mrb[43].mxu1  ;;  %10328 = vmatmul.mubr.bf16.gmra.mrb[36].mxu0 %v5844_v30  ;;  %v5787_v12 = vmax.f32 %v5563_v43, 0.0 }
 0x9f2   : > { %v5558_v20 = vadd.f32 %v12446_v9, %v5557_v58  ;;  %v5785_v34 = vmax.f32 %v5555_v27, 0.0 }
 0x9f3   : > { %v5788_v33 = vmax.f32 %v5566_v8, 0.0 }
 0x9f4   : > { %v5786_v35 = vmax.f32 %v5558_v20, 0.0 }
 0x9f5   : > { %v5846_v5 = vpack.c.bf16 %v5788_v33, %v5787_v12 }
 0x9f6   : > { %v5845_v24 = vpack.c.bf16 %v5786_v35, %v5785_v34  ;;  %v10257_v52 = vpop.f32.mrb[44].mxu1 }
 0x9f7   : > { %v5579_v2 = vadd.f32 %v10257_v52, %v12446_v9  ;;  %v5570_v10 = vpop.f32.mrb[45].mxu1 }
 0x9f8   : > { %v5571_v60 = vadd.f32 %v12446_v9, %v5570_v10  ;;  %v10258_v1 = vpop.f32.mrb[46].mxu1  ;;  %10331 = vmatprep.mubr.bf16.mxu0 %v5845_v24 }
 0x9f9   : > { %v5582_v23 = vadd.f32 %v10258_v1, %v12446_v9  ;;  %v5573_v37 = vpop.f32.mrb[47].mxu1  ;;  %10332 = vmatmul.mubr.bf16.gmra.mrb[40].mxu0 %v5846_v5  ;;  %v5791_v63 = vmax.f32 %v5579_v2, 0.0 }
 0x9fa   : > { %v5574_v38 = vadd.f32 %v12446_v9, %v5573_v37  ;;  %v5789_v6 = vmax.f32 %v5571_v60, 0.0 }
 0x9fb   : > { %v5792_v47 = vmax.f32 %v5582_v23, 0.0 }
 0x9fc   : > { %v5790_v4 = vmax.f32 %v5574_v38, 0.0 }
 0x9fd   : > { %v5848_v39 = vpack.c.bf16 %v5792_v47, %v5791_v63 }
 0x9fe   : > { %v5847_v40 = vpack.c.bf16 %v5790_v4, %v5789_v6  ;;  %v10261_v42 = vpop.f32.mrb[48].mxu1 }
 0x9ff   : > { %v5595_v44 = vadd.f32 %v10261_v42, %v12446_v9  ;;  %v5586_v16 = vpop.f32.mrb[49].mxu1 }
 0xa00   : > { %v5587_v46 = vadd.f32 %v12446_v9, %v5586_v16  ;;  %v10262_v50 = vpop.f32.mrb[50].mxu1  ;;  %10335 = vmatprep.mubr.bf16.mxu0 %v5847_v40 }
 0xa01   : > { %v5598_v18 = vadd.f32 %v10262_v50, %v12446_v9  ;;  %v5589_v49 = vpop.f32.mrb[51].mxu1  ;;  %10336 = vmatmul.mubr.bf16.gmra.mrb[44].mxu0 %v5848_v39  ;;  %v5795_v55 = vmax.f32 %v5595_v44, 0.0 }
 0xa02   : > { %v5590_v3 = vadd.f32 %v12446_v9, %v5589_v49  ;;  %v5793_v19 = vmax.f32 %v5587_v46, 0.0 }
 0xa03   : > { %v5796_v61 = vmax.f32 %v5598_v18, 0.0  ;;  %v10887_v18 = vld [vmem:[%s13229_s3 + $0x2c0] sm:$0xff]  }
 0xa04   : > { %v5794_v54 = vmax.f32 %v5590_v3, 0.0  ;;  %10387 = vmatprep.subr.bf16.mxu1 %v10887_v18 }
 0xa05   : > { %v5850_v53 = vpack.c.bf16 %v5796_v61, %v5795_v55  ;;  %10388 = vmatpush3.bf16.msra.mxu1 %v10887_v18 }
 0xa06   : > { %v5849_v56 = vpack.c.bf16 %v5794_v54, %v5793_v19  ;;  %v10265_v62 = vpop.f32.mrb[52].mxu1  ;;  %v10888_v54 = vld [vmem:[%s13229_s3 + $0x2c8] sm:$0xff]  }
 0xa07   : > { %v5611_v7 = vadd.f32 %v10265_v62, %v12446_v9  ;;  %v5602_v41 = vpop.f32.mrb[53].mxu1  ;;  %v10889_v62 = vld [vmem:[%s13229_s3 + $0x2d0] sm:$0xff]   ;;  %10389 = vmatprep.subr.bf16.mxu1 %v10888_v54 }
 0xa08   : > { %v5603_v13 = vadd.f32 %v12446_v9, %v5602_v41  ;;  %v10266_v15 = vpop.f32.mrb[54].mxu1  ;;  %10339 = vmatprep.mubr.bf16.mxu0 %v5849_v56 }
 0xa09   : > { %v5614_v17 = vadd.f32 %v10266_v15, %v12446_v9  ;;  %v5605_v48 = vpop.f32.mrb[55].mxu1  ;;  %10340 = vmatmul.mubr.bf16.gmra.mrb[48].mxu0 %v5850_v53  ;;  %v5799_v32 = vmax.f32 %v5611_v7, 0.0  ;;  %10390 = vmatpush3.bf16.msra.mxu1 %v10888_v54 }
 0xa0a   : > { %v5606_v28 = vadd.f32 %v12446_v9, %v5605_v48  ;;  %v5797_v31 = vmax.f32 %v5603_v13, 0.0  ;;  %10391 = vmatprep.subr.bf16.mxu1 %v10889_v62 }
 0xa0b   : > { %v5800_v11 = vmax.f32 %v5614_v17, 0.0 }
 0xa0c   : > { %v5798_v36 = vmax.f32 %v5606_v28, 0.0 }
 0xa0d   : > { %v5852_v22 = vpack.c.bf16 %v5800_v11, %v5799_v32  ;;  %v10890_v32 = vld [vmem:[%s13229_s3 + $0x2d8] sm:$0xff]   ;;  %10392 = vmatpush3.bf16.msra.mxu1 %v10889_v62 }
 0xa0e   : > { %v5851_v0 = vpack.c.bf16 %v5798_v36, %v5797_v31  ;;  %v10269_v59 = vpop.f32.mrb[56].mxu1  ;;  %10393 = vmatprep.subr.bf16.mxu1 %v10890_v32  ;;  %v10891_v36 = vld [vmem:[%s13229_s3 + $0x2e0] sm:$0xff]  }
 0xa0f   : > { %v5627_v57 = vadd.f32 %v10269_v59, %v12446_v9  ;;  %v5618_v26 = vpop.f32.mrb[57].mxu1 }
 0xa10   : > { %v5619_v14 = vadd.f32 %v12446_v9, %v5618_v26  ;;  %v10270_v21 = vpop.f32.mrb[58].mxu1  ;;  %10343 = vmatprep.mubr.bf16.mxu0 %v5851_v0  ;;  %v10893_v26 = vld [vmem:[%s13229_s3 + $0x2f0] sm:$0xff]  }
 0xa11   : > { %v5630_v30 = vadd.f32 %v10270_v21, %v12446_v9  ;;  %v5621_v29 = vpop.f32.mrb[59].mxu1  ;;  %10344 = vmatmul.mubr.bf16.gmra.mrb[52].mxu0 %v5852_v22  ;;  %v5803_v43 = vmax.f32 %v5627_v57, 0.0  ;;  %10394 = vmatpush3.bf16.msra.mxu1 %v10890_v32  ;;  %v10892_v22 = vld [vmem:[%s13229_s3 + $0x2e8] sm:$0xff]  }
 0xa12   : > { %v5622_v25 = vadd.f32 %v12446_v9, %v5621_v29  ;;  %v5801_v27 = vmax.f32 %v5619_v14, 0.0  ;;  %10395 = vmatprep.subr.bf16.mxu1 %v10891_v36 }
 0xa13   : > { %v5804_v51 = vmax.f32 %v5630_v30, 0.0 }
 0xa14   : > { %v5802_v45 = vmax.f32 %v5622_v25, 0.0 }
 0xa15   : > { %v5854_v8 = vpack.c.bf16 %v5804_v51, %v5803_v43  ;;  %10396 = vmatpush3.bf16.msra.mxu1 %v10891_v36 }
 0xa16   : > { %v5853_v58 = vpack.c.bf16 %v5802_v45, %v5801_v27  ;;  %v10273_v20 = vpop.f32.mrb[60].mxu1  ;;  %10397 = vmatprep.subr.bf16.mxu1 %v10892_v22  ;;  %v10894_v27 = vld [vmem:[%s13229_s3 + $0x2f8] sm:$0xff]  }
 0xa17   : > { %v5643_v12 = vadd.f32 %v10273_v20, %v12446_v9  ;;  %v5634_v33 = vpop.f32.mrb[61].mxu1 }
 0xa18   : > { %v5635_v34 = vadd.f32 %v12446_v9, %v5634_v33  ;;  %v10274_v35 = vpop.f32.mrb[62].mxu1  ;;  %10347 = vmatprep.mubr.bf16.mxu0 %v5853_v58 }
 0xa19   : > { %v5646_v5 = vadd.f32 %v10274_v35, %v12446_v9  ;;  %v5637_v24 = vpop.f32.mrb[63].mxu1  ;;  %10348 = vmatmul.mubr.bf16.gmra.mrb[56].mxu0 %v5854_v8  ;;  %v5807_v2 = vmax.f32 %v5643_v12, 0.0  ;;  %10398 = vmatpush3.bf16.msra.mxu1 %v10892_v22 }
 0xa1a   : > { %v5638_v52 = vadd.f32 %v12446_v9, %v5637_v24  ;;  %v5805_v60 = vmax.f32 %v5635_v34, 0.0  ;;  %10399 = vmatprep.subr.bf16.mxu1 %v10893_v26 }
 0xa1b   : > { %v5808_v10 = vmax.f32 %v5646_v5, 0.0 }
 0xa1c   : > { %v5806_v1 = vmax.f32 %v5638_v52, 0.0 }
 0xa1d   : > { %v5856_v23 = vpack.c.bf16 %v5808_v10, %v5807_v2  ;;  %10400 = vmatpush3.bf16.msra.mxu1 %v10893_v26 }
 0xa1e   : > { %v5855_v37 = vpack.c.bf16 %v5806_v1, %v5805_v60  ;;  %v10277_v38 = vpop.f32.mrb[64].mxu1  ;;  %10401 = vmatprep.subr.bf16.mxu1 %v10894_v27 }
 0xa1f   : > { %v5659_v63 = vadd.f32 %v10277_v38, %v12446_v9  ;;  %v5650_v47 = vpop.f32.mrb[65].mxu1 }
 0xa20   : > { %v5651_v6 = vadd.f32 %v12446_v9, %v5650_v47  ;;  %v10278_v4 = vpop.f32.mrb[66].mxu1  ;;  %10351 = vmatprep.mubr.bf16.mxu0 %v5855_v37 }
 0xa21   : > { %v5662_v39 = vadd.f32 %v10278_v4, %v12446_v9  ;;  %v5653_v40 = vpop.f32.mrb[67].mxu1  ;;  %10352 = vmatmul.mubr.bf16.gmra.mrb[60].mxu0 %v5856_v23  ;;  %v5811_v44 = vmax.f32 %v5659_v63, 0.0  ;;  %10402 = vmatpush3.bf16.msra.mxu1 %v10894_v27 }
 0xa22   : > { %v5654_v42 = vadd.f32 %v12446_v9, %v5653_v40  ;;  %v5809_v46 = vmax.f32 %v5651_v6, 0.0 }
 0xa23   : > { %v5812_v16 = vmax.f32 %v5662_v39, 0.0 }
 0xa24   : > { %v5810_v50 = vmax.f32 %v5654_v42, 0.0 }
 0xa25   : > { %v5858_v49 = vpack.c.bf16 %v5812_v16, %v5811_v44 }
 0xa26   : > { %v5857_v3 = vpack.c.bf16 %v5810_v50, %v5809_v46  ;;  %v10281_v55 = vpop.f32.mrb[68].mxu1 }
 0xa27   : > { %v5675_v61 = vadd.f32 %v10281_v55, %v12446_v9  ;;  %v5666_v19 = vpop.f32.mrb[69].mxu1 }
 0xa28   : > { %v5667_v53 = vadd.f32 %v12446_v9, %v5666_v19  ;;  %v10282_v56 = vpop.f32.mrb[70].mxu1  ;;  %10355 = vmatprep.mubr.bf16.mxu0 %v5857_v3 }
 0xa29   : > { %v5678_v7 = vadd.f32 %v10282_v56, %v12446_v9  ;;  %v5669_v41 = vpop.f32.mrb[71].mxu1  ;;  %10356 = vmatmul.mubr.bf16.gmra.mrb[64].mxu0 %v5858_v49  ;;  %v5815_v15 = vmax.f32 %v5675_v61, 0.0 }
 0xa2a   : > { %v5670_v13 = vadd.f32 %v12446_v9, %v5669_v41  ;;  %v5813_v48 = vmax.f32 %v5667_v53, 0.0 }
 0xa2b   : > { %v5816_v17 = vmax.f32 %v5678_v7, 0.0 }
 0xa2c   : > { %v5814_v28 = vmax.f32 %v5670_v13, 0.0 }
 0xa2d   : > { %v5860_v11 = vpack.c.bf16 %v5816_v17, %v5815_v15 }
 0xa2e   : > { %v5859_v31 = vpack.c.bf16 %v5814_v28, %v5813_v48 }
 0xa30   : > { %10359 = vmatprep.mubr.bf16.mxu0 %v5859_v31 }
 0xa31   : > { %10360 = vmatmul.mubr.bf16.gmra.mrb[68].mxu0 %v5860_v11 }
 0xa3c   : > { %v10285_v0 = vpop.f32.mrb[72].mxu1 }
 0xa3d   : > { %v5691_v59 = vadd.f32 %v10285_v0, %v12446_v9  ;;  %v5682_v57 = vpop.f32.mrb[73].mxu1 }
 0xa3e   : > { %v5683_v14 = vadd.f32 %v12446_v9, %v5682_v57  ;;  %v10286_v21 = vpop.f32.mrb[74].mxu1 }
 0xa3f   : > { %v5694_v30 = vadd.f32 %v10286_v21, %v12446_v9  ;;  %v5685_v29 = vpop.f32.mrb[75].mxu1  ;;  %v5819_v43 = vmax.f32 %v5691_v59, 0.0 }
 0xa40   : > { %v5686_v25 = vadd.f32 %v12446_v9, %v5685_v29  ;;  %v5817_v45 = vmax.f32 %v5683_v14, 0.0 }
 0xa41   : > { %v5820_v51 = vmax.f32 %v5694_v30, 0.0 }
 0xa42   : > { %v5818_v8 = vmax.f32 %v5686_v25, 0.0 }
 0xa43   : > { %v5862_v58 = vpack.c.bf16 %v5820_v51, %v5819_v43 }
 0xa44   : > { %v5861_v20 = vpack.c.bf16 %v5818_v8, %v5817_v45 }
 0xa46   : > { %10363 = vmatprep.mubr.bf16.mxu0 %v5861_v20 }
 0xa47   : > { %10364 = vmatmul.mubr.bf16.gmra.mrb[72].mxu0 %v5862_v58 }
 0xa54   : > { %v10289_v12 = vpop.f32.mrb[76].mxu1 }
 0xa55   : > { %v5707_v33 = vadd.f32 %v10289_v12, %v12446_v9  ;;  %v5698_v34 = vpop.f32.mrb[77].mxu1 }
 0xa56   : > { %v5699_v35 = vadd.f32 %v12446_v9, %v5698_v34  ;;  %v10290_v5 = vpop.f32.mrb[78].mxu1 }
 0xa57   : > { %v5710_v24 = vadd.f32 %v10290_v5, %v12446_v9  ;;  %v5701_v52 = vpop.f32.mrb[79].mxu1  ;;  %v5823_v10 = vmax.f32 %v5707_v33, 0.0 }
 0xa58   : > { %v5702_v2 = vadd.f32 %v12446_v9, %v5701_v52  ;;  %v5821_v1 = vmax.f32 %v5699_v35, 0.0 }
 0xa59   : > { %v5824_v60 = vmax.f32 %v5710_v24, 0.0  ;;  %v12539_v24 = vld [vmem:[%s13230_s4 + $0xa] ss:$0 sm:$0xff] }
 0xa5a   : > { %v5822_v23 = vmax.f32 %v5702_v2, 0.0 }
 0xa5b   : > { %v5864_v37 = vpack.c.bf16 %v5824_v60, %v5823_v10 }
 0xa5c   : > { %v5863_v38 = vpack.c.bf16 %v5822_v23, %v5821_v1 }
 0xa5e   : > { %10367 = vmatprep.mubr.bf16.mxu0 %v5863_v38 }
 0xa5f   : > { %10368 = vmatmul.mubr.bf16.gmra.mrb[76].mxu0 %v5864_v37 }
 0xa6c   : > { %v10293_v63 = vpop.f32.mrb[80].mxu1 }
 0xa6d   : > { %v5723_v47 = vadd.f32 %v10293_v63, %v12446_v9  ;;  %v5714_v6 = vpop.f32.mrb[81].mxu1 }
 0xa6e   : > { %v5715_v4 = vadd.f32 %v12446_v9, %v5714_v6  ;;  %v10294_v39 = vpop.f32.mrb[82].mxu1 }
 0xa6f   : > { %v5726_v40 = vadd.f32 %v10294_v39, %v12446_v9  ;;  %v5717_v42 = vpop.f32.mrb[83].mxu1  ;;  %v5827_v16 = vmax.f32 %v5723_v47, 0.0 }
 0xa70   : > { %v5718_v44 = vadd.f32 %v12446_v9, %v5717_v42  ;;  %v5825_v50 = vmax.f32 %v5715_v4, 0.0 }
 0xa71   : > { %v5828_v46 = vmax.f32 %v5726_v40, 0.0 }
 0xa72   : > { %v5826_v18 = vmax.f32 %v5718_v44, 0.0 }
 0xa73   : > { %v5866_v49 = vpack.c.bf16 %v5828_v46, %v5827_v16 }
 0xa74   : > { %v5865_v3 = vpack.c.bf16 %v5826_v18, %v5825_v50 }
 0xa76   : > { %10371 = vmatprep.mubr.bf16.mxu0 %v5865_v3 }
 0xa77   : > { %10372 = vmatmul.mubr.bf16.gmra.mrb[80].mxu0 %v5866_v49 }
 0xa84   : > { %v10297_v55 = vpop.f32.mrb[84].mxu1 }
 0xa85   : > { %v5739_v61 = vadd.f32 %v10297_v55, %v12446_v9  ;;  %v5730_v19 = vpop.f32.mrb[85].mxu1 }
 0xa86   : > { %v5731_v54 = vadd.f32 %v12446_v9, %v5730_v19  ;;  %v10298_v53 = vpop.f32.mrb[86].mxu1 }
 0xa87   : > { %v5742_v56 = vadd.f32 %v10298_v53, %v12446_v9  ;;  %v5733_v62 = vpop.f32.mrb[87].mxu1  ;;  %v5831_v41 = vmax.f32 %v5739_v61, 0.0 }
 0xa88   : > { %v5734_v7 = vadd.f32 %v12446_v9, %v5733_v62  ;;  %v5829_v15 = vmax.f32 %v5731_v54, 0.0 }
 0xa89   : > { %v5832_v13 = vmax.f32 %v5742_v56, 0.0 }
 0xa8a   : > { %v5830_v17 = vmax.f32 %v5734_v7, 0.0 }
 0xa8b   : > { %v5868_v48 = vpack.c.bf16 %v5832_v13, %v5831_v41 }
 0xa8c   : > { %v5867_v28 = vpack.c.bf16 %v5830_v17, %v5829_v15 }
 0xa8e   : > { %10375 = vmatprep.mubr.bf16.mxu0 %v5867_v28 }
 0xa8f   : > { %10376 = vmatmul.mubr.bf16.gmra.mrb[84].mxu0 %v5868_v48 }
 0xa9c   : > { %v10301_v32 = vpop.f32.mrb[88].mxu1 }
 0xa9d   : > { %v5755_v11 = vadd.f32 %v10301_v32, %v12446_v9  ;;  %v5746_v31 = vpop.f32.mrb[89].mxu1 }
 0xa9e   : > { %v5747_v36 = vadd.f32 %v12446_v9, %v5746_v31  ;;  %v10302_v22 = vpop.f32.mrb[90].mxu1 }
 0xa9f   : > { %v5758_v0 = vadd.f32 %v10302_v22, %v12446_v9  ;;  %v5749_v59 = vpop.f32.mrb[91].mxu1  ;;  %v5835_v26 = vmax.f32 %v5755_v11, 0.0 }
 0xaa0   : > { %v5750_v57 = vadd.f32 %v12446_v9, %v5749_v59  ;;  %v5833_v21 = vmax.f32 %v5747_v36, 0.0 }
 0xaa1   : > { %v5836_v14 = vmax.f32 %v5758_v0, 0.0 }
 0xaa2   : > { %v5834_v30 = vmax.f32 %v5750_v57, 0.0 }
 0xaa3   : > { %v5870_v29 = vpack.c.bf16 %v5836_v14, %v5835_v26 }
 0xaa4   : > { %v5869_v25 = vpack.c.bf16 %v5834_v30, %v5833_v21 }
 0xaa6   : > { %10379 = vmatprep.mubr.bf16.mxu0 %v5869_v25 }
 0xaa7   : > { %10380 = vmatmul.mubr.bf16.gmra.mrb[88].mxu0 %v5870_v29 }
 0xab4   : > { %v10305_v43 = vpop.f32.mrb[92].mxu1 }
 0xab5   : > { %v5771_v51 = vadd.f32 %v10305_v43, %v12446_v9  ;;  %v5762_v27 = vpop.f32.mrb[93].mxu1 }
 0xab6   : > { %v5763_v45 = vadd.f32 %v12446_v9, %v5762_v27  ;;  %v10306_v8 = vpop.f32.mrb[94].mxu1 }
 0xab7   : > { %v5774_v58 = vadd.f32 %v10306_v8, %v12446_v9  ;;  %v5765_v20 = vpop.f32.mrb[95].mxu1  ;;  %v5839_v33 = vmax.f32 %v5771_v51, 0.0 }
 0xab8   : > { %v5766_v12 = vadd.f32 %v12446_v9, %v5765_v20  ;;  %v5837_v35 = vmax.f32 %v5763_v45, 0.0 }
 0xab9   : > { %v5840_v34 = vmax.f32 %v5774_v58, 0.0 }
 0xaba   : > { %v5838_v5 = vmax.f32 %v5766_v12, 0.0 }
 0xabb   : > { %v5872_v52 = vpack.c.bf16 %v5840_v34, %v5839_v33 }
 0xabc   : > { %v5871_v2 = vpack.c.bf16 %v5838_v5, %v5837_v35  ;;  %v10325_v10 = vpop.f32.mrb[32].mxu0 }
 0xabd   : > { %v5989_v60 = vadd.f32 %v10325_v10, %v12539_v24  ;;  %v5980_v1 = vpop.f32.mrb[33].mxu0 }
 0xabe   : > { %v5981_v23 = vadd.f32 %v12539_v24, %v5980_v1  ;;  %v10326_v37 = vpop.f32.mrb[34].mxu0  ;;  %10383 = vmatprep.mubr.bf16.mxu0 %v5871_v2 }
 0xabf   : > { %v5992_v9 = vadd.f32 %v10326_v37, %v12539_v24  ;;  %v5983_v38 = vpop.f32.mrb[35].mxu0  ;;  %10384 = vmatmul.mubr.bf16.gmra.mrb[92].mxu0 %v5872_v52  ;;  %v6237_v47 = vmax.f32 %v5989_v60, 0.0 }
 0xac0   : > { %v5984_v63 = vadd.f32 %v12539_v24, %v5983_v38  ;;  %v6235_v4 = vmax.f32 %v5981_v23, 0.0 }
 0xac1   : > { %v6238_v6 = vmax.f32 %v5992_v9, 0.0 }
 0xac2   : > { %v6236_v39 = vmax.f32 %v5984_v63, 0.0 }
 0xac3   : > { %v6300_v40 = vpack.c.bf16 %v6238_v6, %v6237_v47 }
 0xac4   : > { %v6299_v42 = vpack.c.bf16 %v6236_v39, %v6235_v4  ;;  %v10329_v44 = vpop.f32.mrb[36].mxu0 }
 0xac5   : > { %v6005_v16 = vadd.f32 %v10329_v44, %v12539_v24  ;;  %v5996_v46 = vpop.f32.mrb[37].mxu0 }
 0xac6   : > { %v5997_v50 = vadd.f32 %v12539_v24, %v5996_v46  ;;  %v10330_v18 = vpop.f32.mrb[38].mxu0  ;;  %10403 = vmatprep.mubr.bf16.mxu1 %v6299_v42 }
 0xac7   : > { %v6008_v49 = vadd.f32 %v10330_v18, %v12539_v24  ;;  %v5999_v3 = vpop.f32.mrb[39].mxu0  ;;  %10404 = vmatmul.mubr.bf16.vlgmr.msra.gmra.mrb[96].mxu1 %v6300_v40  ;;  %v6241_v61 = vmax.f32 %v6005_v16, 0.0 }
 0xac8   : > { %v6000_v55 = vadd.f32 %v12539_v24, %v5999_v3  ;;  %v6239_v54 = vmax.f32 %v5997_v50, 0.0 }
 0xac9   : > { %v6242_v19 = vmax.f32 %v6008_v49, 0.0 }
 0xaca   : > { %v6240_v53 = vmax.f32 %v6000_v55, 0.0 }
 0xacb   : > { %v6302_v56 = vpack.c.bf16 %v6242_v19, %v6241_v61 }
 0xacc   : > { %v6301_v62 = vpack.c.bf16 %v6240_v53, %v6239_v54  ;;  %v10333_v7 = vpop.f32.mrb[40].mxu0 }
 0xacd   : > { %v6021_v41 = vadd.f32 %v10333_v7, %v12539_v24  ;;  %v6012_v13 = vpop.f32.mrb[41].mxu0 }
 0xace   : > { %v6013_v15 = vadd.f32 %v12539_v24, %v6012_v13  ;;  %v10334_v17 = vpop.f32.mrb[42].mxu0  ;;  %10407 = vmatprep.mubr.bf16.mxu1 %v6301_v62 }
 0xacf   : > { %v6024_v48 = vadd.f32 %v10334_v17, %v12539_v24  ;;  %v6015_v28 = vpop.f32.mrb[43].mxu0  ;;  %10408 = vmatmul.mubr.bf16.gmra.mrb[100].mxu1 %v6302_v56  ;;  %v6245_v11 = vmax.f32 %v6021_v41, 0.0 }
 0xad0   : > { %v6016_v32 = vadd.f32 %v12539_v24, %v6015_v28  ;;  %v6243_v36 = vmax.f32 %v6013_v15, 0.0 }
 0xad1   : > { %v6246_v31 = vmax.f32 %v6024_v48, 0.0 }
 0xad2   : > { %v6244_v22 = vmax.f32 %v6016_v32, 0.0 }
 0xad3   : > { %v6304_v0 = vpack.c.bf16 %v6246_v31, %v6245_v11 }
 0xad4   : > { %v6303_v59 = vpack.c.bf16 %v6244_v22, %v6243_v36  ;;  %v10337_v57 = vpop.f32.mrb[44].mxu0 }
 0xad5   : > { %v6037_v26 = vadd.f32 %v10337_v57, %v12539_v24  ;;  %v6028_v14 = vpop.f32.mrb[45].mxu0 }
 0xad6   : > { %v6029_v21 = vadd.f32 %v12539_v24, %v6028_v14  ;;  %v10338_v30 = vpop.f32.mrb[46].mxu0  ;;  %10411 = vmatprep.mubr.bf16.mxu1 %v6303_v59 }
 0xad7   : > { %v6040_v29 = vadd.f32 %v10338_v30, %v12539_v24  ;;  %v6031_v25 = vpop.f32.mrb[47].mxu0  ;;  %10412 = vmatmul.mubr.bf16.gmra.mrb[104].mxu1 %v6304_v0  ;;  %v6249_v51 = vmax.f32 %v6037_v26, 0.0 }
 0xad8   : > { %v6032_v43 = vadd.f32 %v12539_v24, %v6031_v25  ;;  %v6247_v45 = vmax.f32 %v6029_v21, 0.0 }
 0xad9   : > { %v6250_v27 = vmax.f32 %v6040_v29, 0.0 }
 0xada   : > { %v6248_v8 = vmax.f32 %v6032_v43, 0.0 }
 0xadb   : > { %v6306_v58 = vpack.c.bf16 %v6250_v27, %v6249_v51 }
 0xadc   : > { %v6305_v20 = vpack.c.bf16 %v6248_v8, %v6247_v45  ;;  %v10341_v12 = vpop.f32.mrb[48].mxu0 }
 0xadd   : > { %v6053_v33 = vadd.f32 %v10341_v12, %v12539_v24  ;;  %v6044_v34 = vpop.f32.mrb[49].mxu0 }
 0xade   : > { %v6045_v35 = vadd.f32 %v12539_v24, %v6044_v34  ;;  %v10342_v5 = vpop.f32.mrb[50].mxu0  ;;  %10415 = vmatprep.mubr.bf16.mxu1 %v6305_v20 }
 0xadf   : > { %v6056_v52 = vadd.f32 %v10342_v5, %v12539_v24  ;;  %v6047_v2 = vpop.f32.mrb[51].mxu0  ;;  %10416 = vmatmul.mubr.bf16.gmra.mrb[108].mxu1 %v6306_v58  ;;  %v6253_v60 = vmax.f32 %v6053_v33, 0.0 }
 0xae0   : > { %v6048_v10 = vadd.f32 %v12539_v24, %v6047_v2  ;;  %v6251_v23 = vmax.f32 %v6045_v35, 0.0 }
 0xae1   : > { %v6254_v1 = vmax.f32 %v6056_v52, 0.0  ;;  %v10895_v52 = vld [vmem:[%s13229_s3 + $0x300] sm:$0xff]  }
 0xae2   : > { %v6252_v37 = vmax.f32 %v6048_v10, 0.0  ;;  %10467 = vmatprep.subr.bf16.mxu0 %v10895_v52 }
 0xae3   : > { %v6308_v9 = vpack.c.bf16 %v6254_v1, %v6253_v60  ;;  %10468 = vmatpush3.bf16.msra.mxu0 %v10895_v52 }
 0xae4   : > { %v6307_v38 = vpack.c.bf16 %v6252_v37, %v6251_v23  ;;  %v10345_v63 = vpop.f32.mrb[52].mxu0  ;;  %v10896_v37 = vld [vmem:[%s13229_s3 + $0x308] sm:$0xff]  }
 0xae5   : > { %v6069_v47 = vadd.f32 %v10345_v63, %v12539_v24  ;;  %v6060_v6 = vpop.f32.mrb[53].mxu0  ;;  %v10897_v63 = vld [vmem:[%s13229_s3 + $0x310] sm:$0xff]   ;;  %10469 = vmatprep.subr.bf16.mxu0 %v10896_v37 }
 0xae6   : > { %v6061_v4 = vadd.f32 %v12539_v24, %v6060_v6  ;;  %v10346_v39 = vpop.f32.mrb[54].mxu0  ;;  %10419 = vmatprep.mubr.bf16.mxu1 %v6307_v38 }
 0xae7   : > { %v6072_v40 = vadd.f32 %v10346_v39, %v12539_v24  ;;  %v6063_v42 = vpop.f32.mrb[55].mxu0  ;;  %10420 = vmatmul.mubr.bf16.gmra.mrb[112].mxu1 %v6308_v9  ;;  %v6257_v16 = vmax.f32 %v6069_v47, 0.0  ;;  %10470 = vmatpush3.bf16.msra.mxu0 %v10896_v37 }
 0xae8   : > { %v6064_v44 = vadd.f32 %v12539_v24, %v6063_v42  ;;  %v6255_v50 = vmax.f32 %v6061_v4, 0.0  ;;  %10471 = vmatprep.subr.bf16.mxu0 %v10897_v63 }
 0xae9   : > { %v6258_v46 = vmax.f32 %v6072_v40, 0.0 }
 0xaea   : > { %v6256_v18 = vmax.f32 %v6064_v44, 0.0 }
 0xaeb   : > { %v6310_v49 = vpack.c.bf16 %v6258_v46, %v6257_v16  ;;  %v10898_v16 = vld [vmem:[%s13229_s3 + $0x318] sm:$0xff]   ;;  %10472 = vmatpush3.bf16.msra.mxu0 %v10897_v63 }
 0xaec   : > { %v6309_v3 = vpack.c.bf16 %v6256_v18, %v6255_v50  ;;  %v10349_v55 = vpop.f32.mrb[56].mxu0  ;;  %10473 = vmatprep.subr.bf16.mxu0 %v10898_v16  ;;  %v10899_v18 = vld [vmem:[%s13229_s3 + $0x320] sm:$0xff]  }
 0xaed   : > { %v6085_v61 = vadd.f32 %v10349_v55, %v12539_v24  ;;  %v6076_v19 = vpop.f32.mrb[57].mxu0 }
 0xaee   : > { %v6077_v54 = vadd.f32 %v12539_v24, %v6076_v19  ;;  %v10350_v53 = vpop.f32.mrb[58].mxu0  ;;  %10423 = vmatprep.mubr.bf16.mxu1 %v6309_v3  ;;  %v10901_v19 = vld [vmem:[%s13229_s3 + $0x330] sm:$0xff]  }
 0xaef   : > { %v6088_v56 = vadd.f32 %v10350_v53, %v12539_v24  ;;  %v6079_v62 = vpop.f32.mrb[59].mxu0  ;;  %10424 = vmatmul.mubr.bf16.gmra.mrb[116].mxu1 %v6310_v49  ;;  %v6261_v41 = vmax.f32 %v6085_v61, 0.0  ;;  %10474 = vmatpush3.bf16.msra.mxu0 %v10898_v16  ;;  %v10900_v49 = vld [vmem:[%s13229_s3 + $0x328] sm:$0xff]  }
 0xaf0   : > { %v6080_v7 = vadd.f32 %v12539_v24, %v6079_v62  ;;  %v6259_v15 = vmax.f32 %v6077_v54, 0.0  ;;  %10475 = vmatprep.subr.bf16.mxu0 %v10899_v18 }
 0xaf1   : > { %v6262_v13 = vmax.f32 %v6088_v56, 0.0 }
 0xaf2   : > { %v6260_v17 = vmax.f32 %v6080_v7, 0.0 }
 0xaf3   : > { %v6312_v48 = vpack.c.bf16 %v6262_v13, %v6261_v41  ;;  %10476 = vmatpush3.bf16.msra.mxu0 %v10899_v18 }
 0xaf4   : > { %v6311_v28 = vpack.c.bf16 %v6260_v17, %v6259_v15  ;;  %v10353_v32 = vpop.f32.mrb[60].mxu0  ;;  %10477 = vmatprep.subr.bf16.mxu0 %v10900_v49  ;;  %v10902_v15 = vld [vmem:[%s13229_s3 + $0x338] sm:$0xff]  }
 0xaf5   : > { %v6101_v11 = vadd.f32 %v10353_v32, %v12539_v24  ;;  %v6092_v31 = vpop.f32.mrb[61].mxu0 }
 0xaf6   : > { %v6093_v36 = vadd.f32 %v12539_v24, %v6092_v31  ;;  %v10354_v22 = vpop.f32.mrb[62].mxu0  ;;  %10427 = vmatprep.mubr.bf16.mxu1 %v6311_v28 }
 0xaf7   : > { %v6104_v0 = vadd.f32 %v10354_v22, %v12539_v24  ;;  %v6095_v59 = vpop.f32.mrb[63].mxu0  ;;  %10428 = vmatmul.mubr.bf16.gmra.mrb[120].mxu1 %v6312_v48  ;;  %v6265_v26 = vmax.f32 %v6101_v11, 0.0  ;;  %10478 = vmatpush3.bf16.msra.mxu0 %v10900_v49 }
 0xaf8   : > { %v6096_v57 = vadd.f32 %v12539_v24, %v6095_v59  ;;  %v6263_v21 = vmax.f32 %v6093_v36, 0.0  ;;  %10479 = vmatprep.subr.bf16.mxu0 %v10901_v19 }
 0xaf9   : > { %v6266_v14 = vmax.f32 %v6104_v0, 0.0 }
 0xafa   : > { %v6264_v30 = vmax.f32 %v6096_v57, 0.0 }
 0xafb   : > { %v6314_v29 = vpack.c.bf16 %v6266_v14, %v6265_v26  ;;  %10480 = vmatpush3.bf16.msra.mxu0 %v10901_v19 }
 0xafc   : > { %v6313_v25 = vpack.c.bf16 %v6264_v30, %v6263_v21  ;;  %v10357_v43 = vpop.f32.mrb[64].mxu0  ;;  %10481 = vmatprep.subr.bf16.mxu0 %v10902_v15 }
 0xafd   : > { %v6117_v51 = vadd.f32 %v10357_v43, %v12539_v24  ;;  %v6108_v27 = vpop.f32.mrb[65].mxu0 }
 0xafe   : > { %v6109_v45 = vadd.f32 %v12539_v24, %v6108_v27  ;;  %v10358_v8 = vpop.f32.mrb[66].mxu0  ;;  %10431 = vmatprep.mubr.bf16.mxu1 %v6313_v25 }
 0xaff   : > { %v6120_v58 = vadd.f32 %v10358_v8, %v12539_v24  ;;  %v6111_v20 = vpop.f32.mrb[67].mxu0  ;;  %10432 = vmatmul.mubr.bf16.gmra.mrb[124].mxu1 %v6314_v29  ;;  %v6269_v33 = vmax.f32 %v6117_v51, 0.0  ;;  %10482 = vmatpush3.bf16.msra.mxu0 %v10902_v15 }
 0xb00   : > { %v6112_v12 = vadd.f32 %v12539_v24, %v6111_v20  ;;  %v6267_v35 = vmax.f32 %v6109_v45, 0.0 }
 0xb01   : > { %v6270_v34 = vmax.f32 %v6120_v58, 0.0 }
 0xb02   : > { %v6268_v5 = vmax.f32 %v6112_v12, 0.0 }
 0xb03   : > { %v6316_v2 = vpack.c.bf16 %v6270_v34, %v6269_v33 }
 0xb04   : > { %v6315_v10 = vpack.c.bf16 %v6268_v5, %v6267_v35  ;;  %v10361_v60 = vpop.f32.mrb[68].mxu0 }
 0xb05   : > { %v6133_v1 = vadd.f32 %v10361_v60, %v12539_v24  ;;  %v6124_v23 = vpop.f32.mrb[69].mxu0 }
 0xb06   : > { %v6125_v9 = vadd.f32 %v12539_v24, %v6124_v23  ;;  %v10362_v38 = vpop.f32.mrb[70].mxu0  ;;  %10435 = vmatprep.mubr.bf16.mxu1 %v6315_v10 }
 0xb07   : > { %v6136_v47 = vadd.f32 %v10362_v38, %v12539_v24  ;;  %v6127_v6 = vpop.f32.mrb[71].mxu0  ;;  %10436 = vmatmul.mubr.bf16.gmra.mrb[128].mxu1 %v6316_v2  ;;  %v6273_v39 = vmax.f32 %v6133_v1, 0.0 }
 0xb08   : > { %v6128_v4 = vadd.f32 %v12539_v24, %v6127_v6  ;;  %v6271_v42 = vmax.f32 %v6125_v9, 0.0 }
 0xb09   : > { %v6274_v40 = vmax.f32 %v6136_v47, 0.0 }
 0xb0a   : > { %v6272_v44 = vmax.f32 %v6128_v4, 0.0 }
 0xb0b   : > { %v6318_v46 = vpack.c.bf16 %v6274_v40, %v6273_v39 }
 0xb0c   : > { %v6317_v50 = vpack.c.bf16 %v6272_v44, %v6271_v42 }
 0xb0e   : > { %10439 = vmatprep.mubr.bf16.mxu1 %v6317_v50 }
 0xb0f   : > { %10440 = vmatmul.mubr.bf16.gmra.mrb[132].mxu1 %v6318_v46 }
 0xb1a   : > { %v10365_v3 = vpop.f32.mrb[72].mxu0 }
 0xb1b   : > { %v6149_v55 = vadd.f32 %v10365_v3, %v12539_v24  ;;  %v6140_v61 = vpop.f32.mrb[73].mxu0 }
 0xb1c   : > { %v6141_v54 = vadd.f32 %v12539_v24, %v6140_v61  ;;  %v10366_v53 = vpop.f32.mrb[74].mxu0 }
 0xb1d   : > { %v6152_v56 = vadd.f32 %v10366_v53, %v12539_v24  ;;  %v6143_v62 = vpop.f32.mrb[75].mxu0  ;;  %v6277_v41 = vmax.f32 %v6149_v55, 0.0 }
 0xb1e   : > { %v6144_v7 = vadd.f32 %v12539_v24, %v6143_v62  ;;  %v6275_v17 = vmax.f32 %v6141_v54, 0.0 }
 0xb1f   : > { %v6278_v13 = vmax.f32 %v6152_v56, 0.0 }
 0xb20   : > { %v6276_v48 = vmax.f32 %v6144_v7, 0.0 }
 0xb21   : > { %v6320_v28 = vpack.c.bf16 %v6278_v13, %v6277_v41 }
 0xb22   : > { %v6319_v32 = vpack.c.bf16 %v6276_v48, %v6275_v17 }
 0xb24   : > { %10443 = vmatprep.mubr.bf16.mxu1 %v6319_v32 }
 0xb25   : > { %10444 = vmatmul.mubr.bf16.gmra.mrb[136].mxu1 %v6320_v28 }
 0xb32   : > { %v10369_v11 = vpop.f32.mrb[76].mxu0 }
 0xb33   : > { %v6165_v31 = vadd.f32 %v10369_v11, %v12539_v24  ;;  %v6156_v36 = vpop.f32.mrb[77].mxu0 }
 0xb34   : > { %v6157_v22 = vadd.f32 %v12539_v24, %v6156_v36  ;;  %v10370_v0 = vpop.f32.mrb[78].mxu0 }
 0xb35   : > { %v6168_v59 = vadd.f32 %v10370_v0, %v12539_v24  ;;  %v6159_v57 = vpop.f32.mrb[79].mxu0  ;;  %v6281_v14 = vmax.f32 %v6165_v31, 0.0 }
 0xb36   : > { %v6160_v26 = vadd.f32 %v12539_v24, %v6159_v57  ;;  %v6279_v30 = vmax.f32 %v6157_v22, 0.0 }
 0xb37   : > { %v6282_v21 = vmax.f32 %v6168_v59, 0.0  ;;  %v12632_v59 = vld [vmem:[%s13230_s4 + $0xb] ss:$0 sm:$0xff] }
 0xb38   : > { %v6280_v29 = vmax.f32 %v6160_v26, 0.0 }
 0xb39   : > { %v6322_v25 = vpack.c.bf16 %v6282_v21, %v6281_v14 }
 0xb3a   : > { %v6321_v43 = vpack.c.bf16 %v6280_v29, %v6279_v30 }
 0xb3c   : > { %10447 = vmatprep.mubr.bf16.mxu1 %v6321_v43 }
 0xb3d   : > { %10448 = vmatmul.mubr.bf16.gmra.mrb[140].mxu1 %v6322_v25 }
 0xb4a   : > { %v10373_v51 = vpop.f32.mrb[80].mxu0 }
 0xb4b   : > { %v6181_v27 = vadd.f32 %v10373_v51, %v12539_v24  ;;  %v6172_v45 = vpop.f32.mrb[81].mxu0 }
 0xb4c   : > { %v6173_v8 = vadd.f32 %v12539_v24, %v6172_v45  ;;  %v10374_v58 = vpop.f32.mrb[82].mxu0 }
 0xb4d   : > { %v6184_v20 = vadd.f32 %v10374_v58, %v12539_v24  ;;  %v6175_v12 = vpop.f32.mrb[83].mxu0  ;;  %v6285_v34 = vmax.f32 %v6181_v27, 0.0 }
 0xb4e   : > { %v6176_v33 = vadd.f32 %v12539_v24, %v6175_v12  ;;  %v6283_v5 = vmax.f32 %v6173_v8, 0.0 }
 0xb4f   : > { %v6286_v35 = vmax.f32 %v6184_v20, 0.0 }
 0xb50   : > { %v6284_v52 = vmax.f32 %v6176_v33, 0.0 }
 0xb51   : > { %v6324_v2 = vpack.c.bf16 %v6286_v35, %v6285_v34 }
 0xb52   : > { %v6323_v10 = vpack.c.bf16 %v6284_v52, %v6283_v5 }
 0xb54   : > { %10451 = vmatprep.mubr.bf16.mxu1 %v6323_v10 }
 0xb55   : > { %10452 = vmatmul.mubr.bf16.gmra.mrb[144].mxu1 %v6324_v2 }
 0xb62   : > { %v10377_v60 = vpop.f32.mrb[84].mxu0 }
 0xb63   : > { %v6197_v1 = vadd.f32 %v10377_v60, %v12539_v24  ;;  %v6188_v23 = vpop.f32.mrb[85].mxu0 }
 0xb64   : > { %v6189_v37 = vadd.f32 %v12539_v24, %v6188_v23  ;;  %v10378_v9 = vpop.f32.mrb[86].mxu0 }
 0xb65   : > { %v6200_v38 = vadd.f32 %v10378_v9, %v12539_v24  ;;  %v6191_v63 = vpop.f32.mrb[87].mxu0  ;;  %v6289_v6 = vmax.f32 %v6197_v1, 0.0 }
 0xb66   : > { %v6192_v47 = vadd.f32 %v12539_v24, %v6191_v63  ;;  %v6287_v39 = vmax.f32 %v6189_v37, 0.0 }
 0xb67   : > { %v6290_v4 = vmax.f32 %v6200_v38, 0.0 }
 0xb68   : > { %v6288_v40 = vmax.f32 %v6192_v47, 0.0 }
 0xb69   : > { %v6326_v42 = vpack.c.bf16 %v6290_v4, %v6289_v6 }
 0xb6a   : > { %v6325_v44 = vpack.c.bf16 %v6288_v40, %v6287_v39 }
 0xb6c   : > { %10455 = vmatprep.mubr.bf16.mxu1 %v6325_v44 }
 0xb6d   : > { %10456 = vmatmul.mubr.bf16.gmra.mrb[148].mxu1 %v6326_v42 }
 0xb7a   : > { %v10381_v16 = vpop.f32.mrb[88].mxu0 }
 0xb7b   : > { %v6213_v46 = vadd.f32 %v10381_v16, %v12539_v24  ;;  %v6204_v50 = vpop.f32.mrb[89].mxu0 }
 0xb7c   : > { %v6205_v18 = vadd.f32 %v12539_v24, %v6204_v50  ;;  %v10382_v49 = vpop.f32.mrb[90].mxu0 }
 0xb7d   : > { %v6216_v3 = vadd.f32 %v10382_v49, %v12539_v24  ;;  %v6207_v55 = vpop.f32.mrb[91].mxu0  ;;  %v6293_v19 = vmax.f32 %v6213_v46, 0.0 }
 0xb7e   : > { %v6208_v61 = vadd.f32 %v12539_v24, %v6207_v55  ;;  %v6291_v53 = vmax.f32 %v6205_v18, 0.0 }
 0xb7f   : > { %v6294_v54 = vmax.f32 %v6216_v3, 0.0 }
 0xb80   : > { %v6292_v56 = vmax.f32 %v6208_v61, 0.0 }
 0xb81   : > { %v6328_v62 = vpack.c.bf16 %v6294_v54, %v6293_v19 }
 0xb82   : > { %v6327_v7 = vpack.c.bf16 %v6292_v56, %v6291_v53 }
 0xb84   : > { %10459 = vmatprep.mubr.bf16.mxu1 %v6327_v7 }
 0xb85   : > { %10460 = vmatmul.mubr.bf16.gmra.mrb[152].mxu1 %v6328_v62 }
 0xb92   : > { %v10385_v41 = vpop.f32.mrb[92].mxu0 }
 0xb93   : > { %v6229_v13 = vadd.f32 %v10385_v41, %v12539_v24  ;;  %v6220_v15 = vpop.f32.mrb[93].mxu0 }
 0xb94   : > { %v6221_v17 = vadd.f32 %v12539_v24, %v6220_v15  ;;  %v10386_v48 = vpop.f32.mrb[94].mxu0 }
 0xb95   : > { %v6232_v28 = vadd.f32 %v10386_v48, %v12539_v24  ;;  %v6223_v32 = vpop.f32.mrb[95].mxu0  ;;  %v6297_v31 = vmax.f32 %v6229_v13, 0.0 }
 0xb96   : > { %v6224_v11 = vadd.f32 %v12539_v24, %v6223_v32  ;;  %v6295_v22 = vmax.f32 %v6221_v17, 0.0 }
 0xb97   : > { %v6298_v36 = vmax.f32 %v6232_v28, 0.0 }
 0xb98   : > { %v6296_v0 = vmax.f32 %v6224_v11, 0.0 }
 0xb99   : > { %v6330_v57 = vpack.c.bf16 %v6298_v36, %v6297_v31 }
 0xb9a   : > { %v6329_v26 = vpack.c.bf16 %v6296_v0, %v6295_v22  ;;  %v10405_v14 = vpop.f32.mrb[96].mxu1 }
 0xb9b   : > { %v6447_v21 = vadd.f32 %v10405_v14, %v12632_v59  ;;  %v6438_v30 = vpop.f32.mrb[97].mxu1 }
 0xb9c   : > { %v6439_v29 = vadd.f32 %v12632_v59, %v6438_v30  ;;  %v10406_v25 = vpop.f32.mrb[98].mxu1  ;;  %10463 = vmatprep.mubr.bf16.mxu1 %v6329_v26 }
 0xb9d   : > { %v6450_v24 = vadd.f32 %v10406_v25, %v12632_v59  ;;  %v6441_v43 = vpop.f32.mrb[99].mxu1  ;;  %10464 = vmatmul.mubr.bf16.gmra.mrb[156].mxu1 %v6330_v57  ;;  %v6695_v27 = vmax.f32 %v6447_v21, 0.0 }
 0xb9e   : > { %v6442_v51 = vadd.f32 %v12632_v59, %v6441_v43  ;;  %v6693_v8 = vmax.f32 %v6439_v29, 0.0 }
 0xb9f   : > { %v6696_v45 = vmax.f32 %v6450_v24, 0.0 }
 0xba0   : > { %v6694_v58 = vmax.f32 %v6442_v51, 0.0 }
 0xba1   : > { %v6758_v20 = vpack.c.bf16 %v6696_v45, %v6695_v27 }
 0xba2   : > { %v6757_v12 = vpack.c.bf16 %v6694_v58, %v6693_v8  ;;  %v10409_v33 = vpop.f32.mrb[100].mxu1 }
 0xba3   : > { %v6463_v34 = vadd.f32 %v10409_v33, %v12632_v59  ;;  %v6454_v35 = vpop.f32.mrb[101].mxu1 }
 0xba4   : > { %v6455_v5 = vadd.f32 %v12632_v59, %v6454_v35  ;;  %v10410_v52 = vpop.f32.mrb[102].mxu1  ;;  %10483 = vmatprep.mubr.bf16.mxu0 %v6757_v12 }
 0xba5   : > { %v6466_v2 = vadd.f32 %v10410_v52, %v12632_v59  ;;  %v6457_v10 = vpop.f32.mrb[103].mxu1  ;;  %10484 = vmatmul.mubr.bf16.vlgmr.msra.gmra.mrb[96].mxu0 %v6758_v20  ;;  %v6699_v1 = vmax.f32 %v6463_v34, 0.0 }
 0xba6   : > { %v6458_v60 = vadd.f32 %v12632_v59, %v6457_v10  ;;  %v6697_v37 = vmax.f32 %v6455_v5, 0.0 }
 0xba7   : > { %v6700_v23 = vmax.f32 %v6466_v2, 0.0 }
 0xba8   : > { %v6698_v9 = vmax.f32 %v6458_v60, 0.0 }
 0xba9   : > { %v6760_v38 = vpack.c.bf16 %v6700_v23, %v6699_v1 }
 0xbaa   : > { %v6759_v63 = vpack.c.bf16 %v6698_v9, %v6697_v37  ;;  %v10413_v47 = vpop.f32.mrb[104].mxu1 }
 0xbab   : > { %v6479_v6 = vadd.f32 %v10413_v47, %v12632_v59  ;;  %v6470_v4 = vpop.f32.mrb[105].mxu1 }
 0xbac   : > { %v6471_v39 = vadd.f32 %v12632_v59, %v6470_v4  ;;  %v10414_v40 = vpop.f32.mrb[106].mxu1  ;;  %10487 = vmatprep.mubr.bf16.mxu0 %v6759_v63 }
 0xbad   : > { %v6482_v42 = vadd.f32 %v10414_v40, %v12632_v59  ;;  %v6473_v44 = vpop.f32.mrb[107].mxu1  ;;  %10488 = vmatmul.mubr.bf16.gmra.mrb[100].mxu0 %v6760_v38  ;;  %v6703_v46 = vmax.f32 %v6479_v6, 0.0 }
 0xbae   : > { %v6474_v16 = vadd.f32 %v12632_v59, %v6473_v44  ;;  %v6701_v18 = vmax.f32 %v6471_v39, 0.0 }
 0xbaf   : > { %v6704_v50 = vmax.f32 %v6482_v42, 0.0 }
 0xbb0   : > { %v6702_v49 = vmax.f32 %v6474_v16, 0.0 }
 0xbb1   : > { %v6762_v3 = vpack.c.bf16 %v6704_v50, %v6703_v46 }
 0xbb2   : > { %v6761_v55 = vpack.c.bf16 %v6702_v49, %v6701_v18  ;;  %v10417_v61 = vpop.f32.mrb[108].mxu1 }
 0xbb3   : > { %v6495_v19 = vadd.f32 %v10417_v61, %v12632_v59  ;;  %v6486_v54 = vpop.f32.mrb[109].mxu1 }
 0xbb4   : > { %v6487_v53 = vadd.f32 %v12632_v59, %v6486_v54  ;;  %v10418_v56 = vpop.f32.mrb[110].mxu1  ;;  %10491 = vmatprep.mubr.bf16.mxu0 %v6761_v55 }
 0xbb5   : > { %v6498_v62 = vadd.f32 %v10418_v56, %v12632_v59  ;;  %v6489_v7 = vpop.f32.mrb[111].mxu1  ;;  %10492 = vmatmul.mubr.bf16.gmra.mrb[104].mxu0 %v6762_v3  ;;  %v6707_v13 = vmax.f32 %v6495_v19, 0.0 }
 0xbb6   : > { %v6490_v41 = vadd.f32 %v12632_v59, %v6489_v7  ;;  %v6705_v17 = vmax.f32 %v6487_v53, 0.0 }
 0xbb7   : > { %v6708_v15 = vmax.f32 %v6498_v62, 0.0 }
 0xbb8   : > { %v6706_v48 = vmax.f32 %v6490_v41, 0.0 }
 0xbb9   : > { %v6764_v28 = vpack.c.bf16 %v6708_v15, %v6707_v13 }
 0xbba   : > { %v6763_v32 = vpack.c.bf16 %v6706_v48, %v6705_v17  ;;  %v10421_v11 = vpop.f32.mrb[112].mxu1 }
 0xbbb   : > { %v6511_v31 = vadd.f32 %v10421_v11, %v12632_v59  ;;  %v6502_v36 = vpop.f32.mrb[113].mxu1 }
 0xbbc   : > { %v6503_v22 = vadd.f32 %v12632_v59, %v6502_v36  ;;  %v10422_v0 = vpop.f32.mrb[114].mxu1  ;;  %10495 = vmatprep.mubr.bf16.mxu0 %v6763_v32 }
 0xbbd   : > { %v6514_v57 = vadd.f32 %v10422_v0, %v12632_v59  ;;  %v6505_v26 = vpop.f32.mrb[115].mxu1  ;;  %10496 = vmatmul.mubr.bf16.gmra.mrb[108].mxu0 %v6764_v28  ;;  %v6711_v21 = vmax.f32 %v6511_v31, 0.0 }
 0xbbe   : > { %v6506_v14 = vadd.f32 %v12632_v59, %v6505_v26  ;;  %v6709_v29 = vmax.f32 %v6503_v22, 0.0 }
 0xbbf   : > { %v6712_v30 = vmax.f32 %v6514_v57, 0.0  ;;  %v10903_v57 = vld [vmem:[%s13229_s3 + $0x340] sm:$0xff]  }
 0xbc0   : > { %v6710_v25 = vmax.f32 %v6506_v14, 0.0  ;;  %10547 = vmatprep.subr.bf16.mxu1 %v10903_v57 }
 0xbc1   : > { %v6766_v24 = vpack.c.bf16 %v6712_v30, %v6711_v21  ;;  %10548 = vmatpush3.bf16.msra.mxu1 %v10903_v57 }
 0xbc2   : > { %v6765_v43 = vpack.c.bf16 %v6710_v25, %v6709_v29  ;;  %v10425_v51 = vpop.f32.mrb[116].mxu1  ;;  %v10904_v25 = vld [vmem:[%s13229_s3 + $0x348] sm:$0xff]  }
 0xbc3   : > { %v6527_v27 = vadd.f32 %v10425_v51, %v12632_v59  ;;  %v6518_v45 = vpop.f32.mrb[117].mxu1  ;;  %v10905_v51 = vld [vmem:[%s13229_s3 + $0x350] sm:$0xff]   ;;  %10549 = vmatprep.subr.bf16.mxu1 %v10904_v25 }
 0xbc4   : > { %v6519_v8 = vadd.f32 %v12632_v59, %v6518_v45  ;;  %v10426_v58 = vpop.f32.mrb[118].mxu1  ;;  %10499 = vmatprep.mubr.bf16.mxu0 %v6765_v43 }
 0xbc5   : > { %v6530_v20 = vadd.f32 %v10426_v58, %v12632_v59  ;;  %v6521_v12 = vpop.f32.mrb[119].mxu1  ;;  %10500 = vmatmul.mubr.bf16.gmra.mrb[112].mxu0 %v6766_v24  ;;  %v6715_v34 = vmax.f32 %v6527_v27, 0.0  ;;  %10550 = vmatpush3.bf16.msra.mxu1 %v10904_v25 }
 0xbc6   : > { %v6522_v33 = vadd.f32 %v12632_v59, %v6521_v12  ;;  %v6713_v5 = vmax.f32 %v6519_v8, 0.0  ;;  %10551 = vmatprep.subr.bf16.mxu1 %v10905_v51 }
 0xbc7   : > { %v6716_v35 = vmax.f32 %v6530_v20, 0.0 }
 0xbc8   : > { %v6714_v52 = vmax.f32 %v6522_v33, 0.0 }
 0xbc9   : > { %v6768_v2 = vpack.c.bf16 %v6716_v35, %v6715_v34  ;;  %v10906_v34 = vld [vmem:[%s13229_s3 + $0x358] sm:$0xff]   ;;  %10552 = vmatpush3.bf16.msra.mxu1 %v10905_v51 }
 0xbca   : > { %v6767_v10 = vpack.c.bf16 %v6714_v52, %v6713_v5  ;;  %v10429_v60 = vpop.f32.mrb[120].mxu1  ;;  %10553 = vmatprep.subr.bf16.mxu1 %v10906_v34  ;;  %v10907_v52 = vld [vmem:[%s13229_s3 + $0x360] sm:$0xff]  }
 0xbcb   : > { %v6543_v1 = vadd.f32 %v10429_v60, %v12632_v59  ;;  %v6534_v23 = vpop.f32.mrb[121].mxu1 }
 0xbcc   : > { %v6535_v37 = vadd.f32 %v12632_v59, %v6534_v23  ;;  %v10430_v9 = vpop.f32.mrb[122].mxu1  ;;  %10503 = vmatprep.mubr.bf16.mxu0 %v6767_v10  ;;  %v10909_v23 = vld [vmem:[%s13229_s3 + $0x370] sm:$0xff]  }
 0xbcd   : > { %v6546_v38 = vadd.f32 %v10430_v9, %v12632_v59  ;;  %v6537_v63 = vpop.f32.mrb[123].mxu1  ;;  %10504 = vmatmul.mubr.bf16.gmra.mrb[116].mxu0 %v6768_v2  ;;  %v6719_v6 = vmax.f32 %v6543_v1, 0.0  ;;  %10554 = vmatpush3.bf16.msra.mxu1 %v10906_v34  ;;  %v10908_v2 = vld [vmem:[%s13229_s3 + $0x368] sm:$0xff]  }
 0xbce   : > { %v6538_v47 = vadd.f32 %v12632_v59, %v6537_v63  ;;  %v6717_v39 = vmax.f32 %v6535_v37, 0.0  ;;  %10555 = vmatprep.subr.bf16.mxu1 %v10907_v52 }
 0xbcf   : > { %v6720_v4 = vmax.f32 %v6546_v38, 0.0 }
 0xbd0   : > { %v6718_v40 = vmax.f32 %v6538_v47, 0.0 }
 0xbd1   : > { %v6770_v42 = vpack.c.bf16 %v6720_v4, %v6719_v6  ;;  %10556 = vmatpush3.bf16.msra.mxu1 %v10907_v52 }
 0xbd2   : > { %v6769_v44 = vpack.c.bf16 %v6718_v40, %v6717_v39  ;;  %v10433_v16 = vpop.f32.mrb[124].mxu1  ;;  %10557 = vmatprep.subr.bf16.mxu1 %v10908_v2  ;;  %v10910_v39 = vld [vmem:[%s13229_s3 + $0x378] sm:$0xff]  }
 0xbd3   : > { %v6559_v46 = vadd.f32 %v10433_v16, %v12632_v59  ;;  %v6550_v50 = vpop.f32.mrb[125].mxu1 }
 0xbd4   : > { %v6551_v18 = vadd.f32 %v12632_v59, %v6550_v50  ;;  %v10434_v49 = vpop.f32.mrb[126].mxu1  ;;  %10507 = vmatprep.mubr.bf16.mxu0 %v6769_v44 }
 0xbd5   : > { %v6562_v3 = vadd.f32 %v10434_v49, %v12632_v59  ;;  %v6553_v55 = vpop.f32.mrb[127].mxu1  ;;  %10508 = vmatmul.mubr.bf16.gmra.mrb[120].mxu0 %v6770_v42  ;;  %v6723_v19 = vmax.f32 %v6559_v46, 0.0  ;;  %10558 = vmatpush3.bf16.msra.mxu1 %v10908_v2 }
 0xbd6   : > { %v6554_v61 = vadd.f32 %v12632_v59, %v6553_v55  ;;  %v6721_v53 = vmax.f32 %v6551_v18, 0.0  ;;  %10559 = vmatprep.subr.bf16.mxu1 %v10909_v23 }
 0xbd7   : > { %v6724_v54 = vmax.f32 %v6562_v3, 0.0 }
 0xbd8   : > { %v6722_v56 = vmax.f32 %v6554_v61, 0.0 }
 0xbd9   : > { %v6772_v62 = vpack.c.bf16 %v6724_v54, %v6723_v19  ;;  %10560 = vmatpush3.bf16.msra.mxu1 %v10909_v23 }
 0xbda   : > { %v6771_v7 = vpack.c.bf16 %v6722_v56, %v6721_v53  ;;  %v10437_v41 = vpop.f32.mrb[128].mxu1  ;;  %10561 = vmatprep.subr.bf16.mxu1 %v10910_v39 }
 0xbdb   : > { %v6575_v13 = vadd.f32 %v10437_v41, %v12632_v59  ;;  %v6566_v15 = vpop.f32.mrb[129].mxu1 }
 0xbdc   : > { %v6567_v17 = vadd.f32 %v12632_v59, %v6566_v15  ;;  %v10438_v48 = vpop.f32.mrb[130].mxu1  ;;  %10511 = vmatprep.mubr.bf16.mxu0 %v6771_v7 }
 0xbdd   : > { %v6578_v28 = vadd.f32 %v10438_v48, %v12632_v59  ;;  %v6569_v32 = vpop.f32.mrb[131].mxu1  ;;  %10512 = vmatmul.mubr.bf16.gmra.mrb[124].mxu0 %v6772_v62  ;;  %v6727_v31 = vmax.f32 %v6575_v13, 0.0  ;;  %10562 = vmatpush3.bf16.msra.mxu1 %v10910_v39 }
 0xbde   : > { %v6570_v11 = vadd.f32 %v12632_v59, %v6569_v32  ;;  %v6725_v22 = vmax.f32 %v6567_v17, 0.0 }
 0xbdf   : > { %v6728_v36 = vmax.f32 %v6578_v28, 0.0 }
 0xbe0   : > { %v6726_v0 = vmax.f32 %v6570_v11, 0.0 }
 0xbe1   : > { %v6774_v26 = vpack.c.bf16 %v6728_v36, %v6727_v31 }
 0xbe2   : > { %v6773_v14 = vpack.c.bf16 %v6726_v0, %v6725_v22  ;;  %v10441_v21 = vpop.f32.mrb[132].mxu1 }
 0xbe3   : > { %v6591_v30 = vadd.f32 %v10441_v21, %v12632_v59  ;;  %v6582_v29 = vpop.f32.mrb[133].mxu1 }
 0xbe4   : > { %v6583_v24 = vadd.f32 %v12632_v59, %v6582_v29  ;;  %v10442_v43 = vpop.f32.mrb[134].mxu1  ;;  %10515 = vmatprep.mubr.bf16.mxu0 %v6773_v14 }
 0xbe5   : > { %v6594_v27 = vadd.f32 %v10442_v43, %v12632_v59  ;;  %v6585_v45 = vpop.f32.mrb[135].mxu1  ;;  %10516 = vmatmul.mubr.bf16.gmra.mrb[128].mxu0 %v6774_v26  ;;  %v6731_v58 = vmax.f32 %v6591_v30, 0.0 }
 0xbe6   : > { %v6586_v8 = vadd.f32 %v12632_v59, %v6585_v45  ;;  %v6729_v12 = vmax.f32 %v6583_v24, 0.0 }
 0xbe7   : > { %v6732_v20 = vmax.f32 %v6594_v27, 0.0 }
 0xbe8   : > { %v6730_v33 = vmax.f32 %v6586_v8, 0.0 }
 0xbe9   : > { %v6776_v35 = vpack.c.bf16 %v6732_v20, %v6731_v58 }
 0xbea   : > { %v6775_v5 = vpack.c.bf16 %v6730_v33, %v6729_v12 }
 0xbec   : > { %10519 = vmatprep.mubr.bf16.mxu0 %v6775_v5 }
 0xbed   : > { %10520 = vmatmul.mubr.bf16.gmra.mrb[132].mxu0 %v6776_v35 }
 0xbf8   : > { %v10445_v10 = vpop.f32.mrb[136].mxu1 }
 0xbf9   : > { %v6607_v60 = vadd.f32 %v10445_v10, %v12632_v59  ;;  %v6598_v1 = vpop.f32.mrb[137].mxu1 }
 0xbfa   : > { %v6599_v37 = vadd.f32 %v12632_v59, %v6598_v1  ;;  %v10446_v9 = vpop.f32.mrb[138].mxu1 }
 0xbfb   : > { %v6610_v38 = vadd.f32 %v10446_v9, %v12632_v59  ;;  %v6601_v63 = vpop.f32.mrb[139].mxu1  ;;  %v6735_v6 = vmax.f32 %v6607_v60, 0.0 }
 0xbfc   : > { %v6602_v47 = vadd.f32 %v12632_v59, %v6601_v63  ;;  %v6733_v40 = vmax.f32 %v6599_v37, 0.0 }
 0xbfd   : > { %v6736_v4 = vmax.f32 %v6610_v38, 0.0 }
 0xbfe   : > { %v6734_v42 = vmax.f32 %v6602_v47, 0.0 }
 0xbff   : > { %v6778_v44 = vpack.c.bf16 %v6736_v4, %v6735_v6 }
 0xc00   : > { %v6777_v16 = vpack.c.bf16 %v6734_v42, %v6733_v40 }
 0xc02   : > { %10523 = vmatprep.mubr.bf16.mxu0 %v6777_v16 }
 0xc03   : > { %10524 = vmatmul.mubr.bf16.gmra.mrb[136].mxu0 %v6778_v44 }
 0xc10   : > { %v10449_v46 = vpop.f32.mrb[140].mxu1 }
 0xc11   : > { %v6623_v50 = vadd.f32 %v10449_v46, %v12632_v59  ;;  %v6614_v18 = vpop.f32.mrb[141].mxu1 }
 0xc12   : > { %v6615_v49 = vadd.f32 %v12632_v59, %v6614_v18  ;;  %v10450_v3 = vpop.f32.mrb[142].mxu1 }
 0xc13   : > { %v6626_v55 = vadd.f32 %v10450_v3, %v12632_v59  ;;  %v6617_v61 = vpop.f32.mrb[143].mxu1  ;;  %v6739_v54 = vmax.f32 %v6623_v50, 0.0 }
 0xc14   : > { %v6618_v19 = vadd.f32 %v12632_v59, %v6617_v61  ;;  %v6737_v56 = vmax.f32 %v6615_v49, 0.0 }
 0xc15   : > { %v6740_v53 = vmax.f32 %v6626_v55, 0.0  ;;  %v12725_v55 = vld [vmem:[%s13230_s4 + $0xc] ss:$0 sm:$0xff] }
 0xc16   : > { %v6738_v62 = vmax.f32 %v6618_v19, 0.0 }
 0xc17   : > { %v6780_v7 = vpack.c.bf16 %v6740_v53, %v6739_v54 }
 0xc18   : > { %v6779_v41 = vpack.c.bf16 %v6738_v62, %v6737_v56 }
 0xc1a   : > { %10527 = vmatprep.mubr.bf16.mxu0 %v6779_v41 }
 0xc1b   : > { %10528 = vmatmul.mubr.bf16.gmra.mrb[140].mxu0 %v6780_v7 }
 0xc28   : > { %v10453_v13 = vpop.f32.mrb[144].mxu1 }
 0xc29   : > { %v6639_v15 = vadd.f32 %v10453_v13, %v12632_v59  ;;  %v6630_v17 = vpop.f32.mrb[145].mxu1 }
 0xc2a   : > { %v6631_v48 = vadd.f32 %v12632_v59, %v6630_v17  ;;  %v10454_v28 = vpop.f32.mrb[146].mxu1 }
 0xc2b   : > { %v6642_v32 = vadd.f32 %v10454_v28, %v12632_v59  ;;  %v6633_v11 = vpop.f32.mrb[147].mxu1  ;;  %v6743_v36 = vmax.f32 %v6639_v15, 0.0 }
 0xc2c   : > { %v6634_v31 = vadd.f32 %v12632_v59, %v6633_v11  ;;  %v6741_v0 = vmax.f32 %v6631_v48, 0.0 }
 0xc2d   : > { %v6744_v22 = vmax.f32 %v6642_v32, 0.0 }
 0xc2e   : > { %v6742_v57 = vmax.f32 %v6634_v31, 0.0 }
 0xc2f   : > { %v6782_v26 = vpack.c.bf16 %v6744_v22, %v6743_v36 }
 0xc30   : > { %v6781_v14 = vpack.c.bf16 %v6742_v57, %v6741_v0 }
 0xc32   : > { %10531 = vmatprep.mubr.bf16.mxu0 %v6781_v14 }
 0xc33   : > { %10532 = vmatmul.mubr.bf16.gmra.mrb[144].mxu0 %v6782_v26 }
 0xc40   : > { %v10457_v21 = vpop.f32.mrb[148].mxu1 }
 0xc41   : > { %v6655_v30 = vadd.f32 %v10457_v21, %v12632_v59  ;;  %v6646_v29 = vpop.f32.mrb[149].mxu1 }
 0xc42   : > { %v6647_v25 = vadd.f32 %v12632_v59, %v6646_v29  ;;  %v10458_v24 = vpop.f32.mrb[150].mxu1 }
 0xc43   : > { %v6658_v43 = vadd.f32 %v10458_v24, %v12632_v59  ;;  %v6649_v51 = vpop.f32.mrb[151].mxu1  ;;  %v6747_v45 = vmax.f32 %v6655_v30, 0.0 }
 0xc44   : > { %v6650_v27 = vadd.f32 %v12632_v59, %v6649_v51  ;;  %v6745_v58 = vmax.f32 %v6647_v25, 0.0 }
 0xc45   : > { %v6748_v8 = vmax.f32 %v6658_v43, 0.0 }
 0xc46   : > { %v6746_v20 = vmax.f32 %v6650_v27, 0.0 }
 0xc47   : > { %v6784_v12 = vpack.c.bf16 %v6748_v8, %v6747_v45 }
 0xc48   : > { %v6783_v33 = vpack.c.bf16 %v6746_v20, %v6745_v58 }
 0xc4a   : > { %10535 = vmatprep.mubr.bf16.mxu0 %v6783_v33 }
 0xc4b   : > { %10536 = vmatmul.mubr.bf16.gmra.mrb[148].mxu0 %v6784_v12 }
 0xc58   : > { %v10461_v34 = vpop.f32.mrb[152].mxu1 }
 0xc59   : > { %v6671_v35 = vadd.f32 %v10461_v34, %v12632_v59  ;;  %v6662_v5 = vpop.f32.mrb[153].mxu1 }
 0xc5a   : > { %v6663_v52 = vadd.f32 %v12632_v59, %v6662_v5  ;;  %v10462_v2 = vpop.f32.mrb[154].mxu1 }
 0xc5b   : > { %v6674_v10 = vadd.f32 %v10462_v2, %v12632_v59  ;;  %v6665_v60 = vpop.f32.mrb[155].mxu1  ;;  %v6751_v23 = vmax.f32 %v6671_v35, 0.0 }
 0xc5c   : > { %v6666_v1 = vadd.f32 %v12632_v59, %v6665_v60  ;;  %v6749_v9 = vmax.f32 %v6663_v52, 0.0 }
 0xc5d   : > { %v6752_v37 = vmax.f32 %v6674_v10, 0.0 }
 0xc5e   : > { %v6750_v38 = vmax.f32 %v6666_v1, 0.0 }
 0xc5f   : > { %v6786_v63 = vpack.c.bf16 %v6752_v37, %v6751_v23 }
 0xc60   : > { %v6785_v47 = vpack.c.bf16 %v6750_v38, %v6749_v9 }
 0xc62   : > { %10539 = vmatprep.mubr.bf16.mxu0 %v6785_v47 }
 0xc63   : > { %10540 = vmatmul.mubr.bf16.gmra.mrb[152].mxu0 %v6786_v63 }
 0xc70   : > { %v10465_v6 = vpop.f32.mrb[156].mxu1 }
 0xc71   : > { %v6687_v4 = vadd.f32 %v10465_v6, %v12632_v59  ;;  %v6678_v39 = vpop.f32.mrb[157].mxu1 }
 0xc72   : > { %v6679_v40 = vadd.f32 %v12632_v59, %v6678_v39  ;;  %v10466_v42 = vpop.f32.mrb[158].mxu1 }
 0xc73   : > { %v6690_v44 = vadd.f32 %v10466_v42, %v12632_v59  ;;  %v6681_v16 = vpop.f32.mrb[159].mxu1  ;;  %v6755_v50 = vmax.f32 %v6687_v4, 0.0 }
 0xc74   : > { %v6682_v46 = vadd.f32 %v12632_v59, %v6681_v16  ;;  %v6753_v49 = vmax.f32 %v6679_v40, 0.0 }
 0xc75   : > { %v6756_v18 = vmax.f32 %v6690_v44, 0.0 }
 0xc76   : > { %v6754_v3 = vmax.f32 %v6682_v46, 0.0 }
 0xc77   : > { %v6788_v61 = vpack.c.bf16 %v6756_v18, %v6755_v50 }
 0xc78   : > { %v6787_v19 = vpack.c.bf16 %v6754_v3, %v6753_v49  ;;  %v10485_v54 = vpop.f32.mrb[96].mxu0 }
 0xc79   : > { %v6905_v53 = vadd.f32 %v10485_v54, %v12725_v55  ;;  %v6896_v56 = vpop.f32.mrb[97].mxu0 }
 0xc7a   : > { %v6897_v62 = vadd.f32 %v12725_v55, %v6896_v56  ;;  %v10486_v7 = vpop.f32.mrb[98].mxu0  ;;  %10543 = vmatprep.mubr.bf16.mxu0 %v6787_v19 }
 0xc7b   : > { %v6908_v59 = vadd.f32 %v10486_v7, %v12725_v55  ;;  %v6899_v41 = vpop.f32.mrb[99].mxu0  ;;  %10544 = vmatmul.mubr.bf16.gmra.mrb[156].mxu0 %v6788_v61  ;;  %v7153_v15 = vmax.f32 %v6905_v53, 0.0 }
 0xc7c   : > { %v6900_v13 = vadd.f32 %v12725_v55, %v6899_v41  ;;  %v7151_v48 = vmax.f32 %v6897_v62, 0.0 }
 0xc7d   : > { %v7154_v17 = vmax.f32 %v6908_v59, 0.0 }
 0xc7e   : > { %v7152_v28 = vmax.f32 %v6900_v13, 0.0 }
 0xc7f   : > { %v7216_v32 = vpack.c.bf16 %v7154_v17, %v7153_v15 }
 0xc80   : > { %v7215_v11 = vpack.c.bf16 %v7152_v28, %v7151_v48  ;;  %v10489_v31 = vpop.f32.mrb[100].mxu0 }
 0xc81   : > { %v6921_v36 = vadd.f32 %v10489_v31, %v12725_v55  ;;  %v6912_v22 = vpop.f32.mrb[101].mxu0 }
 0xc82   : > { %v6913_v0 = vadd.f32 %v12725_v55, %v6912_v22  ;;  %v10490_v57 = vpop.f32.mrb[102].mxu0  ;;  %10563 = vmatprep.mubr.bf16.mxu1 %v7215_v11 }
 0xc83   : > { %v6924_v26 = vadd.f32 %v10490_v57, %v12725_v55  ;;  %v6915_v14 = vpop.f32.mrb[103].mxu0  ;;  %10564 = vmatmul.mubr.bf16.vlgmr.msra.gmra.mrb[160].mxu1 %v7216_v32  ;;  %v7157_v30 = vmax.f32 %v6921_v36, 0.0 }
 0xc84   : > { %v6916_v21 = vadd.f32 %v12725_v55, %v6915_v14  ;;  %v7155_v25 = vmax.f32 %v6913_v0, 0.0 }
 0xc85   : > { %v7158_v29 = vmax.f32 %v6924_v26, 0.0 }
 0xc86   : > { %v7156_v24 = vmax.f32 %v6916_v21, 0.0 }
 0xc87   : > { %v7218_v43 = vpack.c.bf16 %v7158_v29, %v7157_v30 }
 0xc88   : > { %v7217_v51 = vpack.c.bf16 %v7156_v24, %v7155_v25  ;;  %v10493_v27 = vpop.f32.mrb[104].mxu0 }
 0xc89   : > { %v6937_v45 = vadd.f32 %v10493_v27, %v12725_v55  ;;  %v6928_v8 = vpop.f32.mrb[105].mxu0 }
 0xc8a   : > { %v6929_v58 = vadd.f32 %v12725_v55, %v6928_v8  ;;  %v10494_v20 = vpop.f32.mrb[106].mxu0  ;;  %10567 = vmatprep.mubr.bf16.mxu1 %v7217_v51 }
 0xc8b   : > { %v6940_v12 = vadd.f32 %v10494_v20, %v12725_v55  ;;  %v6931_v33 = vpop.f32.mrb[107].mxu0  ;;  %10568 = vmatmul.mubr.bf16.gmra.mrb[164].mxu1 %v7218_v43  ;;  %v7161_v35 = vmax.f32 %v6937_v45, 0.0 }
 0xc8c   : > { %v6932_v34 = vadd.f32 %v12725_v55, %v6931_v33  ;;  %v7159_v52 = vmax.f32 %v6929_v58, 0.0 }
 0xc8d   : > { %v7162_v5 = vmax.f32 %v6940_v12, 0.0 }
 0xc8e   : > { %v7160_v2 = vmax.f32 %v6932_v34, 0.0 }
 0xc8f   : > { %v7220_v10 = vpack.c.bf16 %v7162_v5, %v7161_v35 }
 0xc90   : > { %v7219_v60 = vpack.c.bf16 %v7160_v2, %v7159_v52  ;;  %v10497_v1 = vpop.f32.mrb[108].mxu0 }
 0xc91   : > { %v6953_v23 = vadd.f32 %v10497_v1, %v12725_v55  ;;  %v6944_v37 = vpop.f32.mrb[109].mxu0 }
 0xc92   : > { %v6945_v9 = vadd.f32 %v12725_v55, %v6944_v37  ;;  %v10498_v38 = vpop.f32.mrb[110].mxu0  ;;  %10571 = vmatprep.mubr.bf16.mxu1 %v7219_v60 }
 0xc93   : > { %v6956_v63 = vadd.f32 %v10498_v38, %v12725_v55  ;;  %v6947_v47 = vpop.f32.mrb[111].mxu0  ;;  %10572 = vmatmul.mubr.bf16.gmra.mrb[168].mxu1 %v7220_v10  ;;  %v7165_v4 = vmax.f32 %v6953_v23, 0.0 }
 0xc94   : > { %v6948_v6 = vadd.f32 %v12725_v55, %v6947_v47  ;;  %v7163_v40 = vmax.f32 %v6945_v9, 0.0 }
 0xc95   : > { %v7166_v39 = vmax.f32 %v6956_v63, 0.0 }
 0xc96   : > { %v7164_v42 = vmax.f32 %v6948_v6, 0.0 }
 0xc97   : > { %v7222_v44 = vpack.c.bf16 %v7166_v39, %v7165_v4 }
 0xc98   : > { %v7221_v16 = vpack.c.bf16 %v7164_v42, %v7163_v40  ;;  %v10501_v46 = vpop.f32.mrb[112].mxu0 }
 0xc99   : > { %v6969_v50 = vadd.f32 %v10501_v46, %v12725_v55  ;;  %v6960_v18 = vpop.f32.mrb[113].mxu0 }
 0xc9a   : > { %v6961_v49 = vadd.f32 %v12725_v55, %v6960_v18  ;;  %v10502_v3 = vpop.f32.mrb[114].mxu0  ;;  %10575 = vmatprep.mubr.bf16.mxu1 %v7221_v16 }
 0xc9b   : > { %v6972_v61 = vadd.f32 %v10502_v3, %v12725_v55  ;;  %v6963_v19 = vpop.f32.mrb[115].mxu0  ;;  %10576 = vmatmul.mubr.bf16.gmra.mrb[172].mxu1 %v7222_v44  ;;  %v7169_v53 = vmax.f32 %v6969_v50, 0.0 }
 0xc9c   : > { %v6964_v54 = vadd.f32 %v12725_v55, %v6963_v19  ;;  %v7167_v62 = vmax.f32 %v6961_v49, 0.0 }
 0xc9d   : > { %v7170_v56 = vmax.f32 %v6972_v61, 0.0  ;;  %v10911_v61 = vld [vmem:[%s13229_s3 + $0x380] sm:$0xff]  }
 0xc9e   : > { %v7168_v7 = vmax.f32 %v6964_v54, 0.0  ;;  %10627 = vmatprep.subr.bf16.mxu0 %v10911_v61 }
 0xc9f   : > { %v7224_v59 = vpack.c.bf16 %v7170_v56, %v7169_v53  ;;  %10628 = vmatpush3.bf16.msra.mxu0 %v10911_v61 }
 0xca0   : > { %v7223_v41 = vpack.c.bf16 %v7168_v7, %v7167_v62  ;;  %v10505_v13 = vpop.f32.mrb[116].mxu0  ;;  %v10912_v7 = vld [vmem:[%s13229_s3 + $0x388] sm:$0xff]  }
 0xca1   : > { %v6985_v15 = vadd.f32 %v10505_v13, %v12725_v55  ;;  %v6976_v17 = vpop.f32.mrb[117].mxu0  ;;  %v10913_v13 = vld [vmem:[%s13229_s3 + $0x390] sm:$0xff]   ;;  %10629 = vmatprep.subr.bf16.mxu0 %v10912_v7 }
 0xca2   : > { %v6977_v48 = vadd.f32 %v12725_v55, %v6976_v17  ;;  %v10506_v28 = vpop.f32.mrb[118].mxu0  ;;  %10579 = vmatprep.mubr.bf16.mxu1 %v7223_v41 }
 0xca3   : > { %v6988_v32 = vadd.f32 %v10506_v28, %v12725_v55  ;;  %v6979_v11 = vpop.f32.mrb[119].mxu0  ;;  %10580 = vmatmul.mubr.bf16.gmra.mrb[176].mxu1 %v7224_v59  ;;  %v7173_v36 = vmax.f32 %v6985_v15, 0.0  ;;  %10630 = vmatpush3.bf16.msra.mxu0 %v10912_v7 }
 0xca4   : > { %v6980_v31 = vadd.f32 %v12725_v55, %v6979_v11  ;;  %v7171_v0 = vmax.f32 %v6977_v48, 0.0  ;;  %10631 = vmatprep.subr.bf16.mxu0 %v10913_v13 }
 0xca5   : > { %v7174_v22 = vmax.f32 %v6988_v32, 0.0 }
 0xca6   : > { %v7172_v57 = vmax.f32 %v6980_v31, 0.0 }
 0xca7   : > { %v7226_v26 = vpack.c.bf16 %v7174_v22, %v7173_v36  ;;  %v10914_v36 = vld [vmem:[%s13229_s3 + $0x398] sm:$0xff]   ;;  %10632 = vmatpush3.bf16.msra.mxu0 %v10913_v13 }
 0xca8   : > { %v7225_v14 = vpack.c.bf16 %v7172_v57, %v7171_v0  ;;  %v10509_v21 = vpop.f32.mrb[120].mxu0  ;;  %10633 = vmatprep.subr.bf16.mxu0 %v10914_v36  ;;  %v10915_v57 = vld [vmem:[%s13229_s3 + $0x3a0] sm:$0xff]  }
 0xca9   : > { %v7001_v30 = vadd.f32 %v10509_v21, %v12725_v55  ;;  %v6992_v29 = vpop.f32.mrb[121].mxu0 }
 0xcaa   : > { %v6993_v25 = vadd.f32 %v12725_v55, %v6992_v29  ;;  %v10510_v24 = vpop.f32.mrb[122].mxu0  ;;  %10583 = vmatprep.mubr.bf16.mxu1 %v7225_v14  ;;  %v10917_v29 = vld [vmem:[%s13229_s3 + $0x3b0] sm:$0xff]  }
 0xcab   : > { %v7004_v43 = vadd.f32 %v10510_v24, %v12725_v55  ;;  %v6995_v51 = vpop.f32.mrb[123].mxu0  ;;  %10584 = vmatmul.mubr.bf16.gmra.mrb[180].mxu1 %v7226_v26  ;;  %v7177_v45 = vmax.f32 %v7001_v30, 0.0  ;;  %10634 = vmatpush3.bf16.msra.mxu0 %v10914_v36  ;;  %v10916_v26 = vld [vmem:[%s13229_s3 + $0x3a8] sm:$0xff]  }
 0xcac   : > { %v6996_v27 = vadd.f32 %v12725_v55, %v6995_v51  ;;  %v7175_v58 = vmax.f32 %v6993_v25, 0.0  ;;  %10635 = vmatprep.subr.bf16.mxu0 %v10915_v57 }
 0xcad   : > { %v7178_v8 = vmax.f32 %v7004_v43, 0.0 }
 0xcae   : > { %v7176_v20 = vmax.f32 %v6996_v27, 0.0 }
 0xcaf   : > { %v7228_v12 = vpack.c.bf16 %v7178_v8, %v7177_v45  ;;  %10636 = vmatpush3.bf16.msra.mxu0 %v10915_v57 }
 0xcb0   : > { %v7227_v33 = vpack.c.bf16 %v7176_v20, %v7175_v58  ;;  %v10513_v34 = vpop.f32.mrb[124].mxu0  ;;  %10637 = vmatprep.subr.bf16.mxu0 %v10916_v26  ;;  %v10918_v58 = vld [vmem:[%s13229_s3 + $0x3b8] sm:$0xff]  }
 0xcb1   : > { %v7017_v35 = vadd.f32 %v10513_v34, %v12725_v55  ;;  %v7008_v5 = vpop.f32.mrb[125].mxu0 }
 0xcb2   : > { %v7009_v52 = vadd.f32 %v12725_v55, %v7008_v5  ;;  %v10514_v2 = vpop.f32.mrb[126].mxu0  ;;  %10587 = vmatprep.mubr.bf16.mxu1 %v7227_v33 }
 0xcb3   : > { %v7020_v10 = vadd.f32 %v10514_v2, %v12725_v55  ;;  %v7011_v60 = vpop.f32.mrb[127].mxu0  ;;  %10588 = vmatmul.mubr.bf16.gmra.mrb[184].mxu1 %v7228_v12  ;;  %v7181_v23 = vmax.f32 %v7017_v35, 0.0  ;;  %10638 = vmatpush3.bf16.msra.mxu0 %v10916_v26 }
 0xcb4   : > { %v7012_v1 = vadd.f32 %v12725_v55, %v7011_v60  ;;  %v7179_v9 = vmax.f32 %v7009_v52, 0.0  ;;  %10639 = vmatprep.subr.bf16.mxu0 %v10917_v29 }
 0xcb5   : > { %v7182_v37 = vmax.f32 %v7020_v10, 0.0 }
 0xcb6   : > { %v7180_v38 = vmax.f32 %v7012_v1, 0.0 }
 0xcb7   : > { %v7230_v63 = vpack.c.bf16 %v7182_v37, %v7181_v23  ;;  %10640 = vmatpush3.bf16.msra.mxu0 %v10917_v29 }
 0xcb8   : > { %v7229_v47 = vpack.c.bf16 %v7180_v38, %v7179_v9  ;;  %v10517_v6 = vpop.f32.mrb[128].mxu0  ;;  %10641 = vmatprep.subr.bf16.mxu0 %v10918_v58 }
 0xcb9   : > { %v7033_v4 = vadd.f32 %v10517_v6, %v12725_v55  ;;  %v7024_v39 = vpop.f32.mrb[129].mxu0 }
 0xcba   : > { %v7025_v40 = vadd.f32 %v12725_v55, %v7024_v39  ;;  %v10518_v42 = vpop.f32.mrb[130].mxu0  ;;  %10591 = vmatprep.mubr.bf16.mxu1 %v7229_v47 }
 0xcbb   : > { %v7036_v44 = vadd.f32 %v10518_v42, %v12725_v55  ;;  %v7027_v16 = vpop.f32.mrb[131].mxu0  ;;  %10592 = vmatmul.mubr.bf16.gmra.mrb[188].mxu1 %v7230_v63  ;;  %v7185_v50 = vmax.f32 %v7033_v4, 0.0  ;;  %10642 = vmatpush3.bf16.msra.mxu0 %v10918_v58 }
 0xcbc   : > { %v7028_v46 = vadd.f32 %v12725_v55, %v7027_v16  ;;  %v7183_v49 = vmax.f32 %v7025_v40, 0.0 }
 0xcbd   : > { %v7186_v18 = vmax.f32 %v7036_v44, 0.0 }
 0xcbe   : > { %v7184_v3 = vmax.f32 %v7028_v46, 0.0 }
 0xcbf   : > { %v7232_v19 = vpack.c.bf16 %v7186_v18, %v7185_v50 }
 0xcc0   : > { %v7231_v54 = vpack.c.bf16 %v7184_v3, %v7183_v49  ;;  %v10521_v53 = vpop.f32.mrb[132].mxu0 }
 0xcc1   : > { %v7049_v56 = vadd.f32 %v10521_v53, %v12725_v55  ;;  %v7040_v62 = vpop.f32.mrb[133].mxu0 }
 0xcc2   : > { %v7041_v59 = vadd.f32 %v12725_v55, %v7040_v62  ;;  %v10522_v41 = vpop.f32.mrb[134].mxu0  ;;  %10595 = vmatprep.mubr.bf16.mxu1 %v7231_v54 }
 0xcc3   : > { %v7052_v15 = vadd.f32 %v10522_v41, %v12725_v55  ;;  %v7043_v17 = vpop.f32.mrb[135].mxu0  ;;  %10596 = vmatmul.mubr.bf16.gmra.mrb[192].mxu1 %v7232_v19  ;;  %v7189_v28 = vmax.f32 %v7049_v56, 0.0 }
 0xcc4   : > { %v7044_v48 = vadd.f32 %v12725_v55, %v7043_v17  ;;  %v7187_v11 = vmax.f32 %v7041_v59, 0.0 }
 0xcc5   : > { %v7190_v32 = vmax.f32 %v7052_v15, 0.0 }
 0xcc6   : > { %v7188_v31 = vmax.f32 %v7044_v48, 0.0 }
 0xcc7   : > { %v7234_v22 = vpack.c.bf16 %v7190_v32, %v7189_v28 }
 0xcc8   : > { %v7233_v0 = vpack.c.bf16 %v7188_v31, %v7187_v11 }
 0xcca   : > { %10599 = vmatprep.mubr.bf16.mxu1 %v7233_v0 }
 0xccb   : > { %10600 = vmatmul.mubr.bf16.gmra.mrb[196].mxu1 %v7234_v22 }
 0xcd6   : > { %v10525_v14 = vpop.f32.mrb[136].mxu0 }
 0xcd7   : > { %v7065_v21 = vadd.f32 %v10525_v14, %v12725_v55  ;;  %v7056_v30 = vpop.f32.mrb[137].mxu0 }
 0xcd8   : > { %v7057_v25 = vadd.f32 %v12725_v55, %v7056_v30  ;;  %v10526_v24 = vpop.f32.mrb[138].mxu0 }
 0xcd9   : > { %v7068_v43 = vadd.f32 %v10526_v24, %v12725_v55  ;;  %v7059_v51 = vpop.f32.mrb[139].mxu0  ;;  %v7193_v45 = vmax.f32 %v7065_v21, 0.0 }
 0xcda   : > { %v7060_v27 = vadd.f32 %v12725_v55, %v7059_v51  ;;  %v7191_v20 = vmax.f32 %v7057_v25, 0.0 }
 0xcdb   : > { %v7194_v8 = vmax.f32 %v7068_v43, 0.0 }
 0xcdc   : > { %v7192_v12 = vmax.f32 %v7060_v27, 0.0 }
 0xcdd   : > { %v7236_v33 = vpack.c.bf16 %v7194_v8, %v7193_v45 }
 0xcde   : > { %v7235_v34 = vpack.c.bf16 %v7192_v12, %v7191_v20 }
 0xce0   : > { %10603 = vmatprep.mubr.bf16.mxu1 %v7235_v34 }
 0xce1   : > { %10604 = vmatmul.mubr.bf16.gmra.mrb[200].mxu1 %v7236_v33 }
 0xcee   : > { %v10529_v35 = vpop.f32.mrb[140].mxu0 }
 0xcef   : > { %v7081_v5 = vadd.f32 %v10529_v35, %v12725_v55  ;;  %v7072_v52 = vpop.f32.mrb[141].mxu0 }
 0xcf0   : > { %v7073_v2 = vadd.f32 %v12725_v55, %v7072_v52  ;;  %v10530_v10 = vpop.f32.mrb[142].mxu0 }
 0xcf1   : > { %v7084_v60 = vadd.f32 %v10530_v10, %v12725_v55  ;;  %v7075_v1 = vpop.f32.mrb[143].mxu0  ;;  %v7197_v37 = vmax.f32 %v7081_v5, 0.0 }
 0xcf2   : > { %v7076_v23 = vadd.f32 %v12725_v55, %v7075_v1  ;;  %v7195_v38 = vmax.f32 %v7073_v2, 0.0 }
 0xcf3   : > { %v7198_v9 = vmax.f32 %v7084_v60, 0.0  ;;  %v12818_v60 = vld [vmem:[%s13230_s4 + $0xd] ss:$0 sm:$0xff] }
 0xcf4   : > { %v7196_v63 = vmax.f32 %v7076_v23, 0.0 }
 0xcf5   : > { %v7238_v47 = vpack.c.bf16 %v7198_v9, %v7197_v37 }
 0xcf6   : > { %v7237_v6 = vpack.c.bf16 %v7196_v63, %v7195_v38 }
 0xcf8   : > { %10607 = vmatprep.mubr.bf16.mxu1 %v7237_v6 }
 0xcf9   : > { %10608 = vmatmul.mubr.bf16.gmra.mrb[204].mxu1 %v7238_v47 }
 0xd06   : > { %v10533_v4 = vpop.f32.mrb[144].mxu0 }
 0xd07   : > { %v7097_v39 = vadd.f32 %v10533_v4, %v12725_v55  ;;  %v7088_v40 = vpop.f32.mrb[145].mxu0 }
 0xd08   : > { %v7089_v42 = vadd.f32 %v12725_v55, %v7088_v40  ;;  %v10534_v44 = vpop.f32.mrb[146].mxu0 }
 0xd09   : > { %v7100_v16 = vadd.f32 %v10534_v44, %v12725_v55  ;;  %v7091_v46 = vpop.f32.mrb[147].mxu0  ;;  %v7201_v18 = vmax.f32 %v7097_v39, 0.0 }
 0xd0a   : > { %v7092_v50 = vadd.f32 %v12725_v55, %v7091_v46  ;;  %v7199_v3 = vmax.f32 %v7089_v42, 0.0 }
 0xd0b   : > { %v7202_v49 = vmax.f32 %v7100_v16, 0.0 }
 0xd0c   : > { %v7200_v61 = vmax.f32 %v7092_v50, 0.0 }
 0xd0d   : > { %v7240_v19 = vpack.c.bf16 %v7202_v49, %v7201_v18 }
 0xd0e   : > { %v7239_v54 = vpack.c.bf16 %v7200_v61, %v7199_v3 }
 0xd10   : > { %10611 = vmatprep.mubr.bf16.mxu1 %v7239_v54 }
 0xd11   : > { %10612 = vmatmul.mubr.bf16.gmra.mrb[208].mxu1 %v7240_v19 }
 0xd1e   : > { %v10537_v53 = vpop.f32.mrb[148].mxu0 }
 0xd1f   : > { %v7113_v56 = vadd.f32 %v10537_v53, %v12725_v55  ;;  %v7104_v62 = vpop.f32.mrb[149].mxu0 }
 0xd20   : > { %v7105_v7 = vadd.f32 %v12725_v55, %v7104_v62  ;;  %v10538_v59 = vpop.f32.mrb[150].mxu0 }
 0xd21   : > { %v7116_v41 = vadd.f32 %v10538_v59, %v12725_v55  ;;  %v7107_v13 = vpop.f32.mrb[151].mxu0  ;;  %v7205_v17 = vmax.f32 %v7113_v56, 0.0 }
 0xd22   : > { %v7108_v15 = vadd.f32 %v12725_v55, %v7107_v13  ;;  %v7203_v28 = vmax.f32 %v7105_v7, 0.0 }
 0xd23   : > { %v7206_v48 = vmax.f32 %v7116_v41, 0.0 }
 0xd24   : > { %v7204_v32 = vmax.f32 %v7108_v15, 0.0 }
 0xd25   : > { %v7242_v11 = vpack.c.bf16 %v7206_v48, %v7205_v17 }
 0xd26   : > { %v7241_v31 = vpack.c.bf16 %v7204_v32, %v7203_v28 }
 0xd28   : > { %10615 = vmatprep.mubr.bf16.mxu1 %v7241_v31 }
 0xd29   : > { %10616 = vmatmul.mubr.bf16.gmra.mrb[212].mxu1 %v7242_v11 }
 0xd36   : > { %v10541_v36 = vpop.f32.mrb[152].mxu0 }
 0xd37   : > { %v7129_v22 = vadd.f32 %v10541_v36, %v12725_v55  ;;  %v7120_v0 = vpop.f32.mrb[153].mxu0 }
 0xd38   : > { %v7121_v57 = vadd.f32 %v12725_v55, %v7120_v0  ;;  %v10542_v26 = vpop.f32.mrb[154].mxu0 }
 0xd39   : > { %v7132_v14 = vadd.f32 %v10542_v26, %v12725_v55  ;;  %v7123_v21 = vpop.f32.mrb[155].mxu0  ;;  %v7209_v29 = vmax.f32 %v7129_v22, 0.0 }
 0xd3a   : > { %v7124_v30 = vadd.f32 %v12725_v55, %v7123_v21  ;;  %v7207_v24 = vmax.f32 %v7121_v57, 0.0 }
 0xd3b   : > { %v7210_v25 = vmax.f32 %v7132_v14, 0.0 }
 0xd3c   : > { %v7208_v43 = vmax.f32 %v7124_v30, 0.0 }
 0xd3d   : > { %v7244_v51 = vpack.c.bf16 %v7210_v25, %v7209_v29 }
 0xd3e   : > { %v7243_v27 = vpack.c.bf16 %v7208_v43, %v7207_v24 }
 0xd40   : > { %10619 = vmatprep.mubr.bf16.mxu1 %v7243_v27 }
 0xd41   : > { %10620 = vmatmul.mubr.bf16.gmra.mrb[216].mxu1 %v7244_v51 }
 0xd4e   : > { %v10545_v45 = vpop.f32.mrb[156].mxu0 }
 0xd4f   : > { %v7145_v8 = vadd.f32 %v10545_v45, %v12725_v55  ;;  %v7136_v58 = vpop.f32.mrb[157].mxu0 }
 0xd50   : > { %v7137_v20 = vadd.f32 %v12725_v55, %v7136_v58  ;;  %v10546_v12 = vpop.f32.mrb[158].mxu0 }
 0xd51   : > { %v7148_v33 = vadd.f32 %v10546_v12, %v12725_v55  ;;  %v7139_v34 = vpop.f32.mrb[159].mxu0  ;;  %v7213_v5 = vmax.f32 %v7145_v8, 0.0 }
 0xd52   : > { %v7140_v35 = vadd.f32 %v12725_v55, %v7139_v34  ;;  %v7211_v2 = vmax.f32 %v7137_v20, 0.0 }
 0xd53   : > { %v7214_v52 = vmax.f32 %v7148_v33, 0.0 }
 0xd54   : > { %v7212_v10 = vmax.f32 %v7140_v35, 0.0 }
 0xd55   : > { %v7246_v1 = vpack.c.bf16 %v7214_v52, %v7213_v5 }
 0xd56   : > { %v7245_v23 = vpack.c.bf16 %v7212_v10, %v7211_v2  ;;  %v10565_v37 = vpop.f32.mrb[160].mxu1 }
 0xd57   : > { %v7363_v9 = vadd.f32 %v10565_v37, %v12818_v60  ;;  %v7354_v38 = vpop.f32.mrb[161].mxu1 }
 0xd58   : > { %v7355_v63 = vadd.f32 %v12818_v60, %v7354_v38  ;;  %v10566_v47 = vpop.f32.mrb[162].mxu1  ;;  %10623 = vmatprep.mubr.bf16.mxu1 %v7245_v23 }
 0xd59   : > { %v7366_v55 = vadd.f32 %v10566_v47, %v12818_v60  ;;  %v7357_v6 = vpop.f32.mrb[163].mxu1  ;;  %10624 = vmatmul.mubr.bf16.gmra.mrb[220].mxu1 %v7246_v1  ;;  %v7611_v39 = vmax.f32 %v7363_v9, 0.0 }
 0xd5a   : > { %v7358_v4 = vadd.f32 %v12818_v60, %v7357_v6  ;;  %v7609_v42 = vmax.f32 %v7355_v63, 0.0 }
 0xd5b   : > { %v7612_v40 = vmax.f32 %v7366_v55, 0.0 }
 0xd5c   : > { %v7610_v44 = vmax.f32 %v7358_v4, 0.0 }
 0xd5d   : > { %v7674_v16 = vpack.c.bf16 %v7612_v40, %v7611_v39 }
 0xd5e   : > { %v7673_v46 = vpack.c.bf16 %v7610_v44, %v7609_v42  ;;  %v10569_v50 = vpop.f32.mrb[164].mxu1 }
 0xd5f   : > { %v7379_v18 = vadd.f32 %v10569_v50, %v12818_v60  ;;  %v7370_v49 = vpop.f32.mrb[165].mxu1 }
 0xd60   : > { %v7371_v3 = vadd.f32 %v12818_v60, %v7370_v49  ;;  %v10570_v61 = vpop.f32.mrb[166].mxu1  ;;  %10643 = vmatprep.mubr.bf16.mxu0 %v7673_v46 }
 0xd61   : > { %v7382_v19 = vadd.f32 %v10570_v61, %v12818_v60  ;;  %v7373_v54 = vpop.f32.mrb[167].mxu1  ;;  %10644 = vmatmul.mubr.bf16.vlgmr.msra.gmra.mrb[160].mxu0 %v7674_v16  ;;  %v7615_v56 = vmax.f32 %v7379_v18, 0.0 }
 0xd62   : > { %v7374_v53 = vadd.f32 %v12818_v60, %v7373_v54  ;;  %v7613_v7 = vmax.f32 %v7371_v3, 0.0 }
 0xd63   : > { %v7616_v62 = vmax.f32 %v7382_v19, 0.0 }
 0xd64   : > { %v7614_v59 = vmax.f32 %v7374_v53, 0.0 }
 0xd65   : > { %v7676_v41 = vpack.c.bf16 %v7616_v62, %v7615_v56 }
 0xd66   : > { %v7675_v13 = vpack.c.bf16 %v7614_v59, %v7613_v7  ;;  %v10573_v15 = vpop.f32.mrb[168].mxu1 }
 0xd67   : > { %v7395_v17 = vadd.f32 %v10573_v15, %v12818_v60  ;;  %v7386_v48 = vpop.f32.mrb[169].mxu1 }
 0xd68   : > { %v7387_v28 = vadd.f32 %v12818_v60, %v7386_v48  ;;  %v10574_v32 = vpop.f32.mrb[170].mxu1  ;;  %10647 = vmatprep.mubr.bf16.mxu0 %v7675_v13 }
 0xd69   : > { %v7398_v11 = vadd.f32 %v10574_v32, %v12818_v60  ;;  %v7389_v31 = vpop.f32.mrb[171].mxu1  ;;  %10648 = vmatmul.mubr.bf16.gmra.mrb[164].mxu0 %v7676_v41  ;;  %v7619_v22 = vmax.f32 %v7395_v17, 0.0 }
 0xd6a   : > { %v7390_v36 = vadd.f32 %v12818_v60, %v7389_v31  ;;  %v7617_v57 = vmax.f32 %v7387_v28, 0.0 }
 0xd6b   : > { %v7620_v0 = vmax.f32 %v7398_v11, 0.0 }
 0xd6c   : > { %v7618_v26 = vmax.f32 %v7390_v36, 0.0 }
 0xd6d   : > { %v7678_v14 = vpack.c.bf16 %v7620_v0, %v7619_v22 }
 0xd6e   : > { %v7677_v21 = vpack.c.bf16 %v7618_v26, %v7617_v57  ;;  %v10577_v30 = vpop.f32.mrb[172].mxu1 }
 0xd6f   : > { %v7411_v29 = vadd.f32 %v10577_v30, %v12818_v60  ;;  %v7402_v25 = vpop.f32.mrb[173].mxu1 }
 0xd70   : > { %v7403_v24 = vadd.f32 %v12818_v60, %v7402_v25  ;;  %v10578_v43 = vpop.f32.mrb[174].mxu1  ;;  %10651 = vmatprep.mubr.bf16.mxu0 %v7677_v21 }
 0xd71   : > { %v7414_v51 = vadd.f32 %v10578_v43, %v12818_v60  ;;  %v7405_v27 = vpop.f32.mrb[175].mxu1  ;;  %10652 = vmatmul.mubr.bf16.gmra.mrb[168].mxu0 %v7678_v14  ;;  %v7623_v8 = vmax.f32 %v7411_v29, 0.0 }
 0xd72   : > { %v7406_v45 = vadd.f32 %v12818_v60, %v7405_v27  ;;  %v7621_v20 = vmax.f32 %v7403_v24, 0.0 }
 0xd73   : > { %v7624_v58 = vmax.f32 %v7414_v51, 0.0 }
 0xd74   : > { %v7622_v12 = vmax.f32 %v7406_v45, 0.0 }
 0xd75   : > { %v7680_v33 = vpack.c.bf16 %v7624_v58, %v7623_v8 }
 0xd76   : > { %v7679_v34 = vpack.c.bf16 %v7622_v12, %v7621_v20  ;;  %v10581_v35 = vpop.f32.mrb[176].mxu1 }
 0xd77   : > { %v7427_v5 = vadd.f32 %v10581_v35, %v12818_v60  ;;  %v7418_v52 = vpop.f32.mrb[177].mxu1 }
 0xd78   : > { %v7419_v2 = vadd.f32 %v12818_v60, %v7418_v52  ;;  %v10582_v10 = vpop.f32.mrb[178].mxu1  ;;  %10655 = vmatprep.mubr.bf16.mxu0 %v7679_v34 }
 0xd79   : > { %v7430_v1 = vadd.f32 %v10582_v10, %v12818_v60  ;;  %v7421_v23 = vpop.f32.mrb[179].mxu1  ;;  %10656 = vmatmul.mubr.bf16.gmra.mrb[172].mxu0 %v7680_v33  ;;  %v7627_v9 = vmax.f32 %v7427_v5, 0.0 }
 0xd7a   : > { %v7422_v37 = vadd.f32 %v12818_v60, %v7421_v23  ;;  %v7625_v63 = vmax.f32 %v7419_v2, 0.0 }
 0xd7b   : > { %v7628_v38 = vmax.f32 %v7430_v1, 0.0 }
 0xd7c   : > { %v7626_v47 = vmax.f32 %v7422_v37, 0.0 }
 0xd7d   : > { %v7682_v55 = vpack.c.bf16 %v7628_v38, %v7627_v9 }
 0xd7e   : > { %v7681_v6 = vpack.c.bf16 %v7626_v47, %v7625_v63  ;;  %v10585_v4 = vpop.f32.mrb[180].mxu1 }
 0xd7f   : > { %v7443_v39 = vadd.f32 %v10585_v4, %v12818_v60  ;;  %v7434_v40 = vpop.f32.mrb[181].mxu1 }
 0xd80   : > { %v7435_v42 = vadd.f32 %v12818_v60, %v7434_v40  ;;  %v10586_v44 = vpop.f32.mrb[182].mxu1  ;;  %10659 = vmatprep.mubr.bf16.mxu0 %v7681_v6 }
 0xd81   : > { %v7446_v16 = vadd.f32 %v10586_v44, %v12818_v60  ;;  %v7437_v46 = vpop.f32.mrb[183].mxu1  ;;  %10660 = vmatmul.mubr.bf16.gmra.mrb[176].mxu0 %v7682_v55  ;;  %v7631_v18 = vmax.f32 %v7443_v39, 0.0 }
 0xd82   : > { %v7438_v50 = vadd.f32 %v12818_v60, %v7437_v46  ;;  %v7629_v3 = vmax.f32 %v7435_v42, 0.0 }
 0xd83   : > { %v7632_v49 = vmax.f32 %v7446_v16, 0.0 }
 0xd84   : > { %v7630_v61 = vmax.f32 %v7438_v50, 0.0 }
 0xd85   : > { %v7684_v19 = vpack.c.bf16 %v7632_v49, %v7631_v18 }
 0xd86   : > { %v7683_v54 = vpack.c.bf16 %v7630_v61, %v7629_v3  ;;  %v10589_v53 = vpop.f32.mrb[184].mxu1 }
 0xd87   : > { %v7459_v56 = vadd.f32 %v10589_v53, %v12818_v60  ;;  %v7450_v62 = vpop.f32.mrb[185].mxu1 }
 0xd88   : > { %v7451_v7 = vadd.f32 %v12818_v60, %v7450_v62  ;;  %v10590_v59 = vpop.f32.mrb[186].mxu1  ;;  %10663 = vmatprep.mubr.bf16.mxu0 %v7683_v54 }
 0xd89   : > { %v7462_v41 = vadd.f32 %v10590_v59, %v12818_v60  ;;  %v7453_v13 = vpop.f32.mrb[187].mxu1  ;;  %10664 = vmatmul.mubr.bf16.gmra.mrb[180].mxu0 %v7684_v19  ;;  %v7635_v17 = vmax.f32 %v7459_v56, 0.0 }
 0xd8a   : > { %v7454_v15 = vadd.f32 %v12818_v60, %v7453_v13  ;;  %v7633_v28 = vmax.f32 %v7451_v7, 0.0 }
 0xd8b   : > { %v7636_v48 = vmax.f32 %v7462_v41, 0.0 }
 0xd8c   : > { %v7634_v32 = vmax.f32 %v7454_v15, 0.0 }
 0xd8d   : > { %v7686_v11 = vpack.c.bf16 %v7636_v48, %v7635_v17 }
 0xd8e   : > { %v7685_v31 = vpack.c.bf16 %v7634_v32, %v7633_v28  ;;  %v10593_v36 = vpop.f32.mrb[188].mxu1 }
 0xd8f   : > { %v7475_v22 = vadd.f32 %v10593_v36, %v12818_v60  ;;  %v7466_v0 = vpop.f32.mrb[189].mxu1 }
 0xd90   : > { %v7467_v57 = vadd.f32 %v12818_v60, %v7466_v0  ;;  %v10594_v26 = vpop.f32.mrb[190].mxu1  ;;  %10667 = vmatprep.mubr.bf16.mxu0 %v7685_v31 }
 0xd91   : > { %v7478_v14 = vadd.f32 %v10594_v26, %v12818_v60  ;;  %v7469_v21 = vpop.f32.mrb[191].mxu1  ;;  %10668 = vmatmul.mubr.bf16.gmra.mrb[184].mxu0 %v7686_v11  ;;  %v7639_v29 = vmax.f32 %v7475_v22, 0.0 }
 0xd92   : > { %v7470_v30 = vadd.f32 %v12818_v60, %v7469_v21  ;;  %v7637_v24 = vmax.f32 %v7467_v57, 0.0 }
 0xd93   : > { %v7640_v25 = vmax.f32 %v7478_v14, 0.0 }
 0xd94   : > { %v7638_v43 = vmax.f32 %v7470_v30, 0.0 }
 0xd95   : > { %v7688_v51 = vpack.c.bf16 %v7640_v25, %v7639_v29 }
 0xd96   : > { %v7687_v27 = vpack.c.bf16 %v7638_v43, %v7637_v24  ;;  %v10597_v45 = vpop.f32.mrb[192].mxu1 }
 0xd97   : > { %v7491_v8 = vadd.f32 %v10597_v45, %v12818_v60  ;;  %v7482_v58 = vpop.f32.mrb[193].mxu1 }
 0xd98   : > { %v7483_v20 = vadd.f32 %v12818_v60, %v7482_v58  ;;  %v10598_v12 = vpop.f32.mrb[194].mxu1  ;;  %10671 = vmatprep.mubr.bf16.mxu0 %v7687_v27 }
 0xd99   : > { %v7494_v33 = vadd.f32 %v10598_v12, %v12818_v60  ;;  %v7485_v34 = vpop.f32.mrb[195].mxu1  ;;  %10672 = vmatmul.mubr.bf16.gmra.mrb[188].mxu0 %v7688_v51  ;;  %v7643_v5 = vmax.f32 %v7491_v8, 0.0 }
 0xd9a   : > { %v7486_v35 = vadd.f32 %v12818_v60, %v7485_v34  ;;  %v7641_v2 = vmax.f32 %v7483_v20, 0.0 }
 0xd9b   : > { %v7644_v52 = vmax.f32 %v7494_v33, 0.0 }
 0xd9c   : > { %v7642_v10 = vmax.f32 %v7486_v35, 0.0 }
 0xd9d   : > { %v7690_v1 = vpack.c.bf16 %v7644_v52, %v7643_v5 }
 0xd9e   : > { %v7689_v23 = vpack.c.bf16 %v7642_v10, %v7641_v2  ;;  %v10601_v37 = vpop.f32.mrb[196].mxu1 }
 0xd9f   : > { %v7507_v9 = vadd.f32 %v10601_v37, %v12818_v60  ;;  %v7498_v38 = vpop.f32.mrb[197].mxu1 }
 0xda0   : > { %v7499_v63 = vadd.f32 %v12818_v60, %v7498_v38  ;;  %v10602_v47 = vpop.f32.mrb[198].mxu1  ;;  %10675 = vmatprep.mubr.bf16.mxu0 %v7689_v23 }
 0xda1   : > { %v7510_v55 = vadd.f32 %v10602_v47, %v12818_v60  ;;  %v7501_v6 = vpop.f32.mrb[199].mxu1  ;;  %10676 = vmatmul.mubr.bf16.gmra.mrb[192].mxu0 %v7690_v1  ;;  %v7647_v39 = vmax.f32 %v7507_v9, 0.0 }
 0xda2   : > { %v7502_v4 = vadd.f32 %v12818_v60, %v7501_v6  ;;  %v7645_v42 = vmax.f32 %v7499_v63, 0.0 }
 0xda3   : > { %v7648_v40 = vmax.f32 %v7510_v55, 0.0 }
 0xda4   : > { %v7646_v44 = vmax.f32 %v7502_v4, 0.0 }
 0xda5   : > { %v7692_v16 = vpack.c.bf16 %v7648_v40, %v7647_v39 }
 0xda6   : > { %v7691_v46 = vpack.c.bf16 %v7646_v44, %v7645_v42 }
 0xda8   : > { %10679 = vmatprep.mubr.bf16.mxu0 %v7691_v46 }
 0xda9   : > { %10680 = vmatmul.mubr.bf16.gmra.mrb[196].mxu0 %v7692_v16 }
 0xdb4   : > { %v10605_v50 = vpop.f32.mrb[200].mxu1 }
 0xdb5   : > { %v7523_v18 = vadd.f32 %v10605_v50, %v12818_v60  ;;  %v7514_v49 = vpop.f32.mrb[201].mxu1 }
 0xdb6   : > { %v7515_v3 = vadd.f32 %v12818_v60, %v7514_v49  ;;  %v10606_v61 = vpop.f32.mrb[202].mxu1 }
 0xdb7   : > { %v7526_v19 = vadd.f32 %v10606_v61, %v12818_v60  ;;  %v7517_v54 = vpop.f32.mrb[203].mxu1  ;;  %v7651_v56 = vmax.f32 %v7523_v18, 0.0 }
 0xdb8   : > { %v7518_v53 = vadd.f32 %v12818_v60, %v7517_v54  ;;  %v7649_v7 = vmax.f32 %v7515_v3, 0.0 }
 0xdb9   : > { %v7652_v62 = vmax.f32 %v7526_v19, 0.0 }
 0xdba   : > { %v7650_v59 = vmax.f32 %v7518_v53, 0.0 }
 0xdbb   : > { %v7694_v41 = vpack.c.bf16 %v7652_v62, %v7651_v56 }
 0xdbc   : > { %v7693_v13 = vpack.c.bf16 %v7650_v59, %v7649_v7 }
 0xdbe   : > { %10683 = vmatprep.mubr.bf16.mxu0 %v7693_v13 }
 0xdbf   : > { %10684 = vmatmul.mubr.bf16.gmra.mrb[200].mxu0 %v7694_v41 }
 0xdcc   : > { %v10609_v15 = vpop.f32.mrb[204].mxu1 }
 0xdcd   : > { %v7539_v17 = vadd.f32 %v10609_v15, %v12818_v60  ;;  %v7530_v48 = vpop.f32.mrb[205].mxu1 }
 0xdce   : > { %v7531_v28 = vadd.f32 %v12818_v60, %v7530_v48  ;;  %v10610_v32 = vpop.f32.mrb[206].mxu1 }
 0xdcf   : > { %v7542_v11 = vadd.f32 %v10610_v32, %v12818_v60  ;;  %v7533_v31 = vpop.f32.mrb[207].mxu1  ;;  %v7655_v22 = vmax.f32 %v7539_v17, 0.0 }
 0xdd0   : > { %v7534_v36 = vadd.f32 %v12818_v60, %v7533_v31  ;;  %v7653_v57 = vmax.f32 %v7531_v28, 0.0 }
 0xdd1   : > { %v7656_v0 = vmax.f32 %v7542_v11, 0.0  ;;  %v12887_v11 = vld [vmem:[%s13230_s4 + $0xe] ss:$0 sm:$0xff] }
 0xdd2   : > { %v7654_v26 = vmax.f32 %v7534_v36, 0.0 }
 0xdd3   : > { %v7696_v14 = vpack.c.bf16 %v7656_v0, %v7655_v22 }
 0xdd4   : > { %v7695_v21 = vpack.c.bf16 %v7654_v26, %v7653_v57  ;;  %v12893_v26 = vld [vmem:[%s13231_s5] ss:$0 sm:$0xff] }
 0xdd6   : > { %10687 = vmatprep.mubr.bf16.mxu0 %v7695_v21 }
 0xdd7   : > { %10688 = vmatmul.mubr.bf16.gmra.mrb[204].mxu0 %v7696_v14 }
 0xde4   : > { %v10613_v30 = vpop.f32.mrb[208].mxu1 }
 0xde5   : > { %v7555_v29 = vadd.f32 %v10613_v30, %v12818_v60  ;;  %v7546_v25 = vpop.f32.mrb[209].mxu1 }
 0xde6   : > { %v7547_v24 = vadd.f32 %v12818_v60, %v7546_v25  ;;  %v10614_v43 = vpop.f32.mrb[210].mxu1 }
 0xde7   : > { %v7558_v51 = vadd.f32 %v10614_v43, %v12818_v60  ;;  %v7549_v27 = vpop.f32.mrb[211].mxu1  ;;  %v7659_v8 = vmax.f32 %v7555_v29, 0.0 }
 0xde8   : > { %v7550_v45 = vadd.f32 %v12818_v60, %v7549_v27  ;;  %v7657_v20 = vmax.f32 %v7547_v24, 0.0 }
 0xde9   : > { %v7660_v58 = vmax.f32 %v7558_v51, 0.0 }
 0xdea   : > { %v7658_v12 = vmax.f32 %v7550_v45, 0.0 }
 0xdeb   : > { %v7698_v33 = vpack.c.bf16 %v7660_v58, %v7659_v8 }
 0xdec   : > { %v7697_v34 = vpack.c.bf16 %v7658_v12, %v7657_v20 }
 0xdee   : > { %10691 = vmatprep.mubr.bf16.mxu0 %v7697_v34 }
 0xdef   : > { %10692 = vmatmul.mubr.bf16.gmra.mrb[208].mxu0 %v7698_v33 }
 0xdfc   : > { %v10617_v35 = vpop.f32.mrb[212].mxu1 }
 0xdfd   : > { %v7571_v5 = vadd.f32 %v10617_v35, %v12818_v60  ;;  %v7562_v52 = vpop.f32.mrb[213].mxu1 }
 0xdfe   : > { %v7563_v2 = vadd.f32 %v12818_v60, %v7562_v52  ;;  %v10618_v10 = vpop.f32.mrb[214].mxu1 }
 0xdff   : > { %v7574_v1 = vadd.f32 %v10618_v10, %v12818_v60  ;;  %v7565_v23 = vpop.f32.mrb[215].mxu1  ;;  %v7663_v9 = vmax.f32 %v7571_v5, 0.0 }
 0xe00   : > { %v7566_v37 = vadd.f32 %v12818_v60, %v7565_v23  ;;  %v7661_v63 = vmax.f32 %v7563_v2, 0.0 }
 0xe01   : > { %v7664_v38 = vmax.f32 %v7574_v1, 0.0 }
 0xe02   : > { %v7662_v47 = vmax.f32 %v7566_v37, 0.0 }
 0xe03   : > { %v7700_v55 = vpack.c.bf16 %v7664_v38, %v7663_v9 }
 0xe04   : > { %v7699_v6 = vpack.c.bf16 %v7662_v47, %v7661_v63 }
 0xe06   : > { %10695 = vmatprep.mubr.bf16.mxu0 %v7699_v6 }
 0xe07   : > { %10696 = vmatmul.mubr.bf16.gmra.mrb[212].mxu0 %v7700_v55 }
 0xe14   : > { %v10621_v4 = vpop.f32.mrb[216].mxu1 }
 0xe15   : > { %v7587_v39 = vadd.f32 %v10621_v4, %v12818_v60  ;;  %v7578_v40 = vpop.f32.mrb[217].mxu1 }
 0xe16   : > { %v7579_v42 = vadd.f32 %v12818_v60, %v7578_v40  ;;  %v10622_v44 = vpop.f32.mrb[218].mxu1 }
 0xe17   : > { %v7590_v16 = vadd.f32 %v10622_v44, %v12818_v60  ;;  %v7581_v46 = vpop.f32.mrb[219].mxu1  ;;  %v7667_v18 = vmax.f32 %v7587_v39, 0.0 }
 0xe18   : > { %v7582_v50 = vadd.f32 %v12818_v60, %v7581_v46  ;;  %v7665_v3 = vmax.f32 %v7579_v42, 0.0 }
 0xe19   : > { %v7668_v49 = vmax.f32 %v7590_v16, 0.0 }
 0xe1a   : > { %v7666_v61 = vmax.f32 %v7582_v50, 0.0 }
 0xe1b   : > { %v7702_v19 = vpack.c.bf16 %v7668_v49, %v7667_v18 }
 0xe1c   : > { %v7701_v54 = vpack.c.bf16 %v7666_v61, %v7665_v3 }
 0xe1e   : > { %10699 = vmatprep.mubr.bf16.mxu0 %v7701_v54 }
 0xe1f   : > { %10700 = vmatmul.mubr.bf16.gmra.mrb[216].mxu0 %v7702_v19 }
 0xe2c   : > { %v10625_v53 = vpop.f32.mrb[220].mxu1 }
 0xe2d   : > { %v7603_v56 = vadd.f32 %v10625_v53, %v12818_v60  ;;  %v7594_v62 = vpop.f32.mrb[221].mxu1 }
 0xe2e   : > { %v7595_v7 = vadd.f32 %v12818_v60, %v7594_v62  ;;  %v10626_v59 = vpop.f32.mrb[222].mxu1 }
 0xe2f   : > { %v7606_v41 = vadd.f32 %v10626_v59, %v12818_v60  ;;  %v7597_v13 = vpop.f32.mrb[223].mxu1  ;;  %v7671_v17 = vmax.f32 %v7603_v56, 0.0 }
 0xe30   : > { %v7598_v15 = vadd.f32 %v12818_v60, %v7597_v13  ;;  %v7669_v28 = vmax.f32 %v7595_v7, 0.0 }
 0xe31   : > { %v7672_v48 = vmax.f32 %v7606_v41, 0.0 }
 0xe32   : > { %v7670_v32 = vmax.f32 %v7598_v15, 0.0 }
 0xe33   : > { %v7704_v31 = vpack.c.bf16 %v7672_v48, %v7671_v17 }
 0xe34   : > { %v7703_v36 = vpack.c.bf16 %v7670_v32, %v7669_v28  ;;  %v10645_v22 = vpop.f32.mrb[160].mxu0 }
 0xe35   : > { %v7821_v0 = vadd.f32 %v10645_v22, %v12887_v11  ;;  %v7812_v57 = vpop.f32.mrb[161].mxu0 }
 0xe36   : > { %v7813_v60 = vadd.f32 %v12887_v11, %v7812_v57  ;;  %v10646_v14 = vpop.f32.mrb[162].mxu0  ;;  %10703 = vmatprep.mubr.bf16.mxu0 %v7703_v36 }
 0xe37   : > { %v8069_v21 = vmax.f32 %v7821_v0, 0.0  ;;  %v7824_v30 = vadd.f32 %v10646_v14, %v12887_v11  ;;  %v7815_v29 = vpop.f32.mrb[163].mxu0  ;;  %10704 = vmatmul.mubr.bf16.gmra.mrb[220].mxu0 %v7704_v31 }
 0xe38   : > { %v8067_v25 = vmax.f32 %v7813_v60, 0.0  ;;  %v7816_v24 = vadd.f32 %v12887_v11, %v7815_v29 }
 0xe39   : > { %v8139_v43 = vmul.f32 %v12893_v26, %v8069_v21  ;;  %v8070_v27 = vmax.f32 %v7824_v30, 0.0 }
 0xe3a   : > { %v8137_v51 = vmul.f32 %v12893_v26, %v8067_v25  ;;  %v8068_v45 = vmax.f32 %v7816_v24, 0.0 }
 0xe3b   : > { %8205 = vadd.xlane.f32.xlu0 %v8139_v43  ;;  %v8140_v33 = vmul.f32 %v12893_v26, %v8070_v27 }
 0xe3c   : > { %v8138_v8 = vmul.f32 %v12893_v26, %v8068_v45  ;;  %v10649_v58 = vpop.f32.mrb[164].mxu0  ;;  %8201 = vadd.xlane.f32.xlu1 %v8137_v51 }
 0xe3d   : > { %v7837_v20 = vadd.f32 %v10649_v58, %v12887_v11  ;;  %v7828_v12 = vpop.f32.mrb[165].mxu0 }
 0xe3e   : > { %v7829_v34 = vadd.f32 %v12887_v11, %v7828_v12  ;;  %v10650_v35 = vpop.f32.mrb[166].mxu0 }
 0xe3f   : > { %v8073_v5 = vmax.f32 %v7837_v20, 0.0  ;;  %v7840_v52 = vadd.f32 %v10650_v35, %v12887_v11  ;;  %v7831_v2 = vpop.f32.mrb[167].mxu0  ;;  %8203 = vadd.xlane.f32.xlu0 %v8138_v8 }
 0xe40   : > { %v7832_v10 = vadd.f32 %v12887_v11, %v7831_v2  ;;  %8207 = vadd.xlane.f32.xlu1 %v8140_v33  ;;  %v8071_v23 = vmax.f32 %v7829_v34, 0.0 }
 0xe41   : > { %v8143_v1 = vmul.f32 %v12893_v26, %v8073_v5  ;;  %v8074_v37 = vmax.f32 %v7840_v52, 0.0 }
 0xe42   : > { %v8072_v38 = vmax.f32 %v7832_v10, 0.0  ;;  %v8141_v47 = vmul.f32 %v12893_v26, %v8071_v23 }
 0xe43   : > { %v8144_v9 = vmul.f32 %v12893_v26, %v8074_v37  ;;  %8213 = vadd.xlane.f32.xlu0 %v8143_v1 }
 0xe44   : > { %v10653_v63 = vpop.f32.mrb[168].mxu0  ;;  %v8142_v40 = vmul.f32 %v12893_v26, %v8072_v38 }
 0xe45   : > { %v7853_v55 = vadd.f32 %v10653_v63, %v12887_v11  ;;  %v7844_v6 = vpop.f32.mrb[169].mxu0  ;;  %8215 = vadd.xlane.f32.xlu1 %v8144_v9 }
 0xe46   : > { %v7845_v4 = vadd.f32 %v12887_v11, %v7844_v6  ;;  %v10654_v39 = vpop.f32.mrb[170].mxu0 }
 0xe47   : > { %v8077_v42 = vmax.f32 %v7853_v55, 0.0  ;;  %v7856_v44 = vadd.f32 %v10654_v39, %v12887_v11  ;;  %v7847_v16 = vpop.f32.mrb[171].mxu0  ;;  %8209 = vadd.xlane.f32.xlu0 %v8141_v47 }
 0xe48   : > { %v7848_v46 = vadd.f32 %v12887_v11, %v7847_v16  ;;  %v8075_v18 = vmax.f32 %v7845_v4, 0.0 }
 0xe49   : > { %v8147_v50 = vmul.f32 %v12893_v26, %v8077_v42  ;;  %v8078_v49 = vmax.f32 %v7856_v44, 0.0  ;;  %8211 = vadd.xlane.f32.xlu1 %v8142_v40 }
 0xe4a   : > { %v8076_v61 = vmax.f32 %v7848_v46, 0.0  ;;  %v8145_v54 = vmul.f32 %v12893_v26, %v8075_v18 }
 0xe4b   : > { %v8148_v3 = vmul.f32 %v12893_v26, %v8078_v49  ;;  %8221 = vadd.xlane.f32.xlu0 %v8147_v50 }
 0xe4c   : > { %v10657_v19 = vpop.f32.mrb[172].mxu0  ;;  %v8146_v59 = vmul.f32 %v12893_v26, %v8076_v61 }
 0xe4d   : > { %v7869_v53 = vadd.f32 %v10657_v19, %v12887_v11  ;;  %v7860_v56 = vpop.f32.mrb[173].mxu0  ;;  %8223 = vadd.xlane.f32.xlu1 %v8148_v3 }
 0xe4e   : > { %v7861_v62 = vadd.f32 %v12887_v11, %v7860_v56  ;;  %v10658_v7 = vpop.f32.mrb[174].mxu0 }
 0xe4f   : > { %v8081_v41 = vmax.f32 %v7869_v53, 0.0  ;;  %v7872_v13 = vadd.f32 %v10658_v7, %v12887_v11  ;;  %v7863_v15 = vpop.f32.mrb[175].mxu0  ;;  %8217 = vadd.xlane.f32.xlu0 %v8145_v54 }
 0xe50   : > { %v7864_v17 = vadd.f32 %v12887_v11, %v7863_v15  ;;  %v8079_v28 = vmax.f32 %v7861_v62, 0.0 }
 0xe51   : > { %v8151_v48 = vmul.f32 %v12893_v26, %v8081_v41  ;;  %v8082_v32 = vmax.f32 %v7872_v13, 0.0  ;;  %8219 = vadd.xlane.f32.xlu1 %v8146_v59 }
 0xe52   : > { %v8080_v36 = vmax.f32 %v7864_v17, 0.0  ;;  %v8149_v0 = vmul.f32 %v12893_v26, %v8079_v28 }
 0xe53   : > { %v8152_v31 = vmul.f32 %v12893_v26, %v8082_v32  ;;  %8229 = vadd.xlane.f32.xlu0 %v8151_v48 }
 0xe54   : > { %v10661_v22 = vpop.f32.mrb[176].mxu0  ;;  %v8150_v30 = vmul.f32 %v12893_v26, %v8080_v36 }
 0xe55   : > { %v7885_v57 = vadd.f32 %v10661_v22, %v12887_v11  ;;  %v7876_v60 = vpop.f32.mrb[177].mxu0  ;;  %8231 = vadd.xlane.f32.xlu1 %v8152_v31 }
 0xe56   : > { %v7877_v14 = vadd.f32 %v12887_v11, %v7876_v60  ;;  %v10662_v21 = vpop.f32.mrb[178].mxu0 }
 0xe57   : > { %v8085_v29 = vmax.f32 %v7885_v57, 0.0  ;;  %v7888_v25 = vadd.f32 %v10662_v21, %v12887_v11  ;;  %v7879_v24 = vpop.f32.mrb[179].mxu0  ;;  %8225 = vadd.xlane.f32.xlu0 %v8149_v0 }
 0xe58   : > { %v7880_v43 = vadd.f32 %v12887_v11, %v7879_v24  ;;  %v8083_v27 = vmax.f32 %v7877_v14, 0.0 }
 0xe59   : > { %v8155_v51 = vmul.f32 %v12893_v26, %v8085_v29  ;;  %v8086_v45 = vmax.f32 %v7888_v25, 0.0  ;;  %8227 = vadd.xlane.f32.xlu1 %v8150_v30 }
 0xe5a   : > { %v8084_v58 = vmax.f32 %v7880_v43, 0.0  ;;  %v8153_v12 = vmul.f32 %v12893_v26, %v8083_v27 }
 0xe5b   : > { %v8156_v8 = vmul.f32 %v12893_v26, %v8086_v45  ;;  %8237 = vadd.xlane.f32.xlu0 %v8155_v51 }
 0xe5c   : > { %v10665_v20 = vpop.f32.mrb[180].mxu0  ;;  %v8154_v52 = vmul.f32 %v12893_v26, %v8084_v58 }
 0xe5d   : > { %v7901_v33 = vadd.f32 %v10665_v20, %v12887_v11  ;;  %v7892_v34 = vpop.f32.mrb[181].mxu0  ;;  %8239 = vadd.xlane.f32.xlu1 %v8156_v8 }
 0xe5e   : > { %v7893_v35 = vadd.f32 %v12887_v11, %v7892_v34  ;;  %v10666_v5 = vpop.f32.mrb[182].mxu0 }
 0xe5f   : > { %v8089_v2 = vmax.f32 %v7901_v33, 0.0  ;;  %v7904_v10 = vadd.f32 %v10666_v5, %v12887_v11  ;;  %v7895_v1 = vpop.f32.mrb[183].mxu0  ;;  %8233 = vadd.xlane.f32.xlu0 %v8153_v12 }
 0xe60   : > { %v7896_v23 = vadd.f32 %v12887_v11, %v7895_v1  ;;  %v8087_v9 = vmax.f32 %v7893_v35, 0.0 }
 0xe61   : > { %v8159_v37 = vmul.f32 %v12893_v26, %v8089_v2  ;;  %v8090_v38 = vmax.f32 %v7904_v10, 0.0  ;;  %8235 = vadd.xlane.f32.xlu1 %v8154_v52 }
 0xe62   : > { %v8088_v47 = vmax.f32 %v7896_v23, 0.0  ;;  %v8157_v6 = vmul.f32 %v12893_v26, %v8087_v9 }
 0xe63   : > { %v8160_v63 = vmul.f32 %v12893_v26, %v8090_v38  ;;  %8245 = vadd.xlane.f32.xlu0 %v8159_v37 }
 0xe64   : > { %v10669_v55 = vpop.f32.mrb[184].mxu0  ;;  %v8158_v44 = vmul.f32 %v12893_v26, %v8088_v47 }
 0xe65   : > { %v7917_v4 = vadd.f32 %v10669_v55, %v12887_v11  ;;  %v7908_v39 = vpop.f32.mrb[185].mxu0  ;;  %8247 = vadd.xlane.f32.xlu1 %v8160_v63 }
 0xe66   : > { %v7909_v40 = vadd.f32 %v12887_v11, %v7908_v39  ;;  %v10670_v42 = vpop.f32.mrb[186].mxu0 }
 0xe67   : > { %v8093_v16 = vmax.f32 %v7917_v4, 0.0  ;;  %v7920_v46 = vadd.f32 %v10670_v42, %v12887_v11  ;;  %v7911_v50 = vpop.f32.mrb[187].mxu0  ;;  %8241 = vadd.xlane.f32.xlu0 %v8157_v6 }
 0xe68   : > { %v7912_v18 = vadd.f32 %v12887_v11, %v7911_v50  ;;  %v8091_v3 = vmax.f32 %v7909_v40, 0.0 }
 0xe69   : > { %v8163_v49 = vmul.f32 %v12893_v26, %v8093_v16  ;;  %v8094_v61 = vmax.f32 %v7920_v46, 0.0  ;;  %8243 = vadd.xlane.f32.xlu1 %v8158_v44 }
 0xe6a   : > { %v8092_v54 = vmax.f32 %v7912_v18, 0.0  ;;  %v8161_v56 = vmul.f32 %v12893_v26, %v8091_v3 }
 0xe6b   : > { %v8164_v19 = vmul.f32 %v12893_v26, %v8094_v61  ;;  %8253 = vadd.xlane.f32.xlu0 %v8163_v49 }
 0xe6c   : > { %v10673_v53 = vpop.f32.mrb[188].mxu0  ;;  %v8162_v13 = vmul.f32 %v12893_v26, %v8092_v54 }
 0xe6d   : > { %v7933_v62 = vadd.f32 %v10673_v53, %v12887_v11  ;;  %v7924_v7 = vpop.f32.mrb[189].mxu0  ;;  %8255 = vadd.xlane.f32.xlu1 %v8164_v19 }
 0xe6e   : > { %v7925_v59 = vadd.f32 %v12887_v11, %v7924_v7  ;;  %v10674_v41 = vpop.f32.mrb[190].mxu0 }
 0xe6f   : > { %v8097_v15 = vmax.f32 %v7933_v62, 0.0  ;;  %v7936_v17 = vadd.f32 %v10674_v41, %v12887_v11  ;;  %v7927_v48 = vpop.f32.mrb[191].mxu0  ;;  %8249 = vadd.xlane.f32.xlu0 %v8161_v56 }
 0xe70   : > { %v7928_v28 = vadd.f32 %v12887_v11, %v7927_v48  ;;  %v8095_v31 = vmax.f32 %v7925_v59, 0.0 }
 0xe71   : > { %v8167_v32 = vmul.f32 %v12893_v26, %v8097_v15  ;;  %v8098_v36 = vmax.f32 %v7936_v17, 0.0  ;;  %8251 = vadd.xlane.f32.xlu1 %v8162_v13 }
 0xe72   : > { %v8096_v0 = vmax.f32 %v7928_v28, 0.0  ;;  %v8165_v60 = vmul.f32 %v12893_v26, %v8095_v31 }
 0xe73   : > { %v8168_v22 = vmul.f32 %v12893_v26, %v8098_v36  ;;  %8261 = vadd.xlane.f32.xlu0 %v8167_v32 }
 0xe74   : > { %v10677_v57 = vpop.f32.mrb[192].mxu0  ;;  %v8166_v25 = vmul.f32 %v12893_v26, %v8096_v0 }
 0xe75   : > { %v7949_v14 = vadd.f32 %v10677_v57, %v12887_v11  ;;  %v7940_v21 = vpop.f32.mrb[193].mxu0  ;;  %8263 = vadd.xlane.f32.xlu1 %v8168_v22 }
 0xe76   : > { %v7941_v30 = vadd.f32 %v12887_v11, %v7940_v21  ;;  %v10678_v29 = vpop.f32.mrb[194].mxu0 }
 0xe77   : > { %v8101_v24 = vmax.f32 %v7949_v14, 0.0  ;;  %v7952_v43 = vadd.f32 %v10678_v29, %v12887_v11  ;;  %v7943_v51 = vpop.f32.mrb[195].mxu0  ;;  %8257 = vadd.xlane.f32.xlu0 %v8165_v60 }
 0xe78   : > { %v7944_v27 = vadd.f32 %v12887_v11, %v7943_v51  ;;  %v8099_v8 = vmax.f32 %v7941_v30, 0.0 }
 0xe79   : > { %v8171_v45 = vmul.f32 %v12893_v26, %v8101_v24  ;;  %v8102_v58 = vmax.f32 %v7952_v43, 0.0  ;;  %8259 = vadd.xlane.f32.xlu1 %v8166_v25 }
 0xe7a   : > { %v8100_v12 = vmax.f32 %v7944_v27, 0.0  ;;  %v8169_v34 = vmul.f32 %v12893_v26, %v8099_v8 }
 0xe7b   : > { %v8172_v20 = vmul.f32 %v12893_v26, %v8102_v58  ;;  %8269 = vadd.xlane.f32.xlu0 %v8171_v45  ;;  %v12994_v58 = vld [vmem:[#allocation2] ss:$0 sm:$0xff] }
 0xe7c   : > { %v10681_v33 = vpop.f32.mrb[196].mxu0  ;;  %v8170_v10 = vmul.f32 %v12893_v26, %v8100_v12 }
 0xe7d   : > { %v7965_v35 = vadd.f32 %v10681_v33, %v12887_v11  ;;  %v7956_v5 = vpop.f32.mrb[197].mxu0  ;;  %8271 = vadd.xlane.f32.xlu1 %v8172_v20 }
 0xe7e   : > { %v7957_v52 = vadd.f32 %v12887_v11, %v7956_v5  ;;  %v10682_v2 = vpop.f32.mrb[198].mxu0 }
 0xe7f   : > { %v8105_v1 = vmax.f32 %v7965_v35, 0.0  ;;  %v7968_v23 = vadd.f32 %v10682_v2, %v12887_v11  ;;  %v7959_v37 = vpop.f32.mrb[199].mxu0  ;;  %8265 = vadd.xlane.f32.xlu0 %v8169_v34 }
 0xe80   : > { %v7960_v9 = vadd.f32 %v12887_v11, %v7959_v37  ;;  %v8103_v63 = vmax.f32 %v7957_v52, 0.0 }
 0xe81   : > { %v8175_v38 = vmul.f32 %v12893_v26, %v8105_v1  ;;  %v8106_v47 = vmax.f32 %v7968_v23, 0.0  ;;  %8267 = vadd.xlane.f32.xlu1 %v8170_v10 }
 0xe82   : > { %v8104_v6 = vmax.f32 %v7960_v9, 0.0  ;;  %v8173_v4 = vmul.f32 %v12893_v26, %v8103_v63 }
 0xe83   : > { %v8176_v55 = vmul.f32 %v12893_v26, %v8106_v47  ;;  %8277 = vadd.xlane.f32.xlu0 %v8175_v38 }
 0xe84   : > { %v8174_v39 = vmul.f32 %v12893_v26, %v8104_v6 }
 0xe85   : > { %8279 = vadd.xlane.f32.xlu1 %v8176_v55 }
 0xe87   : > { %8273 = vadd.xlane.f32.xlu0 %v8173_v4 }
 0xe89   : > { %8275 = vadd.xlane.f32.xlu1 %v8174_v39 }
 0xe92   : > { %v10685_v40 = vpop.f32.mrb[200].mxu0 }
 0xe93   : > { %v7981_v42 = vadd.f32 %v10685_v40, %v12887_v11  ;;  %v7972_v44 = vpop.f32.mrb[201].mxu0 }
 0xe94   : > { %v7973_v16 = vadd.f32 %v12887_v11, %v7972_v44  ;;  %v10686_v46 = vpop.f32.mrb[202].mxu0 }
 0xe95   : > { %v8109_v50 = vmax.f32 %v7981_v42, 0.0  ;;  %v7984_v18 = vadd.f32 %v10686_v46, %v12887_v11  ;;  %v7975_v49 = vpop.f32.mrb[203].mxu0 }
 0xe96   : > { %v7976_v3 = vadd.f32 %v12887_v11, %v7975_v49  ;;  %v8107_v19 = vmax.f32 %v7973_v16, 0.0 }
 0xe97   : > { %v8179_v61 = vmul.f32 %v12893_v26, %v8109_v50  ;;  %v8110_v54 = vmax.f32 %v7984_v18, 0.0 }
 0xe98   : > { %v8108_v56 = vmax.f32 %v7976_v3, 0.0  ;;  %v8177_v62 = vmul.f32 %v12893_v26, %v8107_v19 }
 0xe99   : > { %v8180_v53 = vmul.f32 %v12893_v26, %v8110_v54  ;;  %8285 = vadd.xlane.f32.xlu0 %v8179_v61 }
 0xe9a   : > { %v8178_v7 = vmul.f32 %v12893_v26, %v8108_v56 }
 0xe9b   : > { %8287 = vadd.xlane.f32.xlu1 %v8180_v53 }
 0xe9d   : > { %8281 = vadd.xlane.f32.xlu0 %v8177_v62 }
 0xe9f   : > { %8283 = vadd.xlane.f32.xlu1 %v8178_v7 }
 0xeaa   : > { %v10689_v59 = vpop.f32.mrb[204].mxu0 }
 0xeab   : > { %v7997_v41 = vadd.f32 %v10689_v59, %v12887_v11  ;;  %v7988_v13 = vpop.f32.mrb[205].mxu0 }
 0xeac   : > { %v7989_v15 = vadd.f32 %v12887_v11, %v7988_v13  ;;  %v10690_v17 = vpop.f32.mrb[206].mxu0 }
 0xead   : > { %v8113_v48 = vmax.f32 %v7997_v41, 0.0  ;;  %v8000_v28 = vadd.f32 %v10690_v17, %v12887_v11  ;;  %v7991_v32 = vpop.f32.mrb[207].mxu0 }
 0xeae   : > { %v7992_v31 = vadd.f32 %v12887_v11, %v7991_v32  ;;  %v8111_v22 = vmax.f32 %v7989_v15, 0.0 }
 0xeaf   : > { %v8183_v36 = vmul.f32 %v12893_v26, %v8113_v48  ;;  %v8114_v0 = vmax.f32 %v8000_v28, 0.0 }
 0xeb0   : > { %v8112_v60 = vmax.f32 %v7992_v31, 0.0  ;;  %v8181_v14 = vmul.f32 %v12893_v26, %v8111_v22 }
 0xeb1   : > { %v8184_v57 = vmul.f32 %v12893_v26, %v8114_v0  ;;  %8293 = vadd.xlane.f32.xlu0 %v8183_v36 }
 0xeb2   : > { %v8182_v21 = vmul.f32 %v12893_v26, %v8112_v60 }
 0xeb3   : > { %8295 = vadd.xlane.f32.xlu1 %v8184_v57 }
 0xeb5   : > { %8289 = vadd.xlane.f32.xlu0 %v8181_v14 }
 0xeb7   : > { %8291 = vadd.xlane.f32.xlu1 %v8182_v21 }
 0xec2   : > { %v10693_v30 = vpop.f32.mrb[208].mxu0 }
 0xec3   : > { %v8013_v29 = vadd.f32 %v10693_v30, %v12887_v11  ;;  %v8004_v25 = vpop.f32.mrb[209].mxu0 }
 0xec4   : > { %v8005_v24 = vadd.f32 %v12887_v11, %v8004_v25  ;;  %v10694_v43 = vpop.f32.mrb[210].mxu0 }
 0xec5   : > { %v8117_v51 = vmax.f32 %v8013_v29, 0.0  ;;  %v8016_v27 = vadd.f32 %v10694_v43, %v12887_v11  ;;  %v8007_v45 = vpop.f32.mrb[211].mxu0 }
 0xec6   : > { %v8008_v8 = vadd.f32 %v12887_v11, %v8007_v45  ;;  %v8115_v12 = vmax.f32 %v8005_v24, 0.0 }
 0xec7   : > { %v8187_v20 = vmul.f32 %v12893_v26, %v8117_v51  ;;  %v8118_v33 = vmax.f32 %v8016_v27, 0.0 }
 0xec8   : > { %v8206_v34 = vpop.xlane.xlu0 %8205  ;;  %v8116_v5 = vmax.f32 %v8008_v8, 0.0  ;;  %v8185_v1 = vmul.f32 %v12893_v26, %v8115_v12 }
 0xec9   : > { %v8188_v35 = vmul.f32 %v12893_v26, %v8118_v33  ;;  %v8337_v52 = vadd.f32 %v12994_v58, %v8206_v34  ;;  %8301 = vadd.xlane.f32.xlu0 %v8187_v20  ;;  %v8202_v2 = vpop.xlane.xlu1 %8201 }
 0xeca   : > { %v8335_v10 = vadd.f32 %v12994_v58, %v8202_v2  ;;  %v8186_v37 = vmul.f32 %v12893_v26, %v8116_v5 }
 0xecb   : > { %8402 = vst.msk [vmem:[%s13002_s8 + $0x10] sm:$0xff] %vm8399_vm0, %v8337_v52  ;;  %8303 = vadd.xlane.f32.xlu1 %v8188_v35 }
 0xecc   : > { %8400 = vst.msk [vmem:[%s13002_s8] sm:$0xff] %vm8399_vm0, %v8335_v10  ;;  %v8204_v23 = vpop.xlane.xlu0 %8203 }
 0xecd   : > { %v8336_v9 = vadd.f32 %v12994_v58, %v8204_v23  ;;  %8297 = vadd.xlane.f32.xlu0 %v8185_v1  ;;  %v8208_v38 = vpop.xlane.xlu1 %8207 }
 0xece   : > { %v8338_v63 = vadd.f32 %v12994_v58, %v8208_v38 }
 0xecf   : > { %8401 = vst.msk [vmem:[%s13002_s8 + $0x8] sm:$0xff] %vm8399_vm0, %v8336_v9  ;;  %8299 = vadd.xlane.f32.xlu1 %v8186_v37 }
 0xed0   : > { %8403 = vst.msk [vmem:[%s13002_s8 + $0x18] sm:$0xff] %vm8399_vm0, %v8338_v63  ;;  %v8214_v47 = vpop.xlane.xlu0 %8213 }
 0xed1   : > { %v8341_v55 = vadd.f32 %v12994_v58, %v8214_v47 }
 0xed2   : > { %v8216_v6 = vpop.xlane.xlu1 %8215 }
 0xed3   : > { %8406 = vst.msk [vmem:[%s13002_s8 + $0x30] sm:$0xff] %vm8399_vm0, %v8341_v55  ;;  %v8342_v4 = vadd.f32 %v12994_v58, %v8216_v6 }
 0xed4   : > { %v8210_v39 = vpop.xlane.xlu0 %8209 }
 0xed5   : > { %8407 = vst.msk [vmem:[%s13002_s8 + $0x38] sm:$0xff] %vm8399_vm0, %v8342_v4  ;;  %v8339_v40 = vadd.f32 %v12994_v58, %v8210_v39 }
 0xed6   : > { %v8212_v42 = vpop.xlane.xlu1 %8211 }
 0xed7   : > { %8404 = vst.msk [vmem:[%s13002_s8 + $0x20] sm:$0xff] %vm8399_vm0, %v8339_v40  ;;  %v8340_v44 = vadd.f32 %v12994_v58, %v8212_v42 }
 0xed8   : > { %v8222_v16 = vpop.xlane.xlu0 %8221 }
 0xed9   : > { %8405 = vst.msk [vmem:[%s13002_s8 + $0x28] sm:$0xff] %vm8399_vm0, %v8340_v44  ;;  %v8345_v46 = vadd.f32 %v12994_v58, %v8222_v16 }
 0xeda   : > { %v10697_v50 = vpop.f32.mrb[212].mxu0  ;;  %v8224_v18 = vpop.xlane.xlu1 %8223 }
 0xedb   : > { %8410 = vst.msk [vmem:[%s13002_s8 + $0x50] sm:$0xff] %vm8399_vm0, %v8345_v46  ;;  %v8029_v49 = vadd.f32 %v10697_v50, %v12887_v11  ;;  %v8346_v3 = vadd.f32 %v12994_v58, %v8224_v18  ;;  %v8020_v61 = vpop.f32.mrb[213].mxu0 }
 0xedc   : > { %v8021_v19 = vadd.f32 %v12887_v11, %v8020_v61  ;;  %v10698_v54 = vpop.f32.mrb[214].mxu0  ;;  %v8218_v53 = vpop.xlane.xlu0 %8217 }
 0xedd   : > { %v8121_v56 = vmax.f32 %v8029_v49, 0.0  ;;  %8411 = vst.msk [vmem:[%s13002_s8 + $0x58] sm:$0xff] %vm8399_vm0, %v8346_v3  ;;  %v8032_v62 = vadd.f32 %v10698_v54, %v12887_v11  ;;  %v8343_v7 = vadd.f32 %v12994_v58, %v8218_v53  ;;  %v8023_v59 = vpop.f32.mrb[215].mxu0 }
 0xede   : > { %v8024_v41 = vadd.f32 %v12887_v11, %v8023_v59  ;;  %v8220_v13 = vpop.xlane.xlu1 %8219  ;;  %v8119_v17 = vmax.f32 %v8021_v19, 0.0 }
 0xedf   : > { %v8191_v15 = vmul.f32 %v12893_v26, %v8121_v56  ;;  %v8122_v48 = vmax.f32 %v8032_v62, 0.0  ;;  %8408 = vst.msk [vmem:[%s13002_s8 + $0x40] sm:$0xff] %vm8399_vm0, %v8343_v7  ;;  %v8344_v28 = vadd.f32 %v12994_v58, %v8220_v13 }
 0xee0   : > { %v8230_v32 = vpop.xlane.xlu0 %8229  ;;  %v8120_v36 = vmax.f32 %v8024_v41, 0.0  ;;  %v8189_v57 = vmul.f32 %v12893_v26, %v8119_v17 }
 0xee1   : > { %v8192_v31 = vmul.f32 %v12893_v26, %v8122_v48  ;;  %8409 = vst.msk [vmem:[%s13002_s8 + $0x48] sm:$0xff] %vm8399_vm0, %v8344_v28  ;;  %v8349_v22 = vadd.f32 %v12994_v58, %v8230_v32  ;;  %8309 = vadd.xlane.f32.xlu0 %v8191_v15 }
 0xee2   : > { %v8232_v0 = vpop.xlane.xlu1 %8231  ;;  %v8190_v21 = vmul.f32 %v12893_v26, %v8120_v36 }
 0xee3   : > { %8414 = vst.msk [vmem:[%s13002_s8 + $0x70] sm:$0xff] %vm8399_vm0, %v8349_v22  ;;  %v8350_v60 = vadd.f32 %v12994_v58, %v8232_v0  ;;  %8311 = vadd.xlane.f32.xlu1 %v8192_v31 }
 0xee4   : > { %v8226_v14 = vpop.xlane.xlu0 %8225 }
 0xee5   : > { %8415 = vst.msk [vmem:[%s13002_s8 + $0x78] sm:$0xff] %vm8399_vm0, %v8350_v60  ;;  %v8347_v30 = vadd.f32 %v12994_v58, %v8226_v14  ;;  %8305 = vadd.xlane.f32.xlu0 %v8189_v57 }
 0xee6   : > { %v8228_v29 = vpop.xlane.xlu1 %8227 }
 0xee7   : > { %8412 = vst.msk [vmem:[%s13002_s8 + $0x60] sm:$0xff] %vm8399_vm0, %v8347_v30  ;;  %v8348_v25 = vadd.f32 %v12994_v58, %v8228_v29  ;;  %8307 = vadd.xlane.f32.xlu1 %v8190_v21 }
 0xee8   : > { %v8238_v24 = vpop.xlane.xlu0 %8237 }
 0xee9   : > { %8413 = vst.msk [vmem:[%s13002_s8 + $0x68] sm:$0xff] %vm8399_vm0, %v8348_v25  ;;  %v8353_v43 = vadd.f32 %v12994_v58, %v8238_v24 }
 0xeea   : > { %v8240_v51 = vpop.xlane.xlu1 %8239 }
 0xeeb   : > { %8418 = vst.msk [vmem:[%s13002_s8 + $0x90] sm:$0xff] %vm8399_vm0, %v8353_v43  ;;  %v8354_v27 = vadd.f32 %v12994_v58, %v8240_v51 }
 0xeec   : > { %v8234_v45 = vpop.xlane.xlu0 %8233 }
 0xeed   : > { %8419 = vst.msk [vmem:[%s13002_s8 + $0x98] sm:$0xff] %vm8399_vm0, %v8354_v27  ;;  %v8351_v8 = vadd.f32 %v12994_v58, %v8234_v45 }
 0xeee   : > { %v8236_v20 = vpop.xlane.xlu1 %8235 }
 0xeef   : > { %8416 = vst.msk [vmem:[%s13002_s8 + $0x80] sm:$0xff] %vm8399_vm0, %v8351_v8  ;;  %v8352_v12 = vadd.f32 %v12994_v58, %v8236_v20 }
 0xef0   : > { %v8246_v33 = vpop.xlane.xlu0 %8245 }
 0xef1   : > { %8417 = vst.msk [vmem:[%s13002_s8 + $0x88] sm:$0xff] %vm8399_vm0, %v8352_v12  ;;  %v8357_v34 = vadd.f32 %v12994_v58, %v8246_v33 }
 0xef2   : > { %v10701_v35 = vpop.f32.mrb[216].mxu0  ;;  %v8248_v5 = vpop.xlane.xlu1 %8247 }
 0xef3   : > { %8422 = vst.msk [vmem:[%s13002_s8 + $0xb0] sm:$0xff] %vm8399_vm0, %v8357_v34  ;;  %v8045_v52 = vadd.f32 %v10701_v35, %v12887_v11  ;;  %v8358_v2 = vadd.f32 %v12994_v58, %v8248_v5  ;;  %v8036_v10 = vpop.f32.mrb[217].mxu0 }
 0xef4   : > { %v8037_v1 = vadd.f32 %v12887_v11, %v8036_v10  ;;  %v10702_v23 = vpop.f32.mrb[218].mxu0  ;;  %v8242_v37 = vpop.xlane.xlu0 %8241 }
 0xef5   : > { %v8125_v9 = vmax.f32 %v8045_v52, 0.0  ;;  %8423 = vst.msk [vmem:[%s13002_s8 + $0xb8] sm:$0xff] %vm8399_vm0, %v8358_v2  ;;  %v8048_v38 = vadd.f32 %v10702_v23, %v12887_v11  ;;  %v8355_v63 = vadd.f32 %v12994_v58, %v8242_v37  ;;  %v8039_v47 = vpop.f32.mrb[219].mxu0 }
 0xef6   : > { %v8040_v55 = vadd.f32 %v12887_v11, %v8039_v47  ;;  %v8244_v6 = vpop.xlane.xlu1 %8243  ;;  %v8123_v39 = vmax.f32 %v8037_v1, 0.0 }
 0xef7   : > { %v8195_v4 = vmul.f32 %v12893_v26, %v8125_v9  ;;  %v8126_v40 = vmax.f32 %v8048_v38, 0.0  ;;  %8420 = vst.msk [vmem:[%s13002_s8 + $0xa0] sm:$0xff] %vm8399_vm0, %v8355_v63  ;;  %v8356_v42 = vadd.f32 %v12994_v58, %v8244_v6 }
 0xef8   : > { %v8254_v44 = vpop.xlane.xlu0 %8253  ;;  %v8124_v46 = vmax.f32 %v8040_v55, 0.0  ;;  %v8193_v49 = vmul.f32 %v12893_v26, %v8123_v39 }
 0xef9   : > { %v8196_v16 = vmul.f32 %v12893_v26, %v8126_v40  ;;  %8421 = vst.msk [vmem:[%s13002_s8 + $0xa8] sm:$0xff] %vm8399_vm0, %v8356_v42  ;;  %v8361_v50 = vadd.f32 %v12994_v58, %v8254_v44  ;;  %8317 = vadd.xlane.f32.xlu0 %v8195_v4 }
 0xefa   : > { %v8256_v18 = vpop.xlane.xlu1 %8255  ;;  %v8194_v19 = vmul.f32 %v12893_v26, %v8124_v46 }
 0xefb   : > { %8426 = vst.msk [vmem:[%s13002_s8 + $0xd0] sm:$0xff] %vm8399_vm0, %v8361_v50  ;;  %v8362_v3 = vadd.f32 %v12994_v58, %v8256_v18  ;;  %8319 = vadd.xlane.f32.xlu1 %v8196_v16 }
 0xefc   : > { %v8250_v61 = vpop.xlane.xlu0 %8249 }
 0xefd   : > { %8427 = vst.msk [vmem:[%s13002_s8 + $0xd8] sm:$0xff] %vm8399_vm0, %v8362_v3  ;;  %v8359_v54 = vadd.f32 %v12994_v58, %v8250_v61  ;;  %8313 = vadd.xlane.f32.xlu0 %v8193_v49 }
 0xefe   : > { %v8252_v53 = vpop.xlane.xlu1 %8251 }
 0xeff   : > { %8424 = vst.msk [vmem:[%s13002_s8 + $0xc0] sm:$0xff] %vm8399_vm0, %v8359_v54  ;;  %v8360_v56 = vadd.f32 %v12994_v58, %v8252_v53  ;;  %8315 = vadd.xlane.f32.xlu1 %v8194_v19 }
 0xf00   : > { %v8262_v62 = vpop.xlane.xlu0 %8261 }
 0xf01   : > { %8425 = vst.msk [vmem:[%s13002_s8 + $0xc8] sm:$0xff] %vm8399_vm0, %v8360_v56  ;;  %v8365_v7 = vadd.f32 %v12994_v58, %v8262_v62 }
 0xf02   : > { %v8264_v59 = vpop.xlane.xlu1 %8263 }
 0xf03   : > { %8430 = vst.msk [vmem:[%s13002_s8 + $0xf0] sm:$0xff] %vm8399_vm0, %v8365_v7  ;;  %v8366_v41 = vadd.f32 %v12994_v58, %v8264_v59 }
 0xf04   : > { %v8258_v13 = vpop.xlane.xlu0 %8257 }
 0xf05   : > { %8431 = vst.msk [vmem:[%s13002_s8 + $0xf8] sm:$0xff] %vm8399_vm0, %v8366_v41  ;;  %v8363_v15 = vadd.f32 %v12994_v58, %v8258_v13 }
 0xf06   : > { %v8260_v17 = vpop.xlane.xlu1 %8259 }
 0xf07   : > { %8428 = vst.msk [vmem:[%s13002_s8 + $0xe0] sm:$0xff] %vm8399_vm0, %v8363_v15  ;;  %v8364_v48 = vadd.f32 %v12994_v58, %v8260_v17 }
 0xf08   : > { %v8270_v28 = vpop.xlane.xlu0 %8269 }
 0xf09   : > { %8429 = vst.msk [vmem:[%s13002_s8 + $0xe8] sm:$0xff] %vm8399_vm0, %v8364_v48  ;;  %v8369_v32 = vadd.f32 %v12994_v58, %v8270_v28 }
 0xf0a   : > { %v8272_v31 = vpop.xlane.xlu1 %8271  ;;  %v10705_v36 = vpop.f32.mrb[220].mxu0 }
 0xf0b   : > { %8434 = vst.msk [vmem:[%s13002_s8 + $0x110] sm:$0xff] %vm8399_vm0, %v8369_v32  ;;  %v8370_v22 = vadd.f32 %v12994_v58, %v8272_v31  ;;  %v8052_v0 = vpop.f32.mrb[221].mxu0  ;;  %v8061_v57 = vadd.f32 %v10705_v36, %v12887_v11 }
 0xf0c   : > { %v8053_v60 = vadd.f32 %v12887_v11, %v8052_v0  ;;  %v8266_v14 = vpop.xlane.xlu0 %8265  ;;  %v10706_v21 = vpop.f32.mrb[222].mxu0 }
 0xf0d   : > { %8435 = vst.msk [vmem:[%s13002_s8 + $0x118] sm:$0xff] %vm8399_vm0, %v8370_v22  ;;  %v8367_v30 = vadd.f32 %v12994_v58, %v8266_v14  ;;  %v8055_v29 = vpop.f32.mrb[223].mxu0  ;;  %v8064_v24 = vadd.f32 %v10706_v21, %v12887_v11  ;;  %v8129_v45 = vmax.f32 %v8061_v57, 0.0 }
 0xf0e   : > { %v8127_v25 = vmax.f32 %v8053_v60, 0.0  ;;  %v8056_v43 = vadd.f32 %v12887_v11, %v8055_v29  ;;  %v8268_v51 = vpop.xlane.xlu1 %8267 }
 0xf0f   : > { %8432 = vst.msk [vmem:[%s13002_s8 + $0x100] sm:$0xff] %vm8399_vm0, %v8367_v30  ;;  %v8368_v27 = vadd.f32 %v12994_v58, %v8268_v51  ;;  %v8130_v34 = vmax.f32 %v8064_v24, 0.0  ;;  %v8199_v52 = vmul.f32 %v12893_v26, %v8129_v45 }
 0xf10   : > { %v8197_v8 = vmul.f32 %v12893_v26, %v8127_v25  ;;  %v8128_v20 = vmax.f32 %v8056_v43, 0.0  ;;  %v8278_v12 = vpop.xlane.xlu0 %8277 }
 0xf11   : > { %8433 = vst.msk [vmem:[%s13002_s8 + $0x108] sm:$0xff] %vm8399_vm0, %v8368_v27  ;;  %v8373_v33 = vadd.f32 %v12994_v58, %v8278_v12  ;;  %v8200_v1 = vmul.f32 %v12893_v26, %v8130_v34 }
 0xf12   : > { %v8198_v35 = vmul.f32 %v12893_v26, %v8128_v20  ;;  %v8280_v11 = vpop.xlane.xlu1 %8279  ;;  %8321 = vadd.xlane.f32.xlu0 %v8197_v8 }
 0xf13   : > { %8438 = vst.msk [vmem:[%s13002_s8 + $0x130] sm:$0xff] %vm8399_vm0, %v8373_v33  ;;  %v8374_v5 = vadd.f32 %v12994_v58, %v8280_v11 }
 0xf14   : > { %v8274_v2 = vpop.xlane.xlu0 %8273  ;;  %8323 = vadd.xlane.f32.xlu1 %v8198_v35 }
 0xf15   : > { %8439 = vst.msk [vmem:[%s13002_s8 + $0x138] sm:$0xff] %vm8399_vm0, %v8374_v5  ;;  %v8371_v10 = vadd.f32 %v12994_v58, %v8274_v2 }
 0xf16   : > { %v8276_v23 = vpop.xlane.xlu1 %8275  ;;  %8325 = vadd.xlane.f32.xlu0 %v8199_v52 }
 0xf17   : > { %8436 = vst.msk [vmem:[%s13002_s8 + $0x120] sm:$0xff] %vm8399_vm0, %v8371_v10  ;;  %v8372_v37 = vadd.f32 %v12994_v58, %v8276_v23 }
 0xf18   : > { %8327 = vadd.xlane.f32.xlu1 %v8200_v1 }
 0xf19   : > { %8437 = vst.msk [vmem:[%s13002_s8 + $0x128] sm:$0xff] %vm8399_vm0, %v8372_v37 }
 0xf26   : > { %v8286_v9 = vpop.xlane.xlu0 %8285 }
 0xf27   : > { %v8377_v38 = vadd.f32 %v12994_v58, %v8286_v9 }
 0xf28   : > { %v8288_v63 = vpop.xlane.xlu1 %8287 }
 0xf29   : > { %8442 = vst.msk [vmem:[%s13002_s8 + $0x150] sm:$0xff] %vm8399_vm0, %v8377_v38  ;;  %v8378_v26 = vadd.f32 %v12994_v58, %v8288_v63 }
 0xf2a   : > { %v8282_v47 = vpop.xlane.xlu0 %8281 }
 0xf2b   : > { %8443 = vst.msk [vmem:[%s13002_s8 + $0x158] sm:$0xff] %vm8399_vm0, %v8378_v26  ;;  %v8375_v55 = vadd.f32 %v12994_v58, %v8282_v47 }
 0xf2c   : > { %v8284_v6 = vpop.xlane.xlu1 %8283 }
 0xf2d   : > { %8440 = vst.msk [vmem:[%s13002_s8 + $0x140] sm:$0xff] %vm8399_vm0, %v8375_v55  ;;  %v8376_v4 = vadd.f32 %v12994_v58, %v8284_v6 }
 0xf2f   : > { %8441 = vst.msk [vmem:[%s13002_s8 + $0x148] sm:$0xff] %vm8399_vm0, %v8376_v4 }
 0xf3e   : > { %v8294_v39 = vpop.xlane.xlu0 %8293 }
 0xf3f   : > { %v8381_v40 = vadd.f32 %v12994_v58, %v8294_v39 }
 0xf40   : > { %v8296_v42 = vpop.xlane.xlu1 %8295 }
 0xf41   : > { %8446 = vst.msk [vmem:[%s13002_s8 + $0x170] sm:$0xff] %vm8399_vm0, %v8381_v40  ;;  %v8382_v44 = vadd.f32 %v12994_v58, %v8296_v42 }
 0xf42   : > { %v8290_v16 = vpop.xlane.xlu0 %8289 }
 0xf43   : > { %8447 = vst.msk [vmem:[%s13002_s8 + $0x178] sm:$0xff] %vm8399_vm0, %v8382_v44  ;;  %v8379_v46 = vadd.f32 %v12994_v58, %v8290_v16 }
 0xf44   : > { %v8292_v50 = vpop.xlane.xlu1 %8291 }
 0xf45   : > { %8444 = vst.msk [vmem:[%s13002_s8 + $0x160] sm:$0xff] %vm8399_vm0, %v8379_v46  ;;  %v8380_v18 = vadd.f32 %v12994_v58, %v8292_v50 }
 0xf47   : > { %8445 = vst.msk [vmem:[%s13002_s8 + $0x168] sm:$0xff] %vm8399_vm0, %v8380_v18 }
 0xf56   : > { %v8302_v49 = vpop.xlane.xlu0 %8301 }
 0xf57   : > { %v8385_v3 = vadd.f32 %v12994_v58, %v8302_v49 }
 0xf58   : > { %v8304_v61 = vpop.xlane.xlu1 %8303 }
 0xf59   : > { %8450 = vst.msk [vmem:[%s13002_s8 + $0x190] sm:$0xff] %vm8399_vm0, %v8385_v3  ;;  %v8386_v19 = vadd.f32 %v12994_v58, %v8304_v61 }
 0xf5a   : > { %v8298_v54 = vpop.xlane.xlu0 %8297 }
 0xf5b   : > { %8451 = vst.msk [vmem:[%s13002_s8 + $0x198] sm:$0xff] %vm8399_vm0, %v8386_v19  ;;  %v8383_v53 = vadd.f32 %v12994_v58, %v8298_v54 }
 0xf5c   : > { %v8300_v56 = vpop.xlane.xlu1 %8299 }
 0xf5d   : > { %8448 = vst.msk [vmem:[%s13002_s8 + $0x180] sm:$0xff] %vm8399_vm0, %v8383_v53  ;;  %v8384_v62 = vadd.f32 %v12994_v58, %v8300_v56 }
 0xf5f   : > { %8449 = vst.msk [vmem:[%s13002_s8 + $0x188] sm:$0xff] %vm8399_vm0, %v8384_v62 }
 0xf6e   : > { %v8310_v7 = vpop.xlane.xlu0 %8309 }
 0xf6f   : > { %v8389_v59 = vadd.f32 %v12994_v58, %v8310_v7 }
 0xf70   : > { %v8312_v41 = vpop.xlane.xlu1 %8311 }
 0xf71   : > { %8454 = vst.msk [vmem:[%s13002_s8 + $0x1b0] sm:$0xff] %vm8399_vm0, %v8389_v59  ;;  %v8390_v13 = vadd.f32 %v12994_v58, %v8312_v41 }
 0xf72   : > { %v8306_v15 = vpop.xlane.xlu0 %8305 }
 0xf73   : > { %8455 = vst.msk [vmem:[%s13002_s8 + $0x1b8] sm:$0xff] %vm8399_vm0, %v8390_v13  ;;  %v8387_v17 = vadd.f32 %v12994_v58, %v8306_v15 }
 0xf74   : > { %v8308_v48 = vpop.xlane.xlu1 %8307 }
 0xf75   : > { %8452 = vst.msk [vmem:[%s13002_s8 + $0x1a0] sm:$0xff] %vm8399_vm0, %v8387_v17  ;;  %v8388_v28 = vadd.f32 %v12994_v58, %v8308_v48 }
 0xf77   : > { %8453 = vst.msk [vmem:[%s13002_s8 + $0x1a8] sm:$0xff] %vm8399_vm0, %v8388_v28 }
 0xf86   : > { %v8318_v32 = vpop.xlane.xlu0 %8317 }
 0xf87   : > { %v8393_v31 = vadd.f32 %v12994_v58, %v8318_v32 }
 0xf88   : > { %v8320_v36 = vpop.xlane.xlu1 %8319 }
 0xf89   : > { %8458 = vst.msk [vmem:[%s13002_s8 + $0x1d0] sm:$0xff] %vm8399_vm0, %v8393_v31  ;;  %v8394_v22 = vadd.f32 %v12994_v58, %v8320_v36 }
 0xf8a   : > { %v8314_v0 = vpop.xlane.xlu0 %8313 }
 0xf8b   : > { %8459 = vst.msk [vmem:[%s13002_s8 + $0x1d8] sm:$0xff] %vm8399_vm0, %v8394_v22  ;;  %v8391_v57 = vadd.f32 %v12994_v58, %v8314_v0 }
 0xf8c   : > { %v8316_v60 = vpop.xlane.xlu1 %8315 }
 0xf8d   : > { %8456 = vst.msk [vmem:[%s13002_s8 + $0x1c0] sm:$0xff] %vm8399_vm0, %v8391_v57  ;;  %v8392_v14 = vadd.f32 %v12994_v58, %v8316_v60 }
 0xf8f   : > { %8457 = vst.msk [vmem:[%s13002_s8 + $0x1c8] sm:$0xff] %vm8399_vm0, %v8392_v14 }
 0xf9f   : > { %v8322_v21 = vpop.xlane.xlu0 %8321 }
 0xfa0   : > { %v8395_v30 = vadd.f32 %v12994_v58, %v8322_v21 }
 0xfa1   : > { %v8324_v29 = vpop.xlane.xlu1 %8323 }
 0xfa2   : > { %8460 = vst.msk [vmem:[%s13002_s8 + $0x1e0] sm:$0xff] %vm8399_vm0, %v8395_v30  ;;  %v8396_v25 = vadd.f32 %v12994_v58, %v8324_v29 }
 0xfa3   : > { %v8326_v24 = vpop.xlane.xlu0 %8325 }
 0xfa4   : > { %8461 = vst.msk [vmem:[%s13002_s8 + $0x1e8] sm:$0xff] %vm8399_vm0, %v8396_v25  ;;  %v8397_v43 = vadd.f32 %v12994_v58, %v8326_v24 }
 0xfa5   : > { %v8328_v51 = vpop.xlane.xlu1 %8327 }
 0xfa6   : > { %8462 = vst.msk [vmem:[%s13002_s8 + $0x1f0] sm:$0xff] %vm8399_vm0, %v8397_v43  ;;  %v8398_v27 = vadd.f32 %v12994_v58, %v8328_v51 }
 0xfa8   : > { %8463 = vst.msk [vmem:[%s13002_s8 + $0x1f8] sm:$0xff] %vm8399_vm0, %v8398_v27 }
 0xfa9 PF: > { %s19_s26 = sadd.s32 1, %s10926_s26  }
 0xfaa   : > { %p16_p4 = scmp.ge.s32.totalorder %s19_s26, 4  }
 0xfac   :  { %18 = sbr.rel (!%p16_p4) target bundleno = 3 (0x3), region = 106 }

</bundles_post_ra>
